<compile_context>
chip_gen: v7x
topology: tpu7x:2x2x1
jax: 0.10.0
libtpu: 0.0.40
codegen_flags: <defaults>
</compile_context>

<pallas_src>
import functools

import jax
import jax.numpy as jnp
from jax.experimental import pallas as pl
from jax.experimental.pallas import tpu as pltpu

EPS = 1e-5      # PyTorch BatchNorm3d default eps
LANE = 128      # TPU lane width


def _round_up(x, m):
    return ((x + m - 1) // m) * m


# ----------------------------- Pallas kernels ------------------------------

def _stats_kernel(x_ref, sum_ref, ssq_ref):
    """Tiled per-channel sum / sum-of-squares accumulation (for BatchNorm1)."""
    @pl.when(pl.program_id(0) == 0)
    def _():
        sum_ref[...] = jnp.zeros_like(sum_ref)
        ssq_ref[...] = jnp.zeros_like(ssq_ref)

    x = x_ref[...].astype(jnp.float32)
    sum_ref[...] += jnp.sum(x, axis=0, keepdims=True)
    ssq_ref[...] += jnp.sum(x * x, axis=0, keepdims=True)


def _conv3x3_stage_kernel(D, H, W,
                          x_ref, scale_ref, shift_ref, w_ref, bias_ref,
                          o_ref, sum_ref, ssq_ref,
                          win_ref):
    """Fused BN -> ReLU -> Conv3d(3x3x3, stride 1, pad 1), one depth plane per
    grid step, plus fused per-channel sum/sum^2 of the conv output (the stats
    needed by the next BatchNorm).

    grid = (n, D+1), depth innermost.  At step d the kernel fetches input plane
    min(d, D-1) once, applies BN+ReLU once and pushes it into a rolling bf16
    halo window (H+2, Wp, 3*C) kept in VMEM scratch (kd-major in the lane dim).
    The output for depth (d-1) is computed from the window with 9 kd-folded
    MXU taps (K = 3*C).  Stats accumulate per batch (per-n output blocks).
    """
    d = pl.program_id(1)                      # depth step within batch: 0 .. D
    cp3 = win_ref.shape[-1]
    cp = cp3 // 3
    cout = w_ref.shape[-1]

    # ---- per-batch init: zero the window (its halo border stays zero forever,
    #      shifts only copy zero borders around) and the stat accumulators.
    @pl.when(d == 0)
    def _():
        win_ref[...] = jnp.zeros_like(win_ref)
        sum_ref[...] = jnp.zeros_like(sum_ref)
        ssq_ref[...] = jnp.zeros_like(ssq_ref)

    # ---- rolling depth halo: shift slabs kd0 <- kd1 <- kd2 (VMEM-only copies).
    @pl.when(d > 0)
    def _():
        win_ref[:, :, 0:cp] = win_ref[:, :, cp:2 * cp]
        win_ref[:, :, cp:2 * cp] = win_ref[:, :, 2 * cp:3 * cp]

    # ---- BN + ReLU the newly fetched plane exactly once, store as bf16.
    @pl.when(d < D)
    def _():
        x = x_ref[0, 0].astype(jnp.float32)                     # (H, W, cp)
        a = jnp.maximum(x * scale_ref[...] + shift_ref[...], 0.0)
        win_ref[1:H + 1, 1:W + 1, 2 * cp:3 * cp] = a.astype(jnp.bfloat16)

    @pl.when(d == D)                                            # plane D is zero halo
    def _():
        win_ref[1:H + 1, 1:W + 1, 2 * cp:3 * cp] = jnp.zeros((H, W, cp), jnp.bfloat16)

    # ---- compute output plane (d-1): 9 kd-folded MXU taps + fused BN stats.
    @pl.when(d > 0)
    def _():
        # Row-block so the f32 accumulator stays register-resident for big planes.
        hb = max(1, min(H, (128 * 1024) // max(1, W * cout * 4)))
        psum = jnp.zeros((1, cout), jnp.float32)
        pssq = jnp.zeros((1, cout), jnp.float32)
        for hh in range(0, H, hb):
            rows = min(hb, H - hh)
            acc = jnp.zeros((rows * W, cout), jnp.float32)
            for kh in range(3):
                for kw in range(3):
                    patch = win_ref[hh + kh:hh + kh + rows, kw:kw + W, :]
                    acc += jnp.dot(patch.reshape(rows * W, cp3),
                                   w_ref[kh * 3 + kw],
                                   preferred_element_type=jnp.float32)
            out = acc + bias_ref[...]                           # f32
            o_ref[0, 0, hh:hh + rows] = out.reshape(rows, W, cout).astype(o_ref.dtype)
            psum += jnp.sum(out, axis=0, keepdims=True)
            pssq += jnp.sum(out * out, axis=0, keepdims=True)
        sum_ref[0] += psum
        ssq_ref[0] += pssq


def _final_stage_kernel(project,
                        a_ref, x_ref, scale_ref, shift_ref,
                        w3_ref, b3_ref, w4_ref, b4_ref,
                        o_ref):
    """Fused BN3 -> ReLU -> conv3(1x1x1) + shortcut (conv4 projection or
    identity) + residual add, on lane-dense (tm, 128k) row tiles."""
    a = jnp.maximum(a_ref[...].astype(jnp.float32) * scale_ref[...] + shift_ref[...], 0.0)
    out = jnp.dot(a.astype(jnp.bfloat16), w3_ref[...],
                  preferred_element_type=jnp.float32) + b3_ref[...]
    if project:   # conv4 projection shortcut, fused (no extra HBM round-trip)
        out += jnp.dot(x_ref[...].astype(jnp.bfloat16), w4_ref[...],
                       preferred_element_type=jnp.float32) + b4_ref[...]
    else:         # identity shortcut
        out += x_ref[...].astype(jnp.float32)
    o_ref[...] = out


# ------------------------------ wrappers ------------------------------------

def channel_stats(x2d, tm=1024):
    """Per-channel batch mean / biased variance of (M, C), tiled over M."""
    m, c = x2d.shape
    tm_eff = min(tm, _round_up(m, 8))
    m_pad = _round_up(m, tm_eff)
    if m_pad != m:                       # zero rows: do not change the sums
        x2d = jnp.pad(x2d, ((0, m_pad - m), (0, 0)))
    s, ss = pl.pallas_call(
        _stats_kernel,
        out_shape=(jax.ShapeDtypeStruct((1, c), jnp.float32),
                   jax.ShapeDtypeStruct((1, c), jnp.float32)),
        grid=(m_pad // tm_eff,),
        in_specs=[pl.BlockSpec((tm_eff, c), lambda i: (i, 0))],
        out_specs=(pl.BlockSpec((1, c), lambda i: (0, 0)),
                   pl.BlockSpec((1, c), lambda i: (0, 0))),
        compiler_params=pltpu.CompilerParams(dimension_semantics=("arbitrary",)),
    )(x2d)
    mean = s / m
    var = ss / m - mean * mean
    return mean, var


def conv3x3_stage(y, scale, shift, w9, bias):
    """y: (N, D, H, W, Cpad).  Returns the conv output (N, D, H, W, Coutpad) in
    bfloat16 plus the per-channel mean/var of that output (for the next BN)."""
    n, dd, h, ww, cp = y.shape
    cout = w9.shape[-1]
    wp = _round_up(ww + 2, 8)            # sublane-pad the window's W axis

    y_out, s, ss = pl.pallas_call(
        functools.partial(_conv3x3_stage_kernel, dd, h, ww),
        out_shape=(jax.ShapeDtypeStruct((n, dd, h, ww, cout), jnp.bfloat16),
                   jax.ShapeDtypeStruct((n, 1, cout), jnp.float32),
                   jax.ShapeDtypeStruct((n, 1, cout), jnp.float32)),
        grid=(n, dd + 1),
        in_specs=[
            # one activation plane fetched per step (clamped re-fetch at d==D is
            # skipped by the pipeline since the block index does not change)
            pl.BlockSpec((1, 1, h, ww, cp),
                         lambda i, j: (i, jnp.minimum(j, dd - 1), 0, 0, 0)),
            pl.BlockSpec((1, cp), lambda i, j: (0, 0)),          # BN scale
            pl.BlockSpec((1, cp), lambda i, j: (0, 0)),          # BN shift
            pl.BlockSpec((9, 3 * cp, cout), lambda i, j: (0, 0, 0)),  # kd-folded weights
            pl.BlockSpec((1, cout), lambda i, j: (0, 0)),        # bias
        ],
        out_specs=(
            # output plane for depth d-1 (block revisited between d=0 and d=1,
            # fully written at d=1, so the unwritten d=0 step is never flushed)
            pl.BlockSpec((1, 1, h, ww, cout),
                         lambda i, j: (i, jnp.maximum(j - 1, 0), 0, 0, 0)),
            pl.BlockSpec((1, 1, cout), lambda i, j: (i, 0, 0)),  # per-batch sum
            pl.BlockSpec((1, 1, cout), lambda i, j: (i, 0, 0)),  # per-batch sum^2
        ),
        scratch_shapes=[pltpu.VMEM((h + 2, wp, 3 * cp), jnp.bfloat16)],
        # batch axis parallel (v7x megacore, stats are per-batch so no race);
        # depth axis carries the rolling window + stat accumulators.
        compiler_params=pltpu.CompilerParams(
            dimension_semantics=("parallel", "arbitrary")),
    )(y, scale, shift, w9, bias)

    m_total = n * dd * h * ww
    mean_o = (jnp.sum(s, axis=(0, 1)) / m_total).reshape(1, cout)
    var_o = (jnp.sum(ss, axis=(0, 1)) / m_total).reshape(1, cout) - mean_o * mean_o
    return y_out, mean_o, var_o


def final_stage(a_src, x2, scale, shift, w3, b3, w4, b4, project, tm=1024):
    m, cmid = a_src.shape
    cin = x2.shape[1]
    cout = w3.shape[1]
    tm_eff = min(tm, _round_up(m, 8))
    m_pad = _round_up(m, tm_eff)
    if m_pad != m:
        a_src = jnp.pad(a_src, ((0, m_pad - m), (0, 0)))
        x2 = jnp.pad(x2, ((0, m_pad - m), (0, 0)))
    vmid = pl.BlockSpec((1, cmid), lambda i: (0, 0))
    vout = pl.BlockSpec((1, cout), lambda i: (0, 0))
    out = pl.pallas_call(
        functools.partial(_final_stage_kernel, project),
        out_shape=jax.ShapeDtypeStruct((m_pad, cout), jnp.float32),
        grid=(m_pad // tm_eff,),
        in_specs=[pl.BlockSpec((tm_eff, cmid), lambda i: (i, 0)),
                  pl.BlockSpec((tm_eff, cin), lambda i: (i, 0)),
                  vmid, vmid,
                  pl.BlockSpec((cmid, cout), lambda i: (0, 0)),
                  vout,
                  pl.BlockSpec((cin, cout), lambda i: (0, 0)),
                  vout],
        out_specs=pl.BlockSpec((tm_eff, cout), lambda i: (i, 0)),
        compiler_params=pltpu.CompilerParams(dimension_semantics=("parallel",)),
    )(a_src, x2, scale, shift, w3, b3, w4, b4)
    return out[:m]


# ------------------------- parameter packing ---------------------------------

def _prep_conv3x3(w_t, b_t, cin_p, cout_p):
    """(Cout, Cin, 3,3,3) torch layout -> kd-folded (9, 3*cin_p, cout_p) bf16
    weights (contraction dim kd-major to match the window layout) + f32 bias."""
    cout, cin = w_t.shape[0], w_t.shape[1]
    wm = jnp.transpose(w_t, (3, 4, 2, 1, 0))          # (kh, kw, kd, cin, cout)
    wm = jnp.pad(wm, ((0, 0), (0, 0), (0, 0),
                      (0, cin_p - cin), (0, cout_p - cout)))
    wm = wm.reshape(9, 3 * cin_p, cout_p)
    bias = jnp.pad(b_t, (0, cout_p - cout)).reshape(1, cout_p).astype(jnp.float32)
    return wm.astype(jnp.bfloat16), bias


def _prep_conv1x1(w_t, b_t, cin_p, cout_p):
    """(Cout, Cin, 1,1,1) -> (cin_p, cout_p) bf16, bias (1, cout_p)."""
    cout, cin = w_t.shape[0], w_t.shape[1]
    wm = w_t.reshape(cout, cin).T
    wm = jnp.pad(wm, ((0, cin_p - cin), (0, cout_p - cout)))
    bias = jnp.pad(b_t, (0, cout_p - cout)).reshape(1, cout_p).astype(jnp.float32)
    return wm.astype(jnp.bfloat16), bias


def _bn_scale_shift(mean, var, gamma, beta, c_p):
    """Fold BatchNorm into a single per-channel scale/shift (lane-padded with
    zeros so padded channels stay exactly zero after the fused BN+ReLU)."""
    c = gamma.shape[0]
    g = jnp.pad(gamma, (0, c_p - c)).reshape(1, c_p).astype(jnp.float32)
    b = jnp.pad(beta, (0, c_p - c)).reshape(1, c_p).astype(jnp.float32)
    scale = g * jax.lax.rsqrt(jnp.maximum(var, 0.0) + EPS)   # clamp var >= 0
    shift = b - mean * scale
    return scale, shift


# --------------------------- residual block ----------------------------------

def residual_block_forward(x_ncdhw, p_t, input_channels, output_channels, stride=1):
    assert stride == 1   # TODO(synk): stride > 1 not implemented (module default is 1)
    n, c, d, h, w = x_ncdhw.shape
    assert c == input_channels
    mid = output_channels // 4
    cin_p = _round_up(input_channels, LANE)
    mid_p = _round_up(mid, LANE)
    cout_p = _round_up(output_channels, LANE)
    m = n * d * h * w
    project = (input_channels != output_channels) or (stride != 1)

    # weight packing (lane-padded, bf16 MXU operands)
    w1, b1 = _prep_conv3x3(p_t["w1"], p_t["b1"], cin_p, mid_p)
    w2, b2 = _prep_conv3x3(p_t["w2"], p_t["b2"], mid_p, mid_p)
    w3, b3 = _prep_conv1x1(p_t["w3"], p_t["b3"], mid_p, cout_p)
    w4, b4 = _prep_conv1x1(p_t["w4"], p_t["b4"], cin_p, cout_p)

    # NCDHW -> NDHWC, channels lane-padded to a multiple of 128
    # TODO(synk): fold these full-tensor transposes/pad into the first/last kernels.
    xa = jnp.transpose(x_ncdhw, (0, 2, 3, 4, 1)).astype(jnp.float32)
    xa = jnp.pad(xa, ((0, 0), (0, 0), (0, 0), (0, 0), (0, cin_p - c)))
    x2 = xa.reshape(m, cin_p)

    # bn1 statistics, then two fused BN->ReLU->conv3x3 stages (stats fused as
    # epilogues, intermediate activations stored in bf16).
    mean1, var1 = channel_stats(x2)
    s1, t1 = _bn_scale_shift(mean1, var1, p_t["bn1_g"], p_t["bn1_b"], cin_p)
    y1, mean2, var2 = conv3x3_stage(xa, s1, t1, w1, b1)
    s2, t2 = _bn_scale_shift(mean2, var2, p_t["bn2_g"], p_t["bn2_b"], mid_p)
    y2, mean3, var3 = conv3x3_stage(y1, s2, t2, w2, b2)
    s3, t3 = _bn_scale_shift(mean3, var3, p_t["bn3_g"], p_t["bn3_b"], mid_p)

    # fused BN3 -> ReLU -> conv3(1x1x1) + shortcut (projection conv4 or identity)
    xs = x2.astype(jnp.bfloat16) if project else x2   # projection path only needs bf16
    out2 = final_stage(y2.reshape(m, mid_p), xs, s3, t3, w3, b3, w4, b4, project)

    out = out2[:, :output_channels].reshape(n, d, h, w, output_channels)
    return jnp.transpose(out, (0, 4, 1, 2, 3))  # back to NCDHW


# --------------------------- pure-JAX reference -------------------------------

def _conv3d_ref(x, w, b, padding):
    out = jax.lax.conv_general_dilated(
        x, w, window_strides=(1, 1, 1),
        padding=[(padding, padding)] * 3,
        dimension_numbers=("NCDHW", "OIDHW", "NCDHW"),
    )
    return out + b.reshape(1, -1, 1, 1, 1)


def _bn_relu_ref(x, g, b):
    mu = jnp.mean(x, axis=(0, 2, 3, 4), keepdims=True)
    var = jnp.mean(jnp.square(x - mu), axis=(0, 2, 3, 4), keepdims=True)
    y = (x - mu) * jax.lax.rsqrt(var + EPS)
    y = y * g.reshape(1, -1, 1, 1, 1) + b.reshape(1, -1, 1, 1, 1)
    return jnp.maximum(y, 0.0)


def residual_block_ref(x, p_t, input_channels, output_channels):
    out = _bn_relu_ref(x, p_t["bn1_g"], p_t["bn1_b"])
    out = _conv3d_ref(out, p_t["w1"], p_t["b1"], padding=1)
    out = _bn_relu_ref(out, p_t["bn2_g"], p_t["bn2_b"])
    out = _conv3d_ref(out, p_t["w2"], p_t["b2"], padding=1)
    out = _bn_relu_ref(out, p_t["bn3_g"], p_t["bn3_b"])
    out = _conv3d_ref(out, p_t["w3"], p_t["b3"], padding=0)
    residual = x
    if input_channels != output_channels:
        residual = _conv3d_ref(x, p_t["w4"], p_t["b4"], padding=0)
    return out + residual


# ------------------------------------ main ------------------------------------

if __name__ == "__main__":
    key = jax.random.PRNGKey(0)
    N, Cin, D, H, W = 2, 4, 8, 8, 8
    Cout = 16
    mid = Cout // 4

    keys = jax.random.split(key, 16)
    x = jax.random.normal(keys[0], (N, Cin, D, H, W), dtype=jnp.float32)

    # torch-layout parameters (deterministic, synthetic)
    p_t = {
        "w1": 0.1 * jax.random.normal(keys[1], (mid, Cin, 3, 3, 3), jnp.float32),
        "b1": 0.1 * jax.random.normal(keys[2], (mid,), jnp.float32),
        "w2": 0.1 * jax.random.normal(keys[3], (mid, mid, 3, 3, 3), jnp.float32),
        "b2": 0.1 * jax.random.normal(keys[4], (mid,), jnp.float32),
        "w3": 0.1 * jax.random.normal(keys[5], (Cout, mid, 1, 1, 1), jnp.float32),
        "b3": 0.1 * jax.random.normal(keys[6], (Cout,), jnp.float32),
        "w4": 0.1 * jax.random.normal(keys[7], (Cout, Cin, 1, 1, 1), jnp.float32),
        "b4": 0.1 * jax.random.normal(keys[8], (Cout,), jnp.float32),
        # BatchNorm affine params: PyTorch defaults (gamma=1, beta=0)
        "bn1_g": jnp.ones((Cin,), jnp.float32), "bn1_b": jnp.zeros((Cin,), jnp.float32),
        "bn2_g": jnp.ones((mid,), jnp.float32), "bn2_b": jnp.zeros((mid,), jnp.float32),
        "bn3_g": jnp.ones((mid,), jnp.float32), "bn3_b": jnp.zeros((mid,), jnp.float32),
    }

    fwd = jax.jit(residual_block_forward, static_argnums=(2, 3, 4))
    out = jax.block_until_ready(fwd(x, p_t, Cin, Cout, 1))

    ref = jax.block_until_ready(residual_block_ref(x, p_t, Cin, Cout))
    assert out.shape == (N, Cout, D, H, W), out.shape
    # MXU operands and inter-stage activations are bf16 (f32 accumulation and
    # f32 BN statistics), so compare against the f32 reference at bf16 tolerance.
    assert jnp.allclose(out, ref, rtol=4e-2, atol=4e-2), (
        float(jnp.max(jnp.abs(out - ref)))
    )

    print("KERNEL_OK")
</pallas_src>

<mosaic_0001>
module attributes {stable_mosaic.version = 11 : i64} {
  func.func @_stats_kernel(%arg0: i32, %arg1: memref<1024x128xf32, #tpu.memory_space<vmem>>, %arg2: memref<1x128xf32, #tpu.memory_space<vmem>>, %arg3: memref<1x128xf32, #tpu.memory_space<vmem>>) attributes {dimension_semantics = [#tpu.dimension_semantics<arbitrary>], iteration_bounds = array<i64: 1>, scalar_prefetch = 0 : i64, scratch_operands = 0 : i64, tpu.core_type = #tpu.core_type<tc>, window_params = [{transform_indices = @transform_0, window_bounds = array<i64: 1024, 128>}, {pipeline_mode = #tpu.pipeline_mode<synchronous>, transform_indices = @transform_1, window_bounds = array<i64: 1, 128>}, {pipeline_mode = #tpu.pipeline_mode<synchronous>, transform_indices = @transform_2, window_bounds = array<i64: 1, 128>}]} {
    %c0_i32 = arith.constant 0 : i32
    %0 = arith.cmpi eq, %arg0, %c0_i32 : i32
    %1 = arith.extui %0 : i1 to i32
    %c0_i32_0 = arith.constant 0 : i32
    %2 = arith.cmpi ne, %1, %c0_i32_0 : i32
    scf.if %2 {
      %cst_11 = arith.constant 0.000000e+00 : f32
      %15 = vector.broadcast %cst_11 : f32 to vector<1x128xf32>
      %c0_12 = arith.constant 0 : index
      %c0_13 = arith.constant 0 : index
      %16 = vector.load %arg2[%c0_12, %c0_13] : memref<1x128xf32, #tpu.memory_space<vmem>>, vector<1x128xf32>
      tpu.vector_store %arg2[%c0_12, %c0_13], %15 {strides = array<i32>} : memref<1x128xf32, #tpu.memory_space<vmem>>, vector<1x128xf32>,
      %cst_14 = arith.constant 0.000000e+00 : f32
      %17 = vector.broadcast %cst_14 : f32 to vector<1x128xf32>
      %c0_15 = arith.constant 0 : index
      %c0_16 = arith.constant 0 : index
      %18 = vector.load %arg3[%c0_15, %c0_16] : memref<1x128xf32, #tpu.memory_space<vmem>>, vector<1x128xf32>
      tpu.vector_store %arg3[%c0_15, %c0_16], %17 {strides = array<i32>} : memref<1x128xf32, #tpu.memory_space<vmem>>, vector<1x128xf32>,
    } else {
    }
    %c0 = arith.constant 0 : index
    %c0_1 = arith.constant 0 : index
    %3 = vector.load %arg1[%c0, %c0_1] : memref<1024x128xf32, #tpu.memory_space<vmem>>, vector<1024x128xf32>
    %c0_2 = arith.constant 0 : index
    %c0_3 = arith.constant 0 : index
    %4 = vector.load %arg2[%c0_2, %c0_3] : memref<1x128xf32, #tpu.memory_space<vmem>>, vector<1x128xf32>
    %cst = arith.constant dense<0.000000e+00> : vector<128xf32>
    %5 = vector.multi_reduction <add>, %3, %cst [0] : vector<1024x128xf32> to vector<128xf32>
    %6 = vector.shape_cast %5 : vector<128xf32> to vector<1x128xf32>
    %7 = arith.addf %4, %6 : vector<1x128xf32>
    %c0_4 = arith.constant 0 : index
    %c0_5 = arith.constant 0 : index
    %8 = vector.load %arg2[%c0_4, %c0_5] : memref<1x128xf32, #tpu.memory_space<vmem>>, vector<1x128xf32>
    tpu.vector_store %arg2[%c0_4, %c0_5], %7 {strides = array<i32>} : memref<1x128xf32, #tpu.memory_space<vmem>>, vector<1x128xf32>,
    %c0_6 = arith.constant 0 : index
    %c0_7 = arith.constant 0 : index
    %9 = vector.load %arg3[%c0_6, %c0_7] : memref<1x128xf32, #tpu.memory_space<vmem>>, vector<1x128xf32>
    %10 = arith.mulf %3, %3 : vector<1024x128xf32>
    %cst_8 = arith.constant dense<0.000000e+00> : vector<128xf32>
    %11 = vector.multi_reduction <add>, %10, %cst_8 [0] : vector<1024x128xf32> to vector<128xf32>
    %12 = vector.shape_cast %11 : vector<128xf32> to vector<1x128xf32>
    %13 = arith.addf %9, %12 : vector<1x128xf32>
    %c0_9 = arith.constant 0 : index
    %c0_10 = arith.constant 0 : index
    %14 = vector.load %arg3[%c0_9, %c0_10] : memref<1x128xf32, #tpu.memory_space<vmem>>, vector<1x128xf32>
    tpu.vector_store %arg3[%c0_9, %c0_10], %13 {strides = array<i32>} : memref<1x128xf32, #tpu.memory_space<vmem>>, vector<1x128xf32>,
    return
  }
  func.func @transform_0(%arg0: i32) -> (i32, i32) {
    %c0_i32 = arith.constant 0 : i32
    %c0_i32_0 = arith.constant 0 : i32
    return %arg0, %c0_i32 : i32, i32
  }
  func.func @transform_1(%arg0: i32) -> (i32, i32) {
    %c0_i32 = arith.constant 0 : i32
    %c0_i32_0 = arith.constant 0 : i32
    %c0_i32_1 = arith.constant 0 : i32
    return %c0_i32, %c0_i32_0 : i32, i32
  }
  func.func @transform_2(%arg0: i32) -> (i32, i32) {
    %c0_i32 = arith.constant 0 : i32
    %c0_i32_0 = arith.constant 0 : i32
    %c0_i32_1 = arith.constant 0 : i32
    return %c0_i32, %c0_i32_0 : i32, i32
  }
}

module attributes {stable_mosaic.version = 11 : i64} {
  func.func @_conv3x3_stage_kernel(%arg0: i32, %arg1: i32, %arg2: memref<1x1x8x8x128xf32, #tpu.memory_space<vmem>>, %arg3: memref<1x128xf32, #tpu.memory_space<vmem>>, %arg4: memref<1x128xf32, #tpu.memory_space<vmem>>, %arg5: memref<9x384x128xbf16, #tpu.memory_space<vmem>>, %arg6: memref<1x128xf32, #tpu.memory_space<vmem>>, %arg7: memref<1x1x8x8x128xbf16, #tpu.memory_space<vmem>>, %arg8: memref<1x1x128xf32, #tpu.memory_space<vmem>>, %arg9: memref<1x1x128xf32, #tpu.memory_space<vmem>>, %arg10: memref<10x16x384xbf16, #tpu.memory_space<vmem>>) attributes {dimension_semantics = [#tpu.dimension_semantics<parallel>, #tpu.dimension_semantics<arbitrary>], iteration_bounds = array<i64: 2, 9>, scalar_prefetch = 0 : i64, scratch_operands = 1 : i64, tpu.core_type = #tpu.core_type<tc>, window_params = [{transform_indices = @transform_0, window_bounds = array<i64: 1, 1, 8, 8, 128>}, {pipeline_mode = #tpu.pipeline_mode<synchronous>, transform_indices = @transform_1, window_bounds = array<i64: 1, 128>}, {pipeline_mode = #tpu.pipeline_mode<synchronous>, transform_indices = @transform_2, window_bounds = array<i64: 1, 128>}, {pipeline_mode = #tpu.pipeline_mode<synchronous>, transform_indices = @transform_3, window_bounds = array<i64: 9, 384, 128>}, {pipeline_mode = #tpu.pipeline_mode<synchronous>, transform_indices = @transform_4, window_bounds = array<i64: 1, 128>}, {transform_indices = @transform_5, window_bounds = array<i64: 1, 1, 8, 8, 128>}, {transform_indices = @transform_6, window_bounds = array<i64: 1, 1, 128>}, {transform_indices = @transform_7, window_bounds = array<i64: 1, 1, 128>}]} {
    %c0_i32 = arith.constant 0 : i32
    %0 = arith.cmpi eq, %arg1, %c0_i32 : i32
    %1 = arith.extui %0 : i1 to i32
    %c0_i32_0 = arith.constant 0 : i32
    %2 = arith.cmpi ne, %1, %c0_i32_0 : i32
    scf.if %2 {
      %cst = arith.constant 0.000000e+00 : bf16
      %15 = vector.broadcast %cst : bf16 to vector<10x16x384xbf16>
      %c0 = arith.constant 0 : index
      %c0_8 = arith.constant 0 : index
      %c0_9 = arith.constant 0 : index
      %16 = vector.load %arg10[%c0, %c0_8, %c0_9] : memref<10x16x384xbf16, #tpu.memory_space<vmem>>, vector<10x16x384xbf16>
      tpu.vector_store %arg10[%c0, %c0_8, %c0_9], %15 {strides = array<i32>} : memref<10x16x384xbf16, #tpu.memory_space<vmem>>, vector<10x16x384xbf16>,
      %cst_10 = arith.constant 0.000000e+00 : f32
      %17 = vector.broadcast %cst_10 : f32 to vector<1x1x128xf32>
      %c0_11 = arith.constant 0 : index
      %c0_12 = arith.constant 0 : index
      %c0_13 = arith.constant 0 : index
      %18 = vector.load %arg8[%c0_11, %c0_12, %c0_13] : memref<1x1x128xf32, #tpu.memory_space<vmem>>, vector<1x1x128xf32>
      tpu.vector_store %arg8[%c0_11, %c0_12, %c0_13], %17 {strides = array<i32>} : memref<1x1x128xf32, #tpu.memory_space<vmem>>, vector<1x1x128xf32>,
      %cst_14 = arith.constant 0.000000e+00 : f32
      %19 = vector.broadcast %cst_14 : f32 to vector<1x1x128xf32>
      %c0_15 = arith.constant 0 : index
      %c0_16 = arith.constant 0 : index
      %c0_17 = arith.constant 0 : index
      %20 = vector.load %arg9[%c0_15, %c0_16, %c0_17] : memref<1x1x128xf32, #tpu.memory_space<vmem>>, vector<1x1x128xf32>
      tpu.vector_store %arg9[%c0_15, %c0_16, %c0_17], %19 {strides = array<i32>} : memref<1x1x128xf32, #tpu.memory_space<vmem>>, vector<1x1x128xf32>,
    } else {
    }
    %c0_i32_1 = arith.constant 0 : i32
    %3 = arith.cmpi sgt, %arg1, %c0_i32_1 : i32
    %4 = arith.extui %3 : i1 to i32
    %c0_i32_2 = arith.constant 0 : i32
    %5 = arith.cmpi ne, %4, %c0_i32_2 : i32
    scf.if %5 {
      %c0 = arith.constant 0 : index
      %c0_8 = arith.constant 0 : index
      %c128 = arith.constant 128 : index
      %15 = vector.load %arg10[%c0, %c0_8, %c128] : memref<10x16x384xbf16, #tpu.memory_space<vmem>>, vector<10x16x128xbf16>
      %c0_9 = arith.constant 0 : index
      %c0_10 = arith.constant 0 : index
      %c0_11 = arith.constant 0 : index
      %16 = vector.load %arg10[%c0_9, %c0_10, %c0_11] : memref<10x16x384xbf16, #tpu.memory_space<vmem>>, vector<10x16x128xbf16>
      tpu.vector_store %arg10[%c0_9, %c0_10, %c0_11], %15 {strides = array<i32>} : memref<10x16x384xbf16, #tpu.memory_space<vmem>>, vector<10x16x128xbf16>,
      %c0_12 = arith.constant 0 : index
      %c0_13 = arith.constant 0 : index
      %c256 = arith.constant 256 : index
      %17 = vector.load %arg10[%c0_12, %c0_13, %c256] : memref<10x16x384xbf16, #tpu.memory_space<vmem>>, vector<10x16x128xbf16>
      %c0_14 = arith.constant 0 : index
      %c0_15 = arith.constant 0 : index
      %c128_16 = arith.constant 128 : index
      %18 = vector.load %arg10[%c0_14, %c0_15, %c128_16] : memref<10x16x384xbf16, #tpu.memory_space<vmem>>, vector<10x16x128xbf16>
      tpu.vector_store %arg10[%c0_14, %c0_15, %c128_16], %17 {strides = array<i32>} : memref<10x16x384xbf16, #tpu.memory_space<vmem>>, vector<10x16x128xbf16>,
    } else {
    }
    %c8_i32 = arith.constant 8 : i32
    %6 = arith.cmpi slt, %arg1, %c8_i32 : i32
    %7 = arith.extui %6 : i1 to i32
    %c0_i32_3 = arith.constant 0 : i32
    %8 = arith.cmpi ne, %7, %c0_i32_3 : i32
    scf.if %8 {
      %c0 = arith.constant 0 : index
      %c0_8 = arith.constant 0 : index
      %c0_9 = arith.constant 0 : index
      %c0_10 = arith.constant 0 : index
      %c0_11 = arith.constant 0 : index
      %15 = vector.load %arg2[%c0, %c0_8, %c0_9, %c0_10, %c0_11] : memref<1x1x8x8x128xf32, #tpu.memory_space<vmem>>, vector<1x1x8x8x128xf32>
      %16 = vector.shape_cast %15 : vector<1x1x8x8x128xf32> to vector<8x8x128xf32>
      %c0_12 = arith.constant 0 : index
      %c0_13 = arith.constant 0 : index
      %17 = vector.load %arg3[%c0_12, %c0_13] : memref<1x128xf32, #tpu.memory_space<vmem>>, vector<1x128xf32>
      %18 = vector.shape_cast %17 : vector<1x128xf32> to vector<1x1x128xf32>
      %19 = vector.broadcast %18 : vector<1x1x128xf32> to vector<8x8x128xf32>
      %20 = arith.mulf %16, %19 : vector<8x8x128xf32>
      %c0_14 = arith.constant 0 : index
      %c0_15 = arith.constant 0 : index
      %21 = vector.load %arg4[%c0_14, %c0_15] : memref<1x128xf32, #tpu.memory_space<vmem>>, vector<1x128xf32>
      %22 = vector.shape_cast %21 : vector<1x128xf32> to vector<1x1x128xf32>
      %23 = vector.broadcast %22 : vector<1x1x128xf32> to vector<8x8x128xf32>
      %24 = arith.addf %20, %23 : vector<8x8x128xf32>
      %cst = arith.constant 0.000000e+00 : f32
      %25 = vector.broadcast %cst : f32 to vector<8x8x128xf32>
      %26 = arith.maximumf %24, %25 : vector<8x8x128xf32>
      %27 = arith.truncf %26 : vector<8x8x128xf32> to vector<8x8x128xbf16>
      %c1 = arith.constant 1 : index
      %c1_16 = arith.constant 1 : index
      %c256 = arith.constant 256 : index
      %28 = vector.load %arg10[%c1, %c1_16, %c256] : memref<10x16x384xbf16, #tpu.memory_space<vmem>>, vector<8x8x128xbf16>
      tpu.vector_store %arg10[%c1, %c1_16, %c256], %27 {strides = array<i32>} : memref<10x16x384xbf16, #tpu.memory_space<vmem>>, vector<8x8x128xbf16>,
    } else {
    }
    %c8_i32_4 = arith.constant 8 : i32
    %9 = arith.cmpi eq, %arg1, %c8_i32_4 : i32
    %10 = arith.extui %9 : i1 to i32
    %c0_i32_5 = arith.constant 0 : i32
    %11 = arith.cmpi ne, %10, %c0_i32_5 : i32
    scf.if %11 {
      %cst = arith.constant 0.000000e+00 : bf16
      %15 = vector.broadcast %cst : bf16 to vector<8x8x128xbf16>
      %c1 = arith.constant 1 : index
      %c1_8 = arith.constant 1 : index
      %c256 = arith.constant 256 : index
      %16 = vector.load %arg10[%c1, %c1_8, %c256] : memref<10x16x384xbf16, #tpu.memory_space<vmem>>, vector<8x8x128xbf16>
      tpu.vector_store %arg10[%c1, %c1_8, %c256], %15 {strides = array<i32>} : memref<10x16x384xbf16, #tpu.memory_space<vmem>>, vector<8x8x128xbf16>,
    } else {
    }
    %c0_i32_6 = arith.constant 0 : i32
    %12 = arith.cmpi sgt, %arg1, %c0_i32_6 : i32
    %13 = arith.extui %12 : i1 to i32
    %c0_i32_7 = arith.constant 0 : i32
    %14 = arith.cmpi ne, %13, %c0_i32_7 : i32
    scf.if %14 {
      %cst = arith.constant 0.000000e+00 : f32
      %15 = vector.broadcast %cst : f32 to vector<1x128xf32>
      %cst_8 = arith.constant 0.000000e+00 : f32
      %16 = vector.broadcast %cst_8 : f32 to vector<1x128xf32>
      %cst_9 = arith.constant 0.000000e+00 : f32
      %17 = vector.broadcast %cst_9 : f32 to vector<64x128xf32>
      %c0 = arith.constant 0 : index
      %c0_10 = arith.constant 0 : index
      %c0_11 = arith.constant 0 : index
      %18 = vector.load %arg10[%c0, %c0_10, %c0_11] : memref<10x16x384xbf16, #tpu.memory_space<vmem>>, vector<8x8x384xbf16>
      %19 = vector.shape_cast %18 : vector<8x8x384xbf16> to vector<64x384xbf16>
      %c0_12 = arith.constant 0 : index
      %c0_13 = arith.constant 0 : index
      %c0_14 = arith.constant 0 : index
      %20 = vector.load %arg5[%c0_12, %c0_13, %c0_14] : memref<9x384x128xbf16, #tpu.memory_space<vmem>>, vector<1x384x128xbf16>
      %21 = vector.shape_cast %20 : vector<1x384x128xbf16> to vector<384x128xbf16>
      %cst_15 = arith.constant dense<0.000000e+00> : vector<64x128xf32>
      %22 = tpu.matmul %19, %21, %cst_15 {dimension_numbers = #tpu.dot_dimension_numbers<[1], [0], [0], [1], [0, 0, 1, 1], [], []>} : vector<64x384xbf16>, vector<384x128xbf16>, vector<64x128xf32> -> vector<64x128xf32>
      %23 = arith.addf %17, %22 : vector<64x128xf32>
      %c0_16 = arith.constant 0 : index
      %c1 = arith.constant 1 : index
      %c0_17 = arith.constant 0 : index
      %24 = vector.load %arg10[%c0_16, %c1, %c0_17] : memref<10x16x384xbf16, #tpu.memory_space<vmem>>, vector<8x8x384xbf16>
      %25 = vector.shape_cast %24 : vector<8x8x384xbf16> to vector<64x384xbf16>
      %c1_18 = arith.constant 1 : index
      %c0_19 = arith.constant 0 : index
      %c0_20 = arith.constant 0 : index
      %26 = vector.load %arg5[%c1_18, %c0_19, %c0_20] : memref<9x384x128xbf16, #tpu.memory_space<vmem>>, vector<1x384x128xbf16>
      %27 = vector.shape_cast %26 : vector<1x384x128xbf16> to vector<384x128xbf16>
      %cst_21 = arith.constant dense<0.000000e+00> : vector<64x128xf32>
      %28 = tpu.matmul %25, %27, %cst_21 {dimension_numbers = #tpu.dot_dimension_numbers<[1], [0], [0], [1], [0, 0, 1, 1], [], []>} : vector<64x384xbf16>, vector<384x128xbf16>, vector<64x128xf32> -> vector<64x128xf32>
      %29 = arith.addf %23, %28 : vector<64x128xf32>
      %c0_22 = arith.constant 0 : index
      %c2 = arith.constant 2 : index
      %c0_23 = arith.constant 0 : index
      %30 = vector.load %arg10[%c0_22, %c2, %c0_23] : memref<10x16x384xbf16, #tpu.memory_space<vmem>>, vector<8x8x384xbf16>
      %31 = vector.shape_cast %30 : vector<8x8x384xbf16> to vector<64x384xbf16>
      %c2_24 = arith.constant 2 : index
      %c0_25 = arith.constant 0 : index
      %c0_26 = arith.constant 0 : index
      %32 = vector.load %arg5[%c2_24, %c0_25, %c0_26] : memref<9x384x128xbf16, #tpu.memory_space<vmem>>, vector<1x384x128xbf16>
      %33 = vector.shape_cast %32 : vector<1x384x128xbf16> to vector<384x128xbf16>
      %cst_27 = arith.constant dense<0.000000e+00> : vector<64x128xf32>
      %34 = tpu.matmul %31, %33, %cst_27 {dimension_numbers = #tpu.dot_dimension_numbers<[1], [0], [0], [1], [0, 0, 1, 1], [], []>} : vector<64x384xbf16>, vector<384x128xbf16>, vector<64x128xf32> -> vector<64x128xf32>
      %35 = arith.addf %29, %34 : vector<64x128xf32>
      %c1_28 = arith.constant 1 : index
      %c0_29 = arith.constant 0 : index
      %c0_30 = arith.constant 0 : index
      %36 = vector.load %arg10[%c1_28, %c0_29, %c0_30] : memref<10x16x384xbf16, #tpu.memory_space<vmem>>, vector<8x8x384xbf16>
      %37 = vector.shape_cast %36 : vector<8x8x384xbf16> to vector<64x384xbf16>
      %c3 = arith.constant 3 : index
      %c0_31 = arith.constant 0 : index
      %c0_32 = arith.constant 0 : index
      %38 = vector.load %arg5[%c3, %c0_31, %c0_32] : memref<9x384x128xbf16, #tpu.memory_space<vmem>>, vector<1x384x128xbf16>
      %39 = vector.shape_cast %38 : vector<1x384x128xbf16> to vector<384x128xbf16>
      %cst_33 = arith.constant dense<0.000000e+00> : vector<64x128xf32>
      %40 = tpu.matmul %37, %39, %cst_33 {dimension_numbers = #tpu.dot_dimension_numbers<[1], [0], [0], [1], [0, 0, 1, 1], [], []>} : vector<64x384xbf16>, vector<384x128xbf16>, vector<64x128xf32> -> vector<64x128xf32>
      %41 = arith.addf %35, %40 : vector<64x128xf32>
      %c1_34 = arith.constant 1 : index
      %c1_35 = arith.constant 1 : index
      %c0_36 = arith.constant 0 : index
      %42 = vector.load %arg10[%c1_34, %c1_35, %c0_36] : memref<10x16x384xbf16, #tpu.memory_space<vmem>>, vector<8x8x384xbf16>
      %43 = vector.shape_cast %42 : vector<8x8x384xbf16> to vector<64x384xbf16>
      %c4 = arith.constant 4 : index
      %c0_37 = arith.constant 0 : index
      %c0_38 = arith.constant 0 : index
      %44 = vector.load %arg5[%c4, %c0_37, %c0_38] : memref<9x384x128xbf16, #tpu.memory_space<vmem>>, vector<1x384x128xbf16>
      %45 = vector.shape_cast %44 : vector<1x384x128xbf16> to vector<384x128xbf16>
      %cst_39 = arith.constant dense<0.000000e+00> : vector<64x128xf32>
      %46 = tpu.matmul %43, %45, %cst_39 {dimension_numbers = #tpu.dot_dimension_numbers<[1], [0], [0], [1], [0, 0, 1, 1], [], []>} : vector<64x384xbf16>, vector<384x128xbf16>, vector<64x128xf32> -> vector<64x128xf32>
      %47 = arith.addf %41, %46 : vector<64x128xf32>
      %c1_40 = arith.constant 1 : index
      %c2_41 = arith.constant 2 : index
      %c0_42 = arith.constant 0 : index
      %48 = vector.load %arg10[%c1_40, %c2_41, %c0_42] : memref<10x16x384xbf16, #tpu.memory_space<vmem>>, vector<8x8x384xbf16>
      %49 = vector.shape_cast %48 : vector<8x8x384xbf16> to vector<64x384xbf16>
      %c5 = arith.constant 5 : index
      %c0_43 = arith.constant 0 : index
      %c0_44 = arith.constant 0 : index
      %50 = vector.load %arg5[%c5, %c0_43, %c0_44] : memref<9x384x128xbf16, #tpu.memory_space<vmem>>, vector<1x384x128xbf16>
      %51 = vector.shape_cast %50 : vector<1x384x128xbf16> to vector<384x128xbf16>
      %cst_45 = arith.constant dense<0.000000e+00> : vector<64x128xf32>
      %52 = tpu.matmul %49, %51, %cst_45 {dimension_numbers = #tpu.dot_dimension_numbers<[1], [0], [0], [1], [0, 0, 1, 1], [], []>} : vector<64x384xbf16>, vector<384x128xbf16>, vector<64x128xf32> -> vector<64x128xf32>
      %53 = arith.addf %47, %52 : vector<64x128xf32>
      %c2_46 = arith.constant 2 : index
      %c0_47 = arith.constant 0 : index
      %c0_48 = arith.constant 0 : index
      %54 = vector.load %arg10[%c2_46, %c0_47, %c0_48] : memref<10x16x384xbf16, #tpu.memory_space<vmem>>, vector<8x8x384xbf16>
      %55 = vector.shape_cast %54 : vector<8x8x384xbf16> to vector<64x384xbf16>
      %c6 = arith.constant 6 : index
      %c0_49 = arith.constant 0 : index
      %c0_50 = arith.constant 0 : index
      %56 = vector.load %arg5[%c6, %c0_49, %c0_50] : memref<9x384x128xbf16, #tpu.memory_space<vmem>>, vector<1x384x128xbf16>
      %57 = vector.shape_cast %56 : vector<1x384x128xbf16> to vector<384x128xbf16>
      %cst_51 = arith.constant dense<0.000000e+00> : vector<64x128xf32>
      %58 = tpu.matmul %55, %57, %cst_51 {dimension_numbers = #tpu.dot_dimension_numbers<[1], [0], [0], [1], [0, 0, 1, 1], [], []>} : vector<64x384xbf16>, vector<384x128xbf16>, vector<64x128xf32> -> vector<64x128xf32>
      %59 = arith.addf %53, %58 : vector<64x128xf32>
      %c2_52 = arith.constant 2 : index
      %c1_53 = arith.constant 1 : index
      %c0_54 = arith.constant 0 : index
      %60 = vector.load %arg10[%c2_52, %c1_53, %c0_54] : memref<10x16x384xbf16, #tpu.memory_space<vmem>>, vector<8x8x384xbf16>
      %61 = vector.shape_cast %60 : vector<8x8x384xbf16> to vector<64x384xbf16>
      %c7 = arith.constant 7 : index
      %c0_55 = arith.constant 0 : index
      %c0_56 = arith.constant 0 : index
      %62 = vector.load %arg5[%c7, %c0_55, %c0_56] : memref<9x384x128xbf16, #tpu.memory_space<vmem>>, vector<1x384x128xbf16>
      %63 = vector.shape_cast %62 : vector<1x384x128xbf16> to vector<384x128xbf16>
      %cst_57 = arith.constant dense<0.000000e+00> : vector<64x128xf32>
      %64 = tpu.matmul %61, %63, %cst_57 {dimension_numbers = #tpu.dot_dimension_numbers<[1], [0], [0], [1], [0, 0, 1, 1], [], []>} : vector<64x384xbf16>, vector<384x128xbf16>, vector<64x128xf32> -> vector<64x128xf32>
      %65 = arith.addf %59, %64 : vector<64x128xf32>
      %c2_58 = arith.constant 2 : index
      %c2_59 = arith.constant 2 : index
      %c0_60 = arith.constant 0 : index
      %66 = vector.load %arg10[%c2_58, %c2_59, %c0_60] : memref<10x16x384xbf16, #tpu.memory_space<vmem>>, vector<8x8x384xbf16>
      %67 = vector.shape_cast %66 : vector<8x8x384xbf16> to vector<64x384xbf16>
      %c8 = arith.constant 8 : index
      %c0_61 = arith.constant 0 : index
      %c0_62 = arith.constant 0 : index
      %68 = vector.load %arg5[%c8, %c0_61, %c0_62] : memref<9x384x128xbf16, #tpu.memory_space<vmem>>, vector<1x384x128xbf16>
      %69 = vector.shape_cast %68 : vector<1x384x128xbf16> to vector<384x128xbf16>
      %cst_63 = arith.constant dense<0.000000e+00> : vector<64x128xf32>
      %70 = tpu.matmul %67, %69, %cst_63 {dimension_numbers = #tpu.dot_dimension_numbers<[1], [0], [0], [1], [0, 0, 1, 1], [], []>} : vector<64x384xbf16>, vector<384x128xbf16>, vector<64x128xf32> -> vector<64x128xf32>
      %71 = arith.addf %65, %70 : vector<64x128xf32>
      %c0_64 = arith.constant 0 : index
      %c0_65 = arith.constant 0 : index
      %72 = vector.load %arg6[%c0_64, %c0_65] : memref<1x128xf32, #tpu.memory_space<vmem>>, vector<1x128xf32>
      %73 = vector.broadcast %72 : vector<1x128xf32> to vector<64x128xf32>
      %74 = arith.addf %71, %73 : vector<64x128xf32>
      %75 = vector.shape_cast %74 : vector<64x128xf32> to vector<8x8x128xf32>
      %76 = arith.truncf %75 : vector<8x8x128xf32> to vector<8x8x128xbf16>
      %c0_66 = arith.constant 0 : index
      %c0_67 = arith.constant 0 : index
      %c0_68 = arith.constant 0 : index
      %c0_69 = arith.constant 0 : index
      %c0_70 = arith.constant 0 : index
      %77 = vector.load %arg7[%c0_66, %c0_67, %c0_68, %c0_69, %c0_70] : memref<1x1x8x8x128xbf16, #tpu.memory_space<vmem>>, vector<1x1x8x8x128xbf16>
      %78 = vector.shape_cast %77 : vector<1x1x8x8x128xbf16> to vector<8x8x128xbf16>
      %79 = vector.shape_cast %76 : vector<8x8x128xbf16> to vector<1x1x8x8x128xbf16>
      tpu.vector_store %arg7[%c0_66, %c0_67, %c0_68, %c0_69, %c0_70], %79 {strides = array<i32>} : memref<1x1x8x8x128xbf16, #tpu.memory_space<vmem>>, vector<1x1x8x8x128xbf16>,
      %cst_71 = arith.constant dense<0.000000e+00> : vector<128xf32>
      %80 = vector.multi_reduction <add>, %74, %cst_71 [0] : vector<64x128xf32> to vector<128xf32>
      %81 = vector.shape_cast %80 : vector<128xf32> to vector<1x128xf32>
      %82 = arith.addf %15, %81 : vector<1x128xf32>
      %83 = arith.mulf %74, %74 : vector<64x128xf32>
      %cst_72 = arith.constant dense<0.000000e+00> : vector<128xf32>
      %84 = vector.multi_reduction <add>, %83, %cst_72 [0] : vector<64x128xf32> to vector<128xf32>
      %85 = vector.shape_cast %84 : vector<128xf32> to vector<1x128xf32>
      %86 = arith.addf %16, %85 : vector<1x128xf32>
      %c0_73 = arith.constant 0 : index
      %c0_74 = arith.constant 0 : index
      %c0_75 = arith.constant 0 : index
      %87 = vector.load %arg8[%c0_73, %c0_74, %c0_75] : memref<1x1x128xf32, #tpu.memory_space<vmem>>, vector<1x1x128xf32>
      %88 = vector.shape_cast %87 : vector<1x1x128xf32> to vector<1x128xf32>
      %89 = arith.addf %88, %82 : vector<1x128xf32>
      %c0_76 = arith.constant 0 : index
      %c0_77 = arith.constant 0 : index
      %c0_78 = arith.constant 0 : index
      %90 = vector.load %arg8[%c0_76, %c0_77, %c0_78] : memref<1x1x128xf32, #tpu.memory_space<vmem>>, vector<1x1x128xf32>
      %91 = vector.shape_cast %90 : vector<1x1x128xf32> to vector<1x128xf32>
      %92 = vector.shape_cast %89 : vector<1x128xf32> to vector<1x1x128xf32>
      tpu.vector_store %arg8[%c0_76, %c0_77, %c0_78], %92 {strides = array<i32>} : memref<1x1x128xf32, #tpu.memory_space<vmem>>, vector<1x1x128xf32>,
      %c0_79 = arith.constant 0 : index
      %c0_80 = arith.constant 0 : index
      %c0_81 = arith.constant 0 : index
      %93 = vector.load %arg9[%c0_79, %c0_80, %c0_81] : memref<1x1x128xf32, #tpu.memory_space<vmem>>, vector<1x1x128xf32>
      %94 = vector.shape_cast %93 : vector<1x1x128xf32> to vector<1x128xf32>
      %95 = arith.addf %94, %86 : vector<1x128xf32>
      %c0_82 = arith.constant 0 : index
      %c0_83 = arith.constant 0 : index
      %c0_84 = arith.constant 0 : index
      %96 = vector.load %arg9[%c0_82, %c0_83, %c0_84] : memref<1x1x128xf32, #tpu.memory_space<vmem>>, vector<1x1x128xf32>
      %97 = vector.shape_cast %96 : vector<1x1x128xf32> to vector<1x128xf32>
      %98 = vector.shape_cast %95 : vector<1x128xf32> to vector<1x1x128xf32>
      tpu.vector_store %arg9[%c0_82, %c0_83, %c0_84], %98 {strides = array<i32>} : memref<1x1x128xf32, #tpu.memory_space<vmem>>, vector<1x1x128xf32>,
    } else {
    }
    return
  }
  func.func @transform_0(%arg0: i32, %arg1: i32) -> (i32, i32, i32, i32, i32) {
    %c7_i32 = arith.constant 7 : i32
    %0 = arith.minsi %arg1, %c7_i32 : i32
    %c0_i32 = arith.constant 0 : i32
    %c0_i32_0 = arith.constant 0 : i32
    %c0_i32_1 = arith.constant 0 : i32
    %c0_i32_2 = arith.constant 0 : i32
    return %arg0, %0, %c0_i32, %c0_i32_0, %c0_i32_1 : i32, i32, i32, i32, i32
  }
  func.func @transform_1(%arg0: i32, %arg1: i32) -> (i32, i32) {
    %c0_i32 = arith.constant 0 : i32
    %c0_i32_0 = arith.constant 0 : i32
    %c0_i32_1 = arith.constant 0 : i32
    return %c0_i32, %c0_i32_0 : i32, i32
  }
  func.func @transform_2(%arg0: i32, %arg1: i32) -> (i32, i32) {
    %c0_i32 = arith.constant 0 : i32
    %c0_i32_0 = arith.constant 0 : i32
    %c0_i32_1 = arith.constant 0 : i32
    return %c0_i32, %c0_i32_0 : i32, i32
  }
  func.func @transform_3(%arg0: i32, %arg1: i32) -> (i32, i32, i32) {
    %c0_i32 = arith.constant 0 : i32
    %c0_i32_0 = arith.constant 0 : i32
    %c0_i32_1 = arith.constant 0 : i32
    %c0_i32_2 = arith.constant 0 : i32
    return %c0_i32, %c0_i32_0, %c0_i32_1 : i32, i32, i32
  }
  func.func @transform_4(%arg0: i32, %arg1: i32) -> (i32, i32) {
    %c0_i32 = arith.constant 0 : i32
    %c0_i32_0 = arith.constant 0 : i32
    %c0_i32_1 = arith.constant 0 : i32
    return %c0_i32, %c0_i32_0 : i32, i32
  }
  func.func @transform_5(%arg0: i32, %arg1: i32) -> (i32, i32, i32, i32, i32) {
    %c1_i32 = arith.constant 1 : i32
    %0 = arith.subi %arg1, %c1_i32 : i32
    %c0_i32 = arith.constant 0 : i32
    %1 = arith.maxsi %0, %c0_i32 : i32
    %c0_i32_0 = arith.constant 0 : i32
    %c0_i32_1 = arith.constant 0 : i32
    %c0_i32_2 = arith.constant 0 : i32
    %c0_i32_3 = arith.constant 0 : i32
    return %arg0, %1, %c0_i32_0, %c0_i32_1, %c0_i32_2 : i32, i32, i32, i32, i32
  }
  func.func @transform_6(%arg0: i32, %arg1: i32) -> (i32, i32, i32) {
    %c0_i32 = arith.constant 0 : i32
    %c0_i32_0 = arith.constant 0 : i32
    %c0_i32_1 = arith.constant 0 : i32
    return %arg0, %c0_i32, %c0_i32_0 : i32, i32, i32
  }
  func.func @transform_7(%arg0: i32, %arg1: i32) -> (i32, i32, i32) {
    %c0_i32 = arith.constant 0 : i32
    %c0_i32_0 = arith.constant 0 : i32
    %c0_i32_1 = arith.constant 0 : i32
    return %arg0, %c0_i32, %c0_i32_0 : i32, i32, i32
  }
}

module attributes {stable_mosaic.version = 11 : i64} {
  func.func @_conv3x3_stage_kernel(%arg0: i32, %arg1: i32, %arg2: memref<1x1x8x8x128xbf16, #tpu.memory_space<vmem>>, %arg3: memref<1x128xf32, #tpu.memory_space<vmem>>, %arg4: memref<1x128xf32, #tpu.memory_space<vmem>>, %arg5: memref<9x384x128xbf16, #tpu.memory_space<vmem>>, %arg6: memref<1x128xf32, #tpu.memory_space<vmem>>, %arg7: memref<1x1x8x8x128xbf16, #tpu.memory_space<vmem>>, %arg8: memref<1x1x128xf32, #tpu.memory_space<vmem>>, %arg9: memref<1x1x128xf32, #tpu.memory_space<vmem>>, %arg10: memref<10x16x384xbf16, #tpu.memory_space<vmem>>) attributes {dimension_semantics = [#tpu.dimension_semantics<parallel>, #tpu.dimension_semantics<arbitrary>], iteration_bounds = array<i64: 2, 9>, scalar_prefetch = 0 : i64, scratch_operands = 1 : i64, tpu.core_type = #tpu.core_type<tc>, window_params = [{transform_indices = @transform_0, window_bounds = array<i64: 1, 1, 8, 8, 128>}, {pipeline_mode = #tpu.pipeline_mode<synchronous>, transform_indices = @transform_1, window_bounds = array<i64: 1, 128>}, {pipeline_mode = #tpu.pipeline_mode<synchronous>, transform_indices = @transform_2, window_bounds = array<i64: 1, 128>}, {pipeline_mode = #tpu.pipeline_mode<synchronous>, transform_indices = @transform_3, window_bounds = array<i64: 9, 384, 128>}, {pipeline_mode = #tpu.pipeline_mode<synchronous>, transform_indices = @transform_4, window_bounds = array<i64: 1, 128>}, {transform_indices = @transform_5, window_bounds = array<i64: 1, 1, 8, 8, 128>}, {transform_indices = @transform_6, window_bounds = array<i64: 1, 1, 128>}, {transform_indices = @transform_7, window_bounds = array<i64: 1, 1, 128>}]} {
    %c0_i32 = arith.constant 0 : i32
    %0 = arith.cmpi eq, %arg1, %c0_i32 : i32
    %1 = arith.extui %0 : i1 to i32
    %c0_i32_0 = arith.constant 0 : i32
    %2 = arith.cmpi ne, %1, %c0_i32_0 : i32
    scf.if %2 {
      %cst = arith.constant 0.000000e+00 : bf16
      %15 = vector.broadcast %cst : bf16 to vector<10x16x384xbf16>
      %c0 = arith.constant 0 : index
      %c0_8 = arith.constant 0 : index
      %c0_9 = arith.constant 0 : index
      %16 = vector.load %arg10[%c0, %c0_8, %c0_9] : memref<10x16x384xbf16, #tpu.memory_space<vmem>>, vector<10x16x384xbf16>
      tpu.vector_store %arg10[%c0, %c0_8, %c0_9], %15 {strides = array<i32>} : memref<10x16x384xbf16, #tpu.memory_space<vmem>>, vector<10x16x384xbf16>,
      %cst_10 = arith.constant 0.000000e+00 : f32
      %17 = vector.broadcast %cst_10 : f32 to vector<1x1x128xf32>
      %c0_11 = arith.constant 0 : index
      %c0_12 = arith.constant 0 : index
      %c0_13 = arith.constant 0 : index
      %18 = vector.load %arg8[%c0_11, %c0_12, %c0_13] : memref<1x1x128xf32, #tpu.memory_space<vmem>>, vector<1x1x128xf32>
      tpu.vector_store %arg8[%c0_11, %c0_12, %c0_13], %17 {strides = array<i32>} : memref<1x1x128xf32, #tpu.memory_space<vmem>>, vector<1x1x128xf32>,
      %cst_14 = arith.constant 0.000000e+00 : f32
      %19 = vector.broadcast %cst_14 : f32 to vector<1x1x128xf32>
      %c0_15 = arith.constant 0 : index
      %c0_16 = arith.constant 0 : index
      %c0_17 = arith.constant 0 : index
      %20 = vector.load %arg9[%c0_15, %c0_16, %c0_17] : memref<1x1x128xf32, #tpu.memory_space<vmem>>, vector<1x1x128xf32>
      tpu.vector_store %arg9[%c0_15, %c0_16, %c0_17], %19 {strides = array<i32>} : memref<1x1x128xf32, #tpu.memory_space<vmem>>, vector<1x1x128xf32>,
    } else {
    }
    %c0_i32_1 = arith.constant 0 : i32
    %3 = arith.cmpi sgt, %arg1, %c0_i32_1 : i32
    %4 = arith.extui %3 : i1 to i32
    %c0_i32_2 = arith.constant 0 : i32
    %5 = arith.cmpi ne, %4, %c0_i32_2 : i32
    scf.if %5 {
      %c0 = arith.constant 0 : index
      %c0_8 = arith.constant 0 : index
      %c128 = arith.constant 128 : index
      %15 = vector.load %arg10[%c0, %c0_8, %c128] : memref<10x16x384xbf16, #tpu.memory_space<vmem>>, vector<10x16x128xbf16>
      %c0_9 = arith.constant 0 : index
      %c0_10 = arith.constant 0 : index
      %c0_11 = arith.constant 0 : index
      %16 = vector.load %arg10[%c0_9, %c0_10, %c0_11] : memref<10x16x384xbf16, #tpu.memory_space<vmem>>, vector<10x16x128xbf16>
      tpu.vector_store %arg10[%c0_9, %c0_10, %c0_11], %15 {strides = array<i32>} : memref<10x16x384xbf16, #tpu.memory_space<vmem>>, vector<10x16x128xbf16>,
      %c0_12 = arith.constant 0 : index
      %c0_13 = arith.constant 0 : index
      %c256 = arith.constant 256 : index
      %17 = vector.load %arg10[%c0_12, %c0_13, %c256] : memref<10x16x384xbf16, #tpu.memory_space<vmem>>, vector<10x16x128xbf16>
      %c0_14 = arith.constant 0 : index
      %c0_15 = arith.constant 0 : index
      %c128_16 = arith.constant 128 : index
      %18 = vector.load %arg10[%c0_14, %c0_15, %c128_16] : memref<10x16x384xbf16, #tpu.memory_space<vmem>>, vector<10x16x128xbf16>
      tpu.vector_store %arg10[%c0_14, %c0_15, %c128_16], %17 {strides = array<i32>} : memref<10x16x384xbf16, #tpu.memory_space<vmem>>, vector<10x16x128xbf16>,
    } else {
    }
    %c8_i32 = arith.constant 8 : i32
    %6 = arith.cmpi slt, %arg1, %c8_i32 : i32
    %7 = arith.extui %6 : i1 to i32
    %c0_i32_3 = arith.constant 0 : i32
    %8 = arith.cmpi ne, %7, %c0_i32_3 : i32
    scf.if %8 {
      %c0 = arith.constant 0 : index
      %c0_8 = arith.constant 0 : index
      %c0_9 = arith.constant 0 : index
      %c0_10 = arith.constant 0 : index
      %c0_11 = arith.constant 0 : index
      %15 = vector.load %arg2[%c0, %c0_8, %c0_9, %c0_10, %c0_11] : memref<1x1x8x8x128xbf16, #tpu.memory_space<vmem>>, vector<1x1x8x8x128xbf16>
      %16 = vector.shape_cast %15 : vector<1x1x8x8x128xbf16> to vector<8x8x128xbf16>
      %17 = arith.extf %16 : vector<8x8x128xbf16> to vector<8x8x128xf32>
      %c0_12 = arith.constant 0 : index
      %c0_13 = arith.constant 0 : index
      %18 = vector.load %arg3[%c0_12, %c0_13] : memref<1x128xf32, #tpu.memory_space<vmem>>, vector<1x128xf32>
      %19 = vector.shape_cast %18 : vector<1x128xf32> to vector<1x1x128xf32>
      %20 = vector.broadcast %19 : vector<1x1x128xf32> to vector<8x8x128xf32>
      %21 = arith.mulf %17, %20 : vector<8x8x128xf32>
      %c0_14 = arith.constant 0 : index
      %c0_15 = arith.constant 0 : index
      %22 = vector.load %arg4[%c0_14, %c0_15] : memref<1x128xf32, #tpu.memory_space<vmem>>, vector<1x128xf32>
      %23 = vector.shape_cast %22 : vector<1x128xf32> to vector<1x1x128xf32>
      %24 = vector.broadcast %23 : vector<1x1x128xf32> to vector<8x8x128xf32>
      %25 = arith.addf %21, %24 : vector<8x8x128xf32>
      %cst = arith.constant 0.000000e+00 : f32
      %26 = vector.broadcast %cst : f32 to vector<8x8x128xf32>
      %27 = arith.maximumf %25, %26 : vector<8x8x128xf32>
      %28 = arith.truncf %27 : vector<8x8x128xf32> to vector<8x8x128xbf16>
      %c1 = arith.constant 1 : index
      %c1_16 = arith.constant 1 : index
      %c256 = arith.constant 256 : index
      %29 = vector.load %arg10[%c1, %c1_16, %c256] : memref<10x16x384xbf16, #tpu.memory_space<vmem>>, vector<8x8x128xbf16>
      tpu.vector_store %arg10[%c1, %c1_16, %c256], %28 {strides = array<i32>} : memref<10x16x384xbf16, #tpu.memory_space<vmem>>, vector<8x8x128xbf16>,
    } else {
    }
    %c8_i32_4 = arith.constant 8 : i32
    %9 = arith.cmpi eq, %arg1, %c8_i32_4 : i32
    %10 = arith.extui %9 : i1 to i32
    %c0_i32_5 = arith.constant 0 : i32
    %11 = arith.cmpi ne, %10, %c0_i32_5 : i32
    scf.if %11 {
      %cst = arith.constant 0.000000e+00 : bf16
      %15 = vector.broadcast %cst : bf16 to vector<8x8x128xbf16>
      %c1 = arith.constant 1 : index
      %c1_8 = arith.constant 1 : index
      %c256 = arith.constant 256 : index
      %16 = vector.load %arg10[%c1, %c1_8, %c256] : memref<10x16x384xbf16, #tpu.memory_space<vmem>>, vector<8x8x128xbf16>
      tpu.vector_store %arg10[%c1, %c1_8, %c256], %15 {strides = array<i32>} : memref<10x16x384xbf16, #tpu.memory_space<vmem>>, vector<8x8x128xbf16>,
    } else {
    }
    %c0_i32_6 = arith.constant 0 : i32
    %12 = arith.cmpi sgt, %arg1, %c0_i32_6 : i32
    %13 = arith.extui %12 : i1 to i32
    %c0_i32_7 = arith.constant 0 : i32
    %14 = arith.cmpi ne, %13, %c0_i32_7 : i32
    scf.if %14 {
      %cst = arith.constant 0.000000e+00 : f32
      %15 = vector.broadcast %cst : f32 to vector<1x128xf32>
      %cst_8 = arith.constant 0.000000e+00 : f32
      %16 = vector.broadcast %cst_8 : f32 to vector<1x128xf32>
      %cst_9 = arith.constant 0.000000e+00 : f32
      %17 = vector.broadcast %cst_9 : f32 to vector<64x128xf32>
      %c0 = arith.constant 0 : index
      %c0_10 = arith.constant 0 : index
      %c0_11 = arith.constant 0 : index
      %18 = vector.load %arg10[%c0, %c0_10, %c0_11] : memref<10x16x384xbf16, #tpu.memory_space<vmem>>, vector<8x8x384xbf16>
      %19 = vector.shape_cast %18 : vector<8x8x384xbf16> to vector<64x384xbf16>
      %c0_12 = arith.constant 0 : index
      %c0_13 = arith.constant 0 : index
      %c0_14 = arith.constant 0 : index
      %20 = vector.load %arg5[%c0_12, %c0_13, %c0_14] : memref<9x384x128xbf16, #tpu.memory_space<vmem>>, vector<1x384x128xbf16>
      %21 = vector.shape_cast %20 : vector<1x384x128xbf16> to vector<384x128xbf16>
      %cst_15 = arith.constant dense<0.000000e+00> : vector<64x128xf32>
      %22 = tpu.matmul %19, %21, %cst_15 {dimension_numbers = #tpu.dot_dimension_numbers<[1], [0], [0], [1], [0, 0, 1, 1], [], []>} : vector<64x384xbf16>, vector<384x128xbf16>, vector<64x128xf32> -> vector<64x128xf32>
      %23 = arith.addf %17, %22 : vector<64x128xf32>
      %c0_16 = arith.constant 0 : index
      %c1 = arith.constant 1 : index
      %c0_17 = arith.constant 0 : index
      %24 = vector.load %arg10[%c0_16, %c1, %c0_17] : memref<10x16x384xbf16, #tpu.memory_space<vmem>>, vector<8x8x384xbf16>
      %25 = vector.shape_cast %24 : vector<8x8x384xbf16> to vector<64x384xbf16>
      %c1_18 = arith.constant 1 : index
      %c0_19 = arith.constant 0 : index
      %c0_20 = arith.constant 0 : index
      %26 = vector.load %arg5[%c1_18, %c0_19, %c0_20] : memref<9x384x128xbf16, #tpu.memory_space<vmem>>, vector<1x384x128xbf16>
      %27 = vector.shape_cast %26 : vector<1x384x128xbf16> to vector<384x128xbf16>
      %cst_21 = arith.constant dense<0.000000e+00> : vector<64x128xf32>
      %28 = tpu.matmul %25, %27, %cst_21 {dimension_numbers = #tpu.dot_dimension_numbers<[1], [0], [0], [1], [0, 0, 1, 1], [], []>} : vector<64x384xbf16>, vector<384x128xbf16>, vector<64x128xf32> -> vector<64x128xf32>
      %29 = arith.addf %23, %28 : vector<64x128xf32>
      %c0_22 = arith.constant 0 : index
      %c2 = arith.constant 2 : index
      %c0_23 = arith.constant 0 : index
      %30 = vector.load %arg10[%c0_22, %c2, %c0_23] : memref<10x16x384xbf16, #tpu.memory_space<vmem>>, vector<8x8x384xbf16>
      %31 = vector.shape_cast %30 : vector<8x8x384xbf16> to vector<64x384xbf16>
      %c2_24 = arith.constant 2 : index
      %c0_25 = arith.constant 0 : index
      %c0_26 = arith.constant 0 : index
      %32 = vector.load %arg5[%c2_24, %c0_25, %c0_26] : memref<9x384x128xbf16, #tpu.memory_space<vmem>>, vector<1x384x128xbf16>
      %33 = vector.shape_cast %32 : vector<1x384x128xbf16> to vector<384x128xbf16>
      %cst_27 = arith.constant dense<0.000000e+00> : vector<64x128xf32>
      %34 = tpu.matmul %31, %33, %cst_27 {dimension_numbers = #tpu.dot_dimension_numbers<[1], [0], [0], [1], [0, 0, 1, 1], [], []>} : vector<64x384xbf16>, vector<384x128xbf16>, vector<64x128xf32> -> vector<64x128xf32>
      %35 = arith.addf %29, %34 : vector<64x128xf32>
      %c1_28 = arith.constant 1 : index
      %c0_29 = arith.constant 0 : index
      %c0_30 = arith.constant 0 : index
      %36 = vector.load %arg10[%c1_28, %c0_29, %c0_30] : memref<10x16x384xbf16, #tpu.memory_space<vmem>>, vector<8x8x384xbf16>
      %37 = vector.shape_cast %36 : vector<8x8x384xbf16> to vector<64x384xbf16>
      %c3 = arith.constant 3 : index
      %c0_31 = arith.constant 0 : index
      %c0_32 = arith.constant 0 : index
      %38 = vector.load %arg5[%c3, %c0_31, %c0_32] : memref<9x384x128xbf16, #tpu.memory_space<vmem>>, vector<1x384x128xbf16>
      %39 = vector.shape_cast %38 : vector<1x384x128xbf16> to vector<384x128xbf16>
      %cst_33 = arith.constant dense<0.000000e+00> : vector<64x128xf32>
      %40 = tpu.matmul %37, %39, %cst_33 {dimension_numbers = #tpu.dot_dimension_numbers<[1], [0], [0], [1], [0, 0, 1, 1], [], []>} : vector<64x384xbf16>, vector<384x128xbf16>, vector<64x128xf32> -> vector<64x128xf32>
      %41 = arith.addf %35, %40 : vector<64x128xf32>
      %c1_34 = arith.constant 1 : index
      %c1_35 = arith.constant 1 : index
      %c0_36 = arith.constant 0 : index
      %42 = vector.load %arg10[%c1_34, %c1_35, %c0_36] : memref<10x16x384xbf16, #tpu.memory_space<vmem>>, vector<8x8x384xbf16>
      %43 = vector.shape_cast %42 : vector<8x8x384xbf16> to vector<64x384xbf16>
      %c4 = arith.constant 4 : index
      %c0_37 = arith.constant 0 : index
      %c0_38 = arith.constant 0 : index
      %44 = vector.load %arg5[%c4, %c0_37, %c0_38] : memref<9x384x128xbf16, #tpu.memory_space<vmem>>, vector<1x384x128xbf16>
      %45 = vector.shape_cast %44 : vector<1x384x128xbf16> to vector<384x128xbf16>
      %cst_39 = arith.constant dense<0.000000e+00> : vector<64x128xf32>
      %46 = tpu.matmul %43, %45, %cst_39 {dimension_numbers = #tpu.dot_dimension_numbers<[1], [0], [0], [1], [0, 0, 1, 1], [], []>} : vector<64x384xbf16>, vector<384x128xbf16>, vector<64x128xf32> -> vector<64x128xf32>
      %47 = arith.addf %41, %46 : vector<64x128xf32>
      %c1_40 = arith.constant 1 : index
      %c2_41 = arith.constant 2 : index
      %c0_42 = arith.constant 0 : index
      %48 = vector.load %arg10[%c1_40, %c2_41, %c0_42] : memref<10x16x384xbf16, #tpu.memory_space<vmem>>, vector<8x8x384xbf16>
      %49 = vector.shape_cast %48 : vector<8x8x384xbf16> to vector<64x384xbf16>
      %c5 = arith.constant 5 : index
      %c0_43 = arith.constant 0 : index
      %c0_44 = arith.constant 0 : index
      %50 = vector.load %arg5[%c5, %c0_43, %c0_44] : memref<9x384x128xbf16, #tpu.memory_space<vmem>>, vector<1x384x128xbf16>
      %51 = vector.shape_cast %50 : vector<1x384x128xbf16> to vector<384x128xbf16>
      %cst_45 = arith.constant dense<0.000000e+00> : vector<64x128xf32>
      %52 = tpu.matmul %49, %51, %cst_45 {dimension_numbers = #tpu.dot_dimension_numbers<[1], [0], [0], [1], [0, 0, 1, 1], [], []>} : vector<64x384xbf16>, vector<384x128xbf16>, vector<64x128xf32> -> vector<64x128xf32>
      %53 = arith.addf %47, %52 : vector<64x128xf32>
      %c2_46 = arith.constant 2 : index
      %c0_47 = arith.constant 0 : index
      %c0_48 = arith.constant 0 : index
      %54 = vector.load %arg10[%c2_46, %c0_47, %c0_48] : memref<10x16x384xbf16, #tpu.memory_space<vmem>>, vector<8x8x384xbf16>
      %55 = vector.shape_cast %54 : vector<8x8x384xbf16> to vector<64x384xbf16>
      %c6 = arith.constant 6 : index
      %c0_49 = arith.constant 0 : index
      %c0_50 = arith.constant 0 : index
      %56 = vector.load %arg5[%c6, %c0_49, %c0_50] : memref<9x384x128xbf16, #tpu.memory_space<vmem>>, vector<1x384x128xbf16>
      %57 = vector.shape_cast %56 : vector<1x384x128xbf16> to vector<384x128xbf16>
      %cst_51 = arith.constant dense<0.000000e+00> : vector<64x128xf32>
      %58 = tpu.matmul %55, %57, %cst_51 {dimension_numbers = #tpu.dot_dimension_numbers<[1], [0], [0], [1], [0, 0, 1, 1], [], []>} : vector<64x384xbf16>, vector<384x128xbf16>, vector<64x128xf32> -> vector<64x128xf32>
      %59 = arith.addf %53, %58 : vector<64x128xf32>
      %c2_52 = arith.constant 2 : index
      %c1_53 = arith.constant 1 : index
      %c0_54 = arith.constant 0 : index
      %60 = vector.load %arg10[%c2_52, %c1_53, %c0_54] : memref<10x16x384xbf16, #tpu.memory_space<vmem>>, vector<8x8x384xbf16>
      %61 = vector.shape_cast %60 : vector<8x8x384xbf16> to vector<64x384xbf16>
      %c7 = arith.constant 7 : index
      %c0_55 = arith.constant 0 : index
      %c0_56 = arith.constant 0 : index
      %62 = vector.load %arg5[%c7, %c0_55, %c0_56] : memref<9x384x128xbf16, #tpu.memory_space<vmem>>, vector<1x384x128xbf16>
      %63 = vector.shape_cast %62 : vector<1x384x128xbf16> to vector<384x128xbf16>
      %cst_57 = arith.constant dense<0.000000e+00> : vector<64x128xf32>
      %64 = tpu.matmul %61, %63, %cst_57 {dimension_numbers = #tpu.dot_dimension_numbers<[1], [0], [0], [1], [0, 0, 1, 1], [], []>} : vector<64x384xbf16>, vector<384x128xbf16>, vector<64x128xf32> -> vector<64x128xf32>
      %65 = arith.addf %59, %64 : vector<64x128xf32>
      %c2_58 = arith.constant 2 : index
      %c2_59 = arith.constant 2 : index
      %c0_60 = arith.constant 0 : index
      %66 = vector.load %arg10[%c2_58, %c2_59, %c0_60] : memref<10x16x384xbf16, #tpu.memory_space<vmem>>, vector<8x8x384xbf16>
      %67 = vector.shape_cast %66 : vector<8x8x384xbf16> to vector<64x384xbf16>
      %c8 = arith.constant 8 : index
      %c0_61 = arith.constant 0 : index
      %c0_62 = arith.constant 0 : index
      %68 = vector.load %arg5[%c8, %c0_61, %c0_62] : memref<9x384x128xbf16, #tpu.memory_space<vmem>>, vector<1x384x128xbf16>
      %69 = vector.shape_cast %68 : vector<1x384x128xbf16> to vector<384x128xbf16>
      %cst_63 = arith.constant dense<0.000000e+00> : vector<64x128xf32>
      %70 = tpu.matmul %67, %69, %cst_63 {dimension_numbers = #tpu.dot_dimension_numbers<[1], [0], [0], [1], [0, 0, 1, 1], [], []>} : vector<64x384xbf16>, vector<384x128xbf16>, vector<64x128xf32> -> vector<64x128xf32>
      %71 = arith.addf %65, %70 : vector<64x128xf32>
      %c0_64 = arith.constant 0 : index
      %c0_65 = arith.constant 0 : index
      %72 = vector.load %arg6[%c0_64, %c0_65] : memref<1x128xf32, #tpu.memory_space<vmem>>, vector<1x128xf32>
      %73 = vector.broadcast %72 : vector<1x128xf32> to vector<64x128xf32>
      %74 = arith.addf %71, %73 : vector<64x128xf32>
      %75 = vector.shape_cast %74 : vector<64x128xf32> to vector<8x8x128xf32>
      %76 = arith.truncf %75 : vector<8x8x128xf32> to vector<8x8x128xbf16>
      %c0_66 = arith.constant 0 : index
      %c0_67 = arith.constant 0 : index
      %c0_68 = arith.constant 0 : index
      %c0_69 = arith.constant 0 : index
      %c0_70 = arith.constant 0 : index
      %77 = vector.load %arg7[%c0_66, %c0_67, %c0_68, %c0_69, %c0_70] : memref<1x1x8x8x128xbf16, #tpu.memory_space<vmem>>, vector<1x1x8x8x128xbf16>
      %78 = vector.shape_cast %77 : vector<1x1x8x8x128xbf16> to vector<8x8x128xbf16>
      %79 = vector.shape_cast %76 : vector<8x8x128xbf16> to vector<1x1x8x8x128xbf16>
      tpu.vector_store %arg7[%c0_66, %c0_67, %c0_68, %c0_69, %c0_70], %79 {strides = array<i32>} : memref<1x1x8x8x128xbf16, #tpu.memory_space<vmem>>, vector<1x1x8x8x128xbf16>,
      %cst_71 = arith.constant dense<0.000000e+00> : vector<128xf32>
      %80 = vector.multi_reduction <add>, %74, %cst_71 [0] : vector<64x128xf32> to vector<128xf32>
      %81 = vector.shape_cast %80 : vector<128xf32> to vector<1x128xf32>
      %82 = arith.addf %15, %81 : vector<1x128xf32>
      %83 = arith.mulf %74, %74 : vector<64x128xf32>
      %cst_72 = arith.constant dense<0.000000e+00> : vector<128xf32>
      %84 = vector.multi_reduction <add>, %83, %cst_72 [0] : vector<64x128xf32> to vector<128xf32>
      %85 = vector.shape_cast %84 : vector<128xf32> to vector<1x128xf32>
      %86 = arith.addf %16, %85 : vector<1x128xf32>
      %c0_73 = arith.constant 0 : index
      %c0_74 = arith.constant 0 : index
      %c0_75 = arith.constant 0 : index
      %87 = vector.load %arg8[%c0_73, %c0_74, %c0_75] : memref<1x1x128xf32, #tpu.memory_space<vmem>>, vector<1x1x128xf32>
      %88 = vector.shape_cast %87 : vector<1x1x128xf32> to vector<1x128xf32>
      %89 = arith.addf %88, %82 : vector<1x128xf32>
      %c0_76 = arith.constant 0 : index
      %c0_77 = arith.constant 0 : index
      %c0_78 = arith.constant 0 : index
      %90 = vector.load %arg8[%c0_76, %c0_77, %c0_78] : memref<1x1x128xf32, #tpu.memory_space<vmem>>, vector<1x1x128xf32>
      %91 = vector.shape_cast %90 : vector<1x1x128xf32> to vector<1x128xf32>
      %92 = vector.shape_cast %89 : vector<1x128xf32> to vector<1x1x128xf32>
      tpu.vector_store %arg8[%c0_76, %c0_77, %c0_78], %92 {strides = array<i32>} : memref<1x1x128xf32, #tpu.memory_space<vmem>>, vector<1x1x128xf32>,
      %c0_79 = arith.constant 0 : index
      %c0_80 = arith.constant 0 : index
      %c0_81 = arith.constant 0 : index
      %93 = vector.load %arg9[%c0_79, %c0_80, %c0_81] : memref<1x1x128xf32, #tpu.memory_space<vmem>>, vector<1x1x128xf32>
      %94 = vector.shape_cast %93 : vector<1x1x128xf32> to vector<1x128xf32>
      %95 = arith.addf %94, %86 : vector<1x128xf32>
      %c0_82 = arith.constant 0 : index
      %c0_83 = arith.constant 0 : index
      %c0_84 = arith.constant 0 : index
      %96 = vector.load %arg9[%c0_82, %c0_83, %c0_84] : memref<1x1x128xf32, #tpu.memory_space<vmem>>, vector<1x1x128xf32>
      %97 = vector.shape_cast %96 : vector<1x1x128xf32> to vector<1x128xf32>
      %98 = vector.shape_cast %95 : vector<1x128xf32> to vector<1x1x128xf32>
      tpu.vector_store %arg9[%c0_82, %c0_83, %c0_84], %98 {strides = array<i32>} : memref<1x1x128xf32, #tpu.memory_space<vmem>>, vector<1x1x128xf32>,
    } else {
    }
    return
  }
  func.func @transform_0(%arg0: i32, %arg1: i32) -> (i32, i32, i32, i32, i32) {
    %c7_i32 = arith.constant 7 : i32
    %0 = arith.minsi %arg1, %c7_i32 : i32
    %c0_i32 = arith.constant 0 : i32
    %c0_i32_0 = arith.constant 0 : i32
    %c0_i32_1 = arith.constant 0 : i32
    %c0_i32_2 = arith.constant 0 : i32
    return %arg0, %0, %c0_i32, %c0_i32_0, %c0_i32_1 : i32, i32, i32, i32, i32
  }
  func.func @transform_1(%arg0: i32, %arg1: i32) -> (i32, i32) {
    %c0_i32 = arith.constant 0 : i32
    %c0_i32_0 = arith.constant 0 : i32
    %c0_i32_1 = arith.constant 0 : i32
    return %c0_i32, %c0_i32_0 : i32, i32
  }
  func.func @transform_2(%arg0: i32, %arg1: i32) -> (i32, i32) {
    %c0_i32 = arith.constant 0 : i32
    %c0_i32_0 = arith.constant 0 : i32
    %c0_i32_1 = arith.constant 0 : i32
    return %c0_i32, %c0_i32_0 : i32, i32
  }
  func.func @transform_3(%arg0: i32, %arg1: i32) -> (i32, i32, i32) {
    %c0_i32 = arith.constant 0 : i32
    %c0_i32_0 = arith.constant 0 : i32
    %c0_i32_1 = arith.constant 0 : i32
    %c0_i32_2 = arith.constant 0 : i32
    return %c0_i32, %c0_i32_0, %c0_i32_1 : i32, i32, i32
  }
  func.func @transform_4(%arg0: i32, %arg1: i32) -> (i32, i32) {
    %c0_i32 = arith.constant 0 : i32
    %c0_i32_0 = arith.constant 0 : i32
    %c0_i32_1 = arith.constant 0 : i32
    return %c0_i32, %c0_i32_0 : i32, i32
  }
  func.func @transform_5(%arg0: i32, %arg1: i32) -> (i32, i32, i32, i32, i32) {
    %c1_i32 = arith.constant 1 : i32
    %0 = arith.subi %arg1, %c1_i32 : i32
    %c0_i32 = arith.constant 0 : i32
    %1 = arith.maxsi %0, %c0_i32 : i32
    %c0_i32_0 = arith.constant 0 : i32
    %c0_i32_1 = arith.constant 0 : i32
    %c0_i32_2 = arith.constant 0 : i32
    %c0_i32_3 = arith.constant 0 : i32
    return %arg0, %1, %c0_i32_0, %c0_i32_1, %c0_i32_2 : i32, i32, i32, i32, i32
  }
  func.func @transform_6(%arg0: i32, %arg1: i32) -> (i32, i32, i32) {
    %c0_i32 = arith.constant 0 : i32
    %c0_i32_0 = arith.constant 0 : i32
    %c0_i32_1 = arith.constant 0 : i32
    return %arg0, %c0_i32, %c0_i32_0 : i32, i32, i32
  }
  func.func @transform_7(%arg0: i32, %arg1: i32) -> (i32, i32, i32) {
    %c0_i32 = arith.constant 0 : i32
    %c0_i32_0 = arith.constant 0 : i32
    %c0_i32_1 = arith.constant 0 : i32
    return %arg0, %c0_i32, %c0_i32_0 : i32, i32, i32
  }
}

module attributes {stable_mosaic.version = 11 : i64} {
  func.func @_final_stage_kernel(%arg0: i32, %arg1: memref<1024x128xbf16, #tpu.memory_space<vmem>>, %arg2: memref<1024x128xbf16, #tpu.memory_space<vmem>>, %arg3: memref<1x128xf32, #tpu.memory_space<vmem>>, %arg4: memref<1x128xf32, #tpu.memory_space<vmem>>, %arg5: memref<128x128xbf16, #tpu.memory_space<vmem>>, %arg6: memref<1x128xf32, #tpu.memory_space<vmem>>, %arg7: memref<128x128xbf16, #tpu.memory_space<vmem>>, %arg8: memref<1x128xf32, #tpu.memory_space<vmem>>, %arg9: memref<1024x128xf32, #tpu.memory_space<vmem>>) attributes {dimension_semantics = [#tpu.dimension_semantics<parallel>], iteration_bounds = array<i64: 1>, scalar_prefetch = 0 : i64, scratch_operands = 0 : i64, tpu.core_type = #tpu.core_type<tc>, window_params = [{transform_indices = @transform_0, window_bounds = array<i64: 1024, 128>}, {transform_indices = @transform_1, window_bounds = array<i64: 1024, 128>}, {pipeline_mode = #tpu.pipeline_mode<synchronous>, transform_indices = @transform_2, window_bounds = array<i64: 1, 128>}, {pipeline_mode = #tpu.pipeline_mode<synchronous>, transform_indices = @transform_3, window_bounds = array<i64: 1, 128>}, {pipeline_mode = #tpu.pipeline_mode<synchronous>, transform_indices = @transform_4, window_bounds = array<i64: 128, 128>}, {pipeline_mode = #tpu.pipeline_mode<synchronous>, transform_indices = @transform_5, window_bounds = array<i64: 1, 128>}, {pipeline_mode = #tpu.pipeline_mode<synchronous>, transform_indices = @transform_6, window_bounds = array<i64: 128, 128>}, {pipeline_mode = #tpu.pipeline_mode<synchronous>, transform_indices = @transform_7, window_bounds = array<i64: 1, 128>}, {transform_indices = @transform_8, window_bounds = array<i64: 1024, 128>}]} {
    %c0 = arith.constant 0 : index
    %c0_0 = arith.constant 0 : index
    %0 = vector.load %arg1[%c0, %c0_0] : memref<1024x128xbf16, #tpu.memory_space<vmem>>, vector<1024x128xbf16>
    %1 = arith.extf %0 : vector<1024x128xbf16> to vector<1024x128xf32>
    %c0_1 = arith.constant 0 : index
    %c0_2 = arith.constant 0 : index
    %2 = vector.load %arg3[%c0_1, %c0_2] : memref<1x128xf32, #tpu.memory_space<vmem>>, vector<1x128xf32>
    %3 = vector.broadcast %2 : vector<1x128xf32> to vector<1024x128xf32>
    %4 = arith.mulf %1, %3 : vector<1024x128xf32>
    %c0_3 = arith.constant 0 : index
    %c0_4 = arith.constant 0 : index
    %5 = vector.load %arg4[%c0_3, %c0_4] : memref<1x128xf32, #tpu.memory_space<vmem>>, vector<1x128xf32>
    %6 = vector.broadcast %5 : vector<1x128xf32> to vector<1024x128xf32>
    %7 = arith.addf %4, %6 : vector<1024x128xf32>
    %cst = arith.constant 0.000000e+00 : f32
    %8 = vector.broadcast %cst : f32 to vector<1024x128xf32>
    %9 = arith.maximumf %7, %8 : vector<1024x128xf32>
    %10 = arith.truncf %9 : vector<1024x128xf32> to vector<1024x128xbf16>
    %c0_5 = arith.constant 0 : index
    %c0_6 = arith.constant 0 : index
    %11 = vector.load %arg5[%c0_5, %c0_6] : memref<128x128xbf16, #tpu.memory_space<vmem>>, vector<128x128xbf16>
    %cst_7 = arith.constant dense<0.000000e+00> : vector<1024x128xf32>
    %12 = tpu.matmul %10, %11, %cst_7 {dimension_numbers = #tpu.dot_dimension_numbers<[1], [0], [0], [1], [0, 0, 1, 1], [], []>} : vector<1024x128xbf16>, vector<128x128xbf16>, vector<1024x128xf32> -> vector<1024x128xf32>
    %c0_8 = arith.constant 0 : index
    %c0_9 = arith.constant 0 : index
    %13 = vector.load %arg6[%c0_8, %c0_9] : memref<1x128xf32, #tpu.memory_space<vmem>>, vector<1x128xf32>
    %14 = vector.broadcast %13 : vector<1x128xf32> to vector<1024x128xf32>
    %15 = arith.addf %12, %14 : vector<1024x128xf32>
    %c0_10 = arith.constant 0 : index
    %c0_11 = arith.constant 0 : index
    %16 = vector.load %arg2[%c0_10, %c0_11] : memref<1024x128xbf16, #tpu.memory_space<vmem>>, vector<1024x128xbf16>
    %c0_12 = arith.constant 0 : index
    %c0_13 = arith.constant 0 : index
    %17 = vector.load %arg7[%c0_12, %c0_13] : memref<128x128xbf16, #tpu.memory_space<vmem>>, vector<128x128xbf16>
    %cst_14 = arith.constant dense<0.000000e+00> : vector<1024x128xf32>
    %18 = tpu.matmul %16, %17, %cst_14 {dimension_numbers = #tpu.dot_dimension_numbers<[1], [0], [0], [1], [0, 0, 1, 1], [], []>} : vector<1024x128xbf16>, vector<128x128xbf16>, vector<1024x128xf32> -> vector<1024x128xf32>
    %c0_15 = arith.constant 0 : index
    %c0_16 = arith.constant 0 : index
    %19 = vector.load %arg8[%c0_15, %c0_16] : memref<1x128xf32, #tpu.memory_space<vmem>>, vector<1x128xf32>
    %20 = vector.broadcast %19 : vector<1x128xf32> to vector<1024x128xf32>
    %21 = arith.addf %18, %20 : vector<1024x128xf32>
    %22 = arith.addf %15, %21 : vector<1024x128xf32>
    %c0_17 = arith.constant 0 : index
    %c0_18 = arith.constant 0 : index
    %23 = vector.load %arg9[%c0_17, %c0_18] : memref<1024x128xf32, #tpu.memory_space<vmem>>, vector<1024x128xf32>
    tpu.vector_store %arg9[%c0_17, %c0_18], %22 {strides = array<i32>} : memref<1024x128xf32, #tpu.memory_space<vmem>>, vector<1024x128xf32>,
    return
  }
  func.func @transform_0(%arg0: i32) -> (i32, i32) {
    %c0_i32 = arith.constant 0 : i32
    %c0_i32_0 = arith.constant 0 : i32
    return %arg0, %c0_i32 : i32, i32
  }
  func.func @transform_1(%arg0: i32) -> (i32, i32) {
    %c0_i32 = arith.constant 0 : i32
    %c0_i32_0 = arith.constant 0 : i32
    return %arg0, %c0_i32 : i32, i32
  }
  func.func @transform_2(%arg0: i32) -> (i32, i32) {
    %c0_i32 = arith.constant 0 : i32
    %c0_i32_0 = arith.constant 0 : i32
    %c0_i32_1 = arith.constant 0 : i32
    return %c0_i32, %c0_i32_0 : i32, i32
  }
  func.func @transform_3(%arg0: i32) -> (i32, i32) {
    %c0_i32 = arith.constant 0 : i32
    %c0_i32_0 = arith.constant 0 : i32
    %c0_i32_1 = arith.constant 0 : i32
    return %c0_i32, %c0_i32_0 : i32, i32
  }
  func.func @transform_4(%arg0: i32) -> (i32, i32) {
    %c0_i32 = arith.constant 0 : i32
    %c0_i32_0 = arith.constant 0 : i32
    %c0_i32_1 = arith.constant 0 : i32
    return %c0_i32, %c0_i32_0 : i32, i32
  }
  func.func @transform_5(%arg0: i32) -> (i32, i32) {
    %c0_i32 = arith.constant 0 : i32
    %c0_i32_0 = arith.constant 0 : i32
    %c0_i32_1 = arith.constant 0 : i32
    return %c0_i32, %c0_i32_0 : i32, i32
  }
  func.func @transform_6(%arg0: i32) -> (i32, i32) {
    %c0_i32 = arith.constant 0 : i32
    %c0_i32_0 = arith.constant 0 : i32
    %c0_i32_1 = arith.constant 0 : i32
    return %c0_i32, %c0_i32_0 : i32, i32
  }
  func.func @transform_7(%arg0: i32) -> (i32, i32) {
    %c0_i32 = arith.constant 0 : i32
    %c0_i32_0 = arith.constant 0 : i32
    %c0_i32_1 = arith.constant 0 : i32
    return %c0_i32, %c0_i32_0 : i32, i32
  }
  func.func @transform_8(%arg0: i32) -> (i32, i32) {
    %c0_i32 = arith.constant 0 : i32
    %c0_i32_0 = arith.constant 0 : i32
    return %arg0, %c0_i32 : i32, i32
  }
}

</mosaic_0001>

<bundles_post_ra>
// kernel: residual_block_forward.4
= control target key start
LH: loop header
LB: loop body
LE: loop exit
PB: predicated region body
PF: predicated region fallthrough
CT: control target
= control target key end

     0   :  { %v553_v0 = vmov 0.0   ;;  %s971_s0 = inlined_call_operand.vmem [shape: f32[1024,128], index: 0, kind: input, shape index: {}]   ;;  %s972_s1 = inlined_call_operand.vmem [shape: f32[1,128], index: 1, kind: output, shape index: {0}]   ;;  %s973_s2 = inlined_call_operand.vmem [shape: f32[1,128], index: 2, kind: output, shape index: {1}]  }
   0x1   :  { %14 = vst [vmem:[%s972_s1] sm:$0x1] %v553_v0  ;;  %15 = vst [vmem:[%s973_s2] sm:$0x1] %v553_v0  ;;  %v16_v1 = vld [vmem:[%s971_s0] sm:$0xff]  ;;  %v17_v2 = vld [vmem:[%s971_s0 + $0x8] sm:$0xff] }
   0x2   :  { %v18_v3 = vld [vmem:[%s971_s0 + $0x10] sm:$0xff]  ;;  %v19_v4 = vld [vmem:[%s971_s0 + $0x18] sm:$0xff]  ;;  %v145_v5 = vadd.f32 %v17_v2, %v16_v1  ;;  %v281_v6 = vmul.f32 %v16_v1, %v16_v1  ;;  %v282_v7 = vmul.f32 %v17_v2, %v17_v2  ;;  %v20_v9 = vld [vmem:[%s971_s0 + $0x20] sm:$0xff] }
   0x3   :  { %v283_v8 = vmul.f32 %v18_v3, %v18_v3  ;;  %v284_v11 = vmul.f32 %v19_v4, %v19_v4  ;;  %v21_v13 = vld [vmem:[%s971_s0 + $0x28] sm:$0xff]  ;;  %v285_v15 = vmul.f32 %v20_v9, %v20_v9  ;;  %v22_v17 = vld [vmem:[%s971_s0 + $0x30] sm:$0xff]  ;;  %v23_v21 = vld [vmem:[%s971_s0 + $0x38] sm:$0xff] }
   0x4   :  { %v146_v10 = vadd.f32 %v145_v5, %v18_v3  ;;  %v409_v12 = vadd.f32 %v282_v7, %v281_v6  ;;  %v286_v19 = vmul.f32 %v21_v13, %v21_v13  ;;  %v287_v23 = vmul.f32 %v22_v17, %v22_v17  ;;  %v24_v25 = vld [vmem:[%s971_s0 + $0x40] sm:$0xff]  ;;  %v25_v29 = vld [vmem:[%s971_s0 + $0x48] sm:$0xff]  ;;  %v26_v33 = vld [vmem:[%s971_s0 + $0x50] sm:$0xff] }
   0x5   :  { %v288_v27 = vmul.f32 %v23_v21, %v23_v21  ;;  %v289_v31 = vmul.f32 %v24_v25, %v24_v25  ;;  %v290_v35 = vmul.f32 %v25_v29, %v25_v29  ;;  %v27_v37 = vld [vmem:[%s971_s0 + $0x58] sm:$0xff]  ;;  %v291_v39 = vmul.f32 %v26_v33, %v26_v33  ;;  %v28_v41 = vld [vmem:[%s971_s0 + $0x60] sm:$0xff]  ;;  %v29_v45 = vld [vmem:[%s971_s0 + $0x68] sm:$0xff] }
   0x6   :  { %v147_v14 = vadd.f32 %v146_v10, %v19_v4  ;;  %v410_v16 = vadd.f32 %v409_v12, %v283_v8  ;;  %v292_v43 = vmul.f32 %v27_v37, %v27_v37  ;;  %v293_v47 = vmul.f32 %v28_v41, %v28_v41  ;;  %v30_v49 = vld [vmem:[%s971_s0 + $0x70] sm:$0xff]  ;;  %v31_v53 = vld [vmem:[%s971_s0 + $0x78] sm:$0xff]  ;;  %v32_v57 = vld [vmem:[%s971_s0 + $0x80] sm:$0xff] }
   0x7   :  { %v294_v51 = vmul.f32 %v29_v45, %v29_v45  ;;  %v295_v55 = vmul.f32 %v30_v49, %v30_v49  ;;  %v296_v59 = vmul.f32 %v31_v53, %v31_v53  ;;  %v33_v61 = vld [vmem:[%s971_s0 + $0x88] sm:$0xff]  ;;  %v297_v63 = vmul.f32 %v32_v57, %v32_v57  ;;  %v34_v1 = vld [vmem:[%s971_s0 + $0x90] sm:$0xff]  ;;  %v35_v5 = vld [vmem:[%s971_s0 + $0x98] sm:$0xff] }
   0x8   :  { %v148_v18 = vadd.f32 %v147_v14, %v20_v9  ;;  %v411_v20 = vadd.f32 %v410_v16, %v284_v11  ;;  %v298_v3 = vmul.f32 %v33_v61, %v33_v61  ;;  %v299_v7 = vmul.f32 %v34_v1, %v34_v1  ;;  %v36_v9 = vld [vmem:[%s971_s0 + $0xa0] sm:$0xff] }
   0x9   :  { %v300_v11 = vmul.f32 %v35_v5, %v35_v5 }
   0xa   :  { %v149_v22 = vadd.f32 %v148_v18, %v21_v13  ;;  %v412_v24 = vadd.f32 %v411_v20, %v285_v15  ;;  %v37_v13 = vld [vmem:[%s971_s0 + $0xa8] sm:$0xff]  ;;  %v301_v15 = vmul.f32 %v36_v9, %v36_v9 }
   0xc   :  { %v150_v26 = vadd.f32 %v149_v22, %v22_v17  ;;  %v413_v28 = vadd.f32 %v412_v24, %v286_v19  ;;  %v38_v17 = vld [vmem:[%s971_s0 + $0xb0] sm:$0xff]  ;;  %v302_v19 = vmul.f32 %v37_v13, %v37_v13 }
   0xe   :  { %v151_v30 = vadd.f32 %v150_v26, %v23_v21  ;;  %v414_v32 = vadd.f32 %v413_v28, %v287_v23  ;;  %v39_v21 = vld [vmem:[%s971_s0 + $0xb8] sm:$0xff]  ;;  %v303_v23 = vmul.f32 %v38_v17, %v38_v17 }
  0x10   :  { %v152_v34 = vadd.f32 %v151_v30, %v24_v25  ;;  %v415_v36 = vadd.f32 %v414_v32, %v288_v27  ;;  %v40_v25 = vld [vmem:[%s971_s0 + $0xc0] sm:$0xff]  ;;  %v304_v27 = vmul.f32 %v39_v21, %v39_v21 }
  0x12   :  { %v153_v38 = vadd.f32 %v152_v34, %v25_v29  ;;  %v416_v40 = vadd.f32 %v415_v36, %v289_v31  ;;  %v41_v29 = vld [vmem:[%s971_s0 + $0xc8] sm:$0xff]  ;;  %v305_v31 = vmul.f32 %v40_v25, %v40_v25 }
  0x14   :  { %v154_v42 = vadd.f32 %v153_v38, %v26_v33  ;;  %v417_v44 = vadd.f32 %v416_v40, %v290_v35  ;;  %v42_v33 = vld [vmem:[%s971_s0 + $0xd0] sm:$0xff]  ;;  %v306_v35 = vmul.f32 %v41_v29, %v41_v29 }
  0x16   :  { %v155_v46 = vadd.f32 %v154_v42, %v27_v37  ;;  %v418_v48 = vadd.f32 %v417_v44, %v291_v39  ;;  %v43_v37 = vld [vmem:[%s971_s0 + $0xd8] sm:$0xff]  ;;  %v307_v39 = vmul.f32 %v42_v33, %v42_v33 }
  0x18   :  { %v156_v50 = vadd.f32 %v155_v46, %v28_v41  ;;  %v419_v52 = vadd.f32 %v418_v48, %v292_v43  ;;  %v44_v41 = vld [vmem:[%s971_s0 + $0xe0] sm:$0xff]  ;;  %v308_v43 = vmul.f32 %v43_v37, %v43_v37 }
  0x1a   :  { %v157_v54 = vadd.f32 %v156_v50, %v29_v45  ;;  %v420_v56 = vadd.f32 %v419_v52, %v293_v47  ;;  %v45_v45 = vld [vmem:[%s971_s0 + $0xe8] sm:$0xff]  ;;  %v309_v47 = vmul.f32 %v44_v41, %v44_v41 }
  0x1c   :  { %v158_v58 = vadd.f32 %v157_v54, %v30_v49  ;;  %v421_v60 = vadd.f32 %v420_v56, %v294_v51  ;;  %v46_v49 = vld [vmem:[%s971_s0 + $0xf0] sm:$0xff]  ;;  %v310_v51 = vmul.f32 %v45_v45, %v45_v45 }
  0x1e   :  { %v159_v62 = vadd.f32 %v158_v58, %v31_v53  ;;  %v422_v0 = vadd.f32 %v421_v60, %v295_v55  ;;  %v47_v53 = vld [vmem:[%s971_s0 + $0xf8] sm:$0xff]  ;;  %v311_v55 = vmul.f32 %v46_v49, %v46_v49 }
  0x20   :  { %v160_v2 = vadd.f32 %v159_v62, %v32_v57  ;;  %v423_v4 = vadd.f32 %v422_v0, %v296_v59  ;;  %v48_v57 = vld [vmem:[%s971_s0 + $0x100] sm:$0xff]  ;;  %v312_v59 = vmul.f32 %v47_v53, %v47_v53 }
  0x22   :  { %v161_v6 = vadd.f32 %v160_v2, %v33_v61  ;;  %v424_v8 = vadd.f32 %v423_v4, %v297_v63  ;;  %v49_v61 = vld [vmem:[%s971_s0 + $0x108] sm:$0xff]  ;;  %v313_v63 = vmul.f32 %v48_v57, %v48_v57 }
  0x24   :  { %v162_v10 = vadd.f32 %v161_v6, %v34_v1  ;;  %v425_v12 = vadd.f32 %v424_v8, %v298_v3  ;;  %v50_v1 = vld [vmem:[%s971_s0 + $0x110] sm:$0xff]  ;;  %v314_v3 = vmul.f32 %v49_v61, %v49_v61 }
  0x26   :  { %v163_v14 = vadd.f32 %v162_v10, %v35_v5  ;;  %v426_v16 = vadd.f32 %v425_v12, %v299_v7  ;;  %v51_v5 = vld [vmem:[%s971_s0 + $0x118] sm:$0xff]  ;;  %v315_v7 = vmul.f32 %v50_v1, %v50_v1 }
  0x28   :  { %v164_v18 = vadd.f32 %v163_v14, %v36_v9  ;;  %v427_v20 = vadd.f32 %v426_v16, %v300_v11  ;;  %v52_v9 = vld [vmem:[%s971_s0 + $0x120] sm:$0xff]  ;;  %v316_v11 = vmul.f32 %v51_v5, %v51_v5 }
  0x2a   :  { %v165_v22 = vadd.f32 %v164_v18, %v37_v13  ;;  %v428_v24 = vadd.f32 %v427_v20, %v301_v15  ;;  %v53_v13 = vld [vmem:[%s971_s0 + $0x128] sm:$0xff]  ;;  %v317_v15 = vmul.f32 %v52_v9, %v52_v9 }
  0x2c   :  { %v166_v26 = vadd.f32 %v165_v22, %v38_v17  ;;  %v429_v28 = vadd.f32 %v428_v24, %v302_v19  ;;  %v54_v17 = vld [vmem:[%s971_s0 + $0x130] sm:$0xff]  ;;  %v318_v19 = vmul.f32 %v53_v13, %v53_v13 }
  0x2e   :  { %v167_v30 = vadd.f32 %v166_v26, %v39_v21  ;;  %v430_v32 = vadd.f32 %v429_v28, %v303_v23  ;;  %v55_v21 = vld [vmem:[%s971_s0 + $0x138] sm:$0xff]  ;;  %v319_v23 = vmul.f32 %v54_v17, %v54_v17 }
  0x30   :  { %v168_v34 = vadd.f32 %v167_v30, %v40_v25  ;;  %v431_v36 = vadd.f32 %v430_v32, %v304_v27  ;;  %v56_v25 = vld [vmem:[%s971_s0 + $0x140] sm:$0xff]  ;;  %v320_v27 = vmul.f32 %v55_v21, %v55_v21 }
  0x32   :  { %v169_v38 = vadd.f32 %v168_v34, %v41_v29  ;;  %v432_v40 = vadd.f32 %v431_v36, %v305_v31  ;;  %v57_v29 = vld [vmem:[%s971_s0 + $0x148] sm:$0xff]  ;;  %v321_v31 = vmul.f32 %v56_v25, %v56_v25 }
  0x34   :  { %v170_v42 = vadd.f32 %v169_v38, %v42_v33  ;;  %v433_v44 = vadd.f32 %v432_v40, %v306_v35  ;;  %v58_v33 = vld [vmem:[%s971_s0 + $0x150] sm:$0xff]  ;;  %v322_v35 = vmul.f32 %v57_v29, %v57_v29 }
  0x36   :  { %v171_v46 = vadd.f32 %v170_v42, %v43_v37  ;;  %v434_v48 = vadd.f32 %v433_v44, %v307_v39  ;;  %v59_v37 = vld [vmem:[%s971_s0 + $0x158] sm:$0xff]  ;;  %v323_v39 = vmul.f32 %v58_v33, %v58_v33 }
  0x38   :  { %v172_v50 = vadd.f32 %v171_v46, %v44_v41  ;;  %v435_v52 = vadd.f32 %v434_v48, %v308_v43  ;;  %v60_v41 = vld [vmem:[%s971_s0 + $0x160] sm:$0xff]  ;;  %v324_v43 = vmul.f32 %v59_v37, %v59_v37 }
  0x3a   :  { %v173_v54 = vadd.f32 %v172_v50, %v45_v45  ;;  %v436_v56 = vadd.f32 %v435_v52, %v309_v47  ;;  %v61_v45 = vld [vmem:[%s971_s0 + $0x168] sm:$0xff]  ;;  %v325_v47 = vmul.f32 %v60_v41, %v60_v41 }
  0x3c   :  { %v174_v58 = vadd.f32 %v173_v54, %v46_v49  ;;  %v437_v60 = vadd.f32 %v436_v56, %v310_v51  ;;  %v62_v49 = vld [vmem:[%s971_s0 + $0x170] sm:$0xff]  ;;  %v326_v51 = vmul.f32 %v61_v45, %v61_v45 }
  0x3e   :  { %v175_v62 = vadd.f32 %v174_v58, %v47_v53  ;;  %v438_v0 = vadd.f32 %v437_v60, %v311_v55  ;;  %v63_v53 = vld [vmem:[%s971_s0 + $0x178] sm:$0xff]  ;;  %v327_v55 = vmul.f32 %v62_v49, %v62_v49 }
  0x40   :  { %v176_v2 = vadd.f32 %v175_v62, %v48_v57  ;;  %v439_v4 = vadd.f32 %v438_v0, %v312_v59  ;;  %v64_v57 = vld [vmem:[%s971_s0 + $0x180] sm:$0xff]  ;;  %v328_v59 = vmul.f32 %v63_v53, %v63_v53 }
  0x42   :  { %v177_v6 = vadd.f32 %v176_v2, %v49_v61  ;;  %v440_v8 = vadd.f32 %v439_v4, %v313_v63  ;;  %v65_v61 = vld [vmem:[%s971_s0 + $0x188] sm:$0xff]  ;;  %v329_v63 = vmul.f32 %v64_v57, %v64_v57 }
  0x44   :  { %v178_v10 = vadd.f32 %v177_v6, %v50_v1  ;;  %v441_v12 = vadd.f32 %v440_v8, %v314_v3  ;;  %v66_v1 = vld [vmem:[%s971_s0 + $0x190] sm:$0xff]  ;;  %v330_v3 = vmul.f32 %v65_v61, %v65_v61 }
  0x46   :  { %v179_v14 = vadd.f32 %v178_v10, %v51_v5  ;;  %v442_v16 = vadd.f32 %v441_v12, %v315_v7  ;;  %v67_v5 = vld [vmem:[%s971_s0 + $0x198] sm:$0xff]  ;;  %v331_v7 = vmul.f32 %v66_v1, %v66_v1 }
  0x48   :  { %v180_v18 = vadd.f32 %v179_v14, %v52_v9  ;;  %v443_v20 = vadd.f32 %v442_v16, %v316_v11  ;;  %v68_v9 = vld [vmem:[%s971_s0 + $0x1a0] sm:$0xff]  ;;  %v332_v11 = vmul.f32 %v67_v5, %v67_v5 }
  0x4a   :  { %v181_v22 = vadd.f32 %v180_v18, %v53_v13  ;;  %v444_v24 = vadd.f32 %v443_v20, %v317_v15  ;;  %v69_v13 = vld [vmem:[%s971_s0 + $0x1a8] sm:$0xff]  ;;  %v333_v15 = vmul.f32 %v68_v9, %v68_v9 }
  0x4c   :  { %v182_v26 = vadd.f32 %v181_v22, %v54_v17  ;;  %v445_v28 = vadd.f32 %v444_v24, %v318_v19  ;;  %v70_v17 = vld [vmem:[%s971_s0 + $0x1b0] sm:$0xff]  ;;  %v334_v19 = vmul.f32 %v69_v13, %v69_v13 }
  0x4e   :  { %v183_v30 = vadd.f32 %v182_v26, %v55_v21  ;;  %v446_v32 = vadd.f32 %v445_v28, %v319_v23  ;;  %v71_v21 = vld [vmem:[%s971_s0 + $0x1b8] sm:$0xff]  ;;  %v335_v23 = vmul.f32 %v70_v17, %v70_v17 }
  0x50   :  { %v184_v34 = vadd.f32 %v183_v30, %v56_v25  ;;  %v447_v36 = vadd.f32 %v446_v32, %v320_v27  ;;  %v72_v25 = vld [vmem:[%s971_s0 + $0x1c0] sm:$0xff]  ;;  %v336_v27 = vmul.f32 %v71_v21, %v71_v21 }
  0x52   :  { %v185_v38 = vadd.f32 %v184_v34, %v57_v29  ;;  %v448_v40 = vadd.f32 %v447_v36, %v321_v31  ;;  %v73_v29 = vld [vmem:[%s971_s0 + $0x1c8] sm:$0xff]  ;;  %v337_v31 = vmul.f32 %v72_v25, %v72_v25 }
  0x54   :  { %v186_v42 = vadd.f32 %v185_v38, %v58_v33  ;;  %v449_v44 = vadd.f32 %v448_v40, %v322_v35  ;;  %v74_v33 = vld [vmem:[%s971_s0 + $0x1d0] sm:$0xff]  ;;  %v338_v35 = vmul.f32 %v73_v29, %v73_v29 }
  0x56   :  { %v187_v46 = vadd.f32 %v186_v42, %v59_v37  ;;  %v450_v48 = vadd.f32 %v449_v44, %v323_v39  ;;  %v75_v37 = vld [vmem:[%s971_s0 + $0x1d8] sm:$0xff]  ;;  %v339_v39 = vmul.f32 %v74_v33, %v74_v33 }
  0x58   :  { %v188_v50 = vadd.f32 %v187_v46, %v60_v41  ;;  %v451_v52 = vadd.f32 %v450_v48, %v324_v43  ;;  %v76_v41 = vld [vmem:[%s971_s0 + $0x1e0] sm:$0xff]  ;;  %v340_v43 = vmul.f32 %v75_v37, %v75_v37 }
  0x5a   :  { %v189_v54 = vadd.f32 %v188_v50, %v61_v45  ;;  %v452_v56 = vadd.f32 %v451_v52, %v325_v47  ;;  %v77_v45 = vld [vmem:[%s971_s0 + $0x1e8] sm:$0xff]  ;;  %v341_v47 = vmul.f32 %v76_v41, %v76_v41 }
  0x5c   :  { %v190_v58 = vadd.f32 %v189_v54, %v62_v49  ;;  %v453_v60 = vadd.f32 %v452_v56, %v326_v51  ;;  %v78_v49 = vld [vmem:[%s971_s0 + $0x1f0] sm:$0xff]  ;;  %v342_v51 = vmul.f32 %v77_v45, %v77_v45 }
  0x5e   :  { %v191_v62 = vadd.f32 %v190_v58, %v63_v53  ;;  %v454_v0 = vadd.f32 %v453_v60, %v327_v55  ;;  %v79_v53 = vld [vmem:[%s971_s0 + $0x1f8] sm:$0xff]  ;;  %v343_v55 = vmul.f32 %v78_v49, %v78_v49 }
  0x60   :  { %v192_v2 = vadd.f32 %v191_v62, %v64_v57  ;;  %v455_v4 = vadd.f32 %v454_v0, %v328_v59  ;;  %v80_v57 = vld [vmem:[%s971_s0 + $0x200] sm:$0xff]  ;;  %v344_v59 = vmul.f32 %v79_v53, %v79_v53 }
  0x62   :  { %v193_v6 = vadd.f32 %v192_v2, %v65_v61  ;;  %v456_v8 = vadd.f32 %v455_v4, %v329_v63  ;;  %v81_v61 = vld [vmem:[%s971_s0 + $0x208] sm:$0xff]  ;;  %v345_v63 = vmul.f32 %v80_v57, %v80_v57 }
  0x64   :  { %v194_v10 = vadd.f32 %v193_v6, %v66_v1  ;;  %v457_v12 = vadd.f32 %v456_v8, %v330_v3  ;;  %v82_v1 = vld [vmem:[%s971_s0 + $0x210] sm:$0xff]  ;;  %v346_v3 = vmul.f32 %v81_v61, %v81_v61 }
  0x66   :  { %v195_v14 = vadd.f32 %v194_v10, %v67_v5  ;;  %v458_v16 = vadd.f32 %v457_v12, %v331_v7  ;;  %v83_v5 = vld [vmem:[%s971_s0 + $0x218] sm:$0xff]  ;;  %v347_v7 = vmul.f32 %v82_v1, %v82_v1 }
  0x68   :  { %v196_v18 = vadd.f32 %v195_v14, %v68_v9  ;;  %v459_v20 = vadd.f32 %v458_v16, %v332_v11  ;;  %v84_v9 = vld [vmem:[%s971_s0 + $0x220] sm:$0xff]  ;;  %v348_v11 = vmul.f32 %v83_v5, %v83_v5 }
  0x6a   :  { %v197_v22 = vadd.f32 %v196_v18, %v69_v13  ;;  %v460_v24 = vadd.f32 %v459_v20, %v333_v15  ;;  %v85_v13 = vld [vmem:[%s971_s0 + $0x228] sm:$0xff]  ;;  %v349_v15 = vmul.f32 %v84_v9, %v84_v9 }
  0x6c   :  { %v198_v26 = vadd.f32 %v197_v22, %v70_v17  ;;  %v461_v28 = vadd.f32 %v460_v24, %v334_v19  ;;  %v86_v17 = vld [vmem:[%s971_s0 + $0x230] sm:$0xff]  ;;  %v350_v19 = vmul.f32 %v85_v13, %v85_v13 }
  0x6e   :  { %v199_v30 = vadd.f32 %v198_v26, %v71_v21  ;;  %v462_v32 = vadd.f32 %v461_v28, %v335_v23  ;;  %v87_v21 = vld [vmem:[%s971_s0 + $0x238] sm:$0xff]  ;;  %v351_v23 = vmul.f32 %v86_v17, %v86_v17 }
  0x70   :  { %v200_v34 = vadd.f32 %v199_v30, %v72_v25  ;;  %v463_v36 = vadd.f32 %v462_v32, %v336_v27  ;;  %v88_v25 = vld [vmem:[%s971_s0 + $0x240] sm:$0xff]  ;;  %v352_v27 = vmul.f32 %v87_v21, %v87_v21 }
  0x72   :  { %v201_v38 = vadd.f32 %v200_v34, %v73_v29  ;;  %v464_v40 = vadd.f32 %v463_v36, %v337_v31  ;;  %v89_v29 = vld [vmem:[%s971_s0 + $0x248] sm:$0xff]  ;;  %v353_v31 = vmul.f32 %v88_v25, %v88_v25 }
  0x74   :  { %v202_v42 = vadd.f32 %v201_v38, %v74_v33  ;;  %v465_v44 = vadd.f32 %v464_v40, %v338_v35  ;;  %v90_v33 = vld [vmem:[%s971_s0 + $0x250] sm:$0xff]  ;;  %v354_v35 = vmul.f32 %v89_v29, %v89_v29 }
  0x76   :  { %v203_v46 = vadd.f32 %v202_v42, %v75_v37  ;;  %v466_v48 = vadd.f32 %v465_v44, %v339_v39  ;;  %v91_v37 = vld [vmem:[%s971_s0 + $0x258] sm:$0xff]  ;;  %v355_v39 = vmul.f32 %v90_v33, %v90_v33 }
  0x78   :  { %v204_v50 = vadd.f32 %v203_v46, %v76_v41  ;;  %v467_v52 = vadd.f32 %v466_v48, %v340_v43  ;;  %v92_v41 = vld [vmem:[%s971_s0 + $0x260] sm:$0xff]  ;;  %v356_v43 = vmul.f32 %v91_v37, %v91_v37 }
  0x7a   :  { %v205_v54 = vadd.f32 %v204_v50, %v77_v45  ;;  %v468_v56 = vadd.f32 %v467_v52, %v341_v47  ;;  %v93_v45 = vld [vmem:[%s971_s0 + $0x268] sm:$0xff]  ;;  %v357_v47 = vmul.f32 %v92_v41, %v92_v41 }
  0x7c   :  { %v206_v58 = vadd.f32 %v205_v54, %v78_v49  ;;  %v469_v60 = vadd.f32 %v468_v56, %v342_v51  ;;  %v94_v49 = vld [vmem:[%s971_s0 + $0x270] sm:$0xff]  ;;  %v358_v51 = vmul.f32 %v93_v45, %v93_v45 }
  0x7e   :  { %v207_v62 = vadd.f32 %v206_v58, %v79_v53  ;;  %v470_v0 = vadd.f32 %v469_v60, %v343_v55  ;;  %v95_v53 = vld [vmem:[%s971_s0 + $0x278] sm:$0xff]  ;;  %v359_v55 = vmul.f32 %v94_v49, %v94_v49 }
  0x80   :  { %v208_v2 = vadd.f32 %v207_v62, %v80_v57  ;;  %v471_v4 = vadd.f32 %v470_v0, %v344_v59  ;;  %v96_v57 = vld [vmem:[%s971_s0 + $0x280] sm:$0xff]  ;;  %v360_v59 = vmul.f32 %v95_v53, %v95_v53 }
  0x82   :  { %v209_v6 = vadd.f32 %v208_v2, %v81_v61  ;;  %v472_v8 = vadd.f32 %v471_v4, %v345_v63  ;;  %v97_v61 = vld [vmem:[%s971_s0 + $0x288] sm:$0xff]  ;;  %v361_v63 = vmul.f32 %v96_v57, %v96_v57 }
  0x84   :  { %v210_v10 = vadd.f32 %v209_v6, %v82_v1  ;;  %v473_v12 = vadd.f32 %v472_v8, %v346_v3  ;;  %v98_v1 = vld [vmem:[%s971_s0 + $0x290] sm:$0xff]  ;;  %v362_v3 = vmul.f32 %v97_v61, %v97_v61 }
  0x86   :  { %v211_v14 = vadd.f32 %v210_v10, %v83_v5  ;;  %v474_v16 = vadd.f32 %v473_v12, %v347_v7  ;;  %v99_v5 = vld [vmem:[%s971_s0 + $0x298] sm:$0xff]  ;;  %v363_v7 = vmul.f32 %v98_v1, %v98_v1 }
  0x88   :  { %v212_v18 = vadd.f32 %v211_v14, %v84_v9  ;;  %v475_v20 = vadd.f32 %v474_v16, %v348_v11  ;;  %v100_v9 = vld [vmem:[%s971_s0 + $0x2a0] sm:$0xff]  ;;  %v364_v11 = vmul.f32 %v99_v5, %v99_v5 }
  0x8a   :  { %v213_v22 = vadd.f32 %v212_v18, %v85_v13  ;;  %v476_v24 = vadd.f32 %v475_v20, %v349_v15  ;;  %v101_v13 = vld [vmem:[%s971_s0 + $0x2a8] sm:$0xff]  ;;  %v365_v15 = vmul.f32 %v100_v9, %v100_v9 }
  0x8c   :  { %v214_v26 = vadd.f32 %v213_v22, %v86_v17  ;;  %v477_v28 = vadd.f32 %v476_v24, %v350_v19  ;;  %v102_v17 = vld [vmem:[%s971_s0 + $0x2b0] sm:$0xff]  ;;  %v366_v19 = vmul.f32 %v101_v13, %v101_v13 }
  0x8e   :  { %v215_v30 = vadd.f32 %v214_v26, %v87_v21  ;;  %v478_v32 = vadd.f32 %v477_v28, %v351_v23  ;;  %v103_v21 = vld [vmem:[%s971_s0 + $0x2b8] sm:$0xff]  ;;  %v367_v23 = vmul.f32 %v102_v17, %v102_v17 }
  0x90   :  { %v216_v34 = vadd.f32 %v215_v30, %v88_v25  ;;  %v479_v36 = vadd.f32 %v478_v32, %v352_v27  ;;  %v104_v25 = vld [vmem:[%s971_s0 + $0x2c0] sm:$0xff]  ;;  %v368_v27 = vmul.f32 %v103_v21, %v103_v21 }
  0x92   :  { %v217_v38 = vadd.f32 %v216_v34, %v89_v29  ;;  %v480_v40 = vadd.f32 %v479_v36, %v353_v31  ;;  %v105_v29 = vld [vmem:[%s971_s0 + $0x2c8] sm:$0xff]  ;;  %v369_v31 = vmul.f32 %v104_v25, %v104_v25 }
  0x94   :  { %v218_v42 = vadd.f32 %v217_v38, %v90_v33  ;;  %v481_v44 = vadd.f32 %v480_v40, %v354_v35  ;;  %v106_v33 = vld [vmem:[%s971_s0 + $0x2d0] sm:$0xff]  ;;  %v370_v35 = vmul.f32 %v105_v29, %v105_v29 }
  0x96   :  { %v219_v46 = vadd.f32 %v218_v42, %v91_v37  ;;  %v482_v48 = vadd.f32 %v481_v44, %v355_v39  ;;  %v107_v37 = vld [vmem:[%s971_s0 + $0x2d8] sm:$0xff]  ;;  %v371_v39 = vmul.f32 %v106_v33, %v106_v33 }
  0x98   :  { %v220_v50 = vadd.f32 %v219_v46, %v92_v41  ;;  %v483_v52 = vadd.f32 %v482_v48, %v356_v43  ;;  %v108_v41 = vld [vmem:[%s971_s0 + $0x2e0] sm:$0xff]  ;;  %v372_v43 = vmul.f32 %v107_v37, %v107_v37 }
  0x9a   :  { %v221_v54 = vadd.f32 %v220_v50, %v93_v45  ;;  %v484_v56 = vadd.f32 %v483_v52, %v357_v47  ;;  %v109_v45 = vld [vmem:[%s971_s0 + $0x2e8] sm:$0xff]  ;;  %v373_v47 = vmul.f32 %v108_v41, %v108_v41 }
  0x9c   :  { %v222_v58 = vadd.f32 %v221_v54, %v94_v49  ;;  %v485_v60 = vadd.f32 %v484_v56, %v358_v51  ;;  %v110_v49 = vld [vmem:[%s971_s0 + $0x2f0] sm:$0xff]  ;;  %v374_v51 = vmul.f32 %v109_v45, %v109_v45 }
  0x9e   :  { %v223_v62 = vadd.f32 %v222_v58, %v95_v53  ;;  %v486_v0 = vadd.f32 %v485_v60, %v359_v55  ;;  %v111_v53 = vld [vmem:[%s971_s0 + $0x2f8] sm:$0xff]  ;;  %v375_v55 = vmul.f32 %v110_v49, %v110_v49 }
  0xa0   :  { %v224_v2 = vadd.f32 %v223_v62, %v96_v57  ;;  %v487_v4 = vadd.f32 %v486_v0, %v360_v59  ;;  %v112_v57 = vld [vmem:[%s971_s0 + $0x300] sm:$0xff]  ;;  %v376_v59 = vmul.f32 %v111_v53, %v111_v53 }
  0xa2   :  { %v225_v6 = vadd.f32 %v224_v2, %v97_v61  ;;  %v488_v8 = vadd.f32 %v487_v4, %v361_v63  ;;  %v113_v61 = vld [vmem:[%s971_s0 + $0x308] sm:$0xff]  ;;  %v377_v63 = vmul.f32 %v112_v57, %v112_v57 }
  0xa4   :  { %v226_v10 = vadd.f32 %v225_v6, %v98_v1  ;;  %v489_v12 = vadd.f32 %v488_v8, %v362_v3  ;;  %v114_v1 = vld [vmem:[%s971_s0 + $0x310] sm:$0xff]  ;;  %v378_v3 = vmul.f32 %v113_v61, %v113_v61 }
  0xa6   :  { %v227_v14 = vadd.f32 %v226_v10, %v99_v5  ;;  %v490_v16 = vadd.f32 %v489_v12, %v363_v7  ;;  %v115_v5 = vld [vmem:[%s971_s0 + $0x318] sm:$0xff]  ;;  %v379_v7 = vmul.f32 %v114_v1, %v114_v1 }
  0xa8   :  { %v228_v18 = vadd.f32 %v227_v14, %v100_v9  ;;  %v491_v20 = vadd.f32 %v490_v16, %v364_v11  ;;  %v116_v9 = vld [vmem:[%s971_s0 + $0x320] sm:$0xff]  ;;  %v380_v11 = vmul.f32 %v115_v5, %v115_v5 }
  0xaa   :  { %v229_v22 = vadd.f32 %v228_v18, %v101_v13  ;;  %v492_v24 = vadd.f32 %v491_v20, %v365_v15  ;;  %v117_v13 = vld [vmem:[%s971_s0 + $0x328] sm:$0xff]  ;;  %v381_v15 = vmul.f32 %v116_v9, %v116_v9 }
  0xac   :  { %v230_v26 = vadd.f32 %v229_v22, %v102_v17  ;;  %v493_v28 = vadd.f32 %v492_v24, %v366_v19  ;;  %v118_v17 = vld [vmem:[%s971_s0 + $0x330] sm:$0xff]  ;;  %v382_v19 = vmul.f32 %v117_v13, %v117_v13 }
  0xae   :  { %v231_v30 = vadd.f32 %v230_v26, %v103_v21  ;;  %v494_v32 = vadd.f32 %v493_v28, %v367_v23  ;;  %v119_v21 = vld [vmem:[%s971_s0 + $0x338] sm:$0xff]  ;;  %v383_v23 = vmul.f32 %v118_v17, %v118_v17 }
  0xb0   :  { %v232_v34 = vadd.f32 %v231_v30, %v104_v25  ;;  %v495_v36 = vadd.f32 %v494_v32, %v368_v27  ;;  %v120_v25 = vld [vmem:[%s971_s0 + $0x340] sm:$0xff]  ;;  %v384_v27 = vmul.f32 %v119_v21, %v119_v21 }
  0xb2   :  { %v233_v38 = vadd.f32 %v232_v34, %v105_v29  ;;  %v496_v40 = vadd.f32 %v495_v36, %v369_v31  ;;  %v121_v29 = vld [vmem:[%s971_s0 + $0x348] sm:$0xff]  ;;  %v385_v31 = vmul.f32 %v120_v25, %v120_v25 }
  0xb4   :  { %v234_v42 = vadd.f32 %v233_v38, %v106_v33  ;;  %v497_v44 = vadd.f32 %v496_v40, %v370_v35  ;;  %v122_v33 = vld [vmem:[%s971_s0 + $0x350] sm:$0xff]  ;;  %v386_v35 = vmul.f32 %v121_v29, %v121_v29 }
  0xb6   :  { %v235_v46 = vadd.f32 %v234_v42, %v107_v37  ;;  %v498_v48 = vadd.f32 %v497_v44, %v371_v39  ;;  %v123_v37 = vld [vmem:[%s971_s0 + $0x358] sm:$0xff]  ;;  %v387_v39 = vmul.f32 %v122_v33, %v122_v33 }
  0xb8   :  { %v236_v50 = vadd.f32 %v235_v46, %v108_v41  ;;  %v499_v52 = vadd.f32 %v498_v48, %v372_v43  ;;  %v124_v41 = vld [vmem:[%s971_s0 + $0x360] sm:$0xff]  ;;  %v388_v43 = vmul.f32 %v123_v37, %v123_v37 }
  0xba   :  { %v237_v54 = vadd.f32 %v236_v50, %v109_v45  ;;  %v500_v56 = vadd.f32 %v499_v52, %v373_v47  ;;  %v125_v45 = vld [vmem:[%s971_s0 + $0x368] sm:$0xff]  ;;  %v389_v47 = vmul.f32 %v124_v41, %v124_v41 }
  0xbc   :  { %v238_v58 = vadd.f32 %v237_v54, %v110_v49  ;;  %v501_v60 = vadd.f32 %v500_v56, %v374_v51  ;;  %v126_v49 = vld [vmem:[%s971_s0 + $0x370] sm:$0xff]  ;;  %v390_v51 = vmul.f32 %v125_v45, %v125_v45 }
  0xbe   :  { %v239_v62 = vadd.f32 %v238_v58, %v111_v53  ;;  %v502_v0 = vadd.f32 %v501_v60, %v375_v55  ;;  %v127_v53 = vld [vmem:[%s971_s0 + $0x378] sm:$0xff]  ;;  %v391_v55 = vmul.f32 %v126_v49, %v126_v49 }
  0xc0   :  { %v240_v2 = vadd.f32 %v239_v62, %v112_v57  ;;  %v503_v4 = vadd.f32 %v502_v0, %v376_v59  ;;  %v128_v57 = vld [vmem:[%s971_s0 + $0x380] sm:$0xff]  ;;  %v392_v59 = vmul.f32 %v127_v53, %v127_v53 }
  0xc2   :  { %v241_v6 = vadd.f32 %v240_v2, %v113_v61  ;;  %v504_v8 = vadd.f32 %v503_v4, %v377_v63  ;;  %v129_v61 = vld [vmem:[%s971_s0 + $0x388] sm:$0xff]  ;;  %v393_v63 = vmul.f32 %v128_v57, %v128_v57 }
  0xc4   :  { %v242_v10 = vadd.f32 %v241_v6, %v114_v1  ;;  %v505_v12 = vadd.f32 %v504_v8, %v378_v3  ;;  %v130_v1 = vld [vmem:[%s971_s0 + $0x390] sm:$0xff]  ;;  %v394_v3 = vmul.f32 %v129_v61, %v129_v61 }
  0xc6   :  { %v243_v14 = vadd.f32 %v242_v10, %v115_v5  ;;  %v506_v16 = vadd.f32 %v505_v12, %v379_v7  ;;  %v131_v5 = vld [vmem:[%s971_s0 + $0x398] sm:$0xff]  ;;  %v395_v7 = vmul.f32 %v130_v1, %v130_v1 }
  0xc8   :  { %v244_v18 = vadd.f32 %v243_v14, %v116_v9  ;;  %v507_v20 = vadd.f32 %v506_v16, %v380_v11  ;;  %v132_v9 = vld [vmem:[%s971_s0 + $0x3a0] sm:$0xff]  ;;  %v396_v11 = vmul.f32 %v131_v5, %v131_v5 }
  0xca   :  { %v245_v22 = vadd.f32 %v244_v18, %v117_v13  ;;  %v508_v24 = vadd.f32 %v507_v20, %v381_v15  ;;  %v133_v13 = vld [vmem:[%s971_s0 + $0x3a8] sm:$0xff]  ;;  %v397_v15 = vmul.f32 %v132_v9, %v132_v9 }
  0xcc   :  { %v246_v26 = vadd.f32 %v245_v22, %v118_v17  ;;  %v509_v28 = vadd.f32 %v508_v24, %v382_v19  ;;  %v134_v17 = vld [vmem:[%s971_s0 + $0x3b0] sm:$0xff]  ;;  %v398_v19 = vmul.f32 %v133_v13, %v133_v13 }
  0xce   :  { %v247_v30 = vadd.f32 %v246_v26, %v119_v21  ;;  %v510_v32 = vadd.f32 %v509_v28, %v383_v23  ;;  %v135_v21 = vld [vmem:[%s971_s0 + $0x3b8] sm:$0xff]  ;;  %v399_v23 = vmul.f32 %v134_v17, %v134_v17 }
  0xd0   :  { %v248_v34 = vadd.f32 %v247_v30, %v120_v25  ;;  %v511_v36 = vadd.f32 %v510_v32, %v384_v27  ;;  %v136_v25 = vld [vmem:[%s971_s0 + $0x3c0] sm:$0xff]  ;;  %v400_v27 = vmul.f32 %v135_v21, %v135_v21 }
  0xd2   :  { %v249_v38 = vadd.f32 %v248_v34, %v121_v29  ;;  %v512_v40 = vadd.f32 %v511_v36, %v385_v31  ;;  %v137_v29 = vld [vmem:[%s971_s0 + $0x3c8] sm:$0xff]  ;;  %v401_v31 = vmul.f32 %v136_v25, %v136_v25 }
  0xd4   :  { %v250_v42 = vadd.f32 %v249_v38, %v122_v33  ;;  %v513_v44 = vadd.f32 %v512_v40, %v386_v35  ;;  %v138_v33 = vld [vmem:[%s971_s0 + $0x3d0] sm:$0xff]  ;;  %v402_v35 = vmul.f32 %v137_v29, %v137_v29 }
  0xd6   :  { %v251_v46 = vadd.f32 %v250_v42, %v123_v37  ;;  %v514_v48 = vadd.f32 %v513_v44, %v387_v39  ;;  %v139_v37 = vld [vmem:[%s971_s0 + $0x3d8] sm:$0xff]  ;;  %v403_v39 = vmul.f32 %v138_v33, %v138_v33 }
  0xd8   :  { %v252_v50 = vadd.f32 %v251_v46, %v124_v41  ;;  %v515_v52 = vadd.f32 %v514_v48, %v388_v43  ;;  %v140_v41 = vld [vmem:[%s971_s0 + $0x3e0] sm:$0xff]  ;;  %v404_v43 = vmul.f32 %v139_v37, %v139_v37 }
  0xda   :  { %v253_v54 = vadd.f32 %v252_v50, %v125_v45  ;;  %v516_v56 = vadd.f32 %v515_v52, %v389_v47  ;;  %v141_v45 = vld [vmem:[%s971_s0 + $0x3e8] sm:$0xff]  ;;  %v405_v47 = vmul.f32 %v140_v41, %v140_v41 }
  0xdc   :  { %v254_v58 = vadd.f32 %v253_v54, %v126_v49  ;;  %v517_v60 = vadd.f32 %v516_v56, %v390_v51  ;;  %v142_v49 = vld [vmem:[%s971_s0 + $0x3f0] sm:$0xff]  ;;  %v406_v51 = vmul.f32 %v141_v45, %v141_v45 }
  0xde   :  { %v255_v62 = vadd.f32 %v254_v58, %v127_v53  ;;  %v518_v0 = vadd.f32 %v517_v60, %v391_v55  ;;  %v143_v53 = vld [vmem:[%s971_s0 + $0x3f8] sm:$0xff]  ;;  %v407_v55 = vmul.f32 %v142_v49, %v142_v49 }
  0xdf   :  { %v408_v58 = vmul.f32 %v143_v53, %v143_v53 }
  0xe0   :  { %v256_v2 = vadd.f32 %v255_v62, %v128_v57  ;;  %v519_v4 = vadd.f32 %v518_v0, %v392_v59 }
  0xe2   :  { %v257_v6 = vadd.f32 %v256_v2, %v129_v61  ;;  %v520_v8 = vadd.f32 %v519_v4, %v393_v63 }
  0xe4   :  { %v258_v10 = vadd.f32 %v257_v6, %v130_v1  ;;  %v521_v12 = vadd.f32 %v520_v8, %v394_v3 }
  0xe6   :  { %v259_v14 = vadd.f32 %v258_v10, %v131_v5  ;;  %v522_v16 = vadd.f32 %v521_v12, %v395_v7  ;;  %v144_v7 = vld [vmem:[%s972_s1] sm:$0x1] }
  0xe7   :  { %v280_v12 = vld [vmem:[%s973_s2] sm:$0x1] }
  0xe8   :  { %v260_v18 = vadd.f32 %v259_v14, %v132_v9  ;;  %v523_v20 = vadd.f32 %v522_v16, %v396_v11 }
  0xea   :  { %v261_v22 = vadd.f32 %v260_v18, %v133_v13  ;;  %v524_v24 = vadd.f32 %v523_v20, %v397_v15 }
  0xec   :  { %v262_v26 = vadd.f32 %v261_v22, %v134_v17  ;;  %v525_v28 = vadd.f32 %v524_v24, %v398_v19 }
  0xee   :  { %v263_v30 = vadd.f32 %v262_v26, %v135_v21  ;;  %v526_v32 = vadd.f32 %v525_v28, %v399_v23 }
  0xf0   :  { %v264_v34 = vadd.f32 %v263_v30, %v136_v25  ;;  %v527_v36 = vadd.f32 %v526_v32, %v400_v27 }
  0xf2   :  { %v265_v38 = vadd.f32 %v264_v34, %v137_v29  ;;  %v528_v40 = vadd.f32 %v527_v36, %v401_v31 }
  0xf4   :  { %v266_v42 = vadd.f32 %v265_v38, %v138_v33  ;;  %v529_v44 = vadd.f32 %v528_v40, %v402_v35 }
  0xf6   :  { %v267_v46 = vadd.f32 %v266_v42, %v139_v37  ;;  %v530_v48 = vadd.f32 %v529_v44, %v403_v39 }
  0xf8   :  { %v268_v50 = vadd.f32 %v267_v46, %v140_v41  ;;  %v531_v52 = vadd.f32 %v530_v48, %v404_v43 }
  0xfa   :  { %v269_v54 = vadd.f32 %v268_v50, %v141_v45  ;;  %v532_v56 = vadd.f32 %v531_v52, %v405_v47 }
  0xfc   :  { %v270_v57 = vadd.f32 %v269_v54, %v142_v49  ;;  %v533_v59 = vadd.f32 %v532_v56, %v406_v51 }
  0xfe   :  { %v271_v60 = vadd.f32 %v270_v57, %v143_v53  ;;  %v534_v61 = vadd.f32 %v533_v59, %v407_v55 }
 0x100   :  { %v272_v62 = vrot.slane %v271_v60, 4  ;;  %v535_v63 = vadd.f32 %v534_v61, %v408_v58 }
 0x102   :  { %v273_v0 = vadd.f32 %v272_v62, %v271_v60  ;;  %v536_v1 = vrot.slane %v535_v63, 4 }
 0x104   :  { %v274_v2 = vrot.slane %v273_v0, 2  ;;  %v537_v3 = vadd.f32 %v536_v1, %v535_v63 }
 0x106   :  { %v275_v4 = vadd.f32 %v274_v2, %v273_v0  ;;  %v538_v5 = vrot.slane %v537_v3, 2 }
 0x108   :  { %v276_v6 = vrot.slane %v275_v4, 1  ;;  %v539_v8 = vadd.f32 %v538_v5, %v537_v3 }
 0x10a   :  { %v277_v9 = vadd.f32 %v276_v6, %v275_v4  ;;  %v540_v10 = vrot.slane %v539_v8, 1 }
 0x10c   :  { %v278_v11 = vadd.f32 %v277_v9, %v144_v7  ;;  %v541_v13 = vadd.f32 %v540_v10, %v539_v8 }
 0x10e   :  { %279 = vst [vmem:[%s972_s1] sm:$0x1] %v278_v11  ;;  %v542_v14 = vadd.f32 %v541_v13, %v280_v12 }
 0x110   :  { %543 = vst [vmem:[%s973_s2] sm:$0x1] %v542_v14 }

// kernel: residual_block_forward.7
= control target key start
LH: loop header
LB: loop body
LE: loop exit
PB: predicated region body
PF: predicated region fallthrough
CT: control target
= control target key end

     0   :  { %s5141_s0 = inlined_call_operand.vmem [shape: bf16[1024,128], index: 0, kind: input, shape index: {}]   ;;  %s5142_s1 = inlined_call_operand.vmem [shape: bf16[1024,128], index: 1, kind: input, shape index: {}]   ;;  %s5143_s2 = inlined_call_operand.vmem [shape: f32[1,128], index: 2, kind: input, shape index: {}]   ;;  %s5144_s3 = inlined_call_operand.vmem [shape: f32[1,128], index: 3, kind: input, shape index: {}]   ;;  %s5145_s4 = inlined_call_operand.vmem [shape: bf16[128,128], index: 4, kind: input, shape index: {}]   ;;  %s5146_s5 = inlined_call_operand.vmem [shape: f32[1,128], index: 5, kind: input, shape index: {}]   ;;  %s5147_s6 = inlined_call_operand.vmem [shape: bf16[128,128], index: 6, kind: input, shape index: {}]   ;;  %s5148_s7 = inlined_call_operand.vmem [shape: f32[1,128], index: 7, kind: input, shape index: {}]   ;;  %s5149_s8 = inlined_call_operand.hbm [shape: f32[1024,128], index: 8, kind: output, shape index: {}]  }
   0x1   :  { %v3987_v0 = vld [vmem:[%s5145_s4] sm:$0xff]   ;;  %v3989_v2 = vld [vmem:[%s5145_s4 + $0x8] sm:$0xff]   ;;  %v3991_v4 = vld [vmem:[%s5145_s4 + $0x10] sm:$0xff]  }
   0x2   :  { %v3988_v1 = vld [vmem:[%s5147_s6] sm:$0xff]   ;;  %3312 = vmatprep.subr.bf16.mxu1 %v3987_v0  ;;  %v3990_v3 = vld [vmem:[%s5147_s6 + $0x8] sm:$0xff]   ;;  %v3992_v5 = vld [vmem:[%s5147_s6 + $0x10] sm:$0xff]  }
   0x3   :  { %3313 = vmatpush3.bf16.msra.mxu1 %v3987_v0  ;;  %3456 = vmatprep.subr.bf16.mxu0 %v3988_v1  ;;  %v3993_v6 = vld [vmem:[%s5145_s4 + $0x18] sm:$0xff]   ;;  %v3995_v8 = vld [vmem:[%s5145_s4 + $0x20] sm:$0xff]   ;;  %v3997_v10 = vld [vmem:[%s5145_s4 + $0x28] sm:$0xff]  }
   0x4   :  { %3457 = vmatpush3.bf16.msra.mxu0 %v3988_v1  ;;  %3314 = vmatprep.subr.bf16.mxu1 %v3989_v2  ;;  %v3994_v7 = vld [vmem:[%s5147_s6 + $0x18] sm:$0xff]   ;;  %v3996_v9 = vld [vmem:[%s5147_s6 + $0x20] sm:$0xff]   ;;  %v3998_v11 = vld [vmem:[%s5147_s6 + $0x28] sm:$0xff]  }
   0x5   :  { %3458 = vmatprep.subr.bf16.mxu0 %v3990_v3  ;;  %v2850_v12 = vld [vmem:[%s5141_s0] sm:$0xff]   ;;  %v3105_v17 = vld [vmem:[%s5141_s0 + $0x8] sm:$0xff]   ;;  %v3106_v23 = vld [vmem:[%s5141_s0 + $0x10] sm:$0xff]  }
   0x6   :  { %v4186_v13 = vld [vmem:[%s5143_s2] ss:$0 sm:$0xff]  ;;  %v2851_v15 = vunpack.c.l.bf16 %v2850_v12  ;;  %v2852_v16 = vunpack.c.h.bf16 %v2850_v12  ;;  %v2855_v18 = vunpack.c.l.bf16 %v3105_v17  ;;  %v2856_v19 = vunpack.c.h.bf16 %v3105_v17  ;;  %v3107_v24 = vld [vmem:[%s5141_s0 + $0x18] sm:$0xff]   ;;  %v3999_v25 = vld [vmem:[%s5145_s4 + $0x30] sm:$0xff]  }
   0x7   :  { %3315 = vmatpush3.bf16.msra.mxu1 %v3989_v2  ;;  %v4191_v14 = vld [vmem:[%s5144_s3] ss:$0 sm:$0xff]  ;;  %v2859_v28 = vunpack.c.l.bf16 %v3106_v23  ;;  %v2860_v29 = vunpack.c.h.bf16 %v3106_v23  ;;  %v4000_v30 = vld [vmem:[%s5147_s6 + $0x30] sm:$0xff]   ;;  %v2863_v33 = vunpack.c.l.bf16 %v3107_v24  ;;  %v2864_v34 = vunpack.c.h.bf16 %v3107_v24  ;;  %v4001_v42 = vld [vmem:[%s5145_s4 + $0x38] sm:$0xff]  }
   0x8   :  { %3459 = vmatpush3.bf16.msra.mxu0 %v3990_v3  ;;  %3316 = vmatprep.subr.bf16.mxu1 %v3991_v4  ;;  %v4003_v20 = vld [vmem:[%s5142_s1] sm:$0xff]   ;;  %v294_v21 = vmul.f32 %v2851_v15, %v4186_v13  ;;  %v295_v22 = vmul.f32 %v2852_v16, %v4186_v13  ;;  %v296_v26 = vmul.f32 %v2855_v18, %v4186_v13  ;;  %v4002_v45 = vld [vmem:[%s5147_s6 + $0x38] sm:$0xff]   ;;  %v3109_v53 = vld [vmem:[%s5141_s0 + $0x28] sm:$0xff]  }
   0x9   :  { %3460 = vmatprep.subr.bf16.mxu0 %v3992_v5  ;;  %v297_v27 = vmul.f32 %v2856_v19, %v4186_v13  ;;  %3472 = vmatprep.mubr.bf16.mxu0 %v4003_v20  ;;  %v298_v37 = vmul.f32 %v2859_v28, %v4186_v13  ;;  %v299_v38 = vmul.f32 %v2860_v29, %v4186_v13  ;;  %v3108_v39 = vld [vmem:[%s5141_s0 + $0x20] sm:$0xff]   ;;  %v3110_v54 = vld [vmem:[%s5141_s0 + $0x30] sm:$0xff]   ;;  %v2871_v61 = vunpack.c.l.bf16 %v3109_v53  ;;  %v4004_v2 = vld [vmem:[%s5142_s1 + $0x8] sm:$0xff]  }
   0xa   :  { %v429_v31 = vadd.f32 %v4191_v14, %v294_v21  ;;  %v430_v32 = vadd.f32 %v4191_v14, %v295_v22  ;;  %v431_v35 = vadd.f32 %v4191_v14, %v296_v26  ;;  %v300_v47 = vmul.f32 %v2863_v33, %v4186_v13  ;;  %v3111_v15 = vld [vmem:[%s5141_s0 + $0x38] sm:$0xff]   ;;  %v3112_v18 = vld [vmem:[%s5141_s0 + $0x40] sm:$0xff]  }
   0xb   :  { %3317 = vmatpush3.bf16.msra.mxu1 %v3991_v4  ;;  %v432_v36 = vadd.f32 %v4191_v14, %v297_v27  ;;  %v433_v43 = vadd.f32 %v4191_v14, %v298_v37  ;;  %v434_v44 = vadd.f32 %v4191_v14, %v299_v38  ;;  %v301_v48 = vmul.f32 %v2864_v34, %v4186_v13  ;;  %v4006_v26 = vld [vmem:[%s5142_s1 + $0x18] sm:$0xff]   ;;  %v3113_v37 = vld [vmem:[%s5141_s0 + $0x48] sm:$0xff]  }
   0xc   :  { %3461 = vmatpush3.bf16.msra.mxu0 %v3992_v5  ;;  %3318 = vmatprep.subr.bf16.mxu1 %v3993_v6  ;;  %v557_v40 = vmax.f32 %v429_v31, 0.0  ;;  %v558_v41 = vmax.f32 %v430_v32, 0.0  ;;  %v2867_v49 = vunpack.c.l.bf16 %v3108_v39  ;;  %v559_v50 = vmax.f32 %v431_v35, 0.0 }
   0xd   :  { %3462 = vmatprep.subr.bf16.mxu0 %v3994_v7  ;;  %v560_v51 = vmax.f32 %v432_v36, 0.0  ;;  %v2868_v52 = vunpack.c.h.bf16 %v3108_v39  ;;  %v561_v55 = vmax.f32 %v433_v43, 0.0  ;;  %v562_v56 = vmax.f32 %v434_v44, 0.0 }
   0xe   :  { %v685_v46 = vpack.c.bf16 %v558_v41, %v557_v40  ;;  %v302_v57 = vmul.f32 %v2867_v49, %v4186_v13  ;;  %v435_v59 = vadd.f32 %v4191_v14, %v300_v47  ;;  %v436_v60 = vadd.f32 %v4191_v14, %v301_v48  ;;  %v3114_v40 = vld [vmem:[%s5141_s0 + $0x50] sm:$0xff]   ;;  %v4008_v47 = vld [vmem:[%s5142_s1 + $0x28] sm:$0xff]  }
   0xf   :  { %3319 = vmatpush3.bf16.msra.mxu1 %v3993_v6  ;;  %v303_v58 = vmul.f32 %v2868_v52, %v4186_v13  ;;  %v686_v62 = vpack.c.bf16 %v560_v51, %v559_v50  ;;  %v2872_v63 = vunpack.c.h.bf16 %v3109_v53  ;;  %v2875_v0 = vunpack.c.l.bf16 %v3110_v54  ;;  %v4005_v6 = vld [vmem:[%s5142_s1 + $0x10] sm:$0xff]  }
  0x10   :  { %3463 = vmatpush3.bf16.msra.mxu0 %v3994_v7  ;;  %3320 = vmatprep.subr.bf16.mxu1 %v3995_v8  ;;  %v2876_v1 = vunpack.c.h.bf16 %v3110_v54  ;;  %v687_v3 = vpack.c.bf16 %v562_v56, %v561_v55  ;;  %v437_v4 = vadd.f32 %v4191_v14, %v302_v57  ;;  %v563_v7 = vmax.f32 %v435_v59, 0.0  ;;  %v4009_v52 = vld [vmem:[%s5142_s1 + $0x30] sm:$0xff]   ;;  %v3115_v55 = vld [vmem:[%s5141_s0 + $0x58] sm:$0xff]   ;;  %v3116_v56 = vld [vmem:[%s5141_s0 + $0x60] sm:$0xff]  }
  0x11   :  { %3464 = vmatprep.subr.bf16.mxu0 %v3996_v9  ;;  %3328 = vmatprep.mubr.bf16.mxu1 %v685_v46  ;;  %v438_v5 = vadd.f32 %v4191_v14, %v303_v58  ;;  %v2879_v21 = vunpack.c.l.bf16 %v3111_v15  ;;  %v2883_v28 = vunpack.c.l.bf16 %v3112_v18  ;;  %v2884_v29 = vunpack.c.h.bf16 %v3112_v18 }
  0x12   :  { %v307_v12 = vmul.f32 %v2876_v1, %v4186_v13  ;;  %v565_v16 = vmax.f32 %v437_v4, 0.0  ;;  %v2887_v41 = vunpack.c.l.bf16 %v3113_v37  ;;  %v2891_v50 = vunpack.c.l.bf16 %v3114_v40 }
  0x13   :  { %3321 = vmatpush3.bf16.msra.mxu1 %v3995_v8  ;;  %v564_v8 = vmax.f32 %v436_v60, 0.0  ;;  %v566_v17 = vmax.f32 %v438_v5, 0.0  ;;  %v308_v32 = vmul.f32 %v2879_v21, %v4186_v13  ;;  %v310_v38 = vmul.f32 %v2883_v28, %v4186_v13  ;;  %v4010_v5 = vld [vmem:[%s5142_s1 + $0x38] sm:$0xff]   ;;  %v3117_v21 = vld [vmem:[%s5141_s0 + $0x68] sm:$0xff]  }
  0x14   :  { %3465 = vmatpush3.bf16.msra.mxu0 %v3996_v9  ;;  %3322 = vmatprep.subr.bf16.mxu1 %v3997_v10  ;;  %v304_v9 = vmul.f32 %v2871_v61, %v4186_v13  ;;  %v442_v24 = vadd.f32 %v4191_v14, %v307_v12  ;;  %v311_v39 = vmul.f32 %v2884_v29, %v4186_v13  ;;  %v2892_v51 = vunpack.c.h.bf16 %v3114_v40  ;;  %v4012_v29 = vld [vmem:[%s5142_s1 + $0x48] sm:$0xff]   ;;  %v3119_v40 = vld [vmem:[%s5141_s0 + $0x78] sm:$0xff]  }
  0x15   :  { %3466 = vmatprep.subr.bf16.mxu0 %v3998_v11  ;;  %v688_v19 = vpack.c.bf16 %v564_v8, %v563_v7  ;;  %v689_v27 = vpack.c.bf16 %v566_v17, %v565_v16  ;;  %v445_v48 = vadd.f32 %v4191_v14, %v310_v38  ;;  %v312_v53 = vmul.f32 %v2887_v41, %v4186_v13 }
  0x16   :  { %v439_v20 = vadd.f32 %v4191_v14, %v304_v9  ;;  %v570_v35 = vmax.f32 %v442_v24, 0.0  ;;  %v446_v49 = vadd.f32 %v4191_v14, %v311_v39  ;;  %v314_v61 = vmul.f32 %v2891_v50, %v4186_v13 }
  0x17   :  { %3323 = vmatpush3.bf16.msra.mxu1 %v3997_v10  ;;  %v305_v10 = vmul.f32 %v2872_v63, %v4186_v13  ;;  %v573_v59 = vmax.f32 %v445_v48, 0.0  ;;  %v447_v63 = vadd.f32 %v4191_v14, %v312_v53  ;;  %v2895_v1 = vunpack.c.l.bf16 %v3115_v55 }
  0x18   :  { %3467 = vmatpush3.bf16.msra.mxu0 %v3998_v11  ;;  %3324 = vmatprep.subr.bf16.mxu1 %v3999_v25  ;;  %v306_v11 = vmul.f32 %v2875_v0, %v4186_v13  ;;  %v567_v31 = vmax.f32 %v439_v20, 0.0  ;;  %v574_v60 = vmax.f32 %v446_v49, 0.0  ;;  %v2899_v4 = vunpack.c.l.bf16 %v3116_v56 }
  0x19   :  { %3468 = vmatprep.subr.bf16.mxu0 %v4000_v30  ;;  %v440_v22 = vadd.f32 %v4191_v14, %v305_v10  ;;  %v449_v7 = vadd.f32 %v4191_v14, %v314_v61  ;;  %v2900_v9 = vunpack.c.h.bf16 %v3116_v56  ;;  %v4011_v10 = vld [vmem:[%s5142_s1 + $0x40] sm:$0xff]   ;;  %v3121_v61 = vld [vmem:[%s5141_s0 + $0x88] sm:$0xff]  }
  0x1a   :  { %v441_v23 = vadd.f32 %v4191_v14, %v306_v11  ;;  %v575_v11 = vmax.f32 %v447_v63, 0.0  ;;  %v4015_v56 = vld [vmem:[%s5142_s1 + $0x60] sm:$0xff]  }
  0x1b   :  { %3325 = vmatpush3.bf16.msra.mxu1 %v3999_v25  ;;  %v2880_v25 = vunpack.c.h.bf16 %v3111_v15  ;;  %v568_v33 = vmax.f32 %v440_v22, 0.0  ;;  %v316_v15 = vmul.f32 %v2895_v1, %v4186_v13  ;;  %v577_v17 = vmax.f32 %v449_v7, 0.0  ;;  %v3118_v22 = vld [vmem:[%s5141_s0 + $0x70] sm:$0xff]  }
  0x1c   :  { %3469 = vmatpush3.bf16.msra.mxu0 %v4000_v30  ;;  %3326 = vmatprep.subr.bf16.mxu1 %v4001_v42  ;;  %v4007_v30 = vld [vmem:[%s5142_s1 + $0x20] sm:$0xff]   ;;  %v569_v34 = vmax.f32 %v441_v23, 0.0  ;;  %v319_v20 = vmul.f32 %v2900_v9, %v4186_v13  ;;  %v2907_v28 = vunpack.c.l.bf16 %v3118_v22 }
  0x1d   :  { %3470 = vmatprep.subr.bf16.mxu0 %v4002_v45  ;;  %v309_v36 = vmul.f32 %v2880_v25, %v4186_v13  ;;  %v690_v43 = vpack.c.bf16 %v568_v33, %v567_v31  ;;  %v451_v24 = vadd.f32 %v4191_v14, %v316_v15  ;;  %v2908_v33 = vunpack.c.h.bf16 %v3118_v22 }
  0x1e   :  { %v691_v44 = vpack.c.bf16 %v570_v35, %v569_v34  ;;  %v4013_v34 = vld [vmem:[%s5142_s1 + $0x50] sm:$0xff]   ;;  %v322_v39 = vmul.f32 %v2907_v28, %v4186_v13 }
  0x1f   :  { %3327 = vmatpush3.bf16.msra.mxu1 %v4001_v42  ;;  %v2888_v42 = vunpack.c.h.bf16 %v3113_v37  ;;  %v444_v46 = vadd.f32 %v4191_v14, %v309_v36  ;;  %v579_v35 = vmax.f32 %v451_v24, 0.0 }
  0x20   :  { %3471 = vmatpush3.bf16.msra.mxu0 %v4002_v45  ;;  %v443_v45 = vadd.f32 %v4191_v14, %v308_v32  ;;  %v454_v32 = vadd.f32 %v4191_v14, %v319_v20  ;;  %v457_v50 = vadd.f32 %v4191_v14, %v322_v39 }
  0x21   :  { %v313_v54 = vmul.f32 %v2888_v42, %v4186_v13  ;;  %v572_v58 = vmax.f32 %v444_v46, 0.0  ;;  %v2912_v46 = vunpack.c.h.bf16 %v3119_v40 }
  0x22   :  { %3329 = vmatmul.mubr.bf16.vlgmr.msra.gmra.mrb[0].mxu1 %v686_v62  ;;  %v571_v57 = vmax.f32 %v443_v45, 0.0  ;;  %v315_v62 = vmul.f32 %v2892_v51, %v4186_v13  ;;  %v582_v42 = vmax.f32 %v454_v32, 0.0  ;;  %v2911_v45 = vunpack.c.l.bf16 %v3119_v40  ;;  %v4014_v51 = vld [vmem:[%s5142_s1 + $0x58] sm:$0xff]  }
  0x23   :  { %3473 = vmatmul.mubr.bf16.vlgmr.msra.gmra.mrb[0].mxu0 %v4004_v2  ;;  %3332 = vmatprep.mubr.bf16.mxu1 %v687_v3  ;;  %v448_v0 = vadd.f32 %v4191_v14, %v313_v54  ;;  %v2896_v3 = vunpack.c.h.bf16 %v3115_v55  ;;  %v585_v63 = vmax.f32 %v457_v50, 0.0 }
  0x24   :  { %3476 = vmatprep.mubr.bf16.mxu0 %v4005_v6  ;;  %v692_v2 = vpack.c.bf16 %v572_v58, %v571_v57  ;;  %v693_v6 = vpack.c.bf16 %v574_v60, %v573_v59  ;;  %v450_v8 = vadd.f32 %v4191_v14, %v315_v62  ;;  %v324_v57 = vmul.f32 %v2911_v45, %v4186_v13  ;;  %v3122_v62 = vld [vmem:[%s5141_s0 + $0x90] sm:$0xff]  }
  0x25   :  { %v576_v12 = vmax.f32 %v448_v0, 0.0  ;;  %v317_v16 = vmul.f32 %v2896_v3, %v4186_v13  ;;  %v325_v58 = vmul.f32 %v2912_v46, %v4186_v13  ;;  %v2924_v9 = vunpack.c.h.bf16 %v3122_v62 }
  0x26   :  { %v578_v18 = vmax.f32 %v450_v8, 0.0  ;;  %v459_v3 = vadd.f32 %v4191_v14, %v324_v57  ;;  %v2923_v8 = vunpack.c.l.bf16 %v3122_v62 }
  0x27   :  { %v694_v23 = vpack.c.bf16 %v576_v12, %v575_v11  ;;  %v452_v25 = vadd.f32 %v4191_v14, %v317_v16  ;;  %v4017_v16 = vld [vmem:[%s5142_s1 + $0x70] sm:$0xff]  }
  0x28   :  { %v330_v22 = vmul.f32 %v2923_v8, %v4186_v13 }
  0x29   :  { %v580_v36 = vmax.f32 %v452_v25, 0.0 }
  0x2a   :  { %3333 = vmatmul.mubr.bf16.gmra.mrb[4].mxu1 %v688_v19  ;;  %v318_v19 = vmul.f32 %v2899_v4, %v4186_v13  ;;  %v460_v4 = vadd.f32 %v4191_v14, %v325_v58  ;;  %v465_v32 = vadd.f32 %v4191_v14, %v330_v22 }
  0x2b   :  { %3477 = vmatmul.mubr.bf16.gmra.mrb[4].mxu0 %v4006_v26  ;;  %3336 = vmatprep.mubr.bf16.mxu1 %v689_v27  ;;  %v2903_v26 = vunpack.c.l.bf16 %v3117_v21  ;;  %v2904_v27 = vunpack.c.h.bf16 %v3117_v21 }
  0x2c   :  { %3480 = vmatprep.mubr.bf16.mxu0 %v4007_v30  ;;  %v695_v30 = vpack.c.bf16 %v578_v18, %v577_v17  ;;  %v453_v31 = vadd.f32 %v4191_v14, %v318_v19  ;;  %v3123_v17 = vld [vmem:[%s5141_s0 + $0x98] sm:$0xff]   ;;  %v587_v18 = vmax.f32 %v459_v3, 0.0  ;;  %v588_v19 = vmax.f32 %v460_v4, 0.0 }
  0x2d   :  { %v320_v37 = vmul.f32 %v2903_v26, %v4186_v13  ;;  %v321_v38 = vmul.f32 %v2904_v27, %v4186_v13  ;;  %v3124_v26 = vld [vmem:[%s5141_s0 + $0xa0] sm:$0xff]   ;;  %v593_v45 = vmax.f32 %v465_v32, 0.0 }
  0x2e   :  { %v581_v41 = vmax.f32 %v453_v31, 0.0  ;;  %v700_v31 = vpack.c.bf16 %v588_v19, %v587_v18 }
  0x2f   :  { %v455_v48 = vadd.f32 %v4191_v14, %v320_v37  ;;  %v456_v49 = vadd.f32 %v4191_v14, %v321_v38  ;;  %v2932_v37 = vunpack.c.h.bf16 %v3124_v26  ;;  %v4019_v38 = vld [vmem:[%s5142_s1 + $0x80] sm:$0xff]  }
  0x31   :  { %v583_v59 = vmax.f32 %v455_v48, 0.0  ;;  %v584_v60 = vmax.f32 %v456_v49, 0.0  ;;  %v335_v48 = vmul.f32 %v2932_v37, %v4186_v13 }
  0x32   :  { %3337 = vmatmul.mubr.bf16.gmra.mrb[8].mxu1 %v690_v43  ;;  %v323_v43 = vmul.f32 %v2908_v33, %v4186_v13 }
  0x33   :  { %3481 = vmatmul.mubr.bf16.gmra.mrb[8].mxu0 %v4008_v47  ;;  %3340 = vmatprep.mubr.bf16.mxu1 %v691_v44  ;;  %v3120_v44 = vld [vmem:[%s5141_s0 + $0x80] sm:$0xff]   ;;  %v696_v47 = vpack.c.bf16 %v580_v36, %v579_v35  ;;  %v698_v7 = vpack.c.bf16 %v584_v60, %v583_v59  ;;  %v2931_v36 = vunpack.c.l.bf16 %v3124_v26  ;;  %v470_v58 = vadd.f32 %v4191_v14, %v335_v48  ;;  %v4021_v60 = vld [vmem:[%s5142_s1 + $0x90] sm:$0xff]  }
  0x34   :  { %3484 = vmatprep.mubr.bf16.mxu0 %v4009_v52  ;;  %v697_v52 = vpack.c.bf16 %v582_v42, %v581_v41  ;;  %v458_v53 = vadd.f32 %v4191_v14, %v323_v43  ;;  %v2915_v54 = vunpack.c.l.bf16 %v3120_v44  ;;  %v2916_v55 = vunpack.c.h.bf16 %v3120_v44  ;;  %v3125_v43 = vld [vmem:[%s5141_s0 + $0xa8] sm:$0xff]   ;;  %v3126_v44 = vld [vmem:[%s5141_s0 + $0xb0] sm:$0xff]  }
  0x35   :  { %v2940_v59 = vunpack.c.h.bf16 %v3126_v44 }
  0x36   :  { %v586_v0 = vmax.f32 %v458_v53, 0.0  ;;  %v326_v1 = vmul.f32 %v2915_v54, %v4186_v13  ;;  %v2936_v53 = vunpack.c.h.bf16 %v3125_v43  ;;  %v2939_v54 = vunpack.c.l.bf16 %v3126_v44 }
  0x38   :  { %v699_v11 = vpack.c.bf16 %v586_v0, %v585_v63  ;;  %v461_v12 = vadd.f32 %v4191_v14, %v326_v1  ;;  %v337_v0 = vmul.f32 %v2936_v53, %v4186_v13  ;;  %v338_v1 = vmul.f32 %v2939_v54, %v4186_v13 }
  0x3a   :  { %3341 = vmatmul.mubr.bf16.gmra.mrb[12].mxu1 %v692_v2  ;;  %v327_v2 = vmul.f32 %v2916_v55, %v4186_v13  ;;  %v589_v24 = vmax.f32 %v461_v12, 0.0  ;;  %v4020_v55 = vld [vmem:[%s5142_s1 + $0x88] sm:$0xff]  }
  0x3b   :  { %3485 = vmatmul.mubr.bf16.gmra.mrb[12].mxu0 %v4010_v5  ;;  %3344 = vmatprep.mubr.bf16.mxu1 %v693_v6  ;;  %v2919_v5 = vunpack.c.l.bf16 %v3121_v61  ;;  %v2920_v6 = vunpack.c.h.bf16 %v3121_v61 }
  0x3c   :  { %3488 = vmatprep.mubr.bf16.mxu0 %v4011_v10  ;;  %v4016_v10 = vld [vmem:[%s5142_s1 + $0x68] sm:$0xff]   ;;  %v462_v15 = vadd.f32 %v4191_v14, %v327_v2  ;;  %v3127_v2 = vld [vmem:[%s5141_s0 + $0xb8] sm:$0xff]  }
  0x3d   :  { %v328_v20 = vmul.f32 %v2919_v5, %v4186_v13  ;;  %v329_v21 = vmul.f32 %v2920_v6, %v4186_v13 }
  0x3e   :  { %v590_v25 = vmax.f32 %v462_v15, 0.0 }
  0x3f   :  { %v463_v27 = vadd.f32 %v4191_v14, %v328_v20  ;;  %v464_v28 = vadd.f32 %v4191_v14, %v329_v21 }
  0x40   :  { %v701_v35 = vpack.c.bf16 %v590_v25, %v589_v24 }
  0x41   :  { %v591_v39 = vmax.f32 %v463_v27, 0.0  ;;  %v592_v40 = vmax.f32 %v464_v28, 0.0 }
  0x42   :  { %3345 = vmatmul.mubr.bf16.gmra.mrb[16].mxu1 %v694_v23  ;;  %v331_v23 = vmul.f32 %v2924_v9, %v4186_v13 }
  0x43   :  { %3489 = vmatmul.mubr.bf16.gmra.mrb[16].mxu0 %v4012_v29  ;;  %3348 = vmatprep.mubr.bf16.mxu1 %v695_v30  ;;  %v2927_v29 = vunpack.c.l.bf16 %v3123_v17  ;;  %v2928_v30 = vunpack.c.h.bf16 %v3123_v17 }
  0x44   :  { %3492 = vmatprep.mubr.bf16.mxu0 %v4013_v34  ;;  %v466_v33 = vadd.f32 %v4191_v14, %v331_v23  ;;  %v4018_v34 = vld [vmem:[%s5142_s1 + $0x78] sm:$0xff]  }
  0x45   :  { %v332_v41 = vmul.f32 %v2927_v29, %v4186_v13  ;;  %v333_v42 = vmul.f32 %v2928_v30, %v4186_v13 }
  0x46   :  { %v594_v46 = vmax.f32 %v466_v33, 0.0 }
  0x47   :  { %v467_v49 = vadd.f32 %v4191_v14, %v332_v41  ;;  %v468_v50 = vadd.f32 %v4191_v14, %v333_v42 }
  0x49   :  { %v595_v61 = vmax.f32 %v467_v49, 0.0  ;;  %v596_v62 = vmax.f32 %v468_v50, 0.0 }
  0x4a   :  { %3349 = vmatmul.mubr.bf16.gmra.mrb[20].mxu1 %v696_v47  ;;  %v334_v47 = vmul.f32 %v2931_v36, %v4186_v13 }
  0x4b   :  { %3493 = vmatmul.mubr.bf16.gmra.mrb[20].mxu0 %v4014_v51  ;;  %3352 = vmatprep.mubr.bf16.mxu1 %v697_v52  ;;  %v702_v51 = vpack.c.bf16 %v592_v40, %v591_v39  ;;  %v2935_v52 = vunpack.c.l.bf16 %v3125_v43 }
  0x4c   :  { %3496 = vmatprep.mubr.bf16.mxu0 %v4015_v56  ;;  %v703_v56 = vpack.c.bf16 %v594_v46, %v593_v45  ;;  %v469_v57 = vadd.f32 %v4191_v14, %v334_v47 }
  0x4d   :  { %v336_v63 = vmul.f32 %v2935_v52, %v4186_v13 }
  0x52   :  { %3353 = vmatmul.mubr.bf16.gmra.mrb[24].mxu1 %v698_v7 }
  0x53   :  { %3497 = vmatmul.mubr.bf16.gmra.mrb[24].mxu0 %v4016_v10  ;;  %3356 = vmatprep.mubr.bf16.mxu1 %v699_v11 }
  0x54   :  { %3500 = vmatprep.mubr.bf16.mxu0 %v4017_v16 }
  0x5a   :  { %3357 = vmatmul.mubr.bf16.gmra.mrb[28].mxu1 %v700_v31 }
  0x5b   :  { %3501 = vmatmul.mubr.bf16.gmra.mrb[28].mxu0 %v4018_v34  ;;  %3360 = vmatprep.mubr.bf16.mxu1 %v701_v35 }
  0x5c   :  { %3504 = vmatprep.mubr.bf16.mxu0 %v4019_v38 }
  0x62   :  { %3361 = vmatmul.mubr.bf16.gmra.mrb[32].mxu1 %v702_v51 }
  0x63   :  { %13 = vsyncpa [#allocation3], 0  ;;  %3505 = vmatmul.mubr.bf16.gmra.mrb[32].mxu0 %v4020_v55  ;;  %3364 = vmatprep.mubr.bf16.mxu1 %v703_v56  ;;  %v597_v3 = vmax.f32 %v469_v57, 0.0  ;;  %v598_v4 = vmax.f32 %v470_v58, 0.0  ;;  %v339_v5 = vmul.f32 %v2940_v59, %v4186_v13  ;;  %v3128_v6 = vld [vmem:[%s5141_s0 + $0xc0] sm:$0xff]   ;;  %v704_v7 = vpack.c.bf16 %v596_v62, %v595_v61  ;;  %v4022_v15 = vld [vmem:[%s5142_s1 + $0x98] sm:$0xff]  }
  0x64   :  { %3508 = vmatprep.mubr.bf16.mxu0 %v4021_v60  ;;  %v2943_v8 = vunpack.c.l.bf16 %v3127_v2  ;;  %v471_v9 = vadd.f32 %v4191_v14, %v336_v63  ;;  %v472_v10 = vadd.f32 %v4191_v14, %v337_v0  ;;  %v473_v11 = vadd.f32 %v4191_v14, %v338_v1  ;;  %v4023_v20 = vld [vmem:[%s5142_s1 + $0xa0] sm:$0xff]   ;;  %v3129_v25 = vld [vmem:[%s5141_s0 + $0xc8] sm:$0xff]   ;;  %v3130_v30 = vld [vmem:[%s5141_s0 + $0xd0] sm:$0xff]  }
  0x65   :  { %v2944_v12 = vunpack.c.h.bf16 %v3127_v2  ;;  %v705_v16 = vpack.c.bf16 %v598_v4, %v597_v3  ;;  %v474_v17 = vadd.f32 %v4191_v14, %v339_v5  ;;  %v2947_v18 = vunpack.c.l.bf16 %v3128_v6  ;;  %v4024_v37 = vld [vmem:[%s5142_s1 + $0xa8] sm:$0xff]   ;;  %v4025_v42 = vld [vmem:[%s5142_s1 + $0xb0] sm:$0xff]   ;;  %v3131_v48 = vld [vmem:[%s5141_s0 + $0xd8] sm:$0xff]  }
  0x66   :  { %v2948_v19 = vunpack.c.h.bf16 %v3128_v6  ;;  %v340_v21 = vmul.f32 %v2943_v8, %v4186_v13  ;;  %v599_v22 = vmax.f32 %v471_v9, 0.0  ;;  %v600_v23 = vmax.f32 %v472_v10, 0.0  ;;  %v3132_v52 = vld [vmem:[%s5141_s0 + $0xe0] sm:$0xff]   ;;  %v4026_v59 = vld [vmem:[%s5142_s1 + $0xb8] sm:$0xff]   ;;  %v3133_v9 = vld [vmem:[%s5141_s0 + $0xe8] sm:$0xff]  }
  0x67   :  { %v341_v24 = vmul.f32 %v2944_v12, %v4186_v13  ;;  %v601_v26 = vmax.f32 %v473_v11, 0.0  ;;  %v602_v27 = vmax.f32 %v474_v17, 0.0  ;;  %v342_v28 = vmul.f32 %v2947_v18, %v4186_v13  ;;  %v4027_v0 = vld [vmem:[%s5142_s1 + $0xc0] sm:$0xff]   ;;  %v3134_v10 = vld [vmem:[%s5141_s0 + $0xf0] sm:$0xff]  }
  0x68   :  { %v343_v29 = vmul.f32 %v2948_v19, %v4186_v13  ;;  %v475_v31 = vadd.f32 %v4191_v14, %v340_v21  ;;  %v2951_v32 = vunpack.c.l.bf16 %v3129_v25  ;;  %v706_v33 = vpack.c.bf16 %v600_v23, %v599_v22  ;;  %v4491_v21 = vld [vmem:[%s5144_s3] ss:$0 sm:$0xff] }
  0x69   :  { %v476_v34 = vadd.f32 %v4191_v14, %v341_v24  ;;  %v2952_v35 = vunpack.c.h.bf16 %v3129_v25  ;;  %v2955_v36 = vunpack.c.l.bf16 %v3130_v30  ;;  %v707_v38 = vpack.c.bf16 %v602_v27, %v601_v26  ;;  %v4029_v24 = vld [vmem:[%s5142_s1 + $0xd0] sm:$0xff]   ;;  %v4500_v27 = vld [vmem:[%s5143_s2] ss:$0 sm:$0xff] }
  0x6a   :  { %3365 = vmatmul.mubr.bf16.gmra.mrb[36].mxu1 %v704_v7  ;;  %v477_v39 = vadd.f32 %v4191_v14, %v342_v28  ;;  %v478_v40 = vadd.f32 %v4191_v14, %v343_v29  ;;  %v2956_v41 = vunpack.c.h.bf16 %v3130_v30  ;;  %v603_v43 = vmax.f32 %v475_v31, 0.0  ;;  %v3135_v30 = vld [vmem:[%s5141_s0 + $0xf8] sm:$0xff]  }
  0x6b   :  { %3509 = vmatmul.mubr.bf16.gmra.mrb[36].mxu0 %v4022_v15  ;;  %3368 = vmatprep.mubr.bf16.mxu1 %v705_v16  ;;  %v604_v44 = vmax.f32 %v476_v34, 0.0  ;;  %v344_v45 = vmul.f32 %v2951_v32, %v4186_v13  ;;  %v345_v46 = vmul.f32 %v2952_v35, %v4186_v13  ;;  %v346_v47 = vmul.f32 %v2955_v36, %v4186_v13  ;;  %v3136_v34 = vld [vmem:[%s5141_s0 + $0x100] sm:$0xff]  }
  0x6c   :  { %3512 = vmatprep.mubr.bf16.mxu0 %v4023_v20  ;;  %v605_v49 = vmax.f32 %v477_v39, 0.0  ;;  %v606_v50 = vmax.f32 %v478_v40, 0.0  ;;  %v347_v51 = vmul.f32 %v2956_v41, %v4186_v13  ;;  %v2959_v53 = vunpack.c.l.bf16 %v3131_v48  ;;  %v4030_v41 = vld [vmem:[%s5142_s1 + $0xd8] sm:$0xff]  }
  0x6d   :  { %v2960_v54 = vunpack.c.h.bf16 %v3131_v48  ;;  %v708_v55 = vpack.c.bf16 %v604_v44, %v603_v43  ;;  %v479_v56 = vadd.f32 %v4191_v14, %v344_v45  ;;  %v480_v57 = vadd.f32 %v4191_v14, %v345_v46  ;;  %v4031_v46 = vld [vmem:[%s5142_s1 + $0xe0] sm:$0xff]  }
  0x6e   :  { %v481_v58 = vadd.f32 %v4191_v14, %v346_v47  ;;  %v709_v60 = vpack.c.bf16 %v606_v50, %v605_v49  ;;  %v482_v61 = vadd.f32 %v4191_v14, %v347_v51  ;;  %v2963_v62 = vunpack.c.l.bf16 %v3132_v52  ;;  %v3137_v51 = vld [vmem:[%s5141_s0 + $0x108] sm:$0xff]  }
  0x6f   :  { %v2964_v63 = vunpack.c.h.bf16 %v3132_v52  ;;  %v348_v1 = vmul.f32 %v2959_v53, %v4186_v13  ;;  %v349_v2 = vmul.f32 %v2960_v54, %v4186_v13  ;;  %v607_v3 = vmax.f32 %v479_v56, 0.0  ;;  %v3138_v56 = vld [vmem:[%s5141_s0 + $0x110] sm:$0xff]  }
  0x70   :  { %v608_v4 = vmax.f32 %v480_v57, 0.0  ;;  %v609_v5 = vmax.f32 %v481_v58, 0.0  ;;  %v610_v6 = vmax.f32 %v482_v61, 0.0  ;;  %v350_v7 = vmul.f32 %v2963_v62, %v4186_v13 }
  0x71   :  { %v351_v8 = vmul.f32 %v2964_v63, %v4186_v13  ;;  %v483_v11 = vadd.f32 %v4191_v14, %v348_v1  ;;  %v484_v12 = vadd.f32 %v4191_v14, %v349_v2  ;;  %v2967_v16 = vunpack.c.l.bf16 %v3133_v9  ;;  %v4028_v13 = vld [vmem:[%s5142_s1 + $0xc8] sm:$0xff]  }
  0x72   :  { %3369 = vmatmul.mubr.bf16.gmra.mrb[40].mxu1 %v706_v33  ;;  %v710_v15 = vpack.c.bf16 %v608_v4, %v607_v3  ;;  %v2968_v17 = vunpack.c.h.bf16 %v3133_v9  ;;  %v2971_v18 = vunpack.c.l.bf16 %v3134_v10  ;;  %v711_v19 = vpack.c.bf16 %v610_v6, %v609_v5  ;;  %v4032_v63 = vld [vmem:[%s5142_s1 + $0xe8] sm:$0xff]   ;;  %v4033_v4 = vld [vmem:[%s5142_s1 + $0xf0] sm:$0xff]  }
  0x73   :  { %3513 = vmatmul.mubr.bf16.gmra.mrb[40].mxu0 %v4024_v37  ;;  %3372 = vmatprep.mubr.bf16.mxu1 %v707_v38  ;;  %v485_v20 = vadd.f32 %v4191_v14, %v350_v7  ;;  %v486_v22 = vadd.f32 %v4491_v21, %v351_v8  ;;  %v2972_v23 = vunpack.c.h.bf16 %v3134_v10  ;;  %v611_v25 = vmax.f32 %v483_v11, 0.0  ;;  %v3139_v10 = vld [vmem:[%s5141_s0 + $0x118] sm:$0xff]  }
  0x74   :  { %3516 = vmatprep.mubr.bf16.mxu0 %v4025_v42  ;;  %v612_v26 = vmax.f32 %v484_v12, 0.0  ;;  %v352_v14 = vmul.f32 %v4500_v27, %v2967_v16  ;;  %v353_v28 = vmul.f32 %v4500_v27, %v2968_v17  ;;  %v354_v29 = vmul.f32 %v4500_v27, %v2971_v18  ;;  %v3140_v16 = vld [vmem:[%s5141_s0 + $0x120] sm:$0xff]  }
  0x75   :  { %v613_v31 = vmax.f32 %v485_v20, 0.0  ;;  %v614_v32 = vmax.f32 %v486_v22, 0.0  ;;  %v355_v33 = vmul.f32 %v4500_v27, %v2972_v23  ;;  %v2975_v36 = vunpack.c.l.bf16 %v3135_v30  ;;  %v4034_v23 = vld [vmem:[%s5142_s1 + $0xf8] sm:$0xff]  }
  0x76   :  { %v712_v35 = vpack.c.bf16 %v612_v26, %v611_v25  ;;  %v487_v37 = vadd.f32 %v4491_v21, %v352_v14  ;;  %v488_v38 = vadd.f32 %v4491_v21, %v353_v28  ;;  %v489_v39 = vadd.f32 %v4491_v21, %v354_v29  ;;  %v4035_v28 = vld [vmem:[%s5142_s1 + $0x100] sm:$0xff]  }
  0x77   :  { %v2976_v40 = vunpack.c.h.bf16 %v3135_v30  ;;  %v713_v42 = vpack.c.bf16 %v614_v32, %v613_v31  ;;  %v490_v43 = vadd.f32 %v4491_v21, %v355_v33  ;;  %v2979_v44 = vunpack.c.l.bf16 %v3136_v34 }
  0x78   :  { %v2980_v45 = vunpack.c.h.bf16 %v3136_v34  ;;  %v615_v47 = vmax.f32 %v487_v37, 0.0  ;;  %v616_v48 = vmax.f32 %v488_v38, 0.0  ;;  %v356_v49 = vmul.f32 %v4500_v27, %v2975_v36  ;;  %v3141_v37 = vld [vmem:[%s5141_s0 + $0x128] sm:$0xff]   ;;  %v3142_v38 = vld [vmem:[%s5141_s0 + $0x130] sm:$0xff]  }
  0x79   :  { %v357_v50 = vmul.f32 %v4500_v27, %v2976_v40  ;;  %v617_v52 = vmax.f32 %v489_v39, 0.0  ;;  %v618_v53 = vmax.f32 %v490_v43, 0.0  ;;  %v358_v54 = vmul.f32 %v4500_v27, %v2979_v44 }
  0x7a   :  { %3373 = vmatmul.mubr.bf16.gmra.mrb[44].mxu1 %v708_v55  ;;  %v359_v55 = vmul.f32 %v4500_v27, %v2980_v45  ;;  %v2983_v57 = vunpack.c.l.bf16 %v3137_v51  ;;  %v2984_v58 = vunpack.c.h.bf16 %v3137_v51  ;;  %v2987_v62 = vunpack.c.l.bf16 %v3138_v56  ;;  %v4036_v45 = vld [vmem:[%s5142_s1 + $0x108] sm:$0xff]  }
  0x7b   :  { %3517 = vmatmul.mubr.bf16.gmra.mrb[44].mxu0 %v4026_v59  ;;  %3376 = vmatprep.mubr.bf16.mxu1 %v709_v60  ;;  %v714_v59 = vpack.c.bf16 %v616_v48, %v615_v47  ;;  %v491_v60 = vadd.f32 %v4491_v21, %v356_v49  ;;  %v492_v61 = vadd.f32 %v4491_v21, %v357_v50  ;;  %v2988_v3 = vunpack.c.h.bf16 %v3138_v56  ;;  %v4037_v50 = vld [vmem:[%s5142_s1 + $0x110] sm:$0xff]   ;;  %v3143_v56 = vld [vmem:[%s5141_s0 + $0x138] sm:$0xff]  }
  0x7c   :  { %3520 = vmatprep.mubr.bf16.mxu0 %v4027_v0  ;;  %v715_v0 = vpack.c.bf16 %v618_v53, %v617_v52  ;;  %v493_v1 = vadd.f32 %v4491_v21, %v358_v54  ;;  %v494_v2 = vadd.f32 %v4491_v21, %v359_v55  ;;  %v360_v5 = vmul.f32 %v4500_v27, %v2983_v57 }
  0x7d   :  { %v361_v6 = vmul.f32 %v4500_v27, %v2984_v58  ;;  %v619_v7 = vmax.f32 %v491_v60, 0.0  ;;  %v620_v8 = vmax.f32 %v492_v61, 0.0  ;;  %v362_v9 = vmul.f32 %v4500_v27, %v2987_v62  ;;  %v3144_v60 = vld [vmem:[%s5141_s0 + $0x140] sm:$0xff]  }
  0x7e   :  { %v621_v11 = vmax.f32 %v493_v1, 0.0  ;;  %v622_v12 = vmax.f32 %v494_v2, 0.0  ;;  %v495_v17 = vadd.f32 %v4491_v21, %v360_v5  ;;  %v2992_v22 = vunpack.c.h.bf16 %v3139_v10 }
  0x7f   :  { %v496_v18 = vadd.f32 %v4491_v21, %v361_v6  ;;  %v497_v20 = vadd.f32 %v4491_v21, %v362_v9  ;;  %v2995_v26 = vunpack.c.l.bf16 %v3140_v16  ;;  %v2996_v14 = vunpack.c.h.bf16 %v3140_v16 }
  0x80   :  { %v623_v29 = vmax.f32 %v495_v17, 0.0  ;;  %v365_v32 = vmul.f32 %v4500_v27, %v2992_v22  ;;  %v3000_v43 = vunpack.c.h.bf16 %v3141_v37  ;;  %v3003_v44 = vunpack.c.l.bf16 %v3142_v38 }
  0x81   :  { %v624_v30 = vmax.f32 %v496_v18, 0.0  ;;  %v625_v33 = vmax.f32 %v497_v20, 0.0  ;;  %v367_v36 = vmul.f32 %v4500_v27, %v2996_v14  ;;  %v3004_v49 = vunpack.c.h.bf16 %v3142_v38  ;;  %v4040_v14 = vld [vmem:[%s5142_s1 + $0x128] sm:$0xff]   ;;  %v3147_v38 = vld [vmem:[%s5141_s0 + $0x158] sm:$0xff]  }
  0x82   :  { %3377 = vmatmul.mubr.bf16.gmra.mrb[48].mxu1 %v710_v15  ;;  %v363_v15 = vmul.f32 %v4500_v27, %v2988_v3  ;;  %v369_v54 = vmul.f32 %v4500_v27, %v3000_v43  ;;  %v370_v55 = vmul.f32 %v4500_v27, %v3003_v44  ;;  %v3007_v61 = vunpack.c.l.bf16 %v3143_v56  ;;  %v4038_v3 = vld [vmem:[%s5142_s1 + $0x118] sm:$0xff]  }
  0x83   :  { %3521 = vmatmul.mubr.bf16.gmra.mrb[48].mxu0 %v4028_v13  ;;  %3380 = vmatprep.mubr.bf16.mxu1 %v711_v19  ;;  %v2991_v13 = vunpack.c.l.bf16 %v3139_v10  ;;  %v716_v19 = vpack.c.bf16 %v620_v8, %v619_v7  ;;  %v718_v39 = vpack.c.bf16 %v624_v30, %v623_v29  ;;  %v502_v48 = vadd.f32 %v4491_v21, %v367_v36  ;;  %v4039_v8 = vld [vmem:[%s5142_s1 + $0x120] sm:$0xff]  }
  0x84   :  { %3524 = vmatprep.mubr.bf16.mxu0 %v4029_v24  ;;  %v717_v24 = vpack.c.bf16 %v622_v12, %v621_v11  ;;  %v498_v25 = vadd.f32 %v4491_v21, %v363_v15  ;;  %v3008_v62 = vunpack.c.h.bf16 %v3143_v56  ;;  %v504_v1 = vadd.f32 %v4491_v21, %v369_v54  ;;  %v4043_v54 = vld [vmem:[%s5142_s1 + $0x140] sm:$0xff]  }
  0x85   :  { %v364_v31 = vmul.f32 %v4500_v27, %v2991_v13  ;;  %v630_v58 = vmax.f32 %v502_v48, 0.0  ;;  %v505_v2 = vadd.f32 %v4491_v21, %v370_v55  ;;  %v3011_v6 = vunpack.c.l.bf16 %v3144_v60  ;;  %v3145_v13 = vld [vmem:[%s5141_s0 + $0x148] sm:$0xff]  }
  0x86   :  { %v626_v34 = vmax.f32 %v498_v25, 0.0  ;;  %v3012_v7 = vunpack.c.h.bf16 %v3144_v60  ;;  %v372_v9 = vmul.f32 %v4500_v27, %v3007_v61  ;;  %v373_v10 = vmul.f32 %v4500_v27, %v3008_v62 }
  0x87   :  { %v499_v40 = vadd.f32 %v4491_v21, %v364_v31  ;;  %v632_v12 = vmax.f32 %v504_v1, 0.0  ;;  %v633_v15 = vmax.f32 %v505_v2, 0.0  ;;  %v374_v17 = vmul.f32 %v4500_v27, %v3011_v6 }
  0x88   :  { %v375_v18 = vmul.f32 %v4500_v27, %v3012_v7  ;;  %v507_v20 = vadd.f32 %v4491_v21, %v372_v9  ;;  %v508_v22 = vadd.f32 %v4491_v21, %v373_v10  ;;  %v3016_v25 = vunpack.c.h.bf16 %v3145_v13  ;;  %v4044_v7 = vld [vmem:[%s5142_s1 + $0x148] sm:$0xff]  }
  0x89   :  { %v627_v51 = vmax.f32 %v499_v40, 0.0  ;;  %v509_v29 = vadd.f32 %v4491_v21, %v374_v17  ;;  %v3023_v44 = vunpack.c.l.bf16 %v3147_v38  ;;  %v3024_v48 = vunpack.c.h.bf16 %v3147_v38 }
  0x8a   :  { %3381 = vmatmul.mubr.bf16.gmra.mrb[52].mxu1 %v712_v35  ;;  %v366_v35 = vmul.f32 %v4500_v27, %v2995_v26  ;;  %v510_v30 = vadd.f32 %v4491_v21, %v375_v18  ;;  %v377_v36 = vmul.f32 %v4500_v27, %v3016_v25 }
  0x8b   :  { %3525 = vmatmul.mubr.bf16.gmra.mrb[52].mxu0 %v4030_v41  ;;  %3384 = vmatprep.mubr.bf16.mxu1 %v713_v42  ;;  %v500_v41 = vadd.f32 %v4491_v21, %v365_v32  ;;  %v2999_v42 = vunpack.c.l.bf16 %v3141_v37  ;;  %v4041_v32 = vld [vmem:[%s5142_s1 + $0x130] sm:$0xff]  }
  0x8c   :  { %3528 = vmatprep.mubr.bf16.mxu0 %v4031_v46  ;;  %v719_v46 = vpack.c.bf16 %v626_v34, %v625_v33  ;;  %v501_v47 = vadd.f32 %v4491_v21, %v366_v35  ;;  %v635_v33 = vmax.f32 %v507_v20, 0.0  ;;  %v636_v34 = vmax.f32 %v508_v22, 0.0 }
  0x8d   :  { %v628_v52 = vmax.f32 %v500_v41, 0.0  ;;  %v368_v53 = vmul.f32 %v4500_v27, %v2999_v42  ;;  %v638_v40 = vmax.f32 %v510_v30, 0.0  ;;  %v3148_v42 = vld [vmem:[%s5141_s0 + $0x160] sm:$0xff]  }
  0x8e   :  { %v629_v57 = vmax.f32 %v501_v47, 0.0  ;;  %v724_v43 = vpack.c.bf16 %v636_v34, %v635_v33 }
  0x92   :  { %3385 = vmatmul.mubr.bf16.gmra.mrb[56].mxu1 %v714_v59  ;;  %v371_v59 = vmul.f32 %v4500_v27, %v3004_v49  ;;  %v4042_v49 = vld [vmem:[%s5142_s1 + $0x138] sm:$0xff]  }
  0x93   :  { %3529 = vmatmul.mubr.bf16.gmra.mrb[56].mxu0 %v4032_v63  ;;  %3388 = vmatprep.mubr.bf16.mxu1 %v715_v0  ;;  %v720_v63 = vpack.c.bf16 %v628_v52, %v627_v51  ;;  %v503_v0 = vadd.f32 %v4491_v21, %v368_v53  ;;  %v3027_v52 = vunpack.c.l.bf16 %v3148_v42  ;;  %v3028_v53 = vunpack.c.h.bf16 %v3148_v42 }
  0x94   :  { %3532 = vmatprep.mubr.bf16.mxu0 %v4033_v4  ;;  %v721_v4 = vpack.c.bf16 %v630_v58, %v629_v57  ;;  %v506_v5 = vadd.f32 %v4491_v21, %v371_v59  ;;  %v380_v57 = vmul.f32 %v4500_v27, %v3023_v44  ;;  %v381_v58 = vmul.f32 %v4500_v27, %v3024_v48  ;;  %v3149_v59 = vld [vmem:[%s5141_s0 + $0x168] sm:$0xff]  }
  0x95   :  { %v631_v11 = vmax.f32 %v503_v0, 0.0  ;;  %v382_v62 = vmul.f32 %v4500_v27, %v3027_v52  ;;  %v3150_v0 = vld [vmem:[%s5141_s0 + $0x170] sm:$0xff]   ;;  %v3031_v1 = vunpack.c.l.bf16 %v3149_v59  ;;  %v3032_v2 = vunpack.c.h.bf16 %v3149_v59 }
  0x96   :  { %v634_v16 = vmax.f32 %v506_v5, 0.0  ;;  %v516_v5 = vadd.f32 %v4491_v21, %v381_v58  ;;  %v3035_v6 = vunpack.c.l.bf16 %v3150_v0  ;;  %v4049_v58 = vld [vmem:[%s5142_s1 + $0x170] sm:$0xff]  }
  0x97   :  { %v517_v9 = vadd.f32 %v4491_v21, %v382_v62 }
  0x98   :  { %v644_v18 = vmax.f32 %v516_v5, 0.0 }
  0x99   :  { %v645_v20 = vmax.f32 %v517_v9, 0.0 }
  0x9a   :  { %3389 = vmatmul.mubr.bf16.gmra.mrb[60].mxu1 %v716_v19  ;;  %v3146_v19 = vld [vmem:[%s5141_s0 + $0x150] sm:$0xff]  }
  0x9b   :  { %3533 = vmatmul.mubr.bf16.gmra.mrb[60].mxu0 %v4034_v23  ;;  %3392 = vmatprep.mubr.bf16.mxu1 %v717_v24  ;;  %v722_v23 = vpack.c.bf16 %v632_v12, %v631_v11  ;;  %v3015_v24 = vunpack.c.l.bf16 %v3145_v13  ;;  %v3019_v26 = vunpack.c.l.bf16 %v3146_v19  ;;  %v3020_v31 = vunpack.c.h.bf16 %v3146_v19  ;;  %v4045_v12 = vld [vmem:[%s5142_s1 + $0x150] sm:$0xff]   ;;  %v3151_v19 = vld [vmem:[%s5141_s0 + $0x178] sm:$0xff]  }
  0x9c   :  { %3536 = vmatprep.mubr.bf16.mxu0 %v4035_v28  ;;  %v723_v28 = vpack.c.bf16 %v634_v16, %v633_v15  ;;  %v3036_v11 = vunpack.c.h.bf16 %v3150_v0  ;;  %v384_v15 = vmul.f32 %v4500_v27, %v3031_v1  ;;  %v385_v16 = vmul.f32 %v4500_v27, %v3032_v2  ;;  %v3155_v0 = vld [vmem:[%s5141_s0 + $0x198] sm:$0xff]  }
  0x9d   :  { %v376_v35 = vmul.f32 %v4500_v27, %v3015_v24  ;;  %v378_v37 = vmul.f32 %v4500_v27, %v3019_v26  ;;  %v379_v41 = vmul.f32 %v4500_v27, %v3020_v31  ;;  %v386_v13 = vmul.f32 %v4500_v27, %v3035_v6  ;;  %v3152_v24 = vld [vmem:[%s5141_s0 + $0x180] sm:$0xff]   ;;  %v4046_v31 = vld [vmem:[%s5142_s1 + $0x158] sm:$0xff]  }
  0x9e   :  { %v519_v25 = vadd.f32 %v4491_v21, %v384_v15  ;;  %v520_v26 = vadd.f32 %v4491_v21, %v385_v16  ;;  %v3040_v30 = vunpack.c.h.bf16 %v3151_v19  ;;  %v3043_v34 = vunpack.c.l.bf16 %v3152_v24 }
  0x9f   :  { %v513_v47 = vadd.f32 %v4491_v21, %v378_v37  ;;  %v514_v51 = vadd.f32 %v4491_v21, %v379_v41  ;;  %v3055_v5 = vunpack.c.l.bf16 %v3155_v0  ;;  %v3056_v6 = vunpack.c.h.bf16 %v3155_v0 }
  0xa0   :  { %v647_v37 = vmax.f32 %v519_v25, 0.0  ;;  %v648_v38 = vmax.f32 %v520_v26, 0.0 }
  0xa1   :  { %v641_v60 = vmax.f32 %v513_v47, 0.0  ;;  %v642_v61 = vmax.f32 %v514_v51, 0.0 }
  0xa2   :  { %3393 = vmatmul.mubr.bf16.gmra.mrb[64].mxu1 %v718_v39  ;;  %v637_v39 = vmax.f32 %v509_v29, 0.0  ;;  %v521_v29 = vadd.f32 %v4491_v21, %v386_v13  ;;  %v730_v47 = vpack.c.bf16 %v648_v38, %v647_v37  ;;  %v396_v13 = vmul.f32 %v4500_v27, %v3055_v5 }
  0xa3   :  { %3537 = vmatmul.mubr.bf16.gmra.mrb[64].mxu0 %v4036_v45  ;;  %3396 = vmatprep.mubr.bf16.mxu1 %v719_v46  ;;  %v511_v45 = vadd.f32 %v4491_v21, %v376_v35  ;;  %v512_v46 = vadd.f32 %v4491_v21, %v377_v36  ;;  %v3044_v35 = vunpack.c.h.bf16 %v3152_v24  ;;  %v4047_v36 = vld [vmem:[%s5142_s1 + $0x160] sm:$0xff]  }
  0xa4   :  { %3540 = vmatprep.mubr.bf16.mxu0 %v4037_v50  ;;  %v725_v50 = vpack.c.bf16 %v638_v40, %v637_v39  ;;  %v389_v40 = vmul.f32 %v4500_v27, %v3040_v30  ;;  %v649_v41 = vmax.f32 %v521_v29, 0.0  ;;  %v531_v29 = vadd.f32 %v4491_v21, %v396_v13 }
  0xa5   :  { %v639_v55 = vmax.f32 %v511_v45, 0.0  ;;  %v640_v56 = vmax.f32 %v512_v46, 0.0  ;;  %v391_v44 = vmul.f32 %v4500_v27, %v3044_v35  ;;  %v3153_v45 = vld [vmem:[%s5141_s0 + $0x188] sm:$0xff]   ;;  %v3154_v46 = vld [vmem:[%s5141_s0 + $0x190] sm:$0xff]  }
  0xa6   :  { %v3048_v51 = vunpack.c.h.bf16 %v3153_v45  ;;  %v3051_v52 = vunpack.c.l.bf16 %v3154_v46  ;;  %v4052_v35 = vld [vmem:[%s5142_s1 + $0x188] sm:$0xff]  }
  0xa8   :  { %v393_v62 = vmul.f32 %v4500_v27, %v3048_v51 }
  0xaa   :  { %3397 = vmatmul.mubr.bf16.gmra.mrb[68].mxu1 %v720_v63  ;;  %v383_v63 = vmul.f32 %v4500_v27, %v3028_v53  ;;  %v4048_v53 = vld [vmem:[%s5142_s1 + $0x168] sm:$0xff]   ;;  %v528_v9 = vadd.f32 %v4491_v21, %v393_v62  ;;  %v4055_v62 = vld [vmem:[%s5142_s1 + $0x1a0] sm:$0xff]  }
  0xab   :  { %3541 = vmatmul.mubr.bf16.gmra.mrb[68].mxu0 %v4038_v3  ;;  %3400 = vmatprep.mubr.bf16.mxu1 %v721_v4  ;;  %v726_v3 = vpack.c.bf16 %v640_v56, %v639_v55  ;;  %v515_v4 = vadd.f32 %v4491_v21, %v380_v57  ;;  %v526_v56 = vadd.f32 %v4491_v21, %v391_v44  ;;  %v3052_v57 = vunpack.c.h.bf16 %v3154_v46  ;;  %v3159_v46 = vld [vmem:[%s5141_s0 + $0x1b8] sm:$0xff]  }
  0xac   :  { %3544 = vmatprep.mubr.bf16.mxu0 %v4039_v8  ;;  %v727_v8 = vpack.c.bf16 %v642_v61, %v641_v60  ;;  %v518_v10 = vadd.f32 %v4491_v21, %v383_v63  ;;  %v394_v63 = vmul.f32 %v4500_v27, %v3051_v52  ;;  %v3071_v52 = vunpack.c.l.bf16 %v3159_v46 }
  0xad   :  { %v643_v17 = vmax.f32 %v515_v4, 0.0  ;;  %v654_v2 = vmax.f32 %v526_v56, 0.0  ;;  %v3156_v4 = vld [vmem:[%s5141_s0 + $0x1a0] sm:$0xff]   ;;  %v3072_v56 = vunpack.c.h.bf16 %v3159_v46 }
  0xae   :  { %v646_v22 = vmax.f32 %v518_v10, 0.0  ;;  %v529_v10 = vadd.f32 %v4491_v21, %v394_v63  ;;  %v3059_v16 = vunpack.c.l.bf16 %v3156_v4  ;;  %v4805_v46 = vld [vmem:[%s5148_s7] ss:$0 sm:$0xff] }
  0xb0   :  { %v398_v25 = vmul.f32 %v4500_v27, %v3059_v16 }
  0xb2   :  { %3401 = vmatmul.mubr.bf16.gmra.mrb[72].mxu1 %v722_v23  ;;  %v387_v23 = vmul.f32 %v4500_v27, %v3036_v11  ;;  %v4050_v11 = vld [vmem:[%s5142_s1 + $0x178] sm:$0xff]   ;;  %v533_v37 = vadd.f32 %v4491_v21, %v398_v25 }
  0xb3   :  { %3545 = vmatmul.mubr.bf16.gmra.mrb[72].mxu0 %v4040_v14  ;;  %3404 = vmatprep.mubr.bf16.mxu1 %v723_v28  ;;  %v3039_v14 = vunpack.c.l.bf16 %v3151_v19  ;;  %v728_v28 = vpack.c.bf16 %v644_v18, %v643_v17  ;;  %v3060_v17 = vunpack.c.h.bf16 %v3156_v4  ;;  %v4051_v18 = vld [vmem:[%s5142_s1 + $0x180] sm:$0xff]   ;;  %v397_v19 = vmul.f32 %v4500_v27, %v3056_v6  ;;  %v3163_v25 = vld [vmem:[%s5141_s0 + $0x1d8] sm:$0xff]  }
  0xb4   :  { %3548 = vmatprep.mubr.bf16.mxu0 %v4041_v32  ;;  %v729_v32 = vpack.c.bf16 %v646_v22, %v645_v20  ;;  %v522_v33 = vadd.f32 %v4491_v21, %v387_v23  ;;  %v656_v22 = vmax.f32 %v528_v9, 0.0  ;;  %v657_v23 = vmax.f32 %v529_v10, 0.0 }
  0xb5   :  { %v388_v39 = vmul.f32 %v4500_v27, %v3039_v14  ;;  %v399_v26 = vmul.f32 %v4500_v27, %v3060_v17  ;;  %v3157_v14 = vld [vmem:[%s5141_s0 + $0x1a8] sm:$0xff]   ;;  %v532_v30 = vadd.f32 %v4491_v21, %v397_v19 }
  0xb6   :  { %v650_v42 = vmax.f32 %v522_v33, 0.0  ;;  %v3064_v33 = vunpack.c.h.bf16 %v3157_v14  ;;  %v4056_v17 = vld [vmem:[%s5142_s1 + $0x1a8] sm:$0xff]  }
  0xb7   :  { %v523_v48 = vadd.f32 %v4491_v21, %v388_v39  ;;  %v534_v38 = vadd.f32 %v4491_v21, %v399_v26 }
  0xb8   :  { %v401_v44 = vmul.f32 %v4500_v27, %v3064_v33  ;;  %v3164_v33 = vld [vmem:[%s5141_s0 + $0x1e0] sm:$0xff]  }
  0xb9   :  { %v651_v59 = vmax.f32 %v523_v48, 0.0  ;;  %v662_v48 = vmax.f32 %v534_v38, 0.0 }
  0xba   :  { %3405 = vmatmul.mubr.bf16.gmra.mrb[76].mxu1 %v724_v43  ;;  %v390_v43 = vmul.f32 %v4500_v27, %v3043_v34 }
  0xbb   :  { %3549 = vmatmul.mubr.bf16.gmra.mrb[76].mxu0 %v4042_v49  ;;  %3408 = vmatprep.mubr.bf16.mxu1 %v725_v50  ;;  %v524_v49 = vadd.f32 %v4491_v21, %v389_v40  ;;  %v3047_v50 = vunpack.c.l.bf16 %v3153_v45  ;;  %v4053_v40 = vld [vmem:[%s5142_s1 + $0x190] sm:$0xff]  }
  0xbc   :  { %3552 = vmatprep.mubr.bf16.mxu0 %v4043_v54  ;;  %v731_v54 = vpack.c.bf16 %v650_v42, %v649_v41  ;;  %v525_v55 = vadd.f32 %v4491_v21, %v390_v43  ;;  %v659_v41 = vmax.f32 %v531_v29, 0.0  ;;  %v660_v42 = vmax.f32 %v532_v30, 0.0  ;;  %v4791_v29 = vld [vmem:[%s5146_s5] ss:$0 sm:$0xff] }
  0xbd   :  { %v652_v60 = vmax.f32 %v524_v49, 0.0  ;;  %v392_v61 = vmul.f32 %v4500_v27, %v3047_v50  ;;  %v3160_v50 = vld [vmem:[%s5141_s0 + $0x1c0] sm:$0xff]  }
  0xbe   :  { %v653_v1 = vmax.f32 %v525_v55, 0.0  ;;  %v736_v51 = vpack.c.bf16 %v660_v42, %v659_v41 }
  0xc2   :  { %3409 = vmatmul.mubr.bf16.gmra.mrb[80].mxu1 %v726_v3  ;;  %v395_v3 = vmul.f32 %v4500_v27, %v3052_v57  ;;  %v4054_v57 = vld [vmem:[%s5142_s1 + $0x198] sm:$0xff]  }
  0xc3   :  { %3553 = vmatmul.mubr.bf16.gmra.mrb[80].mxu0 %v4044_v7  ;;  %3412 = vmatprep.mubr.bf16.mxu1 %v727_v8  ;;  %v732_v7 = vpack.c.bf16 %v652_v60, %v651_v59  ;;  %v527_v8 = vadd.f32 %v4491_v21, %v392_v61  ;;  %v3075_v60 = vunpack.c.l.bf16 %v3160_v50  ;;  %v3076_v61 = vunpack.c.h.bf16 %v3160_v50 }
  0xc4   :  { %3556 = vmatprep.mubr.bf16.mxu0 %v4045_v12  ;;  %v733_v12 = vpack.c.bf16 %v654_v2, %v653_v1  ;;  %v530_v15 = vadd.f32 %v4491_v21, %v395_v3  ;;  %v404_v1 = vmul.f32 %v4500_v27, %v3071_v52  ;;  %v405_v2 = vmul.f32 %v4500_v27, %v3072_v56  ;;  %v3161_v3 = vld [vmem:[%s5141_s0 + $0x1c8] sm:$0xff]  }
  0xc5   :  { %v655_v20 = vmax.f32 %v527_v8, 0.0  ;;  %v406_v6 = vmul.f32 %v4500_v27, %v3075_v60  ;;  %v3162_v8 = vld [vmem:[%s5141_s0 + $0x1d0] sm:$0xff]   ;;  %v3079_v9 = vunpack.c.l.bf16 %v3161_v3  ;;  %v3080_v10 = vunpack.c.h.bf16 %v3161_v3 }
  0xc6   :  { %v658_v24 = vmax.f32 %v530_v15, 0.0  ;;  %v540_v15 = vadd.f32 %v4491_v21, %v405_v2  ;;  %v3083_v16 = vunpack.c.l.bf16 %v3162_v8  ;;  %v3092_v52 = vunpack.c.h.bf16 %v3164_v33 }
  0xc7   :  { %v541_v13 = vadd.f32 %v4491_v21, %v406_v6 }
  0xc9   :  { %v669_v30 = vmax.f32 %v541_v13, 0.0 }
  0xca   :  { %3413 = vmatmul.mubr.bf16.gmra.mrb[84].mxu1 %v728_v28  ;;  %v3158_v28 = vld [vmem:[%s5141_s0 + $0x1b0] sm:$0xff]  }
  0xcb   :  { %3557 = vmatmul.mubr.bf16.gmra.mrb[84].mxu0 %v4046_v31  ;;  %3416 = vmatprep.mubr.bf16.mxu1 %v729_v32  ;;  %v734_v31 = vpack.c.bf16 %v656_v22, %v655_v20  ;;  %v3063_v32 = vunpack.c.l.bf16 %v3157_v14  ;;  %v3067_v34 = vunpack.c.l.bf16 %v3158_v28  ;;  %v3068_v39 = vunpack.c.h.bf16 %v3158_v28  ;;  %v4057_v22 = vld [vmem:[%s5142_s1 + $0x1b0] sm:$0xff]  }
  0xcc   :  { %3560 = vmatprep.mubr.bf16.mxu0 %v4047_v36  ;;  %v735_v36 = vpack.c.bf16 %v658_v24, %v657_v23  ;;  %v3084_v20 = vunpack.c.h.bf16 %v3162_v8  ;;  %v408_v23 = vmul.f32 %v4500_v27, %v3079_v9  ;;  %v409_v24 = vmul.f32 %v4500_v27, %v3080_v10  ;;  %v3166_v10 = vld [vmem:[%s5141_s0 + $0x1f0] sm:$0xff]  }
  0xcd   :  { %v400_v43 = vmul.f32 %v4500_v27, %v3063_v32  ;;  %v402_v45 = vmul.f32 %v4500_v27, %v3067_v34  ;;  %v403_v49 = vmul.f32 %v4500_v27, %v3068_v39  ;;  %v668_v14 = vmax.f32 %v540_v15, 0.0 }
  0xce   :  { %v410_v28 = vmul.f32 %v4500_v27, %v3083_v16  ;;  %v411_v32 = vmul.f32 %v4500_v27, %v3084_v20  ;;  %v3087_v34 = vunpack.c.l.bf16 %v3163_v25  ;;  %v544_v38 = vadd.f32 %v4491_v21, %v409_v24 }
  0xcf   :  { %v537_v55 = vadd.f32 %v4491_v21, %v402_v45  ;;  %v538_v59 = vadd.f32 %v4491_v21, %v403_v49  ;;  %v4058_v49 = vld [vmem:[%s5142_s1 + $0x1b8] sm:$0xff]   ;;  %v415_v9 = vmul.f32 %v4500_v27, %v3092_v52 }
  0xd1   :  { %v665_v4 = vmax.f32 %v537_v55, 0.0  ;;  %v666_v5 = vmax.f32 %v538_v59, 0.0 }
  0xd2   :  { %3417 = vmatmul.mubr.bf16.gmra.mrb[88].mxu1 %v730_v47  ;;  %v661_v47 = vmax.f32 %v533_v37, 0.0  ;;  %v543_v37 = vadd.f32 %v4491_v21, %v408_v23 }
  0xd3   :  { %3561 = vmatmul.mubr.bf16.gmra.mrb[88].mxu0 %v4048_v53  ;;  %3420 = vmatprep.mubr.bf16.mxu1 %v731_v54  ;;  %v535_v53 = vadd.f32 %v4491_v21, %v400_v43  ;;  %v536_v54 = vadd.f32 %v4491_v21, %v401_v44  ;;  %v545_v43 = vadd.f32 %v4491_v21, %v410_v28  ;;  %v3091_v44 = vunpack.c.l.bf16 %v3164_v33 }
  0xd4   :  { %3564 = vmatprep.mubr.bf16.mxu0 %v4049_v58  ;;  %v737_v58 = vpack.c.bf16 %v662_v48, %v661_v47  ;;  %v3100_v33 = vunpack.c.h.bf16 %v3166_v10 }
  0xd5   :  { %v663_v63 = vmax.f32 %v535_v53, 0.0  ;;  %v664_v0 = vmax.f32 %v536_v54, 0.0  ;;  %v673_v3 = vmax.f32 %v545_v43, 0.0 }
  0xda   :  { %3421 = vmatmul.mubr.bf16.gmra.mrb[92].mxu1 %v732_v7  ;;  %v407_v7 = vmul.f32 %v4500_v27, %v3076_v61 }
  0xdb   :  { %3565 = vmatmul.mubr.bf16.gmra.mrb[92].mxu0 %v4050_v11  ;;  %3424 = vmatprep.mubr.bf16.mxu1 %v733_v12  ;;  %v738_v11 = vpack.c.bf16 %v664_v0, %v663_v63  ;;  %v539_v12 = vadd.f32 %v4491_v21, %v404_v1  ;;  %v671_v63 = vmax.f32 %v543_v37, 0.0  ;;  %v672_v0 = vmax.f32 %v544_v38, 0.0 }
  0xdc   :  { %3568 = vmatprep.mubr.bf16.mxu0 %v4051_v18  ;;  %v739_v18 = vpack.c.bf16 %v666_v5, %v665_v4  ;;  %v542_v19 = vadd.f32 %v4491_v21, %v407_v7  ;;  %v414_v4 = vmul.f32 %v4500_v27, %v3091_v44  ;;  %v3165_v5 = vld [vmem:[%s5141_s0 + $0x1e8] sm:$0xff]  }
  0xdd   :  { %v667_v26 = vmax.f32 %v539_v12, 0.0  ;;  %v3096_v13 = vunpack.c.h.bf16 %v3165_v5  ;;  %v742_v23 = vpack.c.bf16 %v672_v0, %v671_v63 }
  0xde   :  { %v549_v24 = vadd.f32 %v4491_v21, %v414_v4 }
  0xdf   :  { %v740_v42 = vpack.c.bf16 %v668_v14, %v667_v26 }
  0xe2   :  { %3425 = vmatmul.mubr.bf16.gmra.mrb[96].mxu1 %v734_v31  ;;  %v670_v31 = vmax.f32 %v542_v19, 0.0 }
  0xe3   :  { %3569 = vmatmul.mubr.bf16.gmra.mrb[96].mxu0 %v4052_v35  ;;  %3428 = vmatprep.mubr.bf16.mxu1 %v735_v36  ;;  %v3088_v35 = vunpack.c.h.bf16 %v3163_v25  ;;  %v3099_v25 = vunpack.c.l.bf16 %v3166_v10 }
  0xe4   :  { %3572 = vmatprep.mubr.bf16.mxu0 %v4053_v40  ;;  %v741_v50 = vpack.c.bf16 %v670_v31, %v669_v30  ;;  %v4060_v30 = vld [vmem:[%s5142_s1 + $0x1c8] sm:$0xff]  }
  0xe5   :  { %v413_v59 = vmul.f32 %v4500_v27, %v3088_v35 }
  0xe7   :  { %v548_v15 = vadd.f32 %v4491_v21, %v413_v59 }
  0xea   :  { %3429 = vmatmul.mubr.bf16.gmra.mrb[100].mxu1 %v736_v51  ;;  %v546_v51 = vadd.f32 %v4491_v21, %v411_v32  ;;  %v550_v32 = vadd.f32 %v4491_v21, %v415_v9 }
  0xeb   :  { %3573 = vmatmul.mubr.bf16.gmra.mrb[100].mxu0 %v4054_v57  ;;  %3432 = vmatprep.mubr.bf16.mxu1 %v737_v58  ;;  %v4059_v57 = vld [vmem:[%s5142_s1 + $0x1c0] sm:$0xff]   ;;  %v412_v58 = vmul.f32 %v4500_v27, %v3087_v34 }
  0xec   :  { %3576 = vmatprep.mubr.bf16.mxu0 %v4055_v62  ;;  %v674_v8 = vmax.f32 %v546_v51, 0.0  ;;  %v3167_v51 = vld [vmem:[%s5141_s0 + $0x1f8] sm:$0xff]  }
  0xed   :  { %v547_v12 = vadd.f32 %v4491_v21, %v412_v58 }
  0xee   :  { %v743_v31 = vpack.c.bf16 %v674_v8, %v673_v3 }
  0xef   :  { %v675_v38 = vmax.f32 %v547_v12, 0.0 }
  0xf2   :  { %3433 = vmatmul.mubr.bf16.gmra.mrb[104].mxu1 %v738_v11 }
  0xf3   :  { %3577 = vmatmul.mubr.bf16.gmra.mrb[104].mxu0 %v4056_v17  ;;  %3436 = vmatprep.mubr.bf16.mxu1 %v739_v18  ;;  %v3095_v18 = vunpack.c.l.bf16 %v3165_v5 }
  0xf4   :  { %3580 = vmatprep.mubr.bf16.mxu0 %v4057_v22 }
  0xf5   :  { %v3330_v36 = vpop.f32.mrb[0].mxu1  ;;  %v416_v44 = vmul.f32 %v4500_v27, %v3095_v18 }
  0xf6   :  { %v863_v39 = vadd.f32 %v3330_v36, %v4791_v29  ;;  %v854_v40 = vpop.f32.mrb[1].mxu1  ;;  %v3474_v41 = vpop.f32.mrb[0].mxu0 }
  0xf7   :  { %v855_v45 = vadd.f32 %v4791_v29, %v854_v40  ;;  %v3331_v47 = vpop.f32.mrb[2].mxu1  ;;  %v1982_v48 = vpop.f32.mrb[1].mxu0  ;;  %v4061_v40 = vld [vmem:[%s5142_s1 + $0x1d0] sm:$0xff]   ;;  %v551_v59 = vadd.f32 %v4491_v21, %v416_v44 }
  0xf8   :  { %v3601_v53 = vadd.f32 %v3474_v41, %v863_v39  ;;  %v866_v54 = vadd.f32 %v3331_v47, %v4791_v29  ;;  %v857_v55 = vpop.f32.mrb[3].mxu1  ;;  %v3475_v56 = vpop.f32.mrb[2].mxu0  ;;  %v676_v39 = vmax.f32 %v548_v15, 0.0 }
  0xf9   :  { %v3604_v60 = vadd.f32 %v1982_v48, %v855_v45  ;;  %v858_v61 = vadd.f32 %v4791_v29, %v857_v55  ;;  %v1985_v62 = vpop.f32.mrb[3].mxu0  ;;  %v417_v45 = vmul.f32 %v4500_v27, %v3096_v13  ;;  %v419_v55 = vmul.f32 %v4500_v27, %v3100_v33 }
  0xfa   :  { %v3602_v1 = vadd.f32 %v3601_v53, %v4805_v46  ;;  %v3607_v2 = vadd.f32 %v4805_v46, %v866_v54  ;;  %3437 = vmatmul.mubr.bf16.gmra.mrb[108].mxu1 %v740_v42  ;;  %v678_v54 = vmax.f32 %v550_v32, 0.0  ;;  %v744_v0 = vpack.c.bf16 %v676_v39, %v675_v38 }
  0xfb   :  { %v3605_v6 = vadd.f32 %v3604_v60, %v4805_v46  ;;  %v3610_v7 = vadd.f32 %v4805_v46, %v858_v61  ;;  %3581 = vmatmul.mubr.bf16.gmra.mrb[108].mxu0 %v4058_v49  ;;  %3440 = vmatprep.mubr.bf16.mxu1 %v741_v50  ;;  %v677_v49 = vmax.f32 %v549_v24, 0.0  ;;  %v418_v50 = vmul.f32 %v4500_v27, %v3099_v25 }
  0xfc   :  { %2623 = vst [vmem:[#allocation2 + $0x10] sm:$0xff] %v3602_v1  ;;  %v3608_v11 = vadd.f32 %v3607_v2, %v3475_v56  ;;  %3584 = vmatprep.mubr.bf16.mxu0 %v4059_v57  ;;  %v3103_v60 = vunpack.c.l.bf16 %v3167_v51  ;;  %v552_v1 = vadd.f32 %v4491_v21, %v417_v45  ;;  %v3104_v2 = vunpack.c.h.bf16 %v3167_v51 }
  0xfd   :  { %2621 = vst [vmem:[#allocation2] sm:$0xff] %v3605_v6  ;;  %v3611_v16 = vadd.f32 %v3610_v7, %v1985_v62  ;;  %v3334_v17 = vpop.f32.mrb[4].mxu1  ;;  %v4062_v6 = vld [vmem:[%s5142_s1 + $0x1d8] sm:$0xff]   ;;  %v745_v7 = vpack.c.bf16 %v678_v54, %v677_v49  ;;  %v553_v8 = vadd.f32 %v4491_v21, %v418_v50  ;;  %v554_v9 = vadd.f32 %v4491_v21, %v419_v55  ;;  %v4065_v49 = vld [vmem:[%s5142_s1 + $0x1f0] sm:$0xff]  }
  0xfe   :  { %2624 = vst [vmem:[#allocation2 + $0x18] sm:$0xff] %v3608_v11  ;;  %v879_v19 = vadd.f32 %v3334_v17, %v4791_v29  ;;  %v870_v20 = vpop.f32.mrb[5].mxu1  ;;  %v3478_v22 = vpop.f32.mrb[4].mxu0  ;;  %v421_v24 = vmul.f32 %v4500_v27, %v3104_v2 }
  0xff   :  { %2622 = vst [vmem:[#allocation2 + $0x8] sm:$0xff] %v3611_v16  ;;  %v871_v26 = vadd.f32 %v4791_v29, %v870_v20  ;;  %v3335_v14 = vpop.f32.mrb[6].mxu1  ;;  %v1998_v28 = vpop.f32.mrb[5].mxu0  ;;  %v4063_v16 = vld [vmem:[%s5142_s1 + $0x1e0] sm:$0xff]   ;;  %v420_v20 = vmul.f32 %v4500_v27, %v3103_v60 }
 0x100   :  { %v3613_v34 = vadd.f32 %v4805_v46, %v879_v19  ;;  %v882_v35 = vadd.f32 %v3335_v14, %v4791_v29  ;;  %v873_v36 = vpop.f32.mrb[7].mxu1  ;;  %v3479_v37 = vpop.f32.mrb[6].mxu0  ;;  %v679_v19 = vmax.f32 %v551_v59, 0.0  ;;  %v681_v14 = vmax.f32 %v553_v8, 0.0  ;;  %v4069_v27 = vld [vmem:[%s5144_s3] ss:$0 sm:$0xff] }
 0x101   :  { %v3616_v41 = vadd.f32 %v4805_v46, %v871_v26  ;;  %v874_v42 = vadd.f32 %v4791_v29, %v873_v36  ;;  %v2001_v43 = vpop.f32.mrb[7].mxu0  ;;  %v556_v38 = vadd.f32 %v4069_v27, %v421_v24 }
 0x102   :  { %v3614_v47 = vadd.f32 %v3613_v34, %v3478_v22  ;;  %v3619_v48 = vadd.f32 %v4805_v46, %v882_v35  ;;  %3441 = vmatmul.mubr.bf16.gmra.mrb[112].mxu1 %v742_v23  ;;  %v680_v23 = vmax.f32 %v552_v1, 0.0 }
 0x103   :  { %v3617_v52 = vadd.f32 %v3616_v41, %v1998_v28  ;;  %v3622_v53 = vadd.f32 %v4805_v46, %v874_v42  ;;  %3585 = vmatmul.mubr.bf16.gmra.mrb[112].mxu0 %v4060_v30  ;;  %3444 = vmatprep.mubr.bf16.mxu1 %v743_v31  ;;  %v682_v28 = vmax.f32 %v554_v9, 0.0  ;;  %v4064_v42 = vld [vmem:[%s5142_s1 + $0x1e8] sm:$0xff]  }
 0x104   :  { %2627 = vst [vmem:[#allocation2 + $0x30] sm:$0xff] %v3614_v47  ;;  %v3620_v56 = vadd.f32 %v3619_v48, %v3479_v37  ;;  %3588 = vmatprep.mubr.bf16.mxu0 %v4061_v40  ;;  %v746_v36 = vpack.c.bf16 %v680_v23, %v679_v19  ;;  %v555_v37 = vadd.f32 %v4069_v27, %v420_v20 }
 0x105   :  { %2625 = vst [vmem:[#allocation2 + $0x20] sm:$0xff] %v3617_v52  ;;  %v3623_v57 = vadd.f32 %v3622_v53, %v2001_v43  ;;  %v3338_v58 = vpop.f32.mrb[8].mxu1  ;;  %v747_v43 = vpack.c.bf16 %v682_v28, %v681_v14 }
 0x106   :  { %2628 = vst [vmem:[#allocation2 + $0x38] sm:$0xff] %v3620_v56  ;;  %v895_v61 = vadd.f32 %v3338_v58, %v4791_v29  ;;  %v886_v62 = vpop.f32.mrb[9].mxu1  ;;  %v3482_v63 = vpop.f32.mrb[8].mxu0  ;;  %v683_v55 = vmax.f32 %v555_v37, 0.0  ;;  %v684_v56 = vmax.f32 %v556_v38, 0.0 }
 0x107   :  { %2626 = vst [vmem:[#allocation2 + $0x28] sm:$0xff] %v3623_v57  ;;  %v887_v3 = vadd.f32 %v4791_v29, %v886_v62  ;;  %v3339_v4 = vpop.f32.mrb[10].mxu1  ;;  %v2014_v5 = vpop.f32.mrb[9].mxu0 }
 0x108   :  { %v3625_v10 = vadd.f32 %v4805_v46, %v895_v61  ;;  %v898_v11 = vadd.f32 %v3339_v4, %v4791_v29  ;;  %v889_v12 = vpop.f32.mrb[11].mxu1  ;;  %v3483_v15 = vpop.f32.mrb[10].mxu0  ;;  %v748_v1 = vpack.c.bf16 %v684_v56, %v683_v55 }
 0x109   :  { %v3628_v17 = vadd.f32 %v4805_v46, %v887_v3  ;;  %v890_v18 = vadd.f32 %v4791_v29, %v889_v12  ;;  %v2017_v13 = vpop.f32.mrb[11].mxu0 }
 0x10a   :  { %v3626_v22 = vadd.f32 %v3625_v10, %v3482_v63  ;;  %v3631_v21 = vadd.f32 %v4805_v46, %v898_v11  ;;  %3445 = vmatmul.mubr.bf16.gmra.mrb[116].mxu1 %v744_v0 }
 0x10b   :  { %v3629_v25 = vadd.f32 %v3628_v17, %v2014_v5  ;;  %v3634_v26 = vadd.f32 %v4805_v46, %v890_v18  ;;  %3589 = vmatmul.mubr.bf16.gmra.mrb[116].mxu0 %v4062_v6  ;;  %3448 = vmatprep.mubr.bf16.mxu1 %v745_v7  ;;  %v4066_v5 = vld [vmem:[%s5142_s1 + $0x1f8] sm:$0xff]  }
 0x10c   :  { %2631 = vst [vmem:[#allocation2 + $0x50] sm:$0xff] %v3626_v22  ;;  %v3632_v30 = vadd.f32 %v3631_v21, %v3483_v15  ;;  %3592 = vmatprep.mubr.bf16.mxu0 %v4063_v16 }
 0x10d   :  { %2629 = vst [vmem:[#allocation2 + $0x40] sm:$0xff] %v3629_v25  ;;  %v3635_v31 = vadd.f32 %v3634_v26, %v2017_v13  ;;  %v3342_v32 = vpop.f32.mrb[12].mxu1 }
 0x10e   :  { %2632 = vst [vmem:[#allocation2 + $0x58] sm:$0xff] %v3632_v30  ;;  %v911_v33 = vadd.f32 %v3342_v32, %v4791_v29  ;;  %v902_v34 = vpop.f32.mrb[13].mxu1  ;;  %v3486_v35 = vpop.f32.mrb[12].mxu0 }
 0x10f   :  { %2630 = vst [vmem:[#allocation2 + $0x48] sm:$0xff] %v3635_v31  ;;  %v903_v39 = vadd.f32 %v4791_v29, %v902_v34  ;;  %v3343_v40 = vpop.f32.mrb[14].mxu1  ;;  %v2030_v41 = vpop.f32.mrb[13].mxu0 }
 0x110   :  { %v3637_v44 = vadd.f32 %v4805_v46, %v911_v33  ;;  %v914_v45 = vadd.f32 %v3343_v40, %v4791_v29  ;;  %v905_v47 = vpop.f32.mrb[15].mxu1  ;;  %v3487_v48 = vpop.f32.mrb[14].mxu0 }
 0x111   :  { %v3640_v50 = vadd.f32 %v4805_v46, %v903_v39  ;;  %v906_v51 = vadd.f32 %v4791_v29, %v905_v47  ;;  %v2033_v52 = vpop.f32.mrb[15].mxu0 }
 0x112   :  { %v3638_v53 = vadd.f32 %v3637_v44, %v3486_v35  ;;  %v3643_v54 = vadd.f32 %v4805_v46, %v914_v45  ;;  %3449 = vmatmul.mubr.bf16.gmra.mrb[120].mxu1 %v746_v36 }
 0x113   :  { %v3641_v57 = vadd.f32 %v3640_v50, %v2030_v41  ;;  %v3646_v58 = vadd.f32 %v4805_v46, %v906_v51  ;;  %3593 = vmatmul.mubr.bf16.gmra.mrb[120].mxu0 %v4064_v42  ;;  %3452 = vmatprep.mubr.bf16.mxu1 %v747_v43 }
 0x114   :  { %2635 = vst [vmem:[#allocation2 + $0x70] sm:$0xff] %v3638_v53  ;;  %v3644_v59 = vadd.f32 %v3643_v54, %v3487_v48  ;;  %3596 = vmatprep.mubr.bf16.mxu0 %v4065_v49 }
 0x115   :  { %2633 = vst [vmem:[#allocation2 + $0x60] sm:$0xff] %v3641_v57  ;;  %v3647_v60 = vadd.f32 %v3646_v58, %v2033_v52  ;;  %v3346_v61 = vpop.f32.mrb[16].mxu1 }
 0x116   :  { %2636 = vst [vmem:[#allocation2 + $0x78] sm:$0xff] %v3644_v59  ;;  %v927_v62 = vadd.f32 %v3346_v61, %v4791_v29  ;;  %v918_v63 = vpop.f32.mrb[17].mxu1  ;;  %v3490_v0 = vpop.f32.mrb[16].mxu0 }
 0x117   :  { %2634 = vst [vmem:[#allocation2 + $0x68] sm:$0xff] %v3647_v60  ;;  %v919_v2 = vadd.f32 %v4791_v29, %v918_v63  ;;  %v3347_v3 = vpop.f32.mrb[18].mxu1  ;;  %v2046_v4 = vpop.f32.mrb[17].mxu0 }
 0x118   :  { %v3649_v6 = vadd.f32 %v4805_v46, %v927_v62  ;;  %v930_v7 = vadd.f32 %v3347_v3, %v4791_v29  ;;  %v921_v8 = vpop.f32.mrb[19].mxu1  ;;  %v3491_v9 = vpop.f32.mrb[18].mxu0 }
 0x119   :  { %v3652_v10 = vadd.f32 %v4805_v46, %v919_v2  ;;  %v922_v11 = vadd.f32 %v4791_v29, %v921_v8  ;;  %v2049_v12 = vpop.f32.mrb[19].mxu0 }
 0x11a   :  { %v3650_v15 = vadd.f32 %v3649_v6, %v3490_v0  ;;  %v3655_v16 = vadd.f32 %v4805_v46, %v930_v7  ;;  %3453 = vmatmul.mubr.bf16.gmra.mrb[124].mxu1 %v748_v1 }
 0x11b   :  { %v3653_v17 = vadd.f32 %v3652_v10, %v2046_v4  ;;  %v3658_v18 = vadd.f32 %v4805_v46, %v922_v11  ;;  %3597 = vmatmul.mubr.bf16.gmra.mrb[124].mxu0 %v4066_v5 }
 0x11c   :  { %2639 = vst [vmem:[#allocation2 + $0x90] sm:$0xff] %v3650_v15  ;;  %v3656_v13 = vadd.f32 %v3655_v16, %v3491_v9 }
 0x11d   :  { %2637 = vst [vmem:[#allocation2 + $0x80] sm:$0xff] %v3653_v17  ;;  %v3659_v19 = vadd.f32 %v3658_v18, %v2049_v12  ;;  %v3350_v20 = vpop.f32.mrb[20].mxu1 }
 0x11e   :  { %2640 = vst [vmem:[#allocation2 + $0x98] sm:$0xff] %v3656_v13  ;;  %v943_v22 = vadd.f32 %v3350_v20, %v4791_v29  ;;  %v934_v21 = vpop.f32.mrb[21].mxu1  ;;  %v3494_v23 = vpop.f32.mrb[20].mxu0 }
 0x11f   :  { %2638 = vst [vmem:[#allocation2 + $0x88] sm:$0xff] %v3659_v19  ;;  %v935_v24 = vadd.f32 %v4791_v29, %v934_v21  ;;  %v3351_v25 = vpop.f32.mrb[22].mxu1  ;;  %v2062_v26 = vpop.f32.mrb[21].mxu0 }
 0x120   :  { %v3661_v14 = vadd.f32 %v4805_v46, %v943_v22  ;;  %v946_v28 = vadd.f32 %v3351_v25, %v4791_v29  ;;  %v937_v30 = vpop.f32.mrb[23].mxu1  ;;  %v3495_v31 = vpop.f32.mrb[22].mxu0 }
 0x121   :  { %v3664_v32 = vadd.f32 %v4805_v46, %v935_v24  ;;  %v938_v33 = vadd.f32 %v4791_v29, %v937_v30  ;;  %v2065_v34 = vpop.f32.mrb[23].mxu0 }
 0x122   :  { %v3662_v35 = vadd.f32 %v3661_v14, %v3494_v23  ;;  %v3667_v36 = vadd.f32 %v4805_v46, %v946_v28 }
 0x123   :  { %v3665_v27 = vadd.f32 %v3664_v32, %v2062_v26  ;;  %v3670_v37 = vadd.f32 %v4805_v46, %v938_v33 }
 0x124   :  { %2643 = vst [vmem:[#allocation2 + $0xb0] sm:$0xff] %v3662_v35  ;;  %v3668_v38 = vadd.f32 %v3667_v36, %v3495_v31 }
 0x125   :  { %2641 = vst [vmem:[#allocation2 + $0xa0] sm:$0xff] %v3665_v27  ;;  %v3671_v39 = vadd.f32 %v3670_v37, %v2065_v34  ;;  %v3354_v40 = vpop.f32.mrb[24].mxu1 }
 0x126   :  { %2644 = vst [vmem:[#allocation2 + $0xb8] sm:$0xff] %v3668_v38  ;;  %v959_v41 = vadd.f32 %v3354_v40, %v4791_v29  ;;  %v950_v42 = vpop.f32.mrb[25].mxu1  ;;  %v3498_v43 = vpop.f32.mrb[24].mxu0 }
 0x127   :  { %2642 = vst [vmem:[#allocation2 + $0xa8] sm:$0xff] %v3671_v39  ;;  %v951_v44 = vadd.f32 %v4791_v29, %v950_v42  ;;  %v3355_v45 = vpop.f32.mrb[26].mxu1  ;;  %v2078_v47 = vpop.f32.mrb[25].mxu0 }
 0x128   :  { %v3673_v48 = vadd.f32 %v4805_v46, %v959_v41  ;;  %v962_v49 = vadd.f32 %v3355_v45, %v4791_v29  ;;  %v953_v50 = vpop.f32.mrb[27].mxu1  ;;  %v3499_v51 = vpop.f32.mrb[26].mxu0 }
 0x129   :  { %v3676_v52 = vadd.f32 %v4805_v46, %v951_v44  ;;  %v954_v53 = vadd.f32 %v4791_v29, %v953_v50  ;;  %v2081_v54 = vpop.f32.mrb[27].mxu0 }
 0x12a   :  { %v3674_v55 = vadd.f32 %v3673_v48, %v3498_v43  ;;  %v3679_v56 = vadd.f32 %v4805_v46, %v962_v49 }
 0x12b   :  { %v3677_v57 = vadd.f32 %v3676_v52, %v2078_v47  ;;  %v3682_v58 = vadd.f32 %v4805_v46, %v954_v53 }
 0x12c   :  { %2647 = vst [vmem:[#allocation2 + $0xd0] sm:$0xff] %v3674_v55  ;;  %v3680_v59 = vadd.f32 %v3679_v56, %v3499_v51 }
 0x12d   :  { %2645 = vst [vmem:[#allocation2 + $0xc0] sm:$0xff] %v3677_v57  ;;  %v3683_v60 = vadd.f32 %v3682_v58, %v2081_v54  ;;  %v3358_v61 = vpop.f32.mrb[28].mxu1 }
 0x12e   :  { %2648 = vst [vmem:[#allocation2 + $0xd8] sm:$0xff] %v3680_v59  ;;  %v975_v62 = vadd.f32 %v3358_v61, %v4791_v29  ;;  %v966_v63 = vpop.f32.mrb[29].mxu1  ;;  %v3502_v0 = vpop.f32.mrb[28].mxu0 }
 0x12f   :  { %2646 = vst [vmem:[#allocation2 + $0xc8] sm:$0xff] %v3683_v60  ;;  %v967_v1 = vadd.f32 %v4791_v29, %v966_v63  ;;  %v3359_v2 = vpop.f32.mrb[30].mxu1  ;;  %v2094_v3 = vpop.f32.mrb[29].mxu0 }
 0x130   :  { %v3685_v4 = vadd.f32 %v4805_v46, %v975_v62  ;;  %v978_v5 = vadd.f32 %v3359_v2, %v4791_v29  ;;  %v969_v6 = vpop.f32.mrb[31].mxu1  ;;  %v3503_v7 = vpop.f32.mrb[30].mxu0 }
 0x131   :  { %v3688_v8 = vadd.f32 %v4805_v46, %v967_v1  ;;  %v970_v9 = vadd.f32 %v4791_v29, %v969_v6  ;;  %v2097_v10 = vpop.f32.mrb[31].mxu0 }
 0x132   :  { %v3686_v11 = vadd.f32 %v3685_v4, %v3502_v0  ;;  %v3691_v12 = vadd.f32 %v4805_v46, %v978_v5 }
 0x133   :  { %v3689_v15 = vadd.f32 %v3688_v8, %v2094_v3  ;;  %v3694_v16 = vadd.f32 %v4805_v46, %v970_v9 }
 0x134   :  { %2651 = vst [vmem:[#allocation2 + $0xf0] sm:$0xff] %v3686_v11  ;;  %v3692_v17 = vadd.f32 %v3691_v12, %v3503_v7 }
 0x135   :  { %2649 = vst [vmem:[#allocation2 + $0xe0] sm:$0xff] %v3689_v15  ;;  %v3695_v18 = vadd.f32 %v3694_v16, %v2097_v10  ;;  %v3362_v13 = vpop.f32.mrb[32].mxu1 }
 0x136   :  { %2652 = vst [vmem:[#allocation2 + $0xf8] sm:$0xff] %v3692_v17  ;;  %v991_v19 = vadd.f32 %v3362_v13, %v4791_v29  ;;  %v982_v20 = vpop.f32.mrb[33].mxu1  ;;  %v3506_v22 = vpop.f32.mrb[32].mxu0 }
 0x137   :  { %2650 = vst [vmem:[#allocation2 + $0xe8] sm:$0xff] %v3695_v18  ;;  %v983_v21 = vadd.f32 %v4791_v29, %v982_v20  ;;  %v3363_v23 = vpop.f32.mrb[34].mxu1  ;;  %v2110_v24 = vpop.f32.mrb[33].mxu0 }
 0x138   :  { %v3697_v25 = vadd.f32 %v4805_v46, %v991_v19  ;;  %v994_v26 = vadd.f32 %v3363_v23, %v4791_v29  ;;  %v985_v14 = vpop.f32.mrb[35].mxu1  ;;  %v3507_v28 = vpop.f32.mrb[34].mxu0 }
 0x139   :  { %v3700_v30 = vadd.f32 %v4805_v46, %v983_v21  ;;  %v986_v31 = vadd.f32 %v4791_v29, %v985_v14  ;;  %v2113_v32 = vpop.f32.mrb[35].mxu0 }
 0x13a   :  { %v3698_v33 = vadd.f32 %v3697_v25, %v3506_v22  ;;  %v3703_v34 = vadd.f32 %v4805_v46, %v994_v26 }
 0x13b   :  { %v3701_v35 = vadd.f32 %v3700_v30, %v2110_v24  ;;  %v3706_v36 = vadd.f32 %v4805_v46, %v986_v31 }
 0x13c   :  { %2655 = vst [vmem:[#allocation2 + $0x110] sm:$0xff] %v3698_v33  ;;  %v3704_v27 = vadd.f32 %v3703_v34, %v3507_v28 }
 0x13d   :  { %2653 = vst [vmem:[#allocation2 + $0x100] sm:$0xff] %v3701_v35  ;;  %v3707_v37 = vadd.f32 %v3706_v36, %v2113_v32  ;;  %v3366_v38 = vpop.f32.mrb[36].mxu1 }
 0x13e   :  { %2656 = vst [vmem:[#allocation2 + $0x118] sm:$0xff] %v3704_v27  ;;  %v1007_v39 = vadd.f32 %v3366_v38, %v4791_v29  ;;  %v998_v40 = vpop.f32.mrb[37].mxu1  ;;  %v3510_v41 = vpop.f32.mrb[36].mxu0 }
 0x13f   :  { %2654 = vst [vmem:[#allocation2 + $0x108] sm:$0xff] %v3707_v37  ;;  %v999_v42 = vadd.f32 %v4791_v29, %v998_v40  ;;  %v3367_v43 = vpop.f32.mrb[38].mxu1  ;;  %v2126_v44 = vpop.f32.mrb[37].mxu0 }
 0x140   :  { %v3709_v45 = vadd.f32 %v4805_v46, %v1007_v39  ;;  %v1010_v47 = vadd.f32 %v3367_v43, %v4791_v29  ;;  %v1001_v48 = vpop.f32.mrb[39].mxu1  ;;  %v3511_v49 = vpop.f32.mrb[38].mxu0 }
 0x141   :  { %v3712_v50 = vadd.f32 %v4805_v46, %v999_v42  ;;  %v1002_v51 = vadd.f32 %v4791_v29, %v1001_v48  ;;  %v2129_v52 = vpop.f32.mrb[39].mxu0 }
 0x142   :  { %v3710_v53 = vadd.f32 %v3709_v45, %v3510_v41  ;;  %v3715_v54 = vadd.f32 %v4805_v46, %v1010_v47 }
 0x143   :  { %v3713_v55 = vadd.f32 %v3712_v50, %v2126_v44  ;;  %v3718_v56 = vadd.f32 %v4805_v46, %v1002_v51 }
 0x144   :  { %2659 = vst [vmem:[#allocation2 + $0x130] sm:$0xff] %v3710_v53  ;;  %v3716_v57 = vadd.f32 %v3715_v54, %v3511_v49 }
 0x145   :  { %2657 = vst [vmem:[#allocation2 + $0x120] sm:$0xff] %v3713_v55  ;;  %v3719_v58 = vadd.f32 %v3718_v56, %v2129_v52  ;;  %v3370_v59 = vpop.f32.mrb[40].mxu1 }
 0x146   :  { %2660 = vst [vmem:[#allocation2 + $0x138] sm:$0xff] %v3716_v57  ;;  %v1023_v60 = vadd.f32 %v3370_v59, %v4791_v29  ;;  %v1014_v61 = vpop.f32.mrb[41].mxu1  ;;  %v3514_v62 = vpop.f32.mrb[40].mxu0 }
 0x147   :  { %2658 = vst [vmem:[#allocation2 + $0x128] sm:$0xff] %v3719_v58  ;;  %v1015_v63 = vadd.f32 %v4791_v29, %v1014_v61  ;;  %v3371_v0 = vpop.f32.mrb[42].mxu1  ;;  %v2142_v1 = vpop.f32.mrb[41].mxu0 }
 0x148   :  { %v3721_v2 = vadd.f32 %v4805_v46, %v1023_v60  ;;  %v1026_v3 = vadd.f32 %v3371_v0, %v4791_v29  ;;  %v1017_v4 = vpop.f32.mrb[43].mxu1  ;;  %v3515_v5 = vpop.f32.mrb[42].mxu0 }
 0x149   :  { %v3724_v6 = vadd.f32 %v4805_v46, %v1015_v63  ;;  %v1018_v7 = vadd.f32 %v4791_v29, %v1017_v4  ;;  %v2145_v8 = vpop.f32.mrb[43].mxu0 }
 0x14a   :  { %v3722_v9 = vadd.f32 %v3721_v2, %v3514_v62  ;;  %v3727_v10 = vadd.f32 %v4805_v46, %v1026_v3 }
 0x14b   :  { %v3725_v11 = vadd.f32 %v3724_v6, %v2142_v1  ;;  %v3730_v12 = vadd.f32 %v4805_v46, %v1018_v7 }
 0x14c   :  { %2663 = vst [vmem:[#allocation2 + $0x150] sm:$0xff] %v3722_v9  ;;  %v3728_v15 = vadd.f32 %v3727_v10, %v3515_v5 }
 0x14d   :  { %2661 = vst [vmem:[#allocation2 + $0x140] sm:$0xff] %v3725_v11  ;;  %v3731_v16 = vadd.f32 %v3730_v12, %v2145_v8  ;;  %v3374_v17 = vpop.f32.mrb[44].mxu1 }
 0x14e   :  { %2664 = vst [vmem:[#allocation2 + $0x158] sm:$0xff] %v3728_v15  ;;  %v1039_v18 = vadd.f32 %v3374_v17, %v4791_v29  ;;  %v1030_v13 = vpop.f32.mrb[45].mxu1  ;;  %v3518_v19 = vpop.f32.mrb[44].mxu0 }
 0x14f   :  { %2662 = vst [vmem:[#allocation2 + $0x148] sm:$0xff] %v3731_v16  ;;  %v1031_v20 = vadd.f32 %v4791_v29, %v1030_v13  ;;  %v3375_v22 = vpop.f32.mrb[46].mxu1  ;;  %v2158_v21 = vpop.f32.mrb[45].mxu0 }
 0x150   :  { %v3733_v23 = vadd.f32 %v4805_v46, %v1039_v18  ;;  %v1042_v24 = vadd.f32 %v3375_v22, %v4791_v29  ;;  %v1033_v25 = vpop.f32.mrb[47].mxu1  ;;  %v3519_v26 = vpop.f32.mrb[46].mxu0 }
 0x151   :  { %v3736_v14 = vadd.f32 %v4805_v46, %v1031_v20  ;;  %v1034_v28 = vadd.f32 %v4791_v29, %v1033_v25  ;;  %v2161_v30 = vpop.f32.mrb[47].mxu0 }
 0x152   :  { %v3734_v31 = vadd.f32 %v3733_v23, %v3518_v19  ;;  %v3739_v32 = vadd.f32 %v4805_v46, %v1042_v24 }
 0x153   :  { %v3737_v33 = vadd.f32 %v3736_v14, %v2158_v21  ;;  %v3742_v34 = vadd.f32 %v4805_v46, %v1034_v28 }
 0x154   :  { %2667 = vst [vmem:[#allocation2 + $0x170] sm:$0xff] %v3734_v31  ;;  %v3740_v35 = vadd.f32 %v3739_v32, %v3519_v26 }
 0x155   :  { %2665 = vst [vmem:[#allocation2 + $0x160] sm:$0xff] %v3737_v33  ;;  %v3743_v36 = vadd.f32 %v3742_v34, %v2161_v30  ;;  %v3378_v27 = vpop.f32.mrb[48].mxu1 }
 0x156   :  { %2668 = vst [vmem:[#allocation2 + $0x178] sm:$0xff] %v3740_v35  ;;  %v1055_v37 = vadd.f32 %v3378_v27, %v4791_v29  ;;  %v1046_v38 = vpop.f32.mrb[49].mxu1  ;;  %v3522_v39 = vpop.f32.mrb[48].mxu0 }
 0x157   :  { %2666 = vst [vmem:[#allocation2 + $0x168] sm:$0xff] %v3743_v36  ;;  %v1047_v40 = vadd.f32 %v4791_v29, %v1046_v38  ;;  %v3379_v41 = vpop.f32.mrb[50].mxu1  ;;  %v2174_v42 = vpop.f32.mrb[49].mxu0 }
 0x158   :  { %v3745_v43 = vadd.f32 %v4805_v46, %v1055_v37  ;;  %v1058_v44 = vadd.f32 %v3379_v41, %v4791_v29  ;;  %v1049_v45 = vpop.f32.mrb[51].mxu1  ;;  %v3523_v47 = vpop.f32.mrb[50].mxu0 }
 0x159   :  { %v3748_v48 = vadd.f32 %v4805_v46, %v1047_v40  ;;  %v1050_v49 = vadd.f32 %v4791_v29, %v1049_v45  ;;  %v2177_v50 = vpop.f32.mrb[51].mxu0 }
 0x15a   :  { %v3746_v51 = vadd.f32 %v3745_v43, %v3522_v39  ;;  %v3751_v52 = vadd.f32 %v4805_v46, %v1058_v44 }
 0x15b   :  { %v3749_v53 = vadd.f32 %v3748_v48, %v2174_v42  ;;  %v3754_v54 = vadd.f32 %v4805_v46, %v1050_v49 }
 0x15c   :  { %2671 = vst [vmem:[#allocation2 + $0x190] sm:$0xff] %v3746_v51  ;;  %v3752_v55 = vadd.f32 %v3751_v52, %v3523_v47 }
 0x15d   :  { %2669 = vst [vmem:[#allocation2 + $0x180] sm:$0xff] %v3749_v53  ;;  %v3755_v56 = vadd.f32 %v3754_v54, %v2177_v50  ;;  %v3382_v57 = vpop.f32.mrb[52].mxu1 }
 0x15e   :  { %2672 = vst [vmem:[#allocation2 + $0x198] sm:$0xff] %v3752_v55  ;;  %v1071_v58 = vadd.f32 %v3382_v57, %v4791_v29  ;;  %v1062_v59 = vpop.f32.mrb[53].mxu1  ;;  %v3526_v60 = vpop.f32.mrb[52].mxu0 }
 0x15f   :  { %2670 = vst [vmem:[#allocation2 + $0x188] sm:$0xff] %v3755_v56  ;;  %v1063_v61 = vadd.f32 %v4791_v29, %v1062_v59  ;;  %v3383_v62 = vpop.f32.mrb[54].mxu1  ;;  %v2190_v63 = vpop.f32.mrb[53].mxu0 }
 0x160   :  { %v3757_v0 = vadd.f32 %v4805_v46, %v1071_v58  ;;  %v1074_v1 = vadd.f32 %v3383_v62, %v4791_v29  ;;  %v1065_v2 = vpop.f32.mrb[55].mxu1  ;;  %v3527_v3 = vpop.f32.mrb[54].mxu0 }
 0x161   :  { %v3760_v4 = vadd.f32 %v4805_v46, %v1063_v61  ;;  %v1066_v5 = vadd.f32 %v4791_v29, %v1065_v2  ;;  %v2193_v6 = vpop.f32.mrb[55].mxu0 }
 0x162   :  { %v3758_v7 = vadd.f32 %v3757_v0, %v3526_v60  ;;  %v3763_v8 = vadd.f32 %v4805_v46, %v1074_v1 }
 0x163   :  { %v3761_v9 = vadd.f32 %v3760_v4, %v2190_v63  ;;  %v3766_v10 = vadd.f32 %v4805_v46, %v1066_v5 }
 0x164   :  { %2675 = vst [vmem:[#allocation2 + $0x1b0] sm:$0xff] %v3758_v7  ;;  %v3764_v11 = vadd.f32 %v3763_v8, %v3527_v3 }
 0x165   :  { %2673 = vst [vmem:[#allocation2 + $0x1a0] sm:$0xff] %v3761_v9  ;;  %v3767_v12 = vadd.f32 %v3766_v10, %v2193_v6  ;;  %v3386_v15 = vpop.f32.mrb[56].mxu1 }
 0x166   :  { %2676 = vst [vmem:[#allocation2 + $0x1b8] sm:$0xff] %v3764_v11  ;;  %v1087_v16 = vadd.f32 %v3386_v15, %v4791_v29  ;;  %v1078_v17 = vpop.f32.mrb[57].mxu1  ;;  %v3530_v18 = vpop.f32.mrb[56].mxu0 }
 0x167   :  { %2674 = vst [vmem:[#allocation2 + $0x1a8] sm:$0xff] %v3767_v12  ;;  %v1079_v13 = vadd.f32 %v4791_v29, %v1078_v17  ;;  %v3387_v19 = vpop.f32.mrb[58].mxu1  ;;  %v2206_v20 = vpop.f32.mrb[57].mxu0 }
 0x168   :  { %v3769_v22 = vadd.f32 %v4805_v46, %v1087_v16  ;;  %v1090_v21 = vadd.f32 %v3387_v19, %v4791_v29  ;;  %v1081_v23 = vpop.f32.mrb[59].mxu1  ;;  %v3531_v24 = vpop.f32.mrb[58].mxu0 }
 0x169   :  { %v3772_v25 = vadd.f32 %v4805_v46, %v1079_v13  ;;  %v1082_v26 = vadd.f32 %v4791_v29, %v1081_v23  ;;  %v2209_v14 = vpop.f32.mrb[59].mxu0 }
 0x16a   :  { %v3770_v28 = vadd.f32 %v3769_v22, %v3530_v18  ;;  %v3775_v30 = vadd.f32 %v4805_v46, %v1090_v21 }
 0x16b   :  { %v3773_v31 = vadd.f32 %v3772_v25, %v2206_v20  ;;  %v3778_v32 = vadd.f32 %v4805_v46, %v1082_v26 }
 0x16c   :  { %2679 = vst [vmem:[#allocation2 + $0x1d0] sm:$0xff] %v3770_v28  ;;  %v3776_v33 = vadd.f32 %v3775_v30, %v3531_v24  ;;  %v5007_v24 = vld [vmem:[%s5146_s5] ss:$0 sm:$0xff] }
 0x16d   :  { %2677 = vst [vmem:[#allocation2 + $0x1c0] sm:$0xff] %v3773_v31  ;;  %v3779_v34 = vadd.f32 %v3778_v32, %v2209_v14  ;;  %v3390_v35 = vpop.f32.mrb[60].mxu1 }
 0x16e   :  { %2680 = vst [vmem:[#allocation2 + $0x1d8] sm:$0xff] %v3776_v33  ;;  %v1103_v36 = vadd.f32 %v3390_v35, %v4791_v29  ;;  %v1094_v27 = vpop.f32.mrb[61].mxu1  ;;  %v3534_v37 = vpop.f32.mrb[60].mxu0 }
 0x16f   :  { %2678 = vst [vmem:[#allocation2 + $0x1c8] sm:$0xff] %v3779_v34  ;;  %v1095_v38 = vadd.f32 %v4791_v29, %v1094_v27  ;;  %v3391_v39 = vpop.f32.mrb[62].mxu1  ;;  %v2222_v40 = vpop.f32.mrb[61].mxu0 }
 0x170   :  { %v3781_v41 = vadd.f32 %v4805_v46, %v1103_v36  ;;  %v1106_v42 = vadd.f32 %v3391_v39, %v4791_v29  ;;  %v1097_v43 = vpop.f32.mrb[63].mxu1  ;;  %v3535_v44 = vpop.f32.mrb[62].mxu0  ;;  %v5017_v39 = vld [vmem:[%s5148_s7] ss:$0 sm:$0xff]  ;;  %s4096_s7 = smov [#allocation2]  }
 0x171   :  { %v3784_v45 = vadd.f32 %v4805_v46, %v1095_v38  ;;  %v1098_v47 = vadd.f32 %v4791_v29, %v1097_v43  ;;  %v2225_v48 = vpop.f32.mrb[63].mxu0  ;;  %s2754_s15 = sshll.u32 %s4096_s7, 4  ;;  %s2755_s15 = int_to_ptr.vmem [resolvable:$true] %s2754_s15 }
 0x172   :  { %v3782_v49 = vadd.f32 %v3781_v41, %v3534_v37  ;;  %v3787_v50 = vadd.f32 %v4805_v46, %v1106_v42  ;;  %s4072_s16 = scalar_lea.vmem %s2755_s15, 16384  ;;  %p4077_p1 = scmp.lt.s32.totalorder %s2755_s15, %s2755_s15 }
 0x173   :  { %v3785_v51 = vadd.f32 %v3784_v45, %v2222_v40  ;;  %v3790_v52 = vadd.f32 %v4805_v46, %v1098_v47  ;;  %p4073_p0 = scmp.ne.s32.totalorder %s2755_s15, %s4072_s16  ;;  %p4078_p2 = scmp.lt.s32.totalorder %s4072_s16, %s4072_s16 }
 0x174   :  { %2683 = vst [vmem:[#allocation2 + $0x1f0] sm:$0xff] %v3782_v49  ;;  %v3788_v53 = vadd.f32 %v3787_v50, %v3535_v44 }
 0x175   :  { %2681 = vst [vmem:[#allocation2 + $0x1e0] sm:$0xff] %v3785_v51  ;;  %v3791_v54 = vadd.f32 %v3790_v52, %v2225_v48  ;;  %v3394_v55 = vpop.f32.mrb[64].mxu1  ;;  %p4079_p3 = por %p4078_p2, %p4077_p1 }
 0x176   :  { %2684 = vst [vmem:[#allocation2 + $0x1f8] sm:$0xff] %v3788_v53  ;;  %v1119_v56 = vadd.f32 %v3394_v55, %v4791_v29  ;;  %v1110_v57 = vpop.f32.mrb[65].mxu1  ;;  %v3538_v58 = vpop.f32.mrb[64].mxu0 }
 0x177   :  { %2682 = vst [vmem:[#allocation2 + $0x1e8] sm:$0xff] %v3791_v54  ;;  %v1111_v59 = vadd.f32 %v4791_v29, %v1110_v57  ;;  %v3395_v60 = vpop.f32.mrb[66].mxu1  ;;  %v2238_v61 = vpop.f32.mrb[65].mxu0  ;;  %p4080_p4 = pnand %p4079_p3, %p4073_p0 }
 0x178   :  { %v3793_v62 = vadd.f32 %v4805_v46, %v1119_v56  ;;  %v1122_v63 = vadd.f32 %v3395_v60, %v4791_v29  ;;  %v1113_v0 = vpop.f32.mrb[67].mxu1  ;;  %v3539_v1 = vpop.f32.mrb[66].mxu0 }
 0x179   :  { %v3796_v2 = vadd.f32 %v4805_v46, %v1111_v59  ;;  %v1114_v3 = vadd.f32 %v4791_v29, %v1113_v0  ;;  %v2241_v4 = vpop.f32.mrb[67].mxu0 }
 0x17a   :  { %v3794_v5 = vadd.f32 %v3793_v62, %v3538_v58  ;;  %v3799_v6 = vadd.f32 %v4805_v46, %v1122_v63 }
 0x17b   :  { %v3797_v7 = vadd.f32 %v3796_v2, %v2238_v61  ;;  %v3802_v8 = vadd.f32 %v4805_v46, %v1114_v3 }
 0x17c   :  { %2687 = vst [vmem:[#allocation2 + $0x210] sm:$0xff] %v3794_v5  ;;  %v3800_v9 = vadd.f32 %v3799_v6, %v3539_v1 }
 0x17d   :  { %2685 = vst [vmem:[#allocation2 + $0x200] sm:$0xff] %v3797_v7  ;;  %v3803_v10 = vadd.f32 %v3802_v8, %v2241_v4  ;;  %v3398_v11 = vpop.f32.mrb[68].mxu1 }
 0x17e   :  { %2688 = vst [vmem:[#allocation2 + $0x218] sm:$0xff] %v3800_v9  ;;  %v1135_v12 = vadd.f32 %v3398_v11, %v4791_v29  ;;  %v1126_v15 = vpop.f32.mrb[69].mxu1  ;;  %v3542_v16 = vpop.f32.mrb[68].mxu0 }
 0x17f   :  { %2686 = vst [vmem:[#allocation2 + $0x208] sm:$0xff] %v3803_v10  ;;  %v1127_v17 = vadd.f32 %v4791_v29, %v1126_v15  ;;  %v3399_v18 = vpop.f32.mrb[70].mxu1  ;;  %v2254_v13 = vpop.f32.mrb[69].mxu0 }
 0x180   :  { %v3805_v19 = vadd.f32 %v4805_v46, %v1135_v12  ;;  %v1138_v20 = vadd.f32 %v3399_v18, %v4791_v29  ;;  %v1129_v22 = vpop.f32.mrb[71].mxu1  ;;  %v3543_v21 = vpop.f32.mrb[70].mxu0 }
 0x181   :  { %v3808_v23 = vadd.f32 %v4805_v46, %v1127_v17  ;;  %v1130_v25 = vadd.f32 %v5007_v24, %v1129_v22  ;;  %v2257_v26 = vpop.f32.mrb[71].mxu0 }
 0x182   :  { %v3806_v14 = vadd.f32 %v3805_v19, %v3542_v16  ;;  %v3811_v28 = vadd.f32 %v4805_v46, %v1138_v20 }
 0x183   :  { %v3809_v30 = vadd.f32 %v3808_v23, %v2254_v13  ;;  %v3814_v31 = vadd.f32 %v4805_v46, %v1130_v25 }
 0x184   :  { %2691 = vst [vmem:[#allocation2 + $0x230] sm:$0xff] %v3806_v14  ;;  %v3812_v29 = vadd.f32 %v3811_v28, %v3543_v21 }
 0x185   :  { %2689 = vst [vmem:[#allocation2 + $0x220] sm:$0xff] %v3809_v30  ;;  %v3815_v32 = vadd.f32 %v3814_v31, %v2257_v26  ;;  %v3402_v33 = vpop.f32.mrb[72].mxu1 }
 0x186   :  { %2692 = vst [vmem:[#allocation2 + $0x238] sm:$0xff] %v3812_v29  ;;  %v1151_v34 = vadd.f32 %v5007_v24, %v3402_v33  ;;  %v1142_v35 = vpop.f32.mrb[73].mxu1  ;;  %v3546_v36 = vpop.f32.mrb[72].mxu0 }
 0x187   :  { %2690 = vst [vmem:[#allocation2 + $0x228] sm:$0xff] %v3815_v32  ;;  %v1143_v27 = vadd.f32 %v5007_v24, %v1142_v35  ;;  %v3403_v37 = vpop.f32.mrb[74].mxu1  ;;  %v2270_v38 = vpop.f32.mrb[73].mxu0 }
 0x188   :  { %v3817_v46 = vadd.f32 %v5017_v39, %v1151_v34  ;;  %v1154_v40 = vadd.f32 %v5007_v24, %v3403_v37  ;;  %v1145_v41 = vpop.f32.mrb[75].mxu1  ;;  %v3547_v42 = vpop.f32.mrb[74].mxu0 }
 0x189   :  { %v3820_v43 = vadd.f32 %v5017_v39, %v1143_v27  ;;  %v1146_v44 = vadd.f32 %v5007_v24, %v1145_v41  ;;  %v2273_v45 = vpop.f32.mrb[75].mxu0 }
 0x18a   :  { %v3818_v47 = vadd.f32 %v3817_v46, %v3546_v36  ;;  %v3823_v48 = vadd.f32 %v5017_v39, %v1154_v40 }
 0x18b   :  { %v3821_v49 = vadd.f32 %v3820_v43, %v2270_v38  ;;  %v3826_v50 = vadd.f32 %v5017_v39, %v1146_v44 }
 0x18c   :  { %2695 = vst [vmem:[#allocation2 + $0x250] sm:$0xff] %v3818_v47  ;;  %v3824_v51 = vadd.f32 %v3823_v48, %v3547_v42 }
 0x18d   :  { %2693 = vst [vmem:[#allocation2 + $0x240] sm:$0xff] %v3821_v49  ;;  %v3827_v52 = vadd.f32 %v3826_v50, %v2273_v45  ;;  %v3406_v53 = vpop.f32.mrb[76].mxu1 }
 0x18e   :  { %2696 = vst [vmem:[#allocation2 + $0x258] sm:$0xff] %v3824_v51  ;;  %v1167_v54 = vadd.f32 %v5007_v24, %v3406_v53  ;;  %v1158_v55 = vpop.f32.mrb[77].mxu1  ;;  %v3550_v56 = vpop.f32.mrb[76].mxu0 }
 0x18f   :  { %2694 = vst [vmem:[#allocation2 + $0x248] sm:$0xff] %v3827_v52  ;;  %v1159_v57 = vadd.f32 %v5007_v24, %v1158_v55  ;;  %v3407_v58 = vpop.f32.mrb[78].mxu1  ;;  %v2286_v59 = vpop.f32.mrb[77].mxu0 }
 0x190   :  { %v3829_v60 = vadd.f32 %v5017_v39, %v1167_v54  ;;  %v1170_v61 = vadd.f32 %v5007_v24, %v3407_v58  ;;  %v1161_v62 = vpop.f32.mrb[79].mxu1  ;;  %v3551_v63 = vpop.f32.mrb[78].mxu0 }
 0x191   :  { %v3832_v0 = vadd.f32 %v5017_v39, %v1159_v57  ;;  %v1162_v1 = vadd.f32 %v5007_v24, %v1161_v62  ;;  %v2289_v2 = vpop.f32.mrb[79].mxu0 }
 0x192   :  { %v3830_v3 = vadd.f32 %v3829_v60, %v3550_v56  ;;  %v3835_v4 = vadd.f32 %v5017_v39, %v1170_v61 }
 0x193   :  { %v3833_v5 = vadd.f32 %v3832_v0, %v2286_v59  ;;  %v3838_v6 = vadd.f32 %v5017_v39, %v1162_v1 }
 0x194   :  { %2699 = vst [vmem:[#allocation2 + $0x270] sm:$0xff] %v3830_v3  ;;  %v3836_v7 = vadd.f32 %v3835_v4, %v3551_v63 }
 0x195   :  { %2697 = vst [vmem:[#allocation2 + $0x260] sm:$0xff] %v3833_v5  ;;  %v3839_v8 = vadd.f32 %v3838_v6, %v2289_v2  ;;  %v3410_v9 = vpop.f32.mrb[80].mxu1 }
 0x196   :  { %2700 = vst [vmem:[#allocation2 + $0x278] sm:$0xff] %v3836_v7  ;;  %v1183_v10 = vadd.f32 %v5007_v24, %v3410_v9  ;;  %v1174_v11 = vpop.f32.mrb[81].mxu1  ;;  %v3554_v12 = vpop.f32.mrb[80].mxu0 }
 0x197   :  { %2698 = vst [vmem:[#allocation2 + $0x268] sm:$0xff] %v3839_v8  ;;  %v1175_v15 = vadd.f32 %v5007_v24, %v1174_v11  ;;  %v3411_v16 = vpop.f32.mrb[82].mxu1  ;;  %v2302_v17 = vpop.f32.mrb[81].mxu0 }
 0x198   :  { %v3841_v18 = vadd.f32 %v5017_v39, %v1183_v10  ;;  %v1186_v13 = vadd.f32 %v5007_v24, %v3411_v16  ;;  %v1177_v19 = vpop.f32.mrb[83].mxu1  ;;  %v3555_v20 = vpop.f32.mrb[82].mxu0 }
 0x199   :  { %v3844_v22 = vadd.f32 %v5017_v39, %v1175_v15  ;;  %v1178_v21 = vadd.f32 %v5007_v24, %v1177_v19  ;;  %v2305_v23 = vpop.f32.mrb[83].mxu0 }
 0x19a   :  { %v3842_v25 = vadd.f32 %v3841_v18, %v3554_v12  ;;  %v3847_v26 = vadd.f32 %v5017_v39, %v1186_v13 }
 0x19b   :  { %v3845_v14 = vadd.f32 %v3844_v22, %v2302_v17  ;;  %v3850_v28 = vadd.f32 %v5017_v39, %v1178_v21 }
 0x19c   :  { %2703 = vst [vmem:[#allocation2 + $0x290] sm:$0xff] %v3842_v25  ;;  %v3848_v30 = vadd.f32 %v3847_v26, %v3555_v20 }
 0x19d   :  { %2701 = vst [vmem:[#allocation2 + $0x280] sm:$0xff] %v3845_v14  ;;  %v3851_v31 = vadd.f32 %v3850_v28, %v2305_v23  ;;  %v3414_v29 = vpop.f32.mrb[84].mxu1 }
 0x19e   :  { %2704 = vst [vmem:[#allocation2 + $0x298] sm:$0xff] %v3848_v30  ;;  %v1199_v32 = vadd.f32 %v5007_v24, %v3414_v29  ;;  %v1190_v33 = vpop.f32.mrb[85].mxu1  ;;  %v3558_v34 = vpop.f32.mrb[84].mxu0 }
 0x19f   :  { %2702 = vst [vmem:[#allocation2 + $0x288] sm:$0xff] %v3851_v31  ;;  %v1191_v35 = vadd.f32 %v5007_v24, %v1190_v33  ;;  %v3415_v36 = vpop.f32.mrb[86].mxu1  ;;  %v2318_v27 = vpop.f32.mrb[85].mxu0 }
 0x1a0   :  { %v3853_v37 = vadd.f32 %v5017_v39, %v1199_v32  ;;  %v1202_v38 = vadd.f32 %v5007_v24, %v3415_v36  ;;  %v1193_v46 = vpop.f32.mrb[87].mxu1  ;;  %v3559_v40 = vpop.f32.mrb[86].mxu0 }
 0x1a1   :  { %v3856_v41 = vadd.f32 %v5017_v39, %v1191_v35  ;;  %v1194_v42 = vadd.f32 %v5007_v24, %v1193_v46  ;;  %v2321_v43 = vpop.f32.mrb[87].mxu0 }
 0x1a2   :  { %v3854_v44 = vadd.f32 %v3853_v37, %v3558_v34  ;;  %v3859_v45 = vadd.f32 %v5017_v39, %v1202_v38 }
 0x1a3   :  { %v3857_v47 = vadd.f32 %v3856_v41, %v2318_v27  ;;  %v3862_v48 = vadd.f32 %v5017_v39, %v1194_v42 }
 0x1a4   :  { %2707 = vst [vmem:[#allocation2 + $0x2b0] sm:$0xff] %v3854_v44  ;;  %v3860_v49 = vadd.f32 %v3859_v45, %v3559_v40 }
 0x1a5   :  { %2705 = vst [vmem:[#allocation2 + $0x2a0] sm:$0xff] %v3857_v47  ;;  %v3863_v50 = vadd.f32 %v3862_v48, %v2321_v43  ;;  %v3418_v51 = vpop.f32.mrb[88].mxu1 }
 0x1a6   :  { %2708 = vst [vmem:[#allocation2 + $0x2b8] sm:$0xff] %v3860_v49  ;;  %v1215_v52 = vadd.f32 %v5007_v24, %v3418_v51  ;;  %v1206_v53 = vpop.f32.mrb[89].mxu1  ;;  %v3562_v54 = vpop.f32.mrb[88].mxu0 }
 0x1a7   :  { %2706 = vst [vmem:[#allocation2 + $0x2a8] sm:$0xff] %v3863_v50  ;;  %v1207_v55 = vadd.f32 %v5007_v24, %v1206_v53  ;;  %v3419_v56 = vpop.f32.mrb[90].mxu1  ;;  %v2334_v57 = vpop.f32.mrb[89].mxu0 }
 0x1a8   :  { %v3865_v58 = vadd.f32 %v5017_v39, %v1215_v52  ;;  %v1218_v59 = vadd.f32 %v5007_v24, %v3419_v56  ;;  %v1209_v60 = vpop.f32.mrb[91].mxu1  ;;  %v3563_v61 = vpop.f32.mrb[90].mxu0 }
 0x1a9   :  { %v3868_v62 = vadd.f32 %v5017_v39, %v1207_v55  ;;  %v1210_v63 = vadd.f32 %v5007_v24, %v1209_v60  ;;  %v2337_v0 = vpop.f32.mrb[91].mxu0 }
 0x1aa   :  { %v3866_v1 = vadd.f32 %v3865_v58, %v3562_v54  ;;  %v3871_v2 = vadd.f32 %v5017_v39, %v1218_v59 }
 0x1ab   :  { %v3869_v3 = vadd.f32 %v3868_v62, %v2334_v57  ;;  %v3874_v4 = vadd.f32 %v5017_v39, %v1210_v63 }
 0x1ac   :  { %2711 = vst [vmem:[#allocation2 + $0x2d0] sm:$0xff] %v3866_v1  ;;  %v3872_v5 = vadd.f32 %v3871_v2, %v3563_v61 }
 0x1ad   :  { %2709 = vst [vmem:[#allocation2 + $0x2c0] sm:$0xff] %v3869_v3  ;;  %v3875_v6 = vadd.f32 %v3874_v4, %v2337_v0  ;;  %v3422_v7 = vpop.f32.mrb[92].mxu1 }
 0x1ae   :  { %2712 = vst [vmem:[#allocation2 + $0x2d8] sm:$0xff] %v3872_v5  ;;  %v1231_v8 = vadd.f32 %v5007_v24, %v3422_v7  ;;  %v1222_v9 = vpop.f32.mrb[93].mxu1  ;;  %v3566_v10 = vpop.f32.mrb[92].mxu0 }
 0x1af   :  { %2710 = vst [vmem:[#allocation2 + $0x2c8] sm:$0xff] %v3875_v6  ;;  %v1223_v11 = vadd.f32 %v5007_v24, %v1222_v9  ;;  %v3423_v12 = vpop.f32.mrb[94].mxu1  ;;  %v2350_v15 = vpop.f32.mrb[93].mxu0 }
 0x1b0   :  { %v3877_v16 = vadd.f32 %v5017_v39, %v1231_v8  ;;  %v1234_v17 = vadd.f32 %v5007_v24, %v3423_v12  ;;  %v1225_v18 = vpop.f32.mrb[95].mxu1  ;;  %v3567_v13 = vpop.f32.mrb[94].mxu0 }
 0x1b1   :  { %v3880_v19 = vadd.f32 %v5017_v39, %v1223_v11  ;;  %v1226_v20 = vadd.f32 %v5007_v24, %v1225_v18  ;;  %v2353_v22 = vpop.f32.mrb[95].mxu0 }
 0x1b2   :  { %v3878_v21 = vadd.f32 %v3877_v16, %v3566_v10  ;;  %v3883_v23 = vadd.f32 %v5017_v39, %v1234_v17 }
 0x1b3   :  { %v3881_v25 = vadd.f32 %v3880_v19, %v2350_v15  ;;  %v3886_v26 = vadd.f32 %v5017_v39, %v1226_v20 }
 0x1b4   :  { %2715 = vst [vmem:[#allocation2 + $0x2f0] sm:$0xff] %v3878_v21  ;;  %v3884_v14 = vadd.f32 %v3883_v23, %v3567_v13 }
 0x1b5   :  { %2713 = vst [vmem:[#allocation2 + $0x2e0] sm:$0xff] %v3881_v25  ;;  %v3887_v28 = vadd.f32 %v3886_v26, %v2353_v22  ;;  %v3426_v30 = vpop.f32.mrb[96].mxu1 }
 0x1b6   :  { %2716 = vst [vmem:[#allocation2 + $0x2f8] sm:$0xff] %v3884_v14  ;;  %v1247_v31 = vadd.f32 %v5007_v24, %v3426_v30  ;;  %v1238_v29 = vpop.f32.mrb[97].mxu1  ;;  %v3570_v32 = vpop.f32.mrb[96].mxu0 }
 0x1b7   :  { %2714 = vst [vmem:[#allocation2 + $0x2e8] sm:$0xff] %v3887_v28  ;;  %v1239_v33 = vadd.f32 %v5007_v24, %v1238_v29  ;;  %v3427_v34 = vpop.f32.mrb[98].mxu1  ;;  %v2366_v35 = vpop.f32.mrb[97].mxu0 }
 0x1b8   :  { %v3889_v36 = vadd.f32 %v5017_v39, %v1247_v31  ;;  %v1250_v27 = vadd.f32 %v5007_v24, %v3427_v34  ;;  %v1241_v37 = vpop.f32.mrb[99].mxu1  ;;  %v3571_v38 = vpop.f32.mrb[98].mxu0 }
 0x1b9   :  { %v3892_v46 = vadd.f32 %v5017_v39, %v1239_v33  ;;  %v1242_v40 = vadd.f32 %v5007_v24, %v1241_v37  ;;  %v2369_v41 = vpop.f32.mrb[99].mxu0 }
 0x1ba   :  { %v3890_v42 = vadd.f32 %v3889_v36, %v3570_v32  ;;  %v3895_v43 = vadd.f32 %v5017_v39, %v1250_v27 }
 0x1bb   :  { %v3893_v44 = vadd.f32 %v3892_v46, %v2366_v35  ;;  %v3898_v45 = vadd.f32 %v5017_v39, %v1242_v40 }
 0x1bc   :  { %2719 = vst [vmem:[#allocation2 + $0x310] sm:$0xff] %v3890_v42  ;;  %v3896_v47 = vadd.f32 %v3895_v43, %v3571_v38 }
 0x1bd   :  { %2717 = vst [vmem:[#allocation2 + $0x300] sm:$0xff] %v3893_v44  ;;  %v3899_v48 = vadd.f32 %v3898_v45, %v2369_v41  ;;  %v3430_v49 = vpop.f32.mrb[100].mxu1 }
 0x1be   :  { %2720 = vst [vmem:[#allocation2 + $0x318] sm:$0xff] %v3896_v47  ;;  %v1263_v50 = vadd.f32 %v5007_v24, %v3430_v49  ;;  %v1254_v51 = vpop.f32.mrb[101].mxu1  ;;  %v3574_v52 = vpop.f32.mrb[100].mxu0 }
 0x1bf   :  { %2718 = vst [vmem:[#allocation2 + $0x308] sm:$0xff] %v3899_v48  ;;  %v1255_v53 = vadd.f32 %v5007_v24, %v1254_v51  ;;  %v3431_v54 = vpop.f32.mrb[102].mxu1  ;;  %v2382_v55 = vpop.f32.mrb[101].mxu0 }
 0x1c0   :  { %v3901_v56 = vadd.f32 %v5017_v39, %v1263_v50  ;;  %v1266_v57 = vadd.f32 %v5007_v24, %v3431_v54  ;;  %v1257_v58 = vpop.f32.mrb[103].mxu1  ;;  %v3575_v59 = vpop.f32.mrb[102].mxu0 }
 0x1c1   :  { %v3904_v60 = vadd.f32 %v5017_v39, %v1255_v53  ;;  %v1258_v61 = vadd.f32 %v5007_v24, %v1257_v58  ;;  %v2385_v62 = vpop.f32.mrb[103].mxu0 }
 0x1c2   :  { %v3902_v63 = vadd.f32 %v3901_v56, %v3574_v52  ;;  %v3907_v0 = vadd.f32 %v5017_v39, %v1266_v57 }
 0x1c3   :  { %v3905_v1 = vadd.f32 %v3904_v60, %v2382_v55  ;;  %v3910_v2 = vadd.f32 %v5017_v39, %v1258_v61 }
 0x1c4   :  { %2723 = vst [vmem:[#allocation2 + $0x330] sm:$0xff] %v3902_v63  ;;  %v3908_v3 = vadd.f32 %v3907_v0, %v3575_v59 }
 0x1c5   :  { %2721 = vst [vmem:[#allocation2 + $0x320] sm:$0xff] %v3905_v1  ;;  %v3911_v4 = vadd.f32 %v3910_v2, %v2385_v62  ;;  %v3434_v5 = vpop.f32.mrb[104].mxu1 }
 0x1c6   :  { %2724 = vst [vmem:[#allocation2 + $0x338] sm:$0xff] %v3908_v3  ;;  %v1279_v6 = vadd.f32 %v5007_v24, %v3434_v5  ;;  %v1270_v7 = vpop.f32.mrb[105].mxu1  ;;  %v3578_v8 = vpop.f32.mrb[104].mxu0 }
 0x1c7   :  { %2722 = vst [vmem:[#allocation2 + $0x328] sm:$0xff] %v3911_v4  ;;  %v1271_v9 = vadd.f32 %v5007_v24, %v1270_v7  ;;  %v3435_v10 = vpop.f32.mrb[106].mxu1  ;;  %v2398_v11 = vpop.f32.mrb[105].mxu0 }
 0x1c8   :  { %v3913_v12 = vadd.f32 %v5017_v39, %v1279_v6  ;;  %v1282_v15 = vadd.f32 %v5007_v24, %v3435_v10  ;;  %v1273_v16 = vpop.f32.mrb[107].mxu1  ;;  %v3579_v17 = vpop.f32.mrb[106].mxu0 }
 0x1c9   :  { %v3916_v18 = vadd.f32 %v5017_v39, %v1271_v9  ;;  %v1274_v13 = vadd.f32 %v5007_v24, %v1273_v16  ;;  %v2401_v19 = vpop.f32.mrb[107].mxu0 }
 0x1ca   :  { %v3914_v20 = vadd.f32 %v3913_v12, %v3578_v8  ;;  %v3919_v22 = vadd.f32 %v5017_v39, %v1282_v15 }
 0x1cb   :  { %v3917_v21 = vadd.f32 %v3916_v18, %v2398_v11  ;;  %v3922_v23 = vadd.f32 %v5017_v39, %v1274_v13 }
 0x1cc   :  { %2727 = vst [vmem:[#allocation2 + $0x350] sm:$0xff] %v3914_v20  ;;  %v3920_v25 = vadd.f32 %v3919_v22, %v3579_v17 }
 0x1cd   :  { %2725 = vst [vmem:[#allocation2 + $0x340] sm:$0xff] %v3917_v21  ;;  %v3923_v26 = vadd.f32 %v3922_v23, %v2401_v19  ;;  %v3438_v14 = vpop.f32.mrb[108].mxu1 }
 0x1ce   :  { %2728 = vst [vmem:[#allocation2 + $0x358] sm:$0xff] %v3920_v25  ;;  %v1295_v28 = vadd.f32 %v5007_v24, %v3438_v14  ;;  %v1286_v30 = vpop.f32.mrb[109].mxu1  ;;  %v3582_v31 = vpop.f32.mrb[108].mxu0 }
 0x1cf   :  { %2726 = vst [vmem:[#allocation2 + $0x348] sm:$0xff] %v3923_v26  ;;  %v1287_v29 = vadd.f32 %v5007_v24, %v1286_v30  ;;  %v3439_v32 = vpop.f32.mrb[110].mxu1  ;;  %v2414_v33 = vpop.f32.mrb[109].mxu0 }
 0x1d0   :  { %v3925_v34 = vadd.f32 %v5017_v39, %v1295_v28  ;;  %v1298_v35 = vadd.f32 %v5007_v24, %v3439_v32  ;;  %v1289_v36 = vpop.f32.mrb[111].mxu1  ;;  %v3583_v27 = vpop.f32.mrb[110].mxu0 }
 0x1d1   :  { %v3928_v37 = vadd.f32 %v5017_v39, %v1287_v29  ;;  %v1290_v38 = vadd.f32 %v5007_v24, %v1289_v36  ;;  %v2417_v46 = vpop.f32.mrb[111].mxu0 }
 0x1d2   :  { %v3926_v40 = vadd.f32 %v3925_v34, %v3582_v31  ;;  %v3931_v41 = vadd.f32 %v5017_v39, %v1298_v35 }
 0x1d3   :  { %v3929_v42 = vadd.f32 %v3928_v37, %v2414_v33  ;;  %v3934_v43 = vadd.f32 %v5017_v39, %v1290_v38 }
 0x1d4   :  { %2731 = vst [vmem:[#allocation2 + $0x370] sm:$0xff] %v3926_v40  ;;  %v3932_v44 = vadd.f32 %v3931_v41, %v3583_v27 }
 0x1d5   :  { %2729 = vst [vmem:[#allocation2 + $0x360] sm:$0xff] %v3929_v42  ;;  %v3935_v45 = vadd.f32 %v3934_v43, %v2417_v46  ;;  %v3442_v47 = vpop.f32.mrb[112].mxu1 }
 0x1d6   :  { %2732 = vst [vmem:[#allocation2 + $0x378] sm:$0xff] %v3932_v44  ;;  %v1311_v48 = vadd.f32 %v5007_v24, %v3442_v47  ;;  %v1302_v49 = vpop.f32.mrb[113].mxu1  ;;  %v3586_v50 = vpop.f32.mrb[112].mxu0 }
 0x1d7   :  { %2730 = vst [vmem:[#allocation2 + $0x368] sm:$0xff] %v3935_v45  ;;  %v1303_v51 = vadd.f32 %v5007_v24, %v1302_v49  ;;  %v3443_v52 = vpop.f32.mrb[114].mxu1  ;;  %v2430_v53 = vpop.f32.mrb[113].mxu0 }
 0x1d8   :  { %v3937_v54 = vadd.f32 %v5017_v39, %v1311_v48  ;;  %v1314_v55 = vadd.f32 %v5007_v24, %v3443_v52  ;;  %v1305_v56 = vpop.f32.mrb[115].mxu1  ;;  %v3587_v57 = vpop.f32.mrb[114].mxu0 }
 0x1d9   :  { %v3940_v58 = vadd.f32 %v5017_v39, %v1303_v51  ;;  %v1306_v59 = vadd.f32 %v5007_v24, %v1305_v56  ;;  %v2433_v60 = vpop.f32.mrb[115].mxu0 }
 0x1da   :  { %v3938_v61 = vadd.f32 %v3937_v54, %v3586_v50  ;;  %v3943_v62 = vadd.f32 %v5017_v39, %v1314_v55 }
 0x1db   :  { %v3941_v63 = vadd.f32 %v3940_v58, %v2430_v53  ;;  %v3946_v0 = vadd.f32 %v5017_v39, %v1306_v59 }
 0x1dc   :  { %2735 = vst [vmem:[#allocation2 + $0x390] sm:$0xff] %v3938_v61  ;;  %v3944_v1 = vadd.f32 %v3943_v62, %v3587_v57 }
 0x1dd   :  { %2733 = vst [vmem:[#allocation2 + $0x380] sm:$0xff] %v3941_v63  ;;  %v3947_v2 = vadd.f32 %v3946_v0, %v2433_v60  ;;  %v3446_v3 = vpop.f32.mrb[116].mxu1 }
 0x1de   :  { %2736 = vst [vmem:[#allocation2 + $0x398] sm:$0xff] %v3944_v1  ;;  %v1327_v4 = vadd.f32 %v5007_v24, %v3446_v3  ;;  %v1318_v5 = vpop.f32.mrb[117].mxu1  ;;  %v3590_v6 = vpop.f32.mrb[116].mxu0 }
 0x1df   :  { %2734 = vst [vmem:[#allocation2 + $0x388] sm:$0xff] %v3947_v2  ;;  %v1319_v7 = vadd.f32 %v5007_v24, %v1318_v5  ;;  %v3447_v8 = vpop.f32.mrb[118].mxu1  ;;  %v2446_v9 = vpop.f32.mrb[117].mxu0 }
 0x1e0   :  { %v3949_v10 = vadd.f32 %v5017_v39, %v1327_v4  ;;  %v1330_v11 = vadd.f32 %v5007_v24, %v3447_v8  ;;  %v1321_v12 = vpop.f32.mrb[119].mxu1  ;;  %v3591_v15 = vpop.f32.mrb[118].mxu0 }
 0x1e1   :  { %v3952_v16 = vadd.f32 %v5017_v39, %v1319_v7  ;;  %v1322_v17 = vadd.f32 %v5007_v24, %v1321_v12  ;;  %v2449_v18 = vpop.f32.mrb[119].mxu0 }
 0x1e2   :  { %v3950_v13 = vadd.f32 %v3949_v10, %v3590_v6  ;;  %v3955_v19 = vadd.f32 %v5017_v39, %v1330_v11 }
 0x1e3   :  { %v3953_v20 = vadd.f32 %v3952_v16, %v2446_v9  ;;  %v3958_v22 = vadd.f32 %v5017_v39, %v1322_v17 }
 0x1e4   :  { %2739 = vst [vmem:[#allocation2 + $0x3b0] sm:$0xff] %v3950_v13  ;;  %v3956_v21 = vadd.f32 %v3955_v19, %v3591_v15 }
 0x1e5   :  { %2737 = vst [vmem:[#allocation2 + $0x3a0] sm:$0xff] %v3953_v20  ;;  %v3959_v23 = vadd.f32 %v3958_v22, %v2449_v18  ;;  %v3450_v25 = vpop.f32.mrb[120].mxu1 }
 0x1e6   :  { %2740 = vst [vmem:[#allocation2 + $0x3b8] sm:$0xff] %v3956_v21  ;;  %v1343_v26 = vadd.f32 %v5007_v24, %v3450_v25  ;;  %v1334_v14 = vpop.f32.mrb[121].mxu1  ;;  %v3594_v28 = vpop.f32.mrb[120].mxu0 }
 0x1e7   :  { %2738 = vst [vmem:[#allocation2 + $0x3a8] sm:$0xff] %v3959_v23  ;;  %v1335_v30 = vadd.f32 %v5007_v24, %v1334_v14  ;;  %v3451_v31 = vpop.f32.mrb[122].mxu1  ;;  %v2462_v29 = vpop.f32.mrb[121].mxu0 }
 0x1e8   :  { %v3961_v32 = vadd.f32 %v5017_v39, %v1343_v26  ;;  %v1346_v33 = vadd.f32 %v5007_v24, %v3451_v31  ;;  %v1337_v34 = vpop.f32.mrb[123].mxu1  ;;  %v3595_v35 = vpop.f32.mrb[122].mxu0 }
 0x1e9   :  { %v3964_v36 = vadd.f32 %v5017_v39, %v1335_v30  ;;  %v1338_v27 = vadd.f32 %v5007_v24, %v1337_v34  ;;  %v2465_v37 = vpop.f32.mrb[123].mxu0 }
 0x1ea   :  { %v3962_v38 = vadd.f32 %v3961_v32, %v3594_v28  ;;  %v3967_v46 = vadd.f32 %v5017_v39, %v1346_v33 }
 0x1eb   :  { %v3965_v40 = vadd.f32 %v3964_v36, %v2462_v29  ;;  %v3970_v41 = vadd.f32 %v5017_v39, %v1338_v27 }
 0x1ec   :  { %2743 = vst [vmem:[#allocation2 + $0x3d0] sm:$0xff] %v3962_v38  ;;  %v3968_v42 = vadd.f32 %v3967_v46, %v3595_v35 }
 0x1ed   :  { %2741 = vst [vmem:[#allocation2 + $0x3c0] sm:$0xff] %v3965_v40  ;;  %v3971_v43 = vadd.f32 %v3970_v41, %v2465_v37  ;;  %v3454_v44 = vpop.f32.mrb[124].mxu1 }
 0x1ee   :  { %2744 = vst [vmem:[#allocation2 + $0x3d8] sm:$0xff] %v3968_v42  ;;  %v1359_v45 = vadd.f32 %v5007_v24, %v3454_v44  ;;  %v1350_v47 = vpop.f32.mrb[125].mxu1  ;;  %v3598_v48 = vpop.f32.mrb[124].mxu0 }
 0x1ef   :  { %2742 = vst [vmem:[#allocation2 + $0x3c8] sm:$0xff] %v3971_v43  ;;  %v1351_v49 = vadd.f32 %v5007_v24, %v1350_v47  ;;  %v3455_v50 = vpop.f32.mrb[126].mxu1  ;;  %v2478_v51 = vpop.f32.mrb[125].mxu0 }
 0x1f0   :  { %v3973_v52 = vadd.f32 %v5017_v39, %v1359_v45  ;;  %v1362_v53 = vadd.f32 %v5007_v24, %v3455_v50  ;;  %v1353_v54 = vpop.f32.mrb[127].mxu1  ;;  %v3599_v55 = vpop.f32.mrb[126].mxu0 }
 0x1f1   :  { %v3976_v56 = vadd.f32 %v5017_v39, %v1351_v49  ;;  %v1354_v57 = vadd.f32 %v5007_v24, %v1353_v54  ;;  %v2481_v58 = vpop.f32.mrb[127].mxu0 }
 0x1f2   :  { %v3974_v59 = vadd.f32 %v3973_v52, %v3598_v48  ;;  %v3979_v60 = vadd.f32 %v5017_v39, %v1362_v53 }
 0x1f3   :  { %v3977_v61 = vadd.f32 %v3976_v56, %v2478_v51  ;;  %v3982_v62 = vadd.f32 %v5017_v39, %v1354_v57 }
 0x1f4   :  { %2747 = vst [vmem:[#allocation2 + $0x3f0] sm:$0xff] %v3974_v59  ;;  %v3980_v63 = vadd.f32 %v3979_v60, %v3599_v55 }
 0x1f5   :  { %2745 = vst [vmem:[#allocation2 + $0x3e0] sm:$0xff] %v3977_v61  ;;  %v3983_v0 = vadd.f32 %v3982_v62, %v2481_v58 }
 0x1f6   :  { %2748 = vst [vmem:[#allocation2 + $0x3f8] sm:$0xff] %v3980_v63 }
 0x1f7   :  { %2746 = vst [vmem:[#allocation2 + $0x3e8] sm:$0xff] %v3983_v0 }
 0x1f8   :  { %4083 = shalt.err (!%p4080_p4)
}
 0x1f9   :  { %s4084_s19 = scalar_lea.hbm %s5149_s8, 16384 }
 0x1fa   :  { %p4085_p5 = scmp.ne.s32.totalorder %s5149_s8, %s4084_s19  ;;  %p4088_p6 = scmp.lt.u32.totalorder %s4084_s19, %s5149_s8 }
 0x1fc   :  { %p4090_p7 = pnand %p4088_p6, %p4085_p5 }
 0x1fe   :  { %4093 = shalt.err (!%p4090_p7)
}
 0x1ff   :  { %s4097_s23 = smov 128   ;;  %s4098_s24 = smov 8  }
 0x200   :  { %2760 = dma.vmem_to_hbm [thread:$0]  %s2755_s15, 16384, %s5149_s8, [#allocation3], %s4097_s23, %s4097_s23, %s4098_s24  }
 0x201   :  { %4094 = dma.done.wait [#allocation3], 16384  }
 0x202   :  { %4095 = vsyncadd [#allocation3], 4294950912 }
 0x203   :  { %2764 = vsyncpa [#allocation3], 1 }

// kernel: residual_block_forward.5
= control target key start
LH: loop header
LB: loop body
LE: loop exit
PB: predicated region body
PF: predicated region fallthrough
CT: control target
= control target key end

     0   :  { %s8474_s24 = smov 0   ;;  %s8476_s25 = smov 0   ;;  %s9573_s0 = inlined_call_operand.vmem [shape: f32[2,8,8,8,128], index: 0, kind: input, shape index: {}]   ;;  %s9574_s1 = inlined_call_operand.vmem [shape: f32[1,128], index: 1, kind: input, shape index: {}]   ;;  %s9575_s2 = inlined_call_operand.vmem [shape: f32[1,128], index: 2, kind: input, shape index: {}]   ;;  %s9576_s3 = inlined_call_operand.vmem [shape: bf16[9,384,128], index: 3, kind: input, shape index: {}]   ;;  %s9577_s4 = inlined_call_operand.vmem [shape: f32[1,128], index: 4, kind: input, shape index: {}]   ;;  %s9578_s5 = inlined_call_operand.vmem [shape: bf16[2,8,8,8,128], index: 5, kind: output, shape index: {0}]   ;;  %s9579_s6 = inlined_call_operand.vmem [shape: f32[2,1,128], index: 6, kind: output, shape index: {1}]   ;;  %s9580_s7 = inlined_call_operand.vmem [shape: f32[2,1,128], index: 7, kind: output, shape index: {2}]  }
   0x1   :  { %s8478_s26 = smov 0   ;;  %s8480_s27 = smov 0  }
   0x2   :  { %s8482_s28 = smov 0  }
   0x3 LB: > { %s27_s29 = sadd.s32 1, %s8422_s26  ;;  %s30_s30 = sadd.s32 1, %s8426_s27  ;;  %s8430_s28 = sphi %s8482_s28, %s18_s28   ;;  %s8426_s27 = sphi %s8480_s27, %s9594_s27   ;;  %s8422_s26 = sphi %s8478_s26, %s9593_s26   ;;  %s8418_s25 = sphi %s8476_s25, %s9592_s25   ;;  %s8414_s24 = sphi %s8474_s24, %s9591_s24  }
   0x4   : > { %p28_p0 = scmp.ge.s32.totalorder %s27_s29, 9  ;;  %p6039_p1 = scmp.ge.s32.totalorder %s8430_s28, 1 }
   0x5   : > { %p276_p2 = scmp.lt.s32.totalorder %s8430_s28, 19 }
   0x6   : > { %s9596_s29 = smov (%p28_p0, %s27_s29), 0  ;;  %s9598_s30 = smov (!%p28_p0, %s30_s30), %s8426_s27 }
   0x7   : > { %p277_p3 = pnand %p6039_p1, %p276_p2  ;;  %p32_p4 = scmp.ge.s32.totalorder %s9598_s30, 2 }
   0x8   : > { %p327_p5 = scmp.lt.s32.totalorder (!%p277_p3), %s8414_s24, 7  ;;  %p329_p6 = scmp.lt.s32.totalorder (!%p277_p3), %s8418_s25, 1 }
   0x9   : > { %s9600_s30 = smov (%p32_p4, %s9598_s30), 0  ;;  %280 = sbr.rel (%p277_p3) target bundleno = 709 (0x2c5), region = 40 }
   0xa   : > { %9581 = sst [smem:[#allocation3_spill]] %s9600_s30  ;;  %s6046_s8 = sadd.s32 (!%p277_p3), 4294967295, %s8414_s24 }
   0xb   : > { %p341_p7 = scmp.gt.s32.totalorder (!%p277_p3), %s6046_s8, 0  ;;  %p6047_p8 = scmp.lt.s32.totalorder (!%p277_p3), %s6046_s8, 7 }
   0xc   : > { %p6055_p9 = scmp.ne.s32.totalorder (!%p277_p3), %s8414_s24, 0 }
  0x10   : > { %s328_s9 = scalar_select %p327_p5, %s8414_s24, 7 }
  0x11   : > { %s9602_s25 = smov (!%p329_p6, %s8418_s25), 1  ;;  %s9606_s8 = smov (!%p341_p7, %s6046_s8), 0 }
  0x12   : > { %s9604_s9 = smov (!%p327_p5, %s328_s9), 7  ;;  %s6044_s10 = sshll.u32 %s9602_s25, 6  ;;  %v8432_v0 = vmov (!%p6055_p9), 0   ;;  %v8433_v1 = vmov (!%p6055_p9), 0.0  }
  0x13   : > { %s6043_s11 = sshll.u32 %s9604_s9, 3  ;;  %s8512_s15 = scalar_lea.vmem %s9579_s6, %s9602_s25  ;;  %366 = vst [vmem:[#allocation2] sm:$0xff] (!%p6055_p9), %v8432_v0  ;;  %367 = vst [vmem:[#allocation2 + $0x8] sm:$0xff] (!%p6055_p9), %v8432_v0 }
  0x14   : > { %s335_s12 = sadd.s32 %s6044_s10, %s6043_s11  ;;  %s8517_s19 = scalar_lea.vmem %s9580_s7, %s9602_s25  ;;  %368 = vst [vmem:[#allocation2 + $0x10] sm:$0xff] (!%p6055_p9), %v8432_v0  ;;  %369 = vst [vmem:[#allocation2 + $0x18] sm:$0xff] (!%p6055_p9), %v8432_v0 }
  0x15   : > { %s6045_s16 = sshll.u32 %s335_s12, 3  ;;  %s9608_s8 = smov (!%p6047_p8, %s9606_s8), 7  ;;  %370 = vst [vmem:[#allocation2 + $0x20] sm:$0xff] (!%p6055_p9), %v8432_v0  ;;  %371 = vst [vmem:[#allocation2 + $0x28] sm:$0xff] (!%p6055_p9), %v8432_v0 }
  0x16   : > { %s8522_s22 = scalar_lea.vmem %s9573_s0, %s6045_s16  ;;  %s6052_s23 = sshll.u32 %s9608_s8, 3  ;;  %372 = vst [vmem:[#allocation2 + $0x30] sm:$0xff] (!%p6055_p9), %v8432_v0  ;;  %373 = vst [vmem:[#allocation2 + $0x38] sm:$0xff] (!%p6055_p9), %v8432_v0 }
  0x17   : > { %s349_s9 = sadd.s32 %s6052_s23, %s6044_s10  ;;  %365 = sbr.rel (%p6055_p9) target bundleno = 35 (0x23), region = 44  ;;  %374 = vst [vmem:[#allocation2 + $0x40] sm:$0xff] (!%p6055_p9), %v8432_v0  ;;  %375 = vst [vmem:[#allocation2 + $0x48] sm:$0xff] (!%p6055_p9), %v8432_v0 }
  0x18   : > { %s6054_s11 = sshll.u32 %s349_s9, 2  ;;  %376 = vst [vmem:[#allocation2 + $0x50] sm:$0xff] (!%p6055_p9), %v8432_v0  ;;  %377 = vst [vmem:[#allocation2 + $0x58] sm:$0xff] (!%p6055_p9), %v8432_v0 }
  0x19   : > { %s8527_s14 = scalar_lea.vmem %s9578_s5, %s6054_s11  ;;  %378 = vst [vmem:[#allocation2 + $0x60] sm:$0xff] (!%p6055_p9), %v8432_v0  ;;  %379 = vst [vmem:[#allocation2 + $0x68] sm:$0xff] (!%p6055_p9), %v8432_v0 }
  0x1a   : > { %380 = vst [vmem:[#allocation2 + $0x70] sm:$0xff] (!%p6055_p9), %v8432_v0  ;;  %381 = vst [vmem:[#allocation2 + $0x78] sm:$0xff] (!%p6055_p9), %v8432_v0 }
  0x1b   : > { %382 = vst [vmem:[#allocation2 + $0x80] sm:$0xff] (!%p6055_p9), %v8432_v0  ;;  %383 = vst [vmem:[#allocation2 + $0x88] sm:$0xff] (!%p6055_p9), %v8432_v0 }
  0x1c   : > { %384 = vst [vmem:[#allocation2 + $0x90] sm:$0xff] (!%p6055_p9), %v8432_v0  ;;  %385 = vst [vmem:[#allocation2 + $0x98] sm:$0xff] (!%p6055_p9), %v8432_v0 }
  0x1d   : > { %386 = vst [vmem:[#allocation2 + $0xa0] sm:$0xff] (!%p6055_p9), %v8432_v0  ;;  %387 = vst [vmem:[#allocation2 + $0xa8] sm:$0xff] (!%p6055_p9), %v8432_v0 }
  0x1e   : > { %388 = vst [vmem:[#allocation2 + $0xb0] sm:$0xff] %v8432_v0  ;;  %389 = vst [vmem:[#allocation2 + $0xb8] sm:$0xff] %v8432_v0 }
  0x1f   : > { %390 = vst [vmem:[#allocation2 + $0xc0] sm:$0xff] %v8432_v0  ;;  %391 = vst [vmem:[#allocation2 + $0xc8] sm:$0xff] %v8432_v0 }
  0x20   : > { %392 = vst [vmem:[#allocation2 + $0xd0] sm:$0xff] %v8432_v0  ;;  %393 = vst [vmem:[#allocation2 + $0xd8] sm:$0xff] %v8432_v0 }
  0x21   : > { %394 = vst [vmem:[#allocation2 + $0xe0] sm:$0xff] %v8432_v0  ;;  %395 = vst [vmem:[#allocation2 + $0xe8] sm:$0xff] %v8432_v0 }
  0x22   : > { %396 = vst [vmem:[%s8512_s15] sm:$0x1] %v8433_v1  ;;  %397 = vst [vmem:[%s8517_s19] sm:$0x1] %v8433_v1 }
  0x23 PF: > { %p6056_p10 = scmp.le.s32.totalorder %s8414_s24, 0 }
  0x24   : > { %v402_v2 = vld [vmem:[#allocation2 + $0x8] sm:$0xff] (!%p6056_p10)  ;;  %v403_v3 = vld [vmem:[#allocation2 + $0x20] sm:$0xff] (!%p6056_p10)  ;;  %v404_v4 = vld [vmem:[#allocation2 + $0x38] sm:$0xff] (!%p6056_p10) }
  0x25   : > { %401 = sbr.rel (%p6056_p10) target bundleno = 47 (0x2f), region = 48  ;;  %412 = vst [vmem:[#allocation2] sm:$0xff] (!%p6056_p10), %v402_v2  ;;  %413 = vst [vmem:[#allocation2 + $0x18] sm:$0xff] (!%p6056_p10), %v403_v3  ;;  %v405_v5 = vld [vmem:[#allocation2 + $0x50] sm:$0xff] (!%p6056_p10)  ;;  %v406_v6 = vld [vmem:[#allocation2 + $0x68] sm:$0xff] (!%p6056_p10) }
  0x26   : > { %414 = vst [vmem:[#allocation2 + $0x30] sm:$0xff] (!%p6056_p10), %v404_v4  ;;  %415 = vst [vmem:[#allocation2 + $0x48] sm:$0xff] (!%p6056_p10), %v405_v5  ;;  %v410_v10 = vld [vmem:[#allocation2 + $0xc8] sm:$0xff] (!%p6056_p10)  ;;  %v422_v12 = vld [vmem:[#allocation2 + $0x10] sm:$0xff] (!%p6056_p10) }
  0x27   : > { %v407_v7 = vld [vmem:[#allocation2 + $0x80] sm:$0xff] (!%p6056_p10)  ;;  %416 = vst [vmem:[#allocation2 + $0x60] sm:$0xff] (!%p6056_p10), %v406_v6  ;;  %420 = vst [vmem:[#allocation2 + $0xc0] sm:$0xff] (!%p6056_p10), %v410_v10  ;;  %v423_v13 = vld [vmem:[#allocation2 + $0x28] sm:$0xff] (!%p6056_p10) }
  0x28   : > { %417 = vst [vmem:[#allocation2 + $0x78] sm:$0xff] (!%p6056_p10), %v407_v7  ;;  %v408_v8 = vld [vmem:[#allocation2 + $0x98] sm:$0xff] (!%p6056_p10)  ;;  %v411_v11 = vld [vmem:[#allocation2 + $0xe0] sm:$0xff] (!%p6056_p10)  ;;  %432 = vst [vmem:[#allocation2 + $0x8] sm:$0xff] (!%p6056_p10), %v422_v12 }
  0x29   : > { %418 = vst [vmem:[#allocation2 + $0x90] sm:$0xff] (!%p6056_p10), %v408_v8  ;;  %421 = vst [vmem:[#allocation2 + $0xd8] sm:$0xff] (!%p6056_p10), %v411_v11  ;;  %v424_v14 = vld [vmem:[#allocation2 + $0x40] sm:$0xff] (!%p6056_p10)  ;;  %v425_v15 = vld [vmem:[#allocation2 + $0x58] sm:$0xff] (!%p6056_p10) }
  0x2a   : > { %v409_v9 = vld [vmem:[#allocation2 + $0xb0] sm:$0xff] (!%p6056_p10)  ;;  %433 = vst [vmem:[#allocation2 + $0x20] sm:$0xff] (!%p6056_p10), %v423_v13  ;;  %434 = vst [vmem:[#allocation2 + $0x38] sm:$0xff] (!%p6056_p10), %v424_v14  ;;  %v427_v17 = vld [vmem:[#allocation2 + $0x88] sm:$0xff] (!%p6056_p10) }
  0x2b   : > { %419 = vst [vmem:[#allocation2 + $0xa8] sm:$0xff] (!%p6056_p10), %v409_v9  ;;  %v426_v16 = vld [vmem:[#allocation2 + $0x70] sm:$0xff] (!%p6056_p10)  ;;  %435 = vst [vmem:[#allocation2 + $0x50] sm:$0xff] (!%p6056_p10), %v425_v15  ;;  %v428_v18 = vld [vmem:[#allocation2 + $0xa0] sm:$0xff] (!%p6056_p10) }
  0x2c   : > { %436 = vst [vmem:[#allocation2 + $0x68] sm:$0xff] %v426_v16  ;;  %v429_v19 = vld [vmem:[#allocation2 + $0xb8] sm:$0xff]  ;;  %437 = vst [vmem:[#allocation2 + $0x80] sm:$0xff] %v427_v17  ;;  %v430_v20 = vld [vmem:[#allocation2 + $0xd0] sm:$0xff] }
  0x2d   : > { %438 = vst [vmem:[#allocation2 + $0x98] sm:$0xff] %v428_v18  ;;  %439 = vst [vmem:[#allocation2 + $0xb0] sm:$0xff] %v429_v19  ;;  %v431_v21 = vld [vmem:[#allocation2 + $0xe8] sm:$0xff] }
  0x2e   : > { %440 = vst [vmem:[#allocation2 + $0xc8] sm:$0xff] %v430_v20  ;;  %441 = vst [vmem:[#allocation2 + $0xe0] sm:$0xff] %v431_v21 }
  0x2f PF: > { %p6057_p11 = scmp.ge.s32.totalorder %s8414_s24, 8 }
  0x30   : > { %v446_v22 = vld [vmem:[%s8522_s22] sm:$0xff] (!%p6057_p11)  ;;  %v447_v26 = vld [vmem:[%s8522_s22 + $0x8] sm:$0xff] (!%p6057_p11)  ;;  %v448_v27 = vld [vmem:[%s8522_s22 + $0x10] sm:$0xff] (!%p6057_p11)  ;;  %vm565_vm0 = vcmask (!%p6057_p11), 1044480   ;;  %vm566_vm1 = vsmask.f32 (!%p6057_p11), 4354 }
  0x31   : > { %445 = sbr.rel (%p6057_p11) target bundleno = 74 (0x4a), region = 52  ;;  %v6058_v23 = vld [vmem:[%s9574_s1] ss:$0 sm:$0xff] (!%p6057_p11)  ;;  %v449_v31 = vld [vmem:[%s8522_s22 + $0x18] sm:$0xff] (!%p6057_p11)  ;;  %v451_v37 = vld [vmem:[%s8522_s22 + $0x28] sm:$0xff] (!%p6057_p11) }
  0x32   : > { %v6059_v24 = vld [vmem:[%s9575_s2] ss:$0 sm:$0xff] (!%p6057_p11)  ;;  %v461_v25 = vmul.f32 (!%p6057_p11), %v6058_v23, %v446_v22  ;;  %v462_v28 = vmul.f32 (!%p6057_p11), %v6058_v23, %v447_v26  ;;  %v463_v29 = vmul.f32 (!%p6057_p11), %v6058_v23, %v448_v27  ;;  %v464_v35 = vmul.f32 (!%p6057_p11), %v6058_v23, %v449_v31  ;;  %v452_v40 = vld [vmem:[%s8522_s22 + $0x30] sm:$0xff] (!%p6057_p11)  ;;  %v453_v41 = vld [vmem:[%s8522_s22 + $0x38] sm:$0xff] (!%p6057_p11) }
  0x33   : > { %v450_v32 = vld [vmem:[%s8522_s22 + $0x20] sm:$0xff] (!%p6057_p11)  ;;  %v466_v39 = vmul.f32 (!%p6057_p11), %v6058_v23, %v451_v37  ;;  %v467_v48 = vmul.f32 (!%p6057_p11), %v6058_v23, %v452_v40  ;;  %v468_v49 = vmul.f32 (!%p6057_p11), %v6058_v23, %v453_v41  ;;  %v568_v63 = vld [vmem:[#allocation2 + $0x28] sm:$0x1f] (!%p6057_p11)  ;;  %vm8552_vm2 = vmand (!%p6057_p11), %vm565_vm0, %vm566_vm1 }
  0x34   : > { %v476_v30 = vadd.f32 (!%p6057_p11), %v6059_v24, %v461_v25  ;;  %v477_v33 = vadd.f32 (!%p6057_p11), %v6059_v24, %v462_v28  ;;  %v478_v34 = vadd.f32 (!%p6057_p11), %v6059_v24, %v463_v29  ;;  %v465_v36 = vmul.f32 (!%p6057_p11), %v6058_v23, %v450_v32  ;;  %v571_v5 = vld [vmem:[#allocation2 + $0x40] sm:$0x1f] (!%p6057_p11)  ;;  %v574_v10 = vld [vmem:[#allocation2 + $0x58] sm:$0x1f] (!%p6057_p11)  ;;  %v580_v25 = vld [vmem:[#allocation2 + $0x88] sm:$0x1f] (!%p6057_p11) }
  0x35   : > { %v479_v44 = vadd.f32 (!%p6057_p11), %v6059_v24, %v464_v35  ;;  %v481_v47 = vadd.f32 (!%p6057_p11), %v6059_v24, %v466_v39  ;;  %v482_v57 = vadd.f32 (!%p6057_p11), %v6059_v24, %v467_v48  ;;  %v483_v8 = vadd.f32 (!%p6057_p11), %v6059_v24, %v468_v49  ;;  %v586_v40 = vld [vmem:[#allocation2 + $0xb8] sm:$0x1f] (!%p6057_p11) }
  0x36   : > { %v484_v38 = vmax.f32 (!%p6057_p11), %v476_v30, 0.0  ;;  %v485_v42 = vmax.f32 (!%p6057_p11), %v477_v33, 0.0  ;;  %v486_v43 = vmax.f32 (!%p6057_p11), %v478_v34, 0.0  ;;  %v480_v45 = vadd.f32 (!%p6057_p11), %v6059_v24, %v465_v36  ;;  %v577_v24 = vld [vmem:[#allocation2 + $0x70] sm:$0x1f] (!%p6057_p11) }
  0x37   : > { %v487_v52 = vmax.f32 (!%p6057_p11), %v479_v44, 0.0  ;;  %v489_v56 = vmax.f32 (!%p6057_p11), %v481_v47, 0.0  ;;  %v490_v7 = vmax.f32 (!%p6057_p11), %v482_v57, 0.0  ;;  %v583_v30 = vld [vmem:[#allocation2 + $0xa0] sm:$0x1f] (!%p6057_p11)  ;;  %v491_v31 = vmax.f32 (!%p6057_p11), %v483_v8, 0.0 }
  0x38   : > { %v492_v46 = vpack.c.bf16 %v484_v38, %v484_v38  ;;  %v493_v50 = vpack.c.bf16 %v485_v42, %v485_v42  ;;  %v494_v51 = vpack.c.bf16 %v486_v43, %v486_v43  ;;  %v488_v53 = vmax.f32 %v480_v45, 0.0 }
  0x39   : > { %v495_v0 = vpack.c.bf16 %v487_v52, %v487_v52  ;;  %v497_v2 = vpack.c.bf16 %v489_v56, %v489_v56  ;;  %v498_v27 = vpack.c.bf16 %v490_v7, %v490_v7  ;;  %v499_v37 = vpack.c.bf16 %v491_v31, %v491_v31 }
  0x3a   : > { %v501_v54 = vshrl.u32 %v492_v46, 16  ;;  %v504_v55 = vshll.u32 %v492_v46, 16  ;;  %v508_v58 = vshrl.u32 %v493_v50, 16  ;;  %v511_v59 = vshll.u32 %v493_v50, 16  ;;  %v589_v46 = vld [vmem:[#allocation2 + $0xd0] sm:$0x1f] }
  0x3b   : > { %v515_v60 = vshrl.u32 %v494_v51, 16  ;;  %v518_v61 = vshll.u32 %v494_v51, 16  ;;  %v496_v1 = vpack.c.bf16 %v488_v53, %v488_v53  ;;  %v522_v11 = vshrl.u32 %v495_v0, 16 }
  0x3c   : > { %v503_v62 = vrot.slane %v501_v54, 7  ;;  %v510_v4 = vrot.slane %v508_v58, 7  ;;  %v525_v12 = vshll.u32 %v495_v0, 16  ;;  %v536_v17 = vshrl.u32 %v497_v2, 16 }
  0x3d   : > { %v517_v6 = vrot.slane %v515_v60, 7  ;;  %v529_v13 = vshrl.u32 %v496_v1, 16  ;;  %v532_v16 = vshll.u32 %v496_v1, 16  ;;  %v524_v19 = vrot.slane %v522_v11, 7 }
  0x3e   : > { %v506_v9 = vor.u32 %v504_v55, %v503_v62  ;;  %v513_v14 = vor.u32 %v511_v59, %v510_v4  ;;  %v539_v21 = vshll.u32 %v497_v2, 16  ;;  %v538_v26 = vrot.slane %v536_v17, 7 }
  0x3f   : > { %v520_v15 = vor.u32 %v518_v61, %v517_v6  ;;  %v531_v20 = vrot.slane %v529_v13, 7  ;;  %v527_v28 = vor.u32 %v525_v12, %v524_v19  ;;  %v543_v33 = vshrl.u32 %v498_v27, 16 }
  0x40   : > { %v569_v18 = vsel %vm8552_vm2, %v506_v9, %v568_v63  ;;  %v572_v22 = vsel %vm8552_vm2, %v513_v14, %v571_v5  ;;  %v541_v32 = vor.u32 %v539_v21, %v538_v26  ;;  %v546_v34 = vshll.u32 %v498_v27, 16 }
  0x41   : > { %570 = vst [vmem:[#allocation2 + $0x28] sm:$0x1f] %v569_v18  ;;  %v575_v23 = vsel %vm8552_vm2, %v520_v15, %v574_v10  ;;  %573 = vst [vmem:[#allocation2 + $0x40] sm:$0x1f] %v572_v22  ;;  %v534_v29 = vor.u32 %v532_v16, %v531_v20  ;;  %v578_v35 = vsel %vm8552_vm2, %v527_v28, %v577_v24  ;;  %v545_v39 = vrot.slane %v543_v33, 7 }
  0x42   : > { %576 = vst [vmem:[#allocation2 + $0x58] sm:$0x1f] %v575_v23  ;;  %579 = vst [vmem:[#allocation2 + $0x70] sm:$0x1f] %v578_v35  ;;  %v584_v38 = vsel %vm8552_vm2, %v541_v32, %v583_v30  ;;  %v550_v41 = vshrl.u32 %v499_v37, 16  ;;  %v553_v42 = vshll.u32 %v499_v37, 16 }
  0x43   : > { %v581_v36 = vsel %vm8552_vm2, %v534_v29, %v580_v25  ;;  %585 = vst [vmem:[#allocation2 + $0xa0] sm:$0x1f] %v584_v38  ;;  %v548_v43 = vor.u32 %v546_v34, %v545_v39 }
  0x44   : > { %582 = vst [vmem:[#allocation2 + $0x88] sm:$0x1f] %v581_v36  ;;  %v552_v44 = vrot.slane %v550_v41, 7 }
  0x45   : > { %v587_v45 = vsel %vm8552_vm2, %v548_v43, %v586_v40 }
  0x46   : > { %588 = vst [vmem:[#allocation2 + $0xb8] sm:$0x1f] %v587_v45  ;;  %v555_v47 = vor.u32 %v553_v42, %v552_v44 }
  0x48   : > { %v590_v48 = vsel %vm8552_vm2, %v555_v47, %v589_v46 }
  0x49   : > { %591 = vst [vmem:[#allocation2 + $0xd0] sm:$0x1f] %v590_v48 }
  0x4a PF: > { %p6060_p12 = scmp.ne.s32.totalorder %s8414_s24, 8 }
  0x4b   : > { %vm597_vm3 = vcmask (!%p6060_p12), 1044480   ;;  %vm598_vm4 = vsmask.f32 (!%p6060_p12), 4354  ;;  %v600_v49 = vld [vmem:[#allocation2 + $0x28] sm:$0x1f] (!%p6060_p12) }
  0x4c   : > { %595 = sbr.rel (%p6060_p12) target bundleno = 84 (0x54), region = 56  ;;  %vm8573_vm5 = vmand (!%p6060_p12), %vm597_vm3, %vm598_vm4  ;;  %v603_v51 = vld [vmem:[#allocation2 + $0x40] sm:$0x1f] (!%p6060_p12)  ;;  %v606_v52 = vld [vmem:[#allocation2 + $0x58] sm:$0x1f] (!%p6060_p12) }
  0x4d   : > { %v601_v53 = vsel (!%p6060_p12), %vm8573_vm5, 0, %v600_v49  ;;  %v604_v54 = vsel (!%p6060_p12), %vm8573_vm5, 0, %v603_v51  ;;  %v607_v55 = vsel (!%p6060_p12), %vm8573_vm5, 0, %v606_v52  ;;  %v609_v56 = vld [vmem:[#allocation2 + $0x70] sm:$0x1f] (!%p6060_p12) }
  0x4e   : > { %602 = vst [vmem:[#allocation2 + $0x28] sm:$0x1f] (!%p6060_p12), %v601_v53  ;;  %605 = vst [vmem:[#allocation2 + $0x40] sm:$0x1f] (!%p6060_p12), %v604_v54  ;;  %v610_v57 = vsel (!%p6060_p12), %vm8573_vm5, 0, %v609_v56 }
  0x4f   : > { %608 = vst [vmem:[#allocation2 + $0x58] sm:$0x1f] (!%p6060_p12), %v607_v55  ;;  %v612_v58 = vld [vmem:[#allocation2 + $0x88] sm:$0x1f] (!%p6060_p12)  ;;  %v615_v59 = vld [vmem:[#allocation2 + $0xa0] sm:$0x1f] (!%p6060_p12) }
  0x50   : > { %611 = vst [vmem:[#allocation2 + $0x70] sm:$0x1f] (!%p6060_p12), %v610_v57  ;;  %v613_v60 = vsel (!%p6060_p12), %vm8573_vm5, 0, %v612_v58  ;;  %v616_v61 = vsel (!%p6060_p12), %vm8573_vm5, 0, %v615_v59  ;;  %v618_v62 = vld [vmem:[#allocation2 + $0xb8] sm:$0x1f] (!%p6060_p12) }
  0x51   : > { %v621_v63 = vld [vmem:[#allocation2 + $0xd0] sm:$0x1f] (!%p6060_p12)  ;;  %614 = vst [vmem:[#allocation2 + $0x88] sm:$0x1f] (!%p6060_p12), %v613_v60  ;;  %617 = vst [vmem:[#allocation2 + $0xa0] sm:$0x1f] (!%p6060_p12), %v616_v61 }
  0x52   : > { %v619_v0 = vsel (!%p6060_p12), %vm8573_vm5, 0, %v618_v62  ;;  %v622_v1 = vsel (!%p6060_p12), %vm8573_vm5, 0, %v621_v63 }
  0x53   : > { %620 = vst [vmem:[#allocation2 + $0xb8] sm:$0x1f] %v619_v0  ;;  %623 = vst [vmem:[#allocation2 + $0xd0] sm:$0x1f] %v622_v1 }
  0x54 PF: > { %626 = sbr.rel (%p6056_p10) target bundleno = 709 (0x2c5), region = 60  ;;  %v7900_v2 = vld [vmem:[%s9576_s3 + $0x100] sm:$0xff] (!%p6056_p10)   ;;  %v7903_v5 = vld [vmem:[%s9576_s3 + $0x108] sm:$0xff] (!%p6056_p10)   ;;  %v7906_v8 = vld [vmem:[%s9576_s3 + $0x110] sm:$0xff] (!%p6056_p10)   ;;  %vm875_vm6 = vsmask.f32 (!%p6056_p10), 3328 }
  0x55   : > { %v7901_v3 = vld [vmem:[%s9576_s3 + $0x140] sm:$0xff] (!%p6056_p10)   ;;  %7038 = vmatprep.subr.bf16.mxu0 (!%p6056_p10), %v7900_v2  ;;  %v7904_v6 = vld [vmem:[%s9576_s3 + $0x148] sm:$0xff] (!%p6056_p10)   ;;  %v7907_v9 = vld [vmem:[%s9576_s3 + $0x150] sm:$0xff] (!%p6056_p10)   ;;  %vm876_vm7 = vsmask.f32 (!%p6056_p10), 7440  ;;  %vm1899_vm9 = vcmask (!%p6056_p10), 1042432  }
  0x56   : > { %v7902_v4 = vld [vmem:[%s9576_s3 + $0xc0] sm:$0xff] (!%p6056_p10)   ;;  %7506 = vmatprep.subr.bf16.mxu1 (!%p6056_p10), %v7901_v3  ;;  %v7905_v7 = vld [vmem:[%s9576_s3 + $0xc8] sm:$0xff] (!%p6056_p10)   ;;  %v7908_v10 = vld [vmem:[%s9576_s3 + $0xd0] sm:$0xff] (!%p6056_p10)   ;;  %vm1900_vm10 = vcmask (!%p6056_p10), 1046532  }
  0x57   : > { %7039 = vmatpush3.bf16.msra.mxu0 (!%p6056_p10), %v7902_v4  ;;  %7507 = vmatpush3.bf16.msra.mxu1 (!%p6056_p10), %v7901_v3  ;;  %v7909_v11 = vld [vmem:[%s9576_s3 + $0x118] sm:$0xff] (!%p6056_p10)   ;;  %v7912_v14 = vld [vmem:[%s9576_s3 + $0x120] sm:$0xff] (!%p6056_p10)   ;;  %v7915_v17 = vld [vmem:[%s9576_s3 + $0x128] sm:$0xff] (!%p6056_p10)  }
  0x58   : > { %7040 = vmatprep.subr.bf16.mxu0 (!%p6056_p10), %v7903_v5  ;;  %7508 = vmatprep.subr.bf16.mxu1 (!%p6056_p10), %v7904_v6  ;;  %v7910_v12 = vld [vmem:[%s9576_s3 + $0x158] sm:$0xff] (!%p6056_p10)   ;;  %v7913_v15 = vld [vmem:[%s9576_s3 + $0x160] sm:$0xff] (!%p6056_p10)   ;;  %v7916_v18 = vld [vmem:[%s9576_s3 + $0x168] sm:$0xff] (!%p6056_p10)  }
  0x59   : > { %v7911_v13 = vld [vmem:[%s9576_s3 + $0xd8] sm:$0xff] (!%p6056_p10)   ;;  %v7914_v16 = vld [vmem:[%s9576_s3 + $0xe0] sm:$0xff] (!%p6056_p10)   ;;  %v7917_v19 = vld [vmem:[%s9576_s3 + $0xe8] sm:$0xff] (!%p6056_p10)  }
  0x5a   : > { %v7918_v20 = vld [vmem:[%s9576_s3 + $0x130] sm:$0xff] (!%p6056_p10)   ;;  %v7921_v23 = vld [vmem:[%s9576_s3 + $0x138] sm:$0xff] (!%p6056_p10)   ;;  %v7924_v25 = vld [vmem:[#allocation2] ss:$8 sps:$4 sm:$0xff] (!%p6056_p10)  }
  0x5b   : > { %7041 = vmatpush3.bf16.msra.mxu0 %v7905_v7  ;;  %7509 = vmatpush3.bf16.msra.mxu1 %v7904_v6  ;;  %v7919_v21 = vld [vmem:[%s9576_s3 + $0x170] sm:$0xff]   ;;  %v7922_v24 = vld [vmem:[%s9576_s3 + $0x178] sm:$0xff]   ;;  %v7926_v28 = vld [vmem:[#allocation2 + $0x4] ss:$8 sps:$4 sm:$0x11]   ;;  %v879_v30 = vshrl.u32 %v7924_v25, 16 }
  0x5c   : > { %7042 = vmatprep.subr.bf16.mxu0 %v7906_v8  ;;  %7510 = vmatprep.subr.bf16.mxu1 %v7907_v9  ;;  %v7920_v22 = vld [vmem:[%s9576_s3 + $0xf0] sm:$0xff]   ;;  %v7927_v26 = vld [vmem:[#allocation2 + $0x18] ss:$8 sps:$4 sm:$0xff]   ;;  %v7929_v29 = vld [vmem:[#allocation2 + $0x1c] ss:$8 sps:$4 sm:$0x11]  }
  0x5d   : > { %v7923_v27 = vld [vmem:[%s9576_s3 + $0xf8] sm:$0xff]   ;;  %v882_v31 = vshll.u32 %v7924_v25, 16  ;;  %v888_v32 = vshll.u32 %v7926_v28, 16  ;;  %v907_v33 = vshrl.u32 %v7927_v26, 16  ;;  %v910_v34 = vshll.u32 %v7927_v26, 16  ;;  %v7934_v49 = vld [vmem:[%s9576_s3 + $0x40] sm:$0xff]   ;;  %vm8672_vm8 = vmor %vm875_vm6, %vm876_vm7 }
  0x5e   : > { %v916_v35 = vshll.u32 %v7929_v29, 16  ;;  %v749_v36 = vld [vmem:[#allocation2 + $0x10] sm:$0x1f]  ;;  %v881_v37 = vrot.slane %v879_v30, 4  ;;  %v752_v39 = vld [vmem:[#allocation2 + $0x28] sm:$0x1f]  ;;  %vm8854_vm11 = vmor %vm1899_vm9, %vm1900_vm10 }
  0x5f   : > { %7043 = vmatpush3.bf16.msra.mxu0 %v7908_v10  ;;  %7511 = vmatpush3.bf16.msra.mxu1 %v7907_v9  ;;  %v884_v38 = vrot.slane %v882_v31, 5  ;;  %v6063_v40 = vcombine.low %v749_v36, %v749_v36  ;;  %v6065_v41 = vcombine.high %v749_v36, %v749_v36  ;;  %v890_v42 = vrot.slane %v888_v32, 5  ;;  %v8679_v55 = vld [vmem:[%s9576_s3 + $0x80] sm:$0xff]   ;;  %v758_v61 = vld [vmem:[#allocation2 + $0x58] sm:$0x1f]  ;;  %v7943_v31 = vld [vmem:[%s9576_s3 + $0x8] sm:$0xff]  }
  0x60   : > { %7044 = vmatprep.subr.bf16.mxu0 %v7909_v11  ;;  %7512 = vmatprep.subr.bf16.mxu1 %v7910_v12  ;;  %v909_v43 = vrot.slane %v907_v33, 4  ;;  %v912_v44 = vrot.slane %v910_v34, 5  ;;  %v6067_v46 = vcombine.low %v752_v39, %v752_v39  ;;  %v6069_v47 = vcombine.high %v752_v39, %v752_v39  ;;  %v755_v56 = vld [vmem:[#allocation2 + $0x40] sm:$0x1f]  ;;  %v7950_v32 = vld [vmem:[%s9576_s3 + $0x50] sm:$0xff]  }
  0x61   : > { %v885_v45 = vor.u32 %v884_v38, %v881_v37  ;;  %v893_v48 = vshrl.u32 %v6063_v40, 16  ;;  %v918_v52 = vrot.slane %v916_v35, 5  ;;  %v896_v53 = vshll.u32 %v6063_v40, 16  ;;  %v7944_v37 = vld [vmem:[#allocation2 + $0x30] ss:$8 sps:$4 sm:$0xff]  }
  0x62   : > { %v913_v51 = vor.u32 %v912_v44, %v909_v43  ;;  %v902_v54 = vshll.u32 %v6065_v41, 16  ;;  %v921_v59 = vshrl.u32 %v6067_v46, 16  ;;  %v924_v60 = vshll.u32 %v6067_v46, 16  ;;  %v7946_v39 = vld [vmem:[#allocation2 + $0x34] ss:$8 sps:$4 sm:$0x11]  }
  0x63   : > { %7045 = vmatpush3.bf16.msra.mxu0 %v7911_v13  ;;  %7513 = vmatpush3.bf16.msra.mxu1 %v7910_v12  ;;  %v886_v57 = vrot.slane %v885_v45, 4  ;;  %v895_v58 = vrot.slane %v893_v48, 4  ;;  %v898_v63 = vrot.slane %v896_v53, 5  ;;  %v930_v1 = vshll.u32 %v6069_v47, 16  ;;  %v7947_v40 = vld [vmem:[#allocation2 + $0x48] ss:$8 sps:$4 sm:$0xff]  }
  0x64   : > { %7046 = vmatprep.subr.bf16.mxu0 %v7912_v14  ;;  %7514 = vmatprep.subr.bf16.mxu1 %v7913_v15  ;;  %v914_v62 = vrot.slane %v913_v51, 4  ;;  %v904_v0 = vrot.slane %v902_v54, 5  ;;  %v923_v3 = vrot.slane %v921_v59, 4  ;;  %v926_v4 = vrot.slane %v924_v60, 5  ;;  %v7940_v14 = vld [vmem:[%s9576_s3] sm:$0xff]   ;;  %v7952_v41 = vld [vmem:[%s9576_s3 + $0x10] sm:$0xff]  }
  0x65   : > { %v891_v2 = vsel %vm8672_vm8, %v886_v57, %v890_v42  ;;  %v6071_v5 = vcombine.low %v755_v56, %v755_v56  ;;  %v899_v7 = vor.u32 %v898_v63, %v895_v58  ;;  %v932_v8 = vrot.slane %v930_v1, 5  ;;  %v7949_v43 = vld [vmem:[#allocation2 + $0x4c] ss:$8 sps:$4 sm:$0x11]   ;;  %v7955_v1 = vld [vmem:[%s9576_s3 + $0x18] sm:$0xff]  }
  0x66   : > { %v919_v6 = vsel %vm8672_vm8, %v914_v62, %v918_v52  ;;  %v6073_v9 = vcombine.high %v755_v56, %v755_v56  ;;  %v927_v12 = vor.u32 %v926_v4, %v923_v3  ;;  %v6075_v13 = vcombine.low %v758_v61, %v758_v61  ;;  %v7953_v56 = vld [vmem:[%s9576_s3 + $0x58] sm:$0xff]   ;;  %v7942_v58 = vld [vmem:[%s9576_s3 + $0x88] sm:$0xff]   ;;  %v7962_v4 = vld [vmem:[%s9576_s3 + $0x60] sm:$0xff]  }
  0x67   : > { %7047 = vmatpush3.bf16.msra.mxu0 %v7914_v16  ;;  %7515 = vmatpush3.bf16.msra.mxu1 %v7913_v15  ;;  %v6142_v10 = vcombine.low %v891_v2, %v919_v6  ;;  %v6143_v11 = vcombine.high %v891_v2, %v919_v6  ;;  %v900_v15 = vrot.slane %v899_v7, 4  ;;  %v6077_v16 = vcombine.high %v758_v61, %v758_v61  ;;  %v7951_v6 = vld [vmem:[%s9576_s3 + $0x90] sm:$0xff]  }
  0x68   : > { %7048 = vmatprep.subr.bf16.mxu0 %v7915_v17  ;;  %7516 = vmatprep.subr.bf16.mxu1 %v7916_v18  ;;  %v949_v17 = vshrl.u32 %v6071_v5, 16  ;;  %v935_v44 = vshrl.u32 %v7944_v37, 16  ;;  %v938_v45 = vshll.u32 %v7944_v37, 16  ;;  %v944_v47 = vshll.u32 %v7946_v39, 16 }
  0x69   : > { %1375 = vmatprep.mubr.bf16.mxu0 %v6143_v11  ;;  %v963_v48 = vshrl.u32 %v7947_v40, 16  ;;  %v972_v54 = vshll.u32 %v7949_v43, 16  ;;  %v7959_v11 = vld [vmem:[#allocation2 + $0x78] ss:$8 sps:$4 sm:$0xff]   ;;  %v7978_v43 = vld [vmem:[%s9576_s3 + $0x70] sm:$0xff]  }
  0x6a   : > { %v951_v25 = vrot.slane %v949_v17, 4  ;;  %v937_v52 = vrot.slane %v935_v44, 4  ;;  %v940_v53 = vrot.slane %v938_v45, 5  ;;  %v946_v59 = vrot.slane %v944_v47, 5 }
  0x6b   : > { %7049 = vmatpush3.bf16.msra.mxu0 %v7917_v19  ;;  %7517 = vmatpush3.bf16.msra.mxu1 %v7916_v18  ;;  %v952_v18 = vshll.u32 %v6071_v5, 16  ;;  %v7941_v19 = vld [vmem:[%s9576_s3 + $0x48] sm:$0xff]   ;;  %v965_v60 = vrot.slane %v963_v48, 4 }
  0x6c   : > { %7050 = vmatprep.subr.bf16.mxu0 %v7918_v20  ;;  %7518 = vmatprep.subr.bf16.mxu1 %v7919_v21  ;;  %v928_v20 = vrot.slane %v927_v12, 4  ;;  %v941_v63 = vor.u32 %v940_v53, %v937_v52  ;;  %v7973_v44 = vld [vmem:[#allocation2 + $0xac] ss:$8 sps:$4 sm:$0x11]  }
  0x6d   : > { %v954_v26 = vrot.slane %v952_v18, 5  ;;  %v1019_v18 = vshrl.u32 %v7959_v11, 16  ;;  %v7984_v52 = vld [vmem:[%s9576_s3 + $0x30] sm:$0xff]  }
  0x6e   : > { %v933_v28 = vsel %vm8672_vm8, %v928_v20, %v932_v8  ;;  %v942_v3 = vrot.slane %v941_v63, 4  ;;  %v7964_v8 = vld [vmem:[%s9576_s3 + $0x20] sm:$0xff]  }
  0x6f   : > { %7051 = vmatpush3.bf16.msra.mxu0 %v7920_v22  ;;  %7519 = vmatpush3.bf16.msra.mxu1 %v7919_v21  ;;  %v958_v21 = vshll.u32 %v6073_v9, 16  ;;  %v977_v22 = vshrl.u32 %v6075_v13, 16  ;;  %v955_v34 = vor.u32 %v954_v26, %v951_v25 }
  0x70   : > { %7052 = vmatprep.subr.bf16.mxu0 %v7921_v23  ;;  %7520 = vmatprep.subr.bf16.mxu1 %v7922_v24  ;;  %v980_v23 = vshll.u32 %v6075_v13, 16  ;;  %v947_v7 = vsel %vm8672_vm8, %v942_v3, %v946_v59  ;;  %v7954_v13 = vld [vmem:[%s9576_s3 + $0x98] sm:$0xff]  }
  0x71   : > { %v979_v29 = vrot.slane %v977_v22, 4  ;;  %v960_v35 = vrot.slane %v958_v21, 5  ;;  %v956_v42 = vrot.slane %v955_v34, 4  ;;  %v7966_v34 = vld [vmem:[%s9576_s3 + $0xa8] sm:$0xff]   ;;  %v7985_v59 = vld [vmem:[%s9576_s3 + $0x78] sm:$0xff]  }
  0x72   : > { %v982_v30 = vrot.slane %v980_v23, 5 }
  0x73   : > { %7053 = vmatpush3.bf16.msra.mxu0 %v7923_v27  ;;  %7521 = vmatpush3.bf16.msra.mxu1 %v7922_v24  ;;  %v905_v24 = vsel %vm8672_vm8, %v900_v15, %v904_v0  ;;  %v986_v27 = vshll.u32 %v6077_v16, 16  ;;  %v961_v51 = vsel %vm8672_vm8, %v956_v42, %v960_v35  ;;  %v974_v0 = vrot.slane %v972_v54, 5  ;;  %v7961_v15 = vld [vmem:[#allocation2 + $0x7c] ss:$8 sps:$4 sm:$0x11]   ;;  %v7967_v35 = vld [vmem:[%s9576_s3 + $0x28] sm:$0xff]  }
  0x74   : > { %7090 = vmatprep.subr.bf16.mxu0 %v7934_v49  ;;  %7530 = vmatprep.subr.bf16.mxu1 %v8679_v55  ;;  %v6144_v33 = vcombine.low %v905_v24, %v933_v28  ;;  %v983_v38 = vor.u32 %v982_v30, %v979_v29  ;;  %v966_v49 = vshll.u32 %v7947_v40, 16  ;;  %v1028_v21 = vshll.u32 %v7961_v15, 16  ;;  %v7965_v30 = vld [vmem:[%s9576_s3 + $0x68] sm:$0xff]   ;;  %v767_v15 = vld [vmem:[#allocation2 + $0xa0] sm:$0x1f] }
  0x75   : > { %v988_v36 = vrot.slane %v986_v27, 5  ;;  %v1021_v24 = vrot.slane %v1019_v18, 4  ;;  %v7971_v42 = vld [vmem:[#allocation2 + $0xa8] ss:$8 sps:$4 sm:$0xff]  }
  0x76   : > { %1376 = vmatmul.mubr.bf16.vlgmr.msra.gmra.mrb[0].mxu0 %v6142_v10  ;;  %7522 = vmatprep.mubr.bf16.mxu1 %v6144_v33  ;;  %v984_v46 = vrot.slane %v983_v38, 4  ;;  %v968_v61 = vrot.slane %v966_v49, 5  ;;  %v7956_v10 = vld [vmem:[#allocation2 + $0x60] ss:$8 sps:$4 sm:$0xff]   ;;  %v1030_v29 = vrot.slane %v1028_v21, 5  ;;  %v1075_v48 = vshrl.u32 %v7971_v42, 16 }
  0x77   : > { %7091 = vmatpush3.bf16.msra.mxu0 %v7940_v14  ;;  %v7958_v14 = vld [vmem:[#allocation2 + $0x64] ss:$8 sps:$4 sm:$0x11]   ;;  %v991_v16 = vshrl.u32 %v7956_v10, 16  ;;  %v994_v17 = vshll.u32 %v7956_v10, 16  ;;  %v1078_v49 = vshll.u32 %v7971_v42, 16 }
  0x78   : > { %7092 = vmatprep.subr.bf16.mxu0 %v7941_v19  ;;  %v989_v57 = vsel %vm8672_vm8, %v984_v46, %v988_v36  ;;  %v969_v2 = vor.u32 %v968_v61, %v965_v60  ;;  %v1022_v19 = vshll.u32 %v7959_v11, 16  ;;  %v1000_v20 = vshll.u32 %v7958_v14, 16  ;;  %v7968_v38 = vld [vmem:[#allocation2 + $0x90] ss:$8 sps:$4 sm:$0xff]   ;;  %v7991_v11 = vld [vmem:[%s9576_s3 + $0x1c0] sm:$0xff]  }
  0x79   : > { %v6147_v62 = vcombine.low %v961_v51, %v989_v57  ;;  %v993_v22 = vrot.slane %v991_v16, 4  ;;  %v996_v23 = vrot.slane %v994_v17, 5  ;;  %v1047_v45 = vshrl.u32 %v7968_v38, 16  ;;  %v761_v51 = vld [vmem:[#allocation2 + $0x70] sm:$0x1f]  ;;  %v7986_v10 = vld [vmem:[%s9576_s3 + $0xb8] sm:$0xff]  }
  0x7a   : > { %v970_v5 = vrot.slane %v969_v2, 4  ;;  %v1024_v25 = vrot.slane %v1022_v19, 5  ;;  %v1002_v26 = vrot.slane %v1000_v20, 5  ;;  %v1050_v46 = vshll.u32 %v7968_v38, 16  ;;  %v764_v57 = vld [vmem:[#allocation2 + $0x88] sm:$0x1f] }
  0x7b   : > { %7093 = vmatpush3.bf16.msra.mxu0 %v7943_v31  ;;  %7523 = vmatmul.mubr.bf16.vlgmr.msra.gmra.mrb[0].mxu1 %v6147_v62  ;;  %v997_v27 = vor.u32 %v996_v23, %v993_v22  ;;  %v7963_v31 = vld [vmem:[%s9576_s3 + $0xa0] sm:$0xff]   ;;  %v1049_v53 = vrot.slane %v1047_v45, 4  ;;  %v1077_v61 = vrot.slane %v1075_v48, 4  ;;  %v1080_v62 = vrot.slane %v1078_v49, 5  ;;  %v770_v20 = vld [vmem:[#allocation2 + $0xb8] sm:$0x1f] }
  0x7c   : > { %7094 = vmatprep.subr.bf16.mxu0 %v7950_v32  ;;  %7531 = vmatpush3.bf16.msra.mxu1 %v8679_v55  ;;  %v975_v9 = vsel %vm8672_vm8, %v970_v5, %v974_v0  ;;  %v1025_v28 = vor.u32 %v1024_v25, %v1021_v24  ;;  %v1052_v54 = vrot.slane %v1050_v46, 5  ;;  %v6081_v63 = vcombine.high %v761_v51, %v761_v51  ;;  %v7979_v0 = vld [vmem:[%s9576_s3 + $0xb0] sm:$0xff]   ;;  %v7987_v5 = vld [vmem:[%s9576_s3 + $0x38] sm:$0xff]   ;;  %v7988_v49 = vld [vmem:[#allocation2 + $0x8] ss:$24 sps:$4 sm:$0xff]  }
  0x7d   : > { %7532 = vmatprep.subr.bf16.mxu1 %v7942_v58  ;;  %v6146_v55 = vcombine.high %v947_v7, %v975_v9  ;;  %v6145_v12 = vcombine.low %v947_v7, %v975_v9  ;;  %v998_v32 = vrot.slane %v997_v27, 4  ;;  %v6083_v3 = vcombine.low %v764_v57, %v764_v57 }
  0x7e   : > { %v1026_v33 = vrot.slane %v1025_v28, 4  ;;  %v1014_v9 = vshll.u32 %v6081_v63, 16  ;;  %v6087_v27 = vcombine.low %v767_v15, %v767_v15  ;;  %v6089_v28 = vcombine.high %v767_v15, %v767_v15  ;;  %v8011_v15 = vld [vmem:[%s9576_s3 + $0x1e8] sm:$0xff]  }
  0x7f   : > { %7095 = vmatpush3.bf16.msra.mxu0 %v7952_v41  ;;  %1383 = vmatprep.mubr.bf16.mxu0 %v6146_v55  ;;  %v1003_v36 = vsel %vm8672_vm8, %v998_v32, %v1002_v26  ;;  %v7970_v41 = vld [vmem:[#allocation2 + $0x94] ss:$8 sps:$4 sm:$0x11]   ;;  %v6091_v32 = vcombine.low %v770_v20, %v770_v20 }
  0x80   : > { %7096 = vmatprep.subr.bf16.mxu0 %v7953_v56  ;;  %7533 = vmatpush3.bf16.msra.mxu1 %v7942_v58  ;;  %v1031_v37 = vsel %vm8672_vm8, %v1026_v33, %v1030_v29  ;;  %v1056_v47 = vshll.u32 %v7970_v41, 16  ;;  %v1084_v56 = vshll.u32 %v7973_v44, 16  ;;  %v6079_v58 = vcombine.low %v761_v51, %v761_v51 }
  0x81   : > { %7534 = vmatprep.subr.bf16.mxu1 %v7951_v6  ;;  %1384 = vmatmul.mubr.bf16.gmra.mrb[4].mxu0 %v6145_v12  ;;  %v6149_v39 = vcombine.high %v1003_v36, %v1031_v37  ;;  %v6148_v40 = vcombine.low %v1003_v36, %v1031_v37  ;;  %v1033_v12 = vshrl.u32 %v6083_v3, 16  ;;  %v1016_v19 = vrot.slane %v1014_v9, 5  ;;  %v7992_v37 = vld [vmem:[%s9576_s3 + $0x200] sm:$0xff]   ;;  %v7996_v9 = vld [vmem:[%s9576_s3 + $0x208] sm:$0xff]  }
  0x82   : > { %v1058_v60 = vrot.slane %v1056_v47, 5  ;;  %v1086_v2 = vrot.slane %v1084_v56, 5  ;;  %v1005_v7 = vshrl.u32 %v6079_v58, 16  ;;  %v1064_v36 = vshll.u32 %v6087_v27, 16 }
  0x83   : > { %7097 = vmatpush3.bf16.msra.mxu0 %v7955_v1  ;;  %1391 = vmatprep.mubr.bf16.mxu0 %v6149_v39  ;;  %v1053_v1 = vor.u32 %v1052_v54, %v1049_v53  ;;  %v1035_v22 = vrot.slane %v1033_v12, 4  ;;  %v1070_v39 = vshll.u32 %v6089_v28, 16  ;;  %v1092_v41 = vshll.u32 %v6091_v32, 16  ;;  %v8007_v12 = vld [vmem:[#allocation2 + $0x60] ss:$24 sps:$4 sm:$0xff]  }
  0x84   : > { %7098 = vmatprep.subr.bf16.mxu0 %v7962_v4  ;;  %7535 = vmatpush3.bf16.msra.mxu1 %v7951_v6  ;;  %v6085_v4 = vcombine.high %v764_v57, %v764_v57  ;;  %v1081_v6 = vor.u32 %v1080_v62, %v1077_v61  ;;  %v1007_v17 = vrot.slane %v1005_v7, 4  ;;  %v1066_v44 = vrot.slane %v1064_v36, 5  ;;  %v7995_v61 = vld [vmem:[%s9576_s3 + $0x1c8] sm:$0xff]   ;;  %v8002_v7 = vld [vmem:[%s9576_s3 + $0x190] sm:$0xff]   ;;  %v8023_v28 = vld [vmem:[%s9576_s3 + $0x1b8] sm:$0xff]  }
  0x85   : > { %7536 = vmatprep.subr.bf16.mxu1 %v7954_v13  ;;  %v1054_v55 = vrot.slane %v1053_v1, 4  ;;  %v1094_v48 = vrot.slane %v1092_v41, 5  ;;  %v1072_v53 = vrot.slane %v1070_v39, 5  ;;  %v7997_v1 = vld [vmem:[%s9576_s3 + $0x188] sm:$0xff]  }
  0x86   : > { %v1042_v14 = vshll.u32 %v6085_v4, 16  ;;  %v1082_v16 = vrot.slane %v1081_v6, 4  ;;  %v7998_v4 = vld [vmem:[#allocation2 + $0x38] ss:$24 sps:$4 sm:$0xff]  }
  0x87   : > { %7099 = vmatpush3.bf16.msra.mxu0 %v7964_v8  ;;  %v1008_v8 = vshll.u32 %v6079_v58, 16  ;;  %v1059_v21 = vsel %vm8672_vm8, %v1054_v55, %v1058_v60  ;;  %v7989_v58 = vld [vmem:[#allocation2] ss:$24 sps:$4 sm:$0xff]   ;;  %v8029_v36 = vld [vmem:[#allocation2 + $0x1c] ss:$8 sps:$4 sm:$0x11]  }
  0x88   : > { %7100 = vmatprep.subr.bf16.mxu0 %v7965_v30  ;;  %7537 = vmatpush3.bf16.msra.mxu1 %v7954_v13  ;;  %v1036_v13 = vshll.u32 %v6083_v3, 16  ;;  %v1044_v24 = vrot.slane %v1042_v14, 5  ;;  %v1087_v25 = vsel %vm8672_vm8, %v1082_v16, %v1086_v2  ;;  %v8000_v3 = vld [vmem:[%s9576_s3 + $0x1d0] sm:$0xff]   ;;  %v7993_v6 = vld [vmem:[#allocation2 + $0x40] ss:$24 sps:$4 sm:$0xff]  }
  0x89   : > { %7538 = vmatprep.subr.bf16.mxu1 %v7963_v31  ;;  %1392 = vmatmul.mubr.bf16.gmra.mrb[8].mxu0 %v6148_v40  ;;  %v1010_v18 = vrot.slane %v1008_v8, 5  ;;  %v6152_v29 = vcombine.high %v1059_v21, %v1087_v25  ;;  %v6151_v30 = vcombine.low %v1059_v21, %v1087_v25  ;;  %v1089_v40 = vshrl.u32 %v6091_v32, 16  ;;  %v8003_v8 = vld [vmem:[%s9576_s3 + $0x1d8] sm:$0xff]   ;;  %v8006_v55 = vld [vmem:[#allocation2 + $0x68] ss:$24 sps:$4 sm:$0xff]   ;;  %v8020_v25 = vld [vmem:[%s9576_s3 + $0x1b0] sm:$0xff]  }
  0x8a   : > { %v1038_v23 = vrot.slane %v1036_v13, 5  ;;  %v8008_v13 = vld [vmem:[%s9576_s3 + $0x1e0] sm:$0xff]   ;;  %v8004_v16 = vld [vmem:[%s9576_s3 + $0x218] sm:$0xff]   ;;  %v8016_v21 = vld [vmem:[#allocation2 + $0x70] ss:$24 sps:$4 sm:$0xff]  }
  0x8b   : > { %7101 = vmatpush3.bf16.msra.mxu0 %v7967_v35  ;;  %v1011_v26 = vor.u32 %v1010_v18, %v1007_v17  ;;  %v1061_v35 = vshrl.u32 %v6087_v27, 16  ;;  %1399 = vmatprep.mubr.bf16.mxu0 %v6152_v29  ;;  %v1091_v47 = vrot.slane %v1089_v40, 4  ;;  %v8010_v14 = vld [vmem:[%s9576_s3 + $0x1a0] sm:$0xff]   ;;  %v8013_v17 = vld [vmem:[%s9576_s3 + $0x1a8] sm:$0xff]   ;;  %v8018_v27 = vld [vmem:[%s9576_s3 + $0x230] sm:$0xff]  }
  0x8c   : > { %7102 = vmatprep.subr.bf16.mxu0 %v7978_v43  ;;  %7539 = vmatpush3.bf16.msra.mxu1 %v7963_v31  ;;  %v1039_v31 = vor.u32 %v1038_v23, %v1035_v22  ;;  %v8009_v18 = vld [vmem:[%s9576_s3 + $0x220] sm:$0xff]   ;;  %v8017_v22 = vld [vmem:[%s9576_s3 + $0x1f0] sm:$0xff]   ;;  %v8012_v23 = vld [vmem:[%s9576_s3 + $0x228] sm:$0xff]  }
  0x8d   : > { %7540 = vmatprep.subr.bf16.mxu1 %v7966_v34  ;;  %v1012_v33 = vrot.slane %v1011_v26, 4  ;;  %v1063_v43 = vrot.slane %v1061_v35, 4  ;;  %v1095_v54 = vor.u32 %v1094_v48, %v1091_v47  ;;  %v8021_v26 = vld [vmem:[%s9576_s3 + $0x1f8] sm:$0xff]   ;;  %v1773_v29 = vld [vmem:[#allocation2 + $0x10] sm:$0x1e]  ;;  %v8034_v48 = vld [vmem:[%s9576_s3 + $0x280] sm:$0xff]  }
  0x8e   : > { %v1040_v38 = vrot.slane %v1039_v31, 4  ;;  %v8026_v31 = vld [vmem:[#allocation2 + $0x4] ss:$8 sps:$4 sm:$0x11]   ;;  %v6215_v32 = vcombine.low %v1773_v29, %v1773_v29 }
  0x8f   : > { %7103 = vmatpush3.bf16.msra.mxu0 %v7984_v52  ;;  %v1017_v42 = vsel %vm8672_vm8, %v1012_v33, %v1016_v19  ;;  %v1067_v52 = vor.u32 %v1066_v44, %v1063_v43  ;;  %v1096_v60 = vrot.slane %v1095_v54, 4  ;;  %v8014_v19 = vld [vmem:[#allocation2 + $0x98] ss:$24 sps:$4 sm:$0xff]   ;;  %v6217_v33 = vcombine.high %v1773_v29, %v1773_v29  ;;  %v1776_v40 = vld [vmem:[#allocation2 + $0x28] sm:$0x1e]  ;;  %v8035_v54 = vld [vmem:[%s9576_s3 + $0x2c0] sm:$0xff]  }
  0x90   : > { %7104 = vmatprep.subr.bf16.mxu0 %v7985_v59  ;;  %7541 = vmatpush3.bf16.msra.mxu1 %v7966_v34  ;;  %v6093_v34 = vcombine.high %v770_v20, %v770_v20  ;;  %v1045_v46 = vsel %vm8672_vm8, %v1040_v38, %v1044_v24  ;;  %v7994_v59 = vld [vmem:[%s9576_s3 + $0x180] sm:$0xff]   ;;  %v8015_v20 = vld [vmem:[#allocation2 + $0x90] ss:$24 sps:$4 sm:$0xff]   ;;  %v1904_v39 = vrot.slane %v8026_v31, 5  ;;  %v6247_v41 = vrot.slane %v6215_v32, 9  ;;  %v8055_v29 = vld [vmem:[%s9576_s3 + $0x258] sm:$0xff]  }
  0x91   : > { %7542 = vmatprep.subr.bf16.mxu1 %v7979_v0  ;;  %1400 = vmatmul.mubr.bf16.gmra.mrb[12].mxu0 %v6151_v30  ;;  %v6150_v51 = vcombine.low %v1017_v42, %v1045_v46  ;;  %v1068_v57 = vrot.slane %v1067_v52, 4  ;;  %v8019_v24 = vld [vmem:[#allocation2 + $0xa0] ss:$24 sps:$4 sm:$0xff]   ;;  %v1908_v42 = vrot.slane %v6217_v33, 5  ;;  %v1912_v44 = vrot.slane %v8029_v36, 5 }
  0x92   : > { %v1098_v45 = vshll.u32 %v6093_v34, 16  ;;  %1673 = vmatprep.mubr.bf16.mxu0 %v7988_v49  ;;  %v8024_v30 = vld [vmem:[#allocation2] ss:$8 sps:$4 sm:$0xee]   ;;  %v8022_v34 = vld [vmem:[%s9576_s3 + $0x238] sm:$0xff]   ;;  %v6221_v46 = vcombine.high %v1776_v40, %v1776_v40 }
  0x93   : > { %7105 = vmatpush3.bf16.msra.mxu0 %v7987_v5  ;;  %7526 = vmatprep.mubr.bf16.mxu1 %v6150_v51  ;;  %v1073_v62 = vsel %vm8672_vm8, %v1068_v57, %v1072_v53  ;;  %v7999_v5 = vld [vmem:[#allocation2 + $0x30] ss:$24 sps:$4 sm:$0xff]   ;;  %v8027_v35 = vld [vmem:[#allocation2 + $0x18] ss:$8 sps:$4 sm:$0xee]   ;;  %v6246_v38 = vrot.slane %v8024_v30, 9  ;;  %v1909_v51 = vsel %vm8854_vm11, %v6247_v41, %v1908_v42 }
  0x94   : > { %7142 = vmatprep.subr.bf16.mxu0 %v7991_v11  ;;  %7543 = vmatpush3.bf16.msra.mxu1 %v7979_v0  ;;  %v1100_v56 = vrot.slane %v1098_v45, 5  ;;  %v7990_v0 = vld [vmem:[#allocation2 + $0x10] ss:$24 sps:$4 sm:$0xff]   ;;  %v6248_v43 = vrot.slane %v8027_v35, 9  ;;  %v6219_v45 = vcombine.low %v1776_v40, %v1776_v40  ;;  %v1916_v53 = vrot.slane %v6221_v46, 5  ;;  %v8062_v31 = vld [vmem:[%s9576_s3 + $0x2a0] sm:$0xff]  }
  0x95   : > { %7544 = vmatprep.subr.bf16.mxu1 %v7986_v10  ;;  %v8001_v11 = vld [vmem:[%s9576_s3 + $0x210] sm:$0xff]   ;;  %v1905_v47 = vsel %vm8854_vm11, %v6246_v38, %v1904_v39  ;;  %v8056_v30 = vld [vmem:[#allocation2 + $0x60] ss:$8 sps:$4 sm:$0xee]  }
  0x96   : > { %v1101_v63 = vsel %vm8672_vm8, %v1096_v60, %v1100_v56  ;;  %v1913_v49 = vsel %vm8854_vm11, %v6248_v43, %v1912_v44  ;;  %v6249_v52 = vrot.slane %v6219_v45, 9  ;;  %v1779_v56 = vld [vmem:[#allocation2 + $0x40] sm:$0x1e]  ;;  %v6254_v35 = vrot.slane %v8056_v30, 9  ;;  %v8065_v44 = vld [vmem:[%s9576_s3 + $0x2a8] sm:$0xff]  }
  0x97   : > { %v6153_v2 = vcombine.low %v1073_v62, %v1101_v63  ;;  %v6310_v57 = vcombine.low %v1905_v47, %v1913_v49  ;;  %v6223_v60 = vcombine.low %v1779_v56, %v1779_v56  ;;  %v6225_v62 = vcombine.high %v1779_v56, %v1779_v56  ;;  %v8058_v32 = vld [vmem:[#allocation2 + $0x64] ss:$8 sps:$4 sm:$0x11]   ;;  %v8059_v33 = vld [vmem:[#allocation2 + $0x78] ss:$8 sps:$4 sm:$0xee]  }
  0x98   : > { %7545 = vmatpush3.bf16.msra.mxu1 %v7986_v10  ;;  %v8005_v10 = vld [vmem:[%s9576_s3 + $0x198] sm:$0xff]   ;;  %v1936_v36 = vrot.slane %v8058_v32, 5  ;;  %v6256_v38 = vrot.slane %v8059_v33, 9  ;;  %v8063_v40 = vld [vmem:[%s9576_s3 + $0x2e0] sm:$0xff]  }
  0x99   : > { %7554 = vmatprep.subr.bf16.mxu1 %v7992_v37  ;;  %1674 = vmatmul.mubr.bf16.vlgmr.msra.gmra.mrb[16].mxu0 %v7989_v58  ;;  %v6311_v58 = vcombine.high %v1905_v47, %v1913_v49  ;;  %v8064_v42 = vld [vmem:[%s9576_s3 + $0x260] sm:$0xff]   ;;  %v8066_v47 = vld [vmem:[%s9576_s3 + $0x2e8] sm:$0xff]   ;;  %v8068_v49 = vld [vmem:[#allocation2 + $0x90] ss:$8 sps:$4 sm:$0xee]  }
  0x9a   : > { %7143 = vmatpush3.bf16.msra.mxu0 %v7994_v59  ;;  %7527 = vmatmul.mubr.bf16.gmra.mrb[4].mxu1 %v6153_v2  ;;  %v1782_v59 = vld [vmem:[#allocation2 + $0x58] sm:$0x1e]  ;;  %v1937_v41 = vsel %vm8854_vm11, %v6254_v35, %v1936_v36  ;;  %v8090_v32 = vld [vmem:[#allocation2 + $0x28] ss:$24 sps:$4 sm:$0xff]  }
  0x9b   : > { %7144 = vmatprep.subr.bf16.mxu0 %v7995_v61  ;;  %7546 = vmatprep.mubr.bf16.mxu1 %v7990_v0  ;;  %v1917_v61 = vsel %vm8854_vm11, %v6249_v52, %v1916_v53  ;;  %v6227_v63 = vcombine.low %v1782_v59, %v1782_v59  ;;  %v6229_v0 = vcombine.high %v1782_v59, %v1782_v59  ;;  %v8071_v52 = vld [vmem:[#allocation2 + $0xa8] ss:$8 sps:$4 sm:$0xee]   ;;  %v8073_v53 = vld [vmem:[#allocation2 + $0xac] ss:$8 sps:$4 sm:$0x11]  }
  0x9c   : > { %1681 = vmatprep.mubr.bf16.mxu0 %v7998_v4  ;;  %v6312_v2 = vcombine.low %v1909_v51, %v1917_v61  ;;  %v8041_v4 = vld [vmem:[%s9576_s3 + $0x288] sm:$0xff]   ;;  %v8070_v51 = vld [vmem:[#allocation2 + $0x94] ss:$8 sps:$4 sm:$0x11]   ;;  %v6260_v59 = vrot.slane %v8071_v52, 9  ;;  %v8091_v33 = vld [vmem:[%s9576_s3 + $0x340] sm:$0xff]  }
  0x9d   : > { %v1952_v56 = vrot.slane %v8070_v51, 5  ;;  %v8089_v30 = vld [vmem:[#allocation2 + $0x18] ss:$24 sps:$4 sm:$0xff]   ;;  %v8094_v36 = vld [vmem:[%s9576_s3 + $0x300] sm:$0xff]  }
  0x9e   : > { %7145 = vmatpush3.bf16.msra.mxu0 %v7997_v1  ;;  %v8040_v1 = vld [vmem:[%s9576_s3 + $0x240] sm:$0xff]   ;;  %v8093_v35 = vld [vmem:[#allocation2 + $0x58] ss:$24 sps:$4 sm:$0xff]  }
  0x9f   : > { %7146 = vmatprep.subr.bf16.mxu0 %v8000_v3  ;;  %v6251_v3 = vrot.slane %v6223_v60, 9  ;;  %v1960_v60 = vrot.slane %v8073_v53, 5  ;;  %v8107_v51 = vld [vmem:[#allocation2 + $0x78] ss:$24 sps:$4 sm:$0xff]   ;;  %v8108_v52 = vld [vmem:[%s9576_s3 + $0x360] sm:$0xff]  }
  0xa0   : > { %v8109_v53 = vld [vmem:[%s9576_s3 + $0x3a0] sm:$0xff]  }
  0xa1   : > { %1682 = vmatmul.mubr.bf16.gmra.mrb[20].mxu0 %v7999_v5  ;;  %v1924_v5 = vrot.slane %v6225_v62, 5 }
  0xa2   : > { %7147 = vmatpush3.bf16.msra.mxu0 %v8002_v7  ;;  %7547 = vmatmul.mubr.bf16.vlgmr.msra.gmra.mrb[0].mxu1 %v7993_v6  ;;  %v6253_v6 = vrot.slane %v6227_v63, 9  ;;  %v1932_v7 = vrot.slane %v6229_v0, 5 }
  0xa3   : > { %7148 = vmatprep.subr.bf16.mxu0 %v8003_v8  ;;  %7555 = vmatpush3.bf16.msra.mxu1 %v7992_v37  ;;  %v8043_v8 = vld [vmem:[%s9576_s3 + $0x248] sm:$0xff]  }
  0xa4   : > { %7556 = vmatprep.subr.bf16.mxu1 %v7996_v9  ;;  %1689 = vmatprep.mubr.bf16.mxu0 %v8006_v55 }
  0xa5   : > { %7550 = vmatprep.mubr.bf16.mxu1 %v8016_v21 }
  0xa6   : > { %7149 = vmatpush3.bf16.msra.mxu0 %v8005_v10  ;;  %v1925_v10 = vsel %vm8854_vm11, %v6251_v3, %v1924_v5  ;;  %v1961_v3 = vsel %vm8854_vm11, %v6260_v59, %v1960_v60  ;;  %v8114_v59 = vld [vmem:[#allocation2 + $0xb0] ss:$24 sps:$4 sm:$0xff]  }
  0xa7   : > { %7150 = vmatprep.subr.bf16.mxu0 %v8008_v13  ;;  %7557 = vmatpush3.bf16.msra.mxu1 %v7996_v9  ;;  %v8042_v9 = vld [vmem:[%s9576_s3 + $0x2c8] sm:$0xff]   ;;  %v8046_v13 = vld [vmem:[#allocation2 + $0x34] ss:$8 sps:$4 sm:$0x11]  }
  0xa8   : > { %7558 = vmatprep.subr.bf16.mxu1 %v8001_v11  ;;  %v8115_v60 = vld [vmem:[#allocation2 + $0xa8] ss:$24 sps:$4 sm:$0xff]  }
  0xa9   : > { %1690 = vmatmul.mubr.bf16.gmra.mrb[24].mxu0 %v8007_v12  ;;  %v8044_v12 = vld [vmem:[#allocation2 + $0x30] ss:$8 sps:$4 sm:$0xee]  }
  0xaa   : > { %7151 = vmatpush3.bf16.msra.mxu0 %v8010_v14  ;;  %1697 = vmatprep.mubr.bf16.mxu0 %v8014_v19  ;;  %v8047_v14 = vld [vmem:[#allocation2 + $0x48] ss:$8 sps:$4 sm:$0xee]  }
  0xab   : > { %7152 = vmatprep.subr.bf16.mxu0 %v8011_v15  ;;  %7559 = vmatpush3.bf16.msra.mxu1 %v8001_v11  ;;  %v1933_v11 = vsel %vm8854_vm11, %v6253_v6, %v1932_v7  ;;  %v8049_v15 = vld [vmem:[#allocation2 + $0x4c] ss:$8 sps:$4 sm:$0x11]   ;;  %v1791_v7 = vld [vmem:[#allocation2 + $0xa0] sm:$0x1e] }
  0xac   : > { %7560 = vmatprep.subr.bf16.mxu1 %v8004_v16  ;;  %7551 = vmatmul.mubr.bf16.gmra.mrb[4].mxu1 %v8019_v24  ;;  %v6315_v55 = vcombine.low %v1925_v10, %v1933_v11  ;;  %v8051_v19 = vld [vmem:[%s9576_s3 + $0x2d0] sm:$0xff]   ;;  %v1928_v21 = vrot.slane %v8049_v15, 5  ;;  %v6241_v15 = vcombine.high %v1791_v7, %v1791_v7 }
  0xad   : > { %7570 = vmatprep.mubr.bf16.mxu1 %v6312_v2  ;;  %v8078_v2 = vld [vmem:[%s9576_s3 + $0x2b0] sm:$0xff]  }
  0xae   : > { %7153 = vmatpush3.bf16.msra.mxu0 %v8013_v17  ;;  %v1920_v17 = vrot.slane %v8046_v13, 5  ;;  %v8079_v6 = vld [vmem:[%s9576_s3 + $0x2f0] sm:$0xff]  }
  0xaf   : > { %7561 = vmatpush3.bf16.msra.mxu1 %v8004_v16  ;;  %7154 = vmatprep.subr.bf16.mxu0 %v8017_v22  ;;  %v6250_v16 = vrot.slane %v8044_v12, 9  ;;  %v1794_v12 = vld [vmem:[#allocation2 + $0xb8] sm:$0x1e] }
  0xb0   : > { %7562 = vmatprep.subr.bf16.mxu1 %v8009_v18 }
  0xb1   : > { %1698 = vmatmul.mubr.bf16.gmra.mrb[28].mxu0 %v8015_v20  ;;  %v6252_v20 = vrot.slane %v8047_v14, 9  ;;  %v1921_v22 = vsel %vm8854_vm11, %v6250_v16, %v1920_v17  ;;  %v6239_v14 = vcombine.low %v1791_v7, %v1791_v7  ;;  %v6243_v16 = vcombine.low %v1794_v12, %v1794_v12  ;;  %v8134_v7 = vld [vmem:[%s9576_s3 + $0x400] sm:$0xff]  }
  0xb2   : > { %7155 = vmatpush3.bf16.msra.mxu0 %v8020_v25  ;;  %2239 = vmatprep.mubr.bf16.mxu0 %v6311_v58  ;;  %v8053_v25 = vld [vmem:[%s9576_s3 + $0x298] sm:$0xff]   ;;  %v1788_v58 = vld [vmem:[#allocation2 + $0x88] sm:$0x1e] }
  0xb3   : > { %7563 = vmatpush3.bf16.msra.mxu1 %v8009_v18  ;;  %7156 = vmatprep.subr.bf16.mxu0 %v8021_v26  ;;  %v8050_v18 = vld [vmem:[%s9576_s3 + $0x290] sm:$0xff]   ;;  %v1929_v24 = vsel %vm8854_vm11, %v6252_v20, %v1928_v21  ;;  %v6235_v0 = vcombine.low %v1788_v58, %v1788_v58  ;;  %v6259_v21 = vrot.slane %v6239_v14, 9 }
  0xb4   : > { %7564 = vmatprep.subr.bf16.mxu1 %v8012_v23  ;;  %v6314_v26 = vcombine.high %v1921_v22, %v1929_v24 }
  0xb5   : > { %v6257_v11 = vrot.slane %v6235_v0, 9  ;;  %v8119_v0 = vld [vmem:[#allocation2 + $0xb8] ss:$24 sps:$4 sm:$0xff]  }
  0xb6   : > { %7157 = vmatpush3.bf16.msra.mxu0 %v8023_v28  ;;  %v8054_v28 = vld [vmem:[%s9576_s3 + $0x2d8] sm:$0xff]  }
  0xb7   : > { %7565 = vmatpush3.bf16.msra.mxu1 %v8012_v23  ;;  %7194 = vmatprep.subr.bf16.mxu0 %v8034_v48  ;;  %v8052_v23 = vld [vmem:[%s9576_s3 + $0x250] sm:$0xff]   ;;  %v8067_v48 = vld [vmem:[%s9576_s3 + $0x268] sm:$0xff]  }
  0xb8   : > { %7566 = vmatprep.subr.bf16.mxu1 %v8018_v27 }
  0xb9   : > { %2240 = vmatmul.mubr.bf16.vlgmr.msra.gmra.mrb[32].mxu0 %v6310_v57  ;;  %v1785_v57 = vld [vmem:[#allocation2 + $0x70] sm:$0x1e] }
  0xba   : > { %7195 = vmatpush3.bf16.msra.mxu0 %v8040_v1  ;;  %2247 = vmatprep.mubr.bf16.mxu0 %v6314_v26  ;;  %v6231_v61 = vcombine.low %v1785_v57, %v1785_v57  ;;  %v6233_v62 = vcombine.high %v1785_v57, %v1785_v57  ;;  %v6237_v1 = vcombine.high %v1788_v58, %v1788_v58  ;;  %v8087_v26 = vld [vmem:[%s9576_s3 + $0x278] sm:$0xff]   ;;  %v8112_v57 = vld [vmem:[%s9576_s3 + $0x3a8] sm:$0xff]  }
  0xbb   : > { %7567 = vmatpush3.bf16.msra.mxu1 %v8018_v27  ;;  %7196 = vmatprep.subr.bf16.mxu0 %v8041_v4  ;;  %v6313_v27 = vcombine.low %v1921_v22, %v1929_v24  ;;  %v1956_v22 = vrot.slane %v6241_v15, 5  ;;  %v8086_v24 = vld [vmem:[%s9576_s3 + $0x2f8] sm:$0xff]   ;;  %v8113_v58 = vld [vmem:[%s9576_s3 + $0x328] sm:$0xff]  }
  0xbc   : > { %7568 = vmatprep.subr.bf16.mxu1 %v8022_v34  ;;  %v6255_v4 = vrot.slane %v6231_v61, 9  ;;  %v1940_v5 = vrot.slane %v6233_v62, 5  ;;  %v8116_v61 = vld [vmem:[#allocation2 + $0x88] ss:$24 sps:$4 sm:$0xff]   ;;  %v8117_v62 = vld [vmem:[%s9576_s3 + $0x370] sm:$0xff]  }
  0xbe   : > { %7197 = vmatpush3.bf16.msra.mxu0 %v8043_v8  ;;  %v8084_v8 = vld [vmem:[%s9576_s3 + $0x270] sm:$0xff]   ;;  %v1941_v13 = vsel %vm8854_vm11, %v6255_v4, %v1940_v5  ;;  %v8123_v4 = vld [vmem:[%s9576_s3 + $0x338] sm:$0xff]  }
  0xbf   : > { %7569 = vmatpush3.bf16.msra.mxu1 %v8022_v34  ;;  %7198 = vmatprep.subr.bf16.mxu0 %v8050_v18  ;;  %v8061_v34 = vld [vmem:[#allocation2 + $0x7c] ss:$8 sps:$4 sm:$0x11]   ;;  %v6245_v18 = vcombine.high %v1794_v12, %v1794_v12  ;;  %v8124_v5 = vld [vmem:[#allocation2 + $0x18] ss:$8 sps:$4 sm:$0xff]  }
  0xc0   : > { %7578 = vmatprep.subr.bf16.mxu1 %v8035_v54  ;;  %v1944_v39 = vrot.slane %v8061_v34, 5  ;;  %v8092_v34 = vld [vmem:[%s9576_s3 + $0x380] sm:$0xff]  }
  0xc1   : > { %2248 = vmatmul.mubr.bf16.gmra.mrb[36].mxu0 %v6313_v27  ;;  %v1957_v27 = vsel %vm8854_vm11, %v6259_v21, %v1956_v22 }
  0xc2   : > { %7571 = vmatmul.mubr.bf16.vlgmr.msra.gmra.mrb[0].mxu1 %v6315_v55  ;;  %7199 = vmatpush3.bf16.msra.mxu0 %v8052_v23  ;;  %v1945_v43 = vsel %vm8854_vm11, %v6256_v38, %v1944_v39  ;;  %v1948_v55 = vrot.slane %v6237_v1, 5  ;;  %v6261_v23 = vrot.slane %v6243_v16, 9  ;;  %v8095_v38 = vld [vmem:[%s9576_s3 + $0x348] sm:$0xff]   ;;  %v8120_v1 = vld [vmem:[%s9576_s3 + $0x330] sm:$0xff]  }
  0xc3   : > { %7579 = vmatpush3.bf16.msra.mxu1 %v8035_v54  ;;  %7200 = vmatprep.subr.bf16.mxu0 %v8053_v25  ;;  %v6317_v45 = vcombine.high %v1937_v41, %v1945_v43  ;;  %v6316_v46 = vcombine.low %v1937_v41, %v1945_v43  ;;  %v6258_v54 = vrot.slane %v8068_v49, 9  ;;  %v1964_v25 = vrot.slane %v6245_v18, 5  ;;  %v8096_v39 = vld [vmem:[%s9576_s3 + $0x388] sm:$0xff]   ;;  %v8100_v43 = vld [vmem:[%s9576_s3 + $0x350] sm:$0xff]   ;;  %v8106_v49 = vld [vmem:[#allocation2 + $0x80] ss:$24 sps:$4 sm:$0xff]  }
  0xc4   : > { %7580 = vmatprep.subr.bf16.mxu1 %v8042_v9  ;;  %v1949_v17 = vsel %vm8854_vm11, %v6257_v11, %v1948_v55  ;;  %v8098_v41 = vld [vmem:[#allocation2 + $0x50] ss:$24 sps:$4 sm:$0xff]   ;;  %v2902_v11 = vshrl.u32 %v8124_v5, 16  ;;  %v2905_v55 = vshll.u32 %v8124_v5, 16 }
  0xc5   : > { %2255 = vmatprep.mubr.bf16.mxu0 %v6317_v45  ;;  %v1953_v63 = vsel %vm8854_vm11, %v6258_v54, %v1952_v56  ;;  %v6318_v20 = vcombine.low %v1941_v13, %v1949_v17  ;;  %v8102_v45 = vld [vmem:[%s9576_s3 + $0x310] sm:$0xff]   ;;  %v8110_v54 = vld [vmem:[%s9576_s3 + $0x320] sm:$0xff]   ;;  %v8111_v56 = vld [vmem:[%s9576_s3 + $0x368] sm:$0xff]  }
  0xc6   : > { %7201 = vmatpush3.bf16.msra.mxu0 %v8055_v29  ;;  %v6319_v10 = vcombine.low %v1953_v63, %v1961_v3  ;;  %v1965_v29 = vsel %vm8854_vm11, %v6261_v23, %v1964_v25  ;;  %v2775_v13 = vld [vmem:[#allocation2 + $0x28] sm:$0x1f]  ;;  %v2778_v17 = vld [vmem:[#allocation2 + $0x40] sm:$0x1f] }
  0xc7   : > { %7581 = vmatpush3.bf16.msra.mxu1 %v8042_v9  ;;  %7202 = vmatprep.subr.bf16.mxu0 %v8062_v31  ;;  %v6320_v9 = vcombine.high %v1953_v63, %v1961_v3  ;;  %v6321_v31 = vcombine.low %v1957_v27, %v1965_v29  ;;  %v8118_v63 = vld [vmem:[%s9576_s3 + $0x3b0] sm:$0xff]   ;;  %v8122_v3 = vld [vmem:[%s9576_s3 + $0x3b8] sm:$0xff]   ;;  %v6431_v18 = vcombine.low %v2775_v13, %v2775_v13 }
  0xc8   : > { %7582 = vmatprep.subr.bf16.mxu1 %v8051_v19  ;;  %7574 = vmatprep.mubr.bf16.mxu1 %v6318_v20  ;;  %v2907_v20 = vrot.slane %v2905_v55, 5  ;;  %v6433_v22 = vcombine.high %v2775_v13, %v2775_v13  ;;  %v8150_v13 = vld [vmem:[%s9576_s3 + $0x410] sm:$0xff]  }
  0xc9   : > { %2256 = vmatmul.mubr.bf16.gmra.mrb[40].mxu0 %v6316_v46  ;;  %v8103_v46 = vld [vmem:[%s9576_s3 + $0x358] sm:$0xff]   ;;  %v2916_v29 = vshrl.u32 %v6431_v18, 16 }
  0xca   : > { %7203 = vmatpush3.bf16.msra.mxu0 %v8064_v42  ;;  %2263 = vmatprep.mubr.bf16.mxu0 %v6320_v9  ;;  %v8099_v42 = vld [vmem:[#allocation2 + $0x48] ss:$24 sps:$4 sm:$0xff]   ;;  %v8129_v9 = vld [vmem:[#allocation2 + $0x34] ss:$8 sps:$4 sm:$0x11]  }
  0xcb   : > { %7583 = vmatpush3.bf16.msra.mxu1 %v8051_v19  ;;  %7204 = vmatprep.subr.bf16.mxu0 %v8065_v44  ;;  %v8085_v19 = vld [vmem:[%s9576_s3 + $0x2b8] sm:$0xff]   ;;  %v8101_v44 = vld [vmem:[%s9576_s3 + $0x390] sm:$0xff]   ;;  %v2939_v16 = vshll.u32 %v8129_v9, 16 }
  0xcc   : > { %7584 = vmatprep.subr.bf16.mxu1 %v8054_v28  ;;  %7575 = vmatmul.mubr.bf16.gmra.mrb[4].mxu1 %v6321_v31 }
  0xcd   : > { %7594 = vmatprep.mubr.bf16.mxu1 %v8090_v32  ;;  %v2941_v25 = vrot.slane %v2939_v16, 5  ;;  %v2925_v32 = vshll.u32 %v6433_v22, 16  ;;  %v8144_v16 = vld [vmem:[#allocation2 + $0x48] ss:$8 sps:$4 sm:$0xff]  }
  0xce   : > { %7205 = vmatpush3.bf16.msra.mxu0 %v8067_v48  ;;  %v8105_v48 = vld [vmem:[%s9576_s3 + $0x318] sm:$0xff]   ;;  %v8152_v22 = vld [vmem:[%s9576_s3 + $0x3d0] sm:$0xff]  }
  0xcf   : > { %7585 = vmatpush3.bf16.msra.mxu1 %v8054_v28  ;;  %7206 = vmatprep.subr.bf16.mxu0 %v8078_v2  ;;  %v8088_v28 = vld [vmem:[#allocation2 + $0x20] ss:$24 sps:$4 sm:$0xff]  }
  0xd0   : > { %7586 = vmatprep.subr.bf16.mxu1 %v8063_v40  ;;  %v8121_v2 = vld [vmem:[%s9576_s3 + $0x378] sm:$0xff]  }
  0xd1   : > { %2264 = vmatmul.mubr.bf16.gmra.mrb[44].mxu0 %v6319_v10  ;;  %v9040_v10 = vld [vmem:[%s9576_s3 + $0x440] sm:$0xff]  }
  0xd2   : > { %7207 = vmatpush3.bf16.msra.mxu0 %v8084_v8  ;;  %2667 = vmatprep.mubr.bf16.mxu0 %v8088_v28  ;;  %v8127_v8 = vld [vmem:[#allocation2 + $0x30] ss:$8 sps:$4 sm:$0xff]   ;;  %v6437_v28 = vcombine.high %v2778_v17, %v2778_v17 }
  0xd3   : > { %7587 = vmatpush3.bf16.msra.mxu1 %v8063_v40  ;;  %7208 = vmatprep.subr.bf16.mxu0 %v8085_v19  ;;  %v8097_v40 = vld [vmem:[%s9576_s3 + $0x308] sm:$0xff]   ;;  %v2930_v14 = vshrl.u32 %v8127_v8, 16  ;;  %v2933_v15 = vshll.u32 %v8127_v8, 16  ;;  %v2904_v19 = vrot.slane %v2902_v11, 4 }
  0xd4   : > { %7588 = vmatprep.subr.bf16.mxu1 %v8066_v47 }
  0xd5   : > { %v2932_v23 = vrot.slane %v2930_v14, 4  ;;  %v2908_v27 = vor.u32 %v2907_v20, %v2904_v19  ;;  %v8147_v20 = vld [vmem:[#allocation2 + $0x60] ss:$8 sps:$4 sm:$0xff]  }
  0xd6   : > { %7209 = vmatpush3.bf16.msra.mxu0 %v8087_v26  ;;  %v6435_v26 = vcombine.low %v2778_v17, %v2778_v17  ;;  %v8146_v17 = vld [vmem:[#allocation2 + $0x4c] ss:$8 sps:$4 sm:$0x11]  }
  0xd7   : > { %7589 = vmatpush3.bf16.msra.mxu1 %v8066_v47  ;;  %7246 = vmatprep.subr.bf16.mxu0 %v8091_v33  ;;  %v8104_v47 = vld [vmem:[%s9576_s3 + $0x398] sm:$0xff]  }
  0xd8   : > { %7590 = vmatprep.subr.bf16.mxu1 %v8079_v6  ;;  %v2944_v33 = vshrl.u32 %v6435_v26, 16 }
  0xd9   : > { %2668 = vmatmul.mubr.bf16.vlgmr.msra.gmra.mrb[48].mxu0 %v8089_v30  ;;  %v2919_v30 = vshll.u32 %v6431_v18, 16 }
  0xda   : > { %7247 = vmatpush3.bf16.msra.mxu0 %v8094_v36  ;;  %2675 = vmatprep.mubr.bf16.mxu0 %v8098_v41  ;;  %v2909_v36 = vrot.slane %v2908_v27, 4  ;;  %v2784_v41 = vld [vmem:[#allocation2 + $0x70] sm:$0x1f] }
  0xdb   : > { %7591 = vmatpush3.bf16.msra.mxu1 %v8079_v6  ;;  %7248 = vmatprep.subr.bf16.mxu0 %v8095_v38  ;;  %v8126_v6 = vld [vmem:[#allocation2 + $0x1c] ss:$8 sps:$4 sm:$0x11]   ;;  %v2918_v38 = vrot.slane %v2916_v29, 4  ;;  %v2989_v29 = vshll.u32 %v8147_v20, 16 }
  0xdc   : > { %7592 = vmatprep.subr.bf16.mxu1 %v8086_v24  ;;  %v2911_v12 = vshll.u32 %v8126_v6, 16 }
  0xde   : > { %7249 = vmatpush3.bf16.msra.mxu0 %v8097_v40  ;;  %v2913_v21 = vrot.slane %v2911_v12, 5  ;;  %v2953_v40 = vshll.u32 %v6437_v28, 16  ;;  %v8143_v12 = vld [vmem:[%s9576_s3 + $0x3c8] sm:$0xff]   ;;  %v2986_v28 = vshrl.u32 %v8147_v20, 16  ;;  %v8185_v20 = vld [vmem:[%s9576_s3 + $0x438] sm:$0xff]  }
  0xdf   : > { %7593 = vmatpush3.bf16.msra.mxu1 %v8086_v24  ;;  %7250 = vmatprep.subr.bf16.mxu0 %v8100_v43  ;;  %v2935_v24 = vrot.slane %v2933_v15, 5  ;;  %v2927_v43 = vrot.slane %v2925_v32, 5  ;;  %v8142_v32 = vld [vmem:[%s9576_s3 + $0x448] sm:$0xff]  }
  0xe0   : > { %7602 = vmatprep.subr.bf16.mxu1 %v8092_v34 }
  0xe1   : > { %2676 = vmatmul.mubr.bf16.gmra.mrb[52].mxu0 %v8099_v42  ;;  %v2936_v31 = vor.u32 %v2935_v24, %v2932_v23  ;;  %v2958_v24 = vshrl.u32 %v8144_v16, 16 }
  0xe2   : > { %7595 = vmatmul.mubr.bf16.vlgmr.msra.gmra.mrb[0].mxu1 %v8093_v35  ;;  %7251 = vmatpush3.bf16.msra.mxu0 %v8102_v45  ;;  %v2781_v35 = vld [vmem:[#allocation2 + $0x58] sm:$0x1f] }
  0xe3   : > { %7603 = vmatpush3.bf16.msra.mxu1 %v8092_v34  ;;  %7252 = vmatprep.subr.bf16.mxu0 %v8103_v46  ;;  %v2947_v34 = vshll.u32 %v6435_v26, 16  ;;  %v2937_v42 = vrot.slane %v2936_v31, 4  ;;  %v2914_v46 = vsel %vm8672_vm8, %v2909_v36, %v2913_v21  ;;  %v8149_v21 = vld [vmem:[#allocation2 + $0x64] ss:$8 sps:$4 sm:$0x11]   ;;  %v2967_v26 = vshll.u32 %v8146_v17, 16 }
  0xe4   : > { %7604 = vmatprep.subr.bf16.mxu1 %v8096_v39  ;;  %2683 = vmatprep.mubr.bf16.mxu0 %v8106_v49  ;;  %v6439_v49 = vcombine.low %v2781_v35, %v2781_v35  ;;  %v8153_v36 = vld [vmem:[%s9576_s3 + $0x418] sm:$0xff]   ;;  %v8184_v17 = vld [vmem:[%s9576_s3 + $0x3f0] sm:$0xff]  }
  0xe5   : > { %7598 = vmatprep.mubr.bf16.mxu1 %v8116_v61  ;;  %v2949_v45 = vrot.slane %v2947_v34, 5  ;;  %v8141_v61 = vld [vmem:[%s9576_s3 + $0x408] sm:$0xff]  }
  0xe6   : > { %7253 = vmatpush3.bf16.msra.mxu0 %v8105_v48  ;;  %v2955_v48 = vrot.slane %v2953_v40, 5  ;;  %v2991_v40 = vrot.slane %v2989_v29, 5 }
  0xe7   : > { %7605 = vmatpush3.bf16.msra.mxu1 %v8096_v39  ;;  %7254 = vmatprep.subr.bf16.mxu0 %v8108_v52  ;;  %v2921_v39 = vrot.slane %v2919_v30, 5  ;;  %v2942_v52 = vsel %vm8672_vm8, %v2937_v42, %v2941_v25  ;;  %v2961_v25 = vshll.u32 %v8144_v16, 16  ;;  %v2995_v30 = vshll.u32 %v8149_v21, 16  ;;  %v8155_v42 = vld [vmem:[%s9576_s3 + $0x3d8] sm:$0xff]  }
  0xe8   : > { %7606 = vmatprep.subr.bf16.mxu1 %v8101_v44 }
  0xe9   : > { %2684 = vmatmul.mubr.bf16.gmra.mrb[56].mxu0 %v8107_v51  ;;  %v8140_v51 = vld [vmem:[%s9576_s3 + $0x3c0] sm:$0xff]   ;;  %v2963_v34 = vrot.slane %v2961_v25, 5 }
  0xea   : > { %7255 = vmatpush3.bf16.msra.mxu0 %v8110_v54  ;;  %2691 = vmatprep.mubr.bf16.mxu0 %v8114_v59  ;;  %v6441_v54 = vcombine.high %v2781_v35, %v2781_v35  ;;  %v2969_v35 = vrot.slane %v2967_v26, 5  ;;  %v8170_v26 = vld [vmem:[#allocation2 + $0xac] ss:$8 sps:$4 sm:$0x11]  }
  0xeb   : > { %7607 = vmatpush3.bf16.msra.mxu1 %v8101_v44  ;;  %7256 = vmatprep.subr.bf16.mxu0 %v8111_v56  ;;  %v2946_v44 = vrot.slane %v2944_v33, 4  ;;  %v6443_v56 = vcombine.low %v2784_v41, %v2784_v41  ;;  %v2960_v33 = vrot.slane %v2958_v24, 4 }
  0xec   : > { %7608 = vmatprep.subr.bf16.mxu1 %v8104_v47  ;;  %7599 = vmatmul.mubr.bf16.gmra.mrb[4].mxu1 %v8119_v0  ;;  %v2975_v0 = vshll.u32 %v6439_v49, 16 }
  0xee   : > { %7257 = vmatpush3.bf16.msra.mxu0 %v8113_v58  ;;  %v6511_v58 = vcombine.high %v2914_v46, %v2942_v52  ;;  %v2977_v8 = vrot.slane %v2975_v0, 5 }
  0xef   : > { %7609 = vmatpush3.bf16.msra.mxu1 %v8104_v47  ;;  %7258 = vmatprep.subr.bf16.mxu0 %v8117_v62  ;;  %v2922_v47 = vor.u32 %v2921_v39, %v2918_v38  ;;  %v2988_v39 = vrot.slane %v2986_v28, 4  ;;  %v8187_v28 = vld [vmem:[%s9576_s3 + $0x3f8] sm:$0xff]  }
  0xf0   : > { %7610 = vmatprep.subr.bf16.mxu1 %v8109_v53 }
  0xf1   : > { %2692 = vmatmul.mubr.bf16.gmra.mrb[60].mxu0 %v8115_v60  ;;  %v2923_v59 = vrot.slane %v2922_v47, 4  ;;  %v6445_v60 = vcombine.high %v2784_v41, %v2784_v41  ;;  %v2997_v41 = vrot.slane %v2995_v30, 5  ;;  %v8162_v47 = vld [vmem:[%s9576_s3 + $0x420] sm:$0xff]  }
  0xf2   : > { %7259 = vmatpush3.bf16.msra.mxu0 %v8120_v1  ;;  %v2981_v1 = vshll.u32 %v6441_v54, 16  ;;  %3398 = vmatprep.mubr.bf16.mxu0 %v6511_v58  ;;  %v8158_v54 = vld [vmem:[#allocation2 + $0x7c] ss:$8 sps:$4 sm:$0x11]  }
  0xf3   : > { %7611 = vmatpush3.bf16.msra.mxu1 %v8109_v53  ;;  %7260 = vmatprep.subr.bf16.mxu0 %v8121_v2  ;;  %v2950_v53 = vor.u32 %v2949_v45, %v2946_v44  ;;  %v2928_v2 = vsel %vm8672_vm8, %v2923_v59, %v2927_v43  ;;  %v3009_v5 = vshll.u32 %v6445_v60, 16  ;;  %v2964_v44 = vor.u32 %v2963_v34, %v2960_v33  ;;  %v8161_v59 = vld [vmem:[#allocation2 + $0x94] ss:$8 sps:$4 sm:$0x11]   ;;  %v2787_v33 = vld [vmem:[#allocation2 + $0x88] sm:$0x1f] }
  0xf4   : > { %7612 = vmatprep.subr.bf16.mxu1 %v8112_v57  ;;  %v2983_v15 = vrot.slane %v2981_v1, 5  ;;  %v2992_v45 = vor.u32 %v2991_v40, %v2988_v39  ;;  %v8165_v1 = vld [vmem:[%s9576_s3 + $0x428] sm:$0xff]   ;;  %v8198_v34 = vld [vmem:[%s9576_s3 + $0x4c0] sm:$0xff]   ;;  %v6447_v39 = vcombine.low %v2787_v33, %v2787_v33  ;;  %v6449_v40 = vcombine.high %v2787_v33, %v2787_v33 }
  0xf5   : > { %v2951_v62 = vrot.slane %v2950_v53, 4  ;;  %v3011_v19 = vrot.slane %v3009_v5, 5  ;;  %v3051_v5 = vshll.u32 %v8161_v59, 16 }
  0xf6   : > { %7261 = vmatpush3.bf16.msra.mxu0 %v8123_v4  ;;  %v3003_v4 = vshll.u32 %v6443_v56, 16 }
  0xf7   : > { %7613 = vmatpush3.bf16.msra.mxu1 %v8112_v57  ;;  %7298 = vmatprep.subr.bf16.mxu0 %v8134_v7  ;;  %v6510_v57 = vcombine.low %v2914_v46, %v2942_v52  ;;  %v2956_v6 = vsel %vm8672_vm8, %v2951_v62, %v2955_v48  ;;  %v2965_v46 = vrot.slane %v2964_v44, 4  ;;  %v2993_v48 = vrot.slane %v2992_v45, 4  ;;  %v8156_v52 = vld [vmem:[#allocation2 + $0x78] ss:$8 sps:$4 sm:$0xff]  }
  0xf8   : > { %7614 = vmatprep.subr.bf16.mxu1 %v8118_v63  ;;  %v6512_v9 = vcombine.low %v2928_v2, %v2956_v6  ;;  %v3005_v55 = vrot.slane %v3003_v4, 5  ;;  %v3017_v60 = vshll.u32 %v8156_v52, 16  ;;  %v3023_v62 = vshll.u32 %v8158_v54, 16  ;;  %v8154_v2 = vld [vmem:[%s9576_s3 + $0x458] sm:$0xff]  }
  0xf9   : > { %3399 = vmatmul.mubr.bf16.vlgmr.msra.gmra.mrb[64].mxu0 %v6510_v57  ;;  %v2998_v53 = vsel %vm8672_vm8, %v2993_v48, %v2997_v41  ;;  %v8179_v41 = vld [vmem:[%s9576_s3 + $0x470] sm:$0xff]   ;;  %v3031_v54 = vshll.u32 %v6447_v39, 16 }
  0xfa   : > { %7299 = vmatpush3.bf16.msra.mxu0 %v8140_v51  ;;  %7618 = vmatprep.mubr.bf16.mxu1 %v6512_v9  ;;  %v2970_v51 = vsel %vm8672_vm8, %v2965_v46, %v2969_v35  ;;  %v3019_v4 = vrot.slane %v3017_v60, 5  ;;  %v8178_v9 = vld [vmem:[%s9576_s3 + $0x430] sm:$0xff]   ;;  %v3079_v35 = vshll.u32 %v8170_v26, 16  ;;  %v8188_v26 = vld [vmem:[#allocation2 + $0x18] ss:$8 sps:$4 sm:$0xee]  }
  0xfb   : > { %7615 = vmatpush3.bf16.msra.mxu1 %v8118_v63  ;;  %v2972_v63 = vshrl.u32 %v6439_v49, 16  ;;  %7300 = vmatprep.subr.bf16.mxu0 %v8141_v61  ;;  %v8151_v49 = vld [vmem:[%s9576_s3 + $0x450] sm:$0xff]   ;;  %v6514_v57 = vcombine.high %v2970_v51, %v2998_v53  ;;  %v6513_v58 = vcombine.low %v2970_v51, %v2998_v53  ;;  %v8164_v61 = vld [vmem:[%s9576_s3 + $0x3e0] sm:$0xff]   ;;  %v3028_v53 = vshrl.u32 %v6447_v39, 16 }
  0xfc   : > { %7616 = vmatprep.subr.bf16.mxu1 %v8122_v3  ;;  %v3081_v46 = vrot.slane %v3079_v35, 5  ;;  %v2796_v60 = vld [vmem:[#allocation2 + $0xd0] sm:$0x1f]  ;;  %v6578_v35 = vrot.slane %v8188_v26, 9 }
  0xfd   : > { %v2974_v7 = vrot.slane %v2972_v63, 4  ;;  %3406 = vmatprep.mubr.bf16.mxu0 %v6514_v57  ;;  %v3037_v57 = vshll.u32 %v6449_v40, 16  ;;  %v8193_v39 = vld [vmem:[#allocation2 + $0x34] ss:$8 sps:$4 sm:$0x11]  }
  0xfe   : > { %7301 = vmatpush3.bf16.msra.mxu0 %v8143_v12  ;;  %v3053_v12 = vrot.slane %v3051_v5, 5  ;;  %v8211_v26 = vld [vmem:[#allocation2 + $0x60] ss:$8 sps:$4 sm:$0xee]  }
  0xff   : > { %7617 = vmatpush3.bf16.msra.mxu1 %v8122_v3  ;;  %v3000_v3 = vshrl.u32 %v6443_v56, 16  ;;  %v2978_v14 = vor.u32 %v2977_v8, %v2974_v7  ;;  %7302 = vmatprep.subr.bf16.mxu0 %v8150_v13  ;;  %v8159_v56 = vld [vmem:[#allocation2 + $0x90] ss:$8 sps:$4 sm:$0xff]   ;;  %v8167_v8 = vld [vmem:[%s9576_s3 + $0x3e8] sm:$0xff]  }
 0x100   : > { %7626 = vmatprep.subr.bf16.mxu1 %v9040_v10  ;;  %v3042_v63 = vshrl.u32 %v8159_v56, 16  ;;  %v3045_v0 = vshll.u32 %v8159_v56, 16  ;;  %v2793_v56 = vld [vmem:[#allocation2 + $0xb8] sm:$0x1f] }
 0x101   : > { %v3002_v11 = vrot.slane %v3000_v3, 4  ;;  %v2979_v23 = vrot.slane %v2978_v14, 4  ;;  %3407 = vmatmul.mubr.bf16.gmra.mrb[68].mxu0 %v6513_v58 }
 0x102   : > { %7303 = vmatpush3.bf16.msra.mxu0 %v8152_v22  ;;  %v3044_v6 = vrot.slane %v3042_v63, 4  ;;  %v3047_v7 = vrot.slane %v3045_v0, 5  ;;  %v8168_v22 = vld [vmem:[#allocation2 + $0xa8] ss:$8 sps:$4 sm:$0xff]   ;;  %v3030_v0 = vrot.slane %v3028_v53, 4 }
 0x103   : > { %v3006_v18 = vor.u32 %v3005_v55, %v3002_v11  ;;  %v2984_v31 = vsel %vm8672_vm8, %v2979_v23, %v2983_v15  ;;  %7304 = vmatprep.subr.bf16.mxu0 %v8153_v36  ;;  %v3025_v55 = vrot.slane %v3023_v62, 5  ;;  %v8163_v15 = vld [vmem:[%s9576_s3 + $0x460] sm:$0xff]   ;;  %v3070_v29 = vshrl.u32 %v8168_v22, 16 }
 0x104   : > { %v3048_v13 = vor.u32 %v3047_v7, %v3044_v6  ;;  %v8171_v23 = vld [vmem:[#allocation2 + $0xc0] ss:$8 sps:$4 sm:$0xff]   ;;  %v3073_v30 = vshll.u32 %v8168_v22, 16 }
 0x105   : > { %v3007_v27 = vrot.slane %v3006_v18, 4 }
 0x106   : > { %7305 = vmatpush3.bf16.msra.mxu0 %v8155_v42  ;;  %v3049_v16 = vrot.slane %v3048_v13, 4  ;;  %v3072_v42 = vrot.slane %v3070_v29, 4  ;;  %v6457_v13 = vcombine.high %v2793_v56, %v2793_v56 }
 0x107   : > { %v3012_v38 = vsel %vm8672_vm8, %v3007_v27, %v3011_v19  ;;  %7306 = vmatprep.subr.bf16.mxu0 %v8162_v47  ;;  %v8166_v19 = vld [vmem:[%s9576_s3 + $0x468] sm:$0xff]  }
 0x108   : > { %v6515_v43 = vcombine.low %v2984_v31, %v3012_v38  ;;  %v3054_v21 = vsel %vm8672_vm8, %v3049_v16, %v3053_v12  ;;  %v8173_v27 = vld [vmem:[#allocation2 + $0xc4] ss:$8 sps:$4 sm:$0x11]   ;;  %v3098_v31 = vshrl.u32 %v8171_v23, 16  ;;  %v6461_v16 = vcombine.high %v2796_v60, %v2796_v60 }
 0x109   : > { %v3107_v36 = vshll.u32 %v8173_v27, 16  ;;  %v2790_v38 = vld [vmem:[#allocation2 + $0xa0] sm:$0x1f] }
 0x10a   : > { %7619 = vmatmul.mubr.bf16.vlgmr.msra.gmra.mrb[0].mxu1 %v6515_v43  ;;  %7307 = vmatpush3.bf16.msra.mxu0 %v8164_v61  ;;  %v3075_v43 = vrot.slane %v3073_v30, 5  ;;  %v3100_v44 = vrot.slane %v3098_v31, 4  ;;  %v6451_v48 = vcombine.low %v2790_v38, %v2790_v38  ;;  %v8186_v61 = vld [vmem:[%s9576_s3 + $0x478] sm:$0xff]   ;;  %v3121_v29 = vshll.u32 %v6461_v16, 16 }
 0x10b   : > { %7627 = vmatpush3.bf16.msra.mxu1 %v9040_v10  ;;  %v3014_v10 = vshrl.u32 %v8156_v52, 16  ;;  %7308 = vmatprep.subr.bf16.mxu0 %v8165_v1  ;;  %v3109_v47 = vrot.slane %v3107_v36, 5  ;;  %v3033_v1 = vrot.slane %v3031_v54, 5  ;;  %v8190_v30 = vld [vmem:[#allocation2 + $0x1c] ss:$8 sps:$4 sm:$0x11]  }
 0x10c   : > { %7628 = vmatprep.subr.bf16.mxu1 %v8142_v32  ;;  %v3076_v51 = vor.u32 %v3075_v43, %v3072_v42  ;;  %v3056_v58 = vshrl.u32 %v6451_v48, 16  ;;  %v3059_v59 = vshll.u32 %v6451_v48, 16  ;;  %v3634_v40 = vrot.slane %v8190_v30, 5 }
 0x10d   : > { %v3016_v3 = vrot.slane %v3014_v10, 4  ;;  %v3123_v42 = vrot.slane %v3121_v29, 5  ;;  %v3642_v48 = vrot.slane %v8193_v39, 5 }
 0x10e   : > { %7309 = vmatpush3.bf16.msra.mxu0 %v8167_v8  ;;  %v3077_v62 = vrot.slane %v3076_v51, 4  ;;  %v3034_v8 = vor.u32 %v3033_v1, %v3030_v0  ;;  %v8205_v1 = vld [vmem:[%s9576_s3 + $0x4c8] sm:$0xff]  }
 0x10f   : > { %7629 = vmatpush3.bf16.msra.mxu1 %v8142_v32  ;;  %v3020_v11 = vor.u32 %v3019_v4, %v3016_v3  ;;  %7310 = vmatprep.subr.bf16.mxu0 %v8178_v9  ;;  %v3101_v32 = vshll.u32 %v8171_v23, 16  ;;  %v3058_v3 = vrot.slane %v3056_v58, 4  ;;  %v3061_v4 = vrot.slane %v3059_v59, 5  ;;  %v3512_v59 = vld [vmem:[#allocation2 + $0x58] sm:$0x1e] }
 0x110   : > { %7630 = vmatprep.subr.bf16.mxu1 %v8151_v49  ;;  %v3082_v6 = vsel %vm8672_vm8, %v3077_v62, %v3081_v46  ;;  %v6455_v9 = vcombine.low %v2793_v56, %v2793_v56 }
 0x111   : > { %v3021_v14 = vrot.slane %v3020_v11, 4  ;;  %v3103_v45 = vrot.slane %v3101_v32, 5  ;;  %v3062_v12 = vor.u32 %v3061_v4, %v3058_v3 }
 0x112   : > { %7311 = vmatpush3.bf16.msra.mxu0 %v8184_v17  ;;  %v3084_v17 = vshrl.u32 %v6455_v9, 16 }
 0x113   : > { %7631 = vmatpush3.bf16.msra.mxu1 %v8151_v49  ;;  %v3026_v18 = vsel %vm8672_vm8, %v3021_v14, %v3025_v55  ;;  %v6453_v49 = vcombine.high %v2790_v38, %v2790_v38  ;;  %7312 = vmatprep.subr.bf16.mxu0 %v8185_v20  ;;  %v3104_v52 = vor.u32 %v3103_v45, %v3100_v44  ;;  %v3035_v14 = vrot.slane %v3034_v8, 4  ;;  %v3506_v44 = vld [vmem:[#allocation2 + $0x28] sm:$0x1e]  ;;  %v3509_v45 = vld [vmem:[#allocation2 + $0x40] sm:$0x1e] }
 0x114   : > { %7632 = vmatprep.subr.bf16.mxu1 %v8154_v2  ;;  %v6517_v24 = vcombine.high %v3026_v18, %v3054_v21  ;;  %v6516_v25 = vcombine.low %v3026_v18, %v3054_v21  ;;  %v3063_v18 = vrot.slane %v3062_v12, 4  ;;  %v3093_v20 = vshll.u32 %v6457_v13, 16  ;;  %v9140_v21 = vld [vmem:[%s9576_s3 + $0x500] sm:$0xff]   ;;  %v8207_v12 = vld [vmem:[%s9576_s3 + $0x488] sm:$0xff]  }
 0x115   : > { %v3065_v10 = vshll.u32 %v6453_v49, 16  ;;  %v3105_v63 = vrot.slane %v3104_v52, 4  ;;  %v3086_v23 = vrot.slane %v3084_v17, 4  ;;  %v6547_v49 = vcombine.low %v3506_v44, %v3506_v44  ;;  %v8214_v17 = vld [vmem:[%s9576_s3 + $0x4d0] sm:$0xff]  }
 0x116   : > { %3414 = vmatprep.mubr.bf16.mxu0 %v6517_v24  ;;  %7313 = vmatpush3.bf16.msra.mxu0 %v8187_v28  ;;  %v3095_v38 = vrot.slane %v3093_v20, 5  ;;  %v6549_v52 = vcombine.high %v3506_v44, %v3506_v44  ;;  %v6551_v53 = vcombine.low %v3509_v45, %v3509_v45  ;;  %v6553_v54 = vcombine.high %v3509_v45, %v3509_v45  ;;  %v8208_v20 = vld [vmem:[#allocation2 + $0x48] ss:$8 sps:$4 sm:$0xee]   ;;  %v8226_v44 = vld [vmem:[%s9576_s3 + $0x4e0] sm:$0xff]  }
 0x117   : > { %7633 = vmatpush3.bf16.msra.mxu1 %v8154_v2  ;;  %3415 = vmatmul.mubr.bf16.gmra.mrb[72].mxu0 %v6516_v25  ;;  %v3039_v2 = vrot.slane %v3037_v57, 5  ;;  %v3067_v5 = vrot.slane %v3065_v10, 5  ;;  %v3110_v7 = vsel %vm8672_vm8, %v3105_v63, %v3109_v47  ;;  %v3635_v47 = vsel %vm8854_vm11, %v6578_v35, %v3634_v40  ;;  %v3515_v10 = vld [vmem:[#allocation2 + $0x70] sm:$0x1e]  ;;  %v8219_v40 = vld [vmem:[%s9576_s3 + $0x498] sm:$0xff]  }
 0x118   : > { %7634 = vmatprep.subr.bf16.mxu1 %v8163_v15  ;;  %7350 = vmatprep.subr.bf16.mxu0 %v8198_v34  ;;  %v6520_v11 = vcombine.high %v3082_v6, %v3110_v7  ;;  %v6519_v55 = vcombine.low %v3082_v6, %v3110_v7  ;;  %v8191_v34 = vld [vmem:[#allocation2 + $0x30] ss:$8 sps:$4 sm:$0xee]   ;;  %v6579_v58 = vrot.slane %v6547_v49, 9  ;;  %v3638_v0 = vrot.slane %v6549_v52, 5 }
 0x119   : > { %v3040_v22 = vsel %vm8672_vm8, %v3035_v14, %v3039_v2  ;;  %v3068_v27 = vsel %vm8672_vm8, %v3063_v18, %v3067_v5  ;;  %v6580_v43 = vrot.slane %v8191_v34, 9  ;;  %v6581_v3 = vrot.slane %v6551_v53, 9  ;;  %v8215_v35 = vld [vmem:[%s9576_s3 + $0x510] sm:$0xff]   ;;  %v8222_v45 = vld [vmem:[#allocation2 + $0x7c] ss:$8 sps:$4 sm:$0x11]  }
 0x11a   : > { %3422 = vmatprep.mubr.bf16.mxu0 %v6520_v11  ;;  %v6518_v31 = vcombine.low %v3040_v22, %v3068_v27  ;;  %v3646_v4 = vrot.slane %v6553_v54, 5  ;;  %v6555_v5 = vcombine.low %v3512_v59, %v3512_v59  ;;  %v3639_v6 = vsel %vm8854_vm11, %v6579_v58, %v3638_v0  ;;  %v8210_v22 = vld [vmem:[#allocation2 + $0x4c] ss:$8 sps:$4 sm:$0x11]   ;;  %v8228_v54 = vld [vmem:[%s9576_s3 + $0x4a0] sm:$0xff]  }
 0x11b   : > { %7635 = vmatpush3.bf16.msra.mxu1 %v8163_v15  ;;  %v6459_v15 = vcombine.low %v2796_v60, %v2796_v60  ;;  %v3643_v57 = vsel %vm8854_vm11, %v6580_v43, %v3642_v48  ;;  %v8204_v60 = vld [vmem:[%s9576_s3 + $0x480] sm:$0xff]   ;;  %v6557_v7 = vcombine.high %v3512_v59, %v3512_v59  ;;  %v6559_v8 = vcombine.low %v3515_v10, %v3515_v10  ;;  %v8229_v58 = vld [vmem:[%s9576_s3 + $0x4e8] sm:$0xff]  }
 0x11c   : > { %7636 = vmatprep.subr.bf16.mxu1 %v8166_v19  ;;  %7622 = vmatprep.mubr.bf16.mxu1 %v6518_v31  ;;  %v6642_v62 = vcombine.low %v3635_v47, %v3643_v57  ;;  %v6643_v63 = vcombine.high %v3635_v47, %v3643_v57  ;;  %v3647_v11 = vsel %vm8854_vm11, %v6581_v3, %v3646_v4  ;;  %v8213_v27 = vld [vmem:[#allocation2 + $0x64] ss:$8 sps:$4 sm:$0x11]   ;;  %v6582_v29 = vrot.slane %v8208_v20, 9 }
 0x11d   : > { %v3112_v24 = vshrl.u32 %v6459_v15, 16  ;;  %v3115_v25 = vshll.u32 %v6459_v15, 16  ;;  %v6644_v13 = vcombine.low %v3639_v6, %v3647_v11  ;;  %v3654_v14 = vrot.slane %v6557_v7, 5  ;;  %v8220_v43 = vld [vmem:[#allocation2 + $0x78] ss:$8 sps:$4 sm:$0xee]  }
 0x11e   : > { %v6585_v15 = vrot.slane %v6559_v8, 9  ;;  %v3650_v30 = vrot.slane %v8210_v22, 5  ;;  %v6584_v31 = vrot.slane %v8211_v26, 9  ;;  %v8225_v47 = vld [vmem:[#allocation2 + $0x94] ss:$8 sps:$4 sm:$0x11]  }
 0x11f   : > { %7637 = vmatpush3.bf16.msra.mxu1 %v8166_v19  ;;  %v3087_v19 = vshll.u32 %v6455_v9, 16  ;;  %3423 = vmatmul.mubr.bf16.gmra.mrb[76].mxu0 %v6519_v55  ;;  %v3114_v32 = vrot.slane %v3112_v24, 4  ;;  %v3117_v33 = vrot.slane %v3115_v25, 5  ;;  %v6561_v9 = vcombine.high %v3515_v10, %v3515_v10  ;;  %v8206_v25 = vld [vmem:[%s9576_s3 + $0x508] sm:$0xff]   ;;  %v3524_v26 = vld [vmem:[#allocation2 + $0xb8] sm:$0x1e] }
 0x120   : > { %7638 = vmatprep.subr.bf16.mxu1 %v8179_v41  ;;  %3969 = vmatprep.mubr.bf16.mxu0 %v6643_v63  ;;  %v6583_v55 = vrot.slane %v6555_v5, 9  ;;  %v6586_v48 = vrot.slane %v8220_v43, 9  ;;  %v3666_v49 = vrot.slane %v8222_v45, 5  ;;  %v3674_v52 = vrot.slane %v8225_v47, 5  ;;  %v8231_v0 = vld [vmem:[%s9576_s3 + $0x4a8] sm:$0xff]  }
 0x121   : > { %v3089_v28 = vrot.slane %v3087_v19, 5  ;;  %v3662_v16 = vrot.slane %v6561_v9, 5  ;;  %v8232_v4 = vld [vmem:[#allocation2 + $0xa8] ss:$8 sps:$4 sm:$0xee]  }
 0x122   : > { %v3655_v18 = vsel %vm8854_vm11, %v6583_v55, %v3654_v14  ;;  %v3667_v53 = vsel %vm8854_vm11, %v6586_v48, %v3666_v49  ;;  %v8234_v5 = vld [vmem:[#allocation2 + $0xac] ss:$8 sps:$4 sm:$0x11]   ;;  %v8235_v6 = vld [vmem:[#allocation2 + $0xc0] ss:$8 sps:$4 sm:$0xee]  }
 0x123   : > { %7639 = vmatpush3.bf16.msra.mxu1 %v8179_v41  ;;  %v3090_v36 = vor.u32 %v3089_v28, %v3086_v23  ;;  %v3118_v41 = vor.u32 %v3117_v33, %v3114_v32  ;;  %v3663_v19 = vsel %vm8854_vm11, %v6585_v15, %v3662_v16  ;;  %v8216_v23 = vld [vmem:[%s9576_s3 + $0x490] sm:$0xff]   ;;  %v8217_v28 = vld [vmem:[%s9576_s3 + $0x4d8] sm:$0xff]   ;;  %v3658_v32 = vrot.slane %v8213_v27, 5  ;;  %v8237_v7 = vld [vmem:[#allocation2 + $0xc4] ss:$8 sps:$4 sm:$0x11]  }
 0x124   : > { %7640 = vmatprep.subr.bf16.mxu1 %v8186_v61  ;;  %v6647_v24 = vcombine.low %v3655_v18, %v3663_v19  ;;  %v3651_v33 = vsel %vm8854_vm11, %v6582_v29, %v3650_v30  ;;  %v6590_v8 = vrot.slane %v8232_v4, 9  ;;  %v3682_v9 = vrot.slane %v8234_v5, 5  ;;  %v3518_v11 = vld [vmem:[#allocation2 + $0x88] sm:$0x1e]  ;;  %v3521_v55 = vld [vmem:[#allocation2 + $0xa0] sm:$0x1e] }
 0x125   : > { %v3091_v46 = vrot.slane %v3090_v36, 4  ;;  %v3119_v51 = vrot.slane %v3118_v41, 4  ;;  %v3659_v34 = vsel %vm8854_vm11, %v6584_v31, %v3658_v32  ;;  %v6563_v14 = vcombine.low %v3518_v11, %v3518_v11  ;;  %v8242_v19 = vld [vmem:[%s9576_s3 + $0x4f0] sm:$0xff]   ;;  %v8251_v48 = vld [vmem:[%s9576_s3 + $0x4b8] sm:$0xff]   ;;  %v8260_v5 = vld [vmem:[%s9576_s3 + $0x5c8] sm:$0xff]  }
 0x126   : > { %v6645_v39 = vcombine.low %v3651_v33, %v3659_v34  ;;  %v6565_v15 = vcombine.high %v3518_v11, %v3518_v11  ;;  %v3683_v16 = vsel %vm8854_vm11, %v6590_v8, %v3682_v9  ;;  %v6569_v18 = vcombine.high %v3521_v55, %v3521_v55  ;;  %v8248_v27 = vld [vmem:[%s9576_s3 + $0x4b0] sm:$0xff]   ;;  %v8261_v8 = vld [vmem:[%s9576_s3 + $0x548] sm:$0xff]  }
 0x127   : > { %7641 = vmatpush3.bf16.msra.mxu1 %v8186_v61  ;;  %v3096_v56 = vsel %vm8672_vm8, %v3091_v46, %v3095_v38  ;;  %v3124_v61 = vsel %vm8672_vm8, %v3119_v51, %v3123_v42  ;;  %3970 = vmatmul.mubr.bf16.vlgmr.msra.gmra.mrb[80].mxu0 %v6642_v62  ;;  %v6646_v38 = vcombine.high %v3651_v33, %v3659_v34  ;;  %v8223_v46 = vld [vmem:[#allocation2 + $0x90] ss:$8 sps:$4 sm:$0xee]   ;;  %v8262_v11 = vld [vmem:[#allocation2 + $0x68] ss:$24 sps:$4 sm:$0xff]  }
 0x128   : > { %7650 = vmatprep.subr.bf16.mxu1 %v9140_v21  ;;  %v6521_v2 = vcombine.low %v3096_v56, %v3124_v61  ;;  %7351 = vmatpush3.bf16.msra.mxu0 %v8204_v60  ;;  %v6588_v51 = vrot.slane %v8223_v46, 9  ;;  %v8227_v61 = vld [vmem:[%s9576_s3 + $0x520] sm:$0xff]   ;;  %v3678_v31 = vrot.slane %v6569_v18, 5  ;;  %v3527_v32 = vld [vmem:[#allocation2 + $0xd0] sm:$0x1e]  ;;  %v6571_v34 = vcombine.low %v3524_v26, %v3524_v26  ;;  %v8250_v46 = vld [vmem:[%s9576_s3 + $0x538] sm:$0xff]  }
 0x129   : > { %7352 = vmatprep.subr.bf16.mxu0 %v8205_v1  ;;  %3977 = vmatprep.mubr.bf16.mxu0 %v6646_v38 }
 0x12a   : > { %7623 = vmatmul.mubr.bf16.gmra.mrb[4].mxu1 %v6521_v2  ;;  %v3675_v57 = vsel %vm8854_vm11, %v6588_v51, %v3674_v52  ;;  %v8230_v2 = vld [vmem:[%s9576_s3 + $0x528] sm:$0xff]   ;;  %v8252_v52 = vld [vmem:[#allocation2 + $0x38] ss:$24 sps:$4 sm:$0xff]  }
 0x12b   : > { %7642 = vmatprep.mubr.bf16.mxu1 %v6644_v13  ;;  %v6649_v10 = vcombine.high %v3667_v53, %v3675_v57  ;;  %v6648_v60 = vcombine.low %v3667_v53, %v3675_v57  ;;  %v3690_v13 = vrot.slane %v8237_v7, 5  ;;  %v8254_v57 = vld [vmem:[#allocation2 + $0x40] ss:$24 sps:$4 sm:$0xff]  }
 0x12c   : > { %7353 = vmatpush3.bf16.msra.mxu0 %v8207_v12  ;;  %v6592_v12 = vrot.slane %v8235_v6, 9 }
 0x12d   : > { %7354 = vmatprep.subr.bf16.mxu0 %v8214_v17  ;;  %v6567_v17 = vcombine.low %v3521_v55, %v3521_v55 }
 0x12e   : > { %v3691_v22 = vsel %vm8854_vm11, %v6592_v12, %v3690_v13  ;;  %v8263_v12 = vld [vmem:[#allocation2 + $0x60] ss:$24 sps:$4 sm:$0xff]   ;;  %v8264_v13 = vld [vmem:[%s9576_s3 + $0x590] sm:$0xff]  }
 0x12f   : > { %3978 = vmatmul.mubr.bf16.gmra.mrb[84].mxu0 %v6645_v39  ;;  %v6651_v29 = vcombine.low %v3683_v16, %v3691_v22  ;;  %v6589_v30 = vrot.slane %v6567_v17, 9  ;;  %v6577_v39 = vcombine.high %v3527_v32, %v3527_v32  ;;  %v8266_v17 = vld [vmem:[%s9576_s3 + $0x550] sm:$0xff]  }
 0x130   : > { %7355 = vmatpush3.bf16.msra.mxu0 %v8216_v23  ;;  %3985 = vmatprep.mubr.bf16.mxu0 %v6649_v10  ;;  %v6587_v23 = vrot.slane %v6563_v14, 9  ;;  %v8256_v10 = vld [vmem:[%s9576_s3 + $0x5c0] sm:$0xff]  }
 0x131   : > { %7356 = vmatprep.subr.bf16.mxu0 %v8217_v28  ;;  %v6652_v28 = vcombine.high %v3683_v16, %v3691_v22  ;;  %v3679_v38 = vsel %vm8854_vm11, %v6589_v30, %v3678_v31  ;;  %v3694_v47 = vrot.slane %v6577_v39, 5  ;;  %v8271_v31 = vld [vmem:[#allocation2 + $0x90] ss:$24 sps:$4 sm:$0xff]  }
 0x132   : > { %7643 = vmatmul.mubr.bf16.vlgmr.msra.gmra.mrb[0].mxu1 %v6647_v24  ;;  %v3670_v24 = vrot.slane %v6565_v15, 5  ;;  %v8265_v15 = vld [vmem:[%s9576_s3 + $0x5d0] sm:$0xff]  }
 0x133   : > { %7651 = vmatpush3.bf16.msra.mxu1 %v9140_v21  ;;  %v8218_v21 = vld [vmem:[%s9576_s3 + $0x518] sm:$0xff]  }
 0x134   : > { %7652 = vmatprep.subr.bf16.mxu1 %v8206_v25  ;;  %7357 = vmatpush3.bf16.msra.mxu0 %v8219_v40  ;;  %v3671_v33 = vsel %vm8854_vm11, %v6587_v23, %v3670_v24  ;;  %v8249_v40 = vld [vmem:[%s9576_s3 + $0x4f8] sm:$0xff]  }
 0x135   : > { %7358 = vmatprep.subr.bf16.mxu0 %v8226_v44  ;;  %v6650_v43 = vcombine.low %v3671_v33, %v3679_v38  ;;  %v6591_v44 = vrot.slane %v6571_v34, 9  ;;  %v8268_v23 = vld [vmem:[%s9576_s3 + $0x5d8] sm:$0xff]  }
 0x137   : > { %7653 = vmatpush3.bf16.msra.mxu1 %v8206_v25  ;;  %3986 = vmatmul.mubr.bf16.gmra.mrb[88].mxu0 %v6648_v60  ;;  %v8243_v25 = vld [vmem:[%s9576_s3 + $0x530] sm:$0xff]  }
 0x138   : > { %7654 = vmatprep.subr.bf16.mxu1 %v8215_v35  ;;  %7359 = vmatpush3.bf16.msra.mxu0 %v8228_v54  ;;  %v8253_v54 = vld [vmem:[#allocation2 + $0x30] ss:$24 sps:$4 sm:$0xff]  }
 0x139   : > { %7360 = vmatprep.subr.bf16.mxu0 %v8229_v58  ;;  %3993 = vmatprep.mubr.bf16.mxu0 %v6652_v28  ;;  %v8255_v58 = vld [vmem:[%s9576_s3 + $0x580] sm:$0xff]   ;;  %v8270_v28 = vld [vmem:[#allocation2 + $0x98] ss:$24 sps:$4 sm:$0xff]  }
 0x13a   : > { %7646 = vmatprep.mubr.bf16.mxu1 %v6650_v43 }
 0x13b   : > { %7655 = vmatpush3.bf16.msra.mxu1 %v8215_v35  ;;  %v6573_v35 = vcombine.high %v3524_v26, %v3524_v26  ;;  %v8269_v26 = vld [vmem:[%s9576_s3 + $0x558] sm:$0xff]  }
 0x13c   : > { %7656 = vmatprep.subr.bf16.mxu1 %v8218_v21  ;;  %7361 = vmatpush3.bf16.msra.mxu0 %v8231_v0  ;;  %v8258_v0 = vld [vmem:[%s9576_s3 + $0x540] sm:$0xff]  }
 0x13d   : > { %7362 = vmatprep.subr.bf16.mxu0 %v8242_v19 }
 0x13f   : > { %7657 = vmatpush3.bf16.msra.mxu1 %v8218_v21  ;;  %3994 = vmatmul.mubr.bf16.gmra.mrb[92].mxu0 %v6651_v29  ;;  %v3686_v21 = vrot.slane %v6573_v35, 5  ;;  %v8273_v35 = vld [vmem:[%s9576_s3 + $0x5e0] sm:$0xff]  }
 0x140   : > { %7658 = vmatprep.subr.bf16.mxu1 %v8227_v61  ;;  %7363 = vmatpush3.bf16.msra.mxu0 %v8248_v27 }
 0x141   : > { %7364 = vmatprep.subr.bf16.mxu0 %v8249_v40  ;;  %v3687_v51 = vsel %vm8854_vm11, %v6591_v44, %v3686_v21  ;;  %4397 = vmatprep.mubr.bf16.mxu0 %v8252_v52  ;;  %v8279_v52 = vld [vmem:[#allocation2 + $0xc0] ss:$24 sps:$4 sm:$0xff]  }
 0x143   : > { %7659 = vmatpush3.bf16.msra.mxu1 %v8227_v61 }
 0x144   : > { %7660 = vmatprep.subr.bf16.mxu1 %v8230_v2  ;;  %7365 = vmatpush3.bf16.msra.mxu0 %v8251_v48 }
 0x145   : > { %7402 = vmatprep.subr.bf16.mxu0 %v8255_v58  ;;  %v8283_v58 = vld [vmem:[#allocation2 + $0xd0] ss:$24 sps:$4 sm:$0xff]  }
 0x147   : > { %7661 = vmatpush3.bf16.msra.mxu1 %v8230_v2  ;;  %4398 = vmatmul.mubr.bf16.vlgmr.msra.gmra.mrb[96].mxu0 %v8253_v54  ;;  %v8259_v2 = vld [vmem:[%s9576_s3 + $0x588] sm:$0xff]   ;;  %v8281_v54 = vld [vmem:[%s9576_s3 + $0x5b0] sm:$0xff]  }
 0x148   : > { %7662 = vmatprep.subr.bf16.mxu1 %v8243_v25  ;;  %7403 = vmatpush3.bf16.msra.mxu0 %v8258_v0 }
 0x149   : > { %v7054_v36 = vpop.f32.mrb[0].mxu0  ;;  %7404 = vmatprep.subr.bf16.mxu0 %v8259_v2  ;;  %4405 = vmatprep.mubr.bf16.mxu0 %v8262_v11  ;;  %v8290_v11 = vld [vmem:[#allocation2 + $0x34] ss:$8 sps:$4 sm:$0x11]  }
 0x14a   : > { %v7055_v41 = vpop.f32.mrb[1].mxu0 }
 0x14b   : > { %v9195_v42 = vadd.f32 %v7055_v41, %v7054_v36  ;;  %v7057_v56 = vpop.f32.mrb[2].mxu0  ;;  %v6575_v36 = vcombine.low %v3527_v32, %v3527_v32  ;;  %7663 = vmatpush3.bf16.msra.mxu1 %v8243_v25  ;;  %v8272_v32 = vld [vmem:[%s9576_s3 + $0x5a0] sm:$0xff]  }
 0x14c   : > { %v7058_v59 = vpop.f32.mrb[3].mxu0  ;;  %7664 = vmatprep.subr.bf16.mxu1 %v8250_v46  ;;  %7405 = vmatpush3.bf16.msra.mxu0 %v8261_v8 }
 0x14d   : > { %v9216_v62 = vadd.f32 %v7058_v59, %v7057_v56  ;;  %v6593_v45 = vrot.slane %v6575_v36, 9  ;;  %7406 = vmatprep.subr.bf16.mxu0 %v8264_v13  ;;  %v8291_v13 = vld [vmem:[#allocation2 + $0x48] ss:$8 sps:$4 sm:$0xff]  }
 0x14f   : > { %v3695_v53 = vsel %vm8854_vm11, %v6593_v45, %v3694_v47  ;;  %7665 = vmatpush3.bf16.msra.mxu1 %v8250_v46  ;;  %4406 = vmatmul.mubr.bf16.gmra.mrb[100].mxu0 %v8263_v12  ;;  %v8277_v45 = vld [vmem:[%s9576_s3 + $0x568] sm:$0xff]   ;;  %v8298_v12 = vld [vmem:[%s9576_s3 + $0x640] sm:$0xff]  }
 0x150   : > { %v6653_v56 = vcombine.low %v3687_v51, %v3695_v53  ;;  %7674 = vmatprep.subr.bf16.mxu1 %v8256_v10  ;;  %7407 = vmatpush3.bf16.msra.mxu0 %v8266_v17  ;;  %v8278_v47 = vld [vmem:[#allocation2 + $0xc8] ss:$24 sps:$4 sm:$0xff]  }
 0x151   : > { %4413 = vmatprep.mubr.bf16.mxu0 %v8270_v28 }
 0x152   : > { %7647 = vmatmul.mubr.bf16.gmra.mrb[4].mxu1 %v6653_v56 }
 0x153   : > { %7666 = vmatprep.mubr.bf16.mxu1 %v8254_v57 }
 0x154   : > { %v7060_v63 = vpop.f32.mrb[4].mxu0 }
 0x155   : > { %v7061_v1 = vpop.f32.mrb[5].mxu0 }
 0x156   : > { %v9224_v3 = vadd.f32 %v7061_v1, %v7060_v63  ;;  %v7063_v20 = vpop.f32.mrb[6].mxu0  ;;  %v8257_v63 = vld [vmem:[#allocation2 + $0x70] ss:$24 sps:$4 sm:$0xff]  }
 0x157   : > { %v7064_v41 = vpop.f32.mrb[7].mxu0  ;;  %4414 = vmatmul.mubr.bf16.gmra.mrb[104].mxu0 %v8271_v31 }
 0x158   : > { %v9252_v49 = vadd.f32 %v7064_v41, %v7063_v20  ;;  %v8267_v20 = vld [vmem:[%s9576_s3 + $0x598] sm:$0xff]   ;;  %v8276_v41 = vld [vmem:[%s9576_s3 + $0x5e8] sm:$0xff]   ;;  %4421 = vmatprep.mubr.bf16.mxu0 %v8278_v47 }
 0x159   : > { %7408 = vmatprep.subr.bf16.mxu0 %v8267_v20  ;;  %v4505_v20 = vld [vmem:[#allocation2 + $0x40] sm:$0x1f] }
 0x15a   : > { %7667 = vmatmul.mubr.bf16.vlgmr.msra.gmra.mrb[0].mxu1 %v8257_v63  ;;  %7409 = vmatpush3.bf16.msra.mxu0 %v8269_v26  ;;  %v6763_v26 = vcombine.low %v4505_v20, %v4505_v20  ;;  %v6765_v31 = vcombine.high %v4505_v20, %v4505_v20 }
 0x15b   : > { %7675 = vmatpush3.bf16.msra.mxu1 %v8256_v10  ;;  %7410 = vmatprep.subr.bf16.mxu0 %v8272_v32  ;;  %v8284_v10 = vld [vmem:[%s9576_s3 + $0x570] sm:$0xff]  }
 0x15c   : > { %v7066_v59 = vpop.f32.mrb[8].mxu0  ;;  %7676 = vmatprep.subr.bf16.mxu1 %v8260_v5 }
 0x15d   : > { %v7067_v60 = vpop.f32.mrb[9].mxu0 }
 0x15e   : > { %v9264_v61 = vadd.f32 %v7067_v60, %v7066_v59  ;;  %v7069_v1 = vpop.f32.mrb[10].mxu0 }
 0x15f   : > { %v7070_v4 = vpop.f32.mrb[11].mxu0  ;;  %7677 = vmatpush3.bf16.msra.mxu1 %v8260_v5  ;;  %4422 = vmatmul.mubr.bf16.gmra.mrb[108].mxu0 %v8279_v52  ;;  %v8287_v5 = vld [vmem:[%s9576_s3 + $0x578] sm:$0xff]   ;;  %v4514_v52 = vld [vmem:[#allocation2 + $0x88] sm:$0x1f] }
 0x160   : > { %v9275_v6 = vadd.f32 %v7070_v4, %v7069_v1  ;;  %7678 = vmatprep.subr.bf16.mxu1 %v8265_v15  ;;  %v8286_v1 = vld [vmem:[%s9576_s3 + $0x5f8] sm:$0xff]  }
 0x163   : > { %7679 = vmatpush3.bf16.msra.mxu1 %v8265_v15  ;;  %v9365_v15 = vld [vmem:[%s9576_s3 + $0x680] sm:$0xff]  }
 0x164   : > { %v7072_v7 = vpop.f32.mrb[12].mxu0  ;;  %7680 = vmatprep.subr.bf16.mxu1 %v8268_v23 }
 0x165   : > { %v7073_v9 = vpop.f32.mrb[13].mxu0 }
 0x166   : > { %v9280_v55 = vadd.f32 %v7073_v9, %v7072_v7  ;;  %v7075_v14 = vpop.f32.mrb[14].mxu0  ;;  %v8288_v9 = vld [vmem:[#allocation2 + $0x30] ss:$8 sps:$4 sm:$0xff]  }
 0x167   : > { %v7076_v16 = vpop.f32.mrb[15].mxu0  ;;  %7681 = vmatpush3.bf16.msra.mxu1 %v8268_v23  ;;  %v4635_v17 = vshll.u32 %v8288_v9, 16  ;;  %v4663_v23 = vshll.u32 %v8291_v13, 16 }
 0x168   : > { %v9291_v18 = vadd.f32 %v7076_v16, %v7075_v14  ;;  %7682 = vmatprep.subr.bf16.mxu1 %v8273_v35  ;;  %v8293_v14 = vld [vmem:[#allocation2 + $0x4c] ss:$8 sps:$4 sm:$0x11]  }
 0x169   : > { %v4637_v28 = vrot.slane %v4635_v17, 5 }
 0x16b   : > { %7683 = vmatpush3.bf16.msra.mxu1 %v8273_v35 }
 0x16c   : > { %v7106_v19 = vpop.f32.mrb[16].mxu0  ;;  %7684 = vmatprep.subr.bf16.mxu1 %v8276_v41 }
 0x16d   : > { %v7107_v22 = vpop.f32.mrb[17].mxu0 }
 0x16e   : > { %v7108_v24 = vadd.f32 %v7107_v22, %v7106_v19  ;;  %v7109_v25 = vpop.f32.mrb[18].mxu0  ;;  %v4641_v19 = vshll.u32 %v8290_v11, 16  ;;  %v4660_v22 = vshrl.u32 %v8291_v13, 16 }
 0x16f   : > { %v7110_v27 = vpop.f32.mrb[19].mxu0  ;;  %7685 = vmatpush3.bf16.msra.mxu1 %v8276_v41 }
 0x170   : > { %v9303_v29 = vadd.f32 %v7108_v24, %v9195_v42  ;;  %v7111_v30 = vadd.f32 %v7110_v27, %v7109_v25  ;;  %v8274_v42 = vld [vmem:[%s9576_s3 + $0x560] sm:$0xff]   ;;  %v4669_v24 = vshll.u32 %v8293_v14, 16  ;;  %v4508_v25 = vld [vmem:[#allocation2 + $0x58] sm:$0x1f]  ;;  %v4662_v32 = vrot.slane %v4660_v22, 4 }
 0x171   : > { %7411 = vmatpush3.bf16.msra.mxu0 %v8274_v42  ;;  %v6767_v35 = vcombine.low %v4508_v25, %v4508_v25  ;;  %v6769_v42 = vcombine.high %v4508_v25, %v4508_v25 }
 0x172   : > { %v9309_v33 = vadd.f32 %v7111_v30, %v9216_v62  ;;  %v8275_v62 = vld [vmem:[%s9576_s3 + $0x5a8] sm:$0xff]   ;;  %v4643_v30 = vrot.slane %v4641_v19, 5 }
 0x173   : > { %7412 = vmatprep.subr.bf16.mxu0 %v8275_v62  ;;  %v4674_v41 = vshrl.u32 %v6767_v35, 16 }
 0x174   : > { %v7112_v34 = vpop.f32.mrb[20].mxu0 }
 0x175   : > { %v7113_v36 = vpop.f32.mrb[21].mxu0  ;;  %7413 = vmatpush3.bf16.msra.mxu0 %v8277_v45 }
 0x176   : > { %v7114_v38 = vadd.f32 %v7113_v36, %v7112_v34  ;;  %v7115_v39 = vpop.f32.mrb[22].mxu0  ;;  %7414 = vmatprep.subr.bf16.mxu0 %v8281_v54  ;;  %v4665_v34 = vrot.slane %v4663_v23, 5 }
 0x177   : > { %v7116_v40 = vpop.f32.mrb[23].mxu0 }
 0x178   : > { %v9324_v43 = vadd.f32 %v7114_v38, %v9224_v3  ;;  %v7117_v44 = vadd.f32 %v7116_v40, %v7115_v39  ;;  %v8280_v3 = vld [vmem:[#allocation2 + $0xa0] ss:$24 sps:$4 sm:$0xff]   ;;  %v4646_v38 = vshrl.u32 %v6763_v26, 16  ;;  %v4649_v39 = vshll.u32 %v6763_v26, 16 }
 0x179   : > { %7670 = vmatprep.mubr.bf16.mxu1 %v8280_v3  ;;  %7415 = vmatpush3.bf16.msra.mxu0 %v8284_v10  ;;  %v4666_v62 = vor.u32 %v4665_v34, %v4662_v32  ;;  %v4655_v40 = vshll.u32 %v6765_v31, 16  ;;  %v8308_v34 = vld [vmem:[#allocation2 + $0x60] ss:$8 sps:$4 sm:$0xff]  }
 0x17a   : > { %v9330_v48 = vadd.f32 %v7117_v44, %v9252_v49  ;;  %v8282_v49 = vld [vmem:[%s9576_s3 + $0x5f0] sm:$0xff]   ;;  %7671 = vmatmul.mubr.bf16.gmra.mrb[4].mxu1 %v8283_v58  ;;  %v4677_v44 = vshll.u32 %v6767_v35, 16  ;;  %v4651_v47 = vrot.slane %v4649_v39, 5 }
 0x17b   : > { %7686 = vmatprep.subr.bf16.mxu1 %v8282_v49  ;;  %v4667_v3 = vrot.slane %v4666_v62, 4  ;;  %v4657_v54 = vrot.slane %v4655_v40, 5  ;;  %v8316_v39 = vld [vmem:[%s9576_s3 + $0x610] sm:$0xff]   ;;  %v4688_v40 = vshrl.u32 %v8308_v34, 16 }
 0x17c   : > { %v7118_v21 = vpop.f32.mrb[24].mxu0  ;;  %7687 = vmatpush3.bf16.msra.mxu1 %v8282_v49  ;;  %v4679_v49 = vrot.slane %v4677_v44, 5 }
 0x17d   : > { %v7119_v46 = vpop.f32.mrb[25].mxu0  ;;  %7688 = vmatprep.subr.bf16.mxu1 %v8286_v1 }
 0x17e   : > { %v7120_v51 = vadd.f32 %v7119_v46, %v7118_v21  ;;  %v7121_v56 = vpop.f32.mrb[26].mxu0  ;;  %v4511_v21 = vld [vmem:[#allocation2 + $0x70] sm:$0x1f]  ;;  %v4648_v46 = vrot.slane %v4646_v38, 4 }
 0x17f   : > { %v7122_v57 = vpop.f32.mrb[27].mxu0  ;;  %v6771_v10 = vcombine.low %v4511_v21, %v4511_v21  ;;  %v8313_v38 = vld [vmem:[#allocation2 + $0x7c] ss:$8 sps:$4 sm:$0x11]  }
 0x180   : > { %v9333_v53 = vadd.f32 %v7120_v51, %v9264_v61  ;;  %v7123_v59 = vadd.f32 %v7122_v57, %v7121_v56  ;;  %v8285_v61 = vld [vmem:[%s9576_s3 + $0x5b8] sm:$0xff]   ;;  %7689 = vmatpush3.bf16.msra.mxu1 %v8286_v1  ;;  %v4683_v51 = vshll.u32 %v6769_v42, 16  ;;  %v4676_v56 = vrot.slane %v4674_v41, 4 }
 0x181   : > { %7416 = vmatprep.subr.bf16.mxu0 %v8285_v61  ;;  %7698 = vmatprep.subr.bf16.mxu1 %v9365_v15  ;;  %v4652_v58 = vor.u32 %v4651_v47, %v4648_v46  ;;  %v6773_v1 = vcombine.high %v4511_v21, %v4511_v21  ;;  %v4705_v13 = vshll.u32 %v6771_v10, 16  ;;  %v8311_v42 = vld [vmem:[#allocation2 + $0x78] ss:$8 sps:$4 sm:$0xff]   ;;  %v4691_v41 = vshll.u32 %v8308_v34, 16  ;;  %v8331_v34 = vld [vmem:[%s9576_s3 + $0x628] sm:$0xff]  }
 0x182   : > { %v9348_v63 = vadd.f32 %v7123_v59, %v9275_v6  ;;  %7417 = vmatpush3.bf16.msra.mxu0 %v8287_v5  ;;  %v4685_v59 = vrot.slane %v4683_v51, 5  ;;  %v4719_v46 = vshll.u32 %v8311_v42, 16  ;;  %v4725_v47 = vshll.u32 %v8313_v38, 16  ;;  %v8327_v38 = vld [vmem:[%s9576_s3 + $0x6a0] sm:$0xff]  }
 0x183   : > { %7454 = vmatprep.subr.bf16.mxu0 %v8298_v12  ;;  %v4702_v12 = vshrl.u32 %v6771_v10, 16  ;;  %v4711_v14 = vshll.u32 %v6773_v1, 16 }
 0x184   : > { %v7124_v60 = vpop.f32.mrb[28].mxu0  ;;  %v4727_v10 = vrot.slane %v4725_v47, 5  ;;  %v8349_v47 = vld [vmem:[%s9576_s3 + $0x678] sm:$0xff]  }
 0x185   : > { %v7125_v0 = vpop.f32.mrb[29].mxu0  ;;  %v4704_v23 = vrot.slane %v4702_v12, 4  ;;  %v4713_v32 = vrot.slane %v4711_v14, 5  ;;  %v8322_v12 = vld [vmem:[#allocation2 + $0x94] ss:$8 sps:$4 sm:$0x11]  }
 0x186   : > { %v7126_v2 = vadd.f32 %v7125_v0, %v7124_v60  ;;  %v7127_v4 = vpop.f32.mrb[30].mxu0  ;;  %v8304_v60 = vld [vmem:[%s9576_s3 + $0x600] sm:$0xff]   ;;  %v4680_v0 = vor.u32 %v4679_v49, %v4676_v56  ;;  %v8317_v49 = vld [vmem:[%s9576_s3 + $0x658] sm:$0xff]  }
 0x187   : > { %v7128_v7 = vpop.f32.mrb[31].mxu0 }
 0x188   : > { %v9357_v8 = vadd.f32 %v7126_v2, %v9280_v55  ;;  %v7129_v6 = vadd.f32 %v7128_v7, %v7127_v4  ;;  %v4632_v55 = vshrl.u32 %v8288_v9, 16  ;;  %v6775_v2 = vcombine.low %v4514_v52, %v4514_v52  ;;  %v8305_v9 = vld [vmem:[%s9576_s3 + $0x648] sm:$0xff]  }
 0x189   : > { %v4653_v7 = vrot.slane %v4652_v58, 4  ;;  %v4681_v11 = vrot.slane %v4680_v0, 4 }
 0x18a   : > { %v9368_v16 = vadd.f32 %v7129_v6, %v9291_v18  ;;  %v4634_v27 = vrot.slane %v4632_v55, 4  ;;  %v4671_v18 = vrot.slane %v4669_v24, 5  ;;  %v6777_v6 = vcombine.high %v4514_v52, %v4514_v52  ;;  %v8306_v52 = vld [vmem:[%s9576_s3 + $0x688] sm:$0xff]  }
 0x18b   : > { %v4658_v55 = vsel %vm8672_vm8, %v4653_v7, %v4657_v54  ;;  %v4730_v17 = vshrl.u32 %v6775_v2, 16  ;;  %v4733_v19 = vshll.u32 %v6775_v2, 16  ;;  %v4686_v22 = vsel %vm8672_vm8, %v4681_v11, %v4685_v59  ;;  %v8315_v7 = vld [vmem:[%s9576_s3 + $0x690] sm:$0xff]  }
 0x18c   : > { %v4638_v36 = vor.u32 %v4637_v28, %v4634_v27  ;;  %v4672_v61 = vsel %vm8672_vm8, %v4667_v3, %v4671_v18  ;;  %v4739_v20 = vshll.u32 %v6777_v6, 16  ;;  %v4707_v24 = vrot.slane %v4705_v13, 5  ;;  %v8307_v28 = vld [vmem:[%s9576_s3 + $0x608] sm:$0xff]  }
 0x18d   : > { %v6844_v25 = vcombine.low %v4658_v55, %v4686_v22  ;;  %v4732_v26 = vrot.slane %v4730_v17, 4  ;;  %v4735_v27 = vrot.slane %v4733_v19, 5  ;;  %v8310_v18 = vld [vmem:[#allocation2 + $0x64] ss:$8 sps:$4 sm:$0x11]   ;;  %v4690_v3 = vrot.slane %v4688_v40, 4 }
 0x18e   : > { %v4639_v45 = vrot.slane %v4638_v36, 4  ;;  %v4708_v31 = vor.u32 %v4707_v24, %v4704_v23  ;;  %v4741_v36 = vrot.slane %v4739_v20, 5  ;;  %v4697_v44 = vshll.u32 %v8310_v18, 16  ;;  %v8323_v13 = vld [vmem:[#allocation2 + $0xa8] ss:$8 sps:$4 sm:$0xff]   ;;  %v8328_v20 = vld [vmem:[%s9576_s3 + $0x620] sm:$0xff]  }
 0x18f   : > { %7690 = vmatprep.mubr.bf16.mxu1 %v6844_v25  ;;  %v4736_v35 = vor.u32 %v4735_v27, %v4732_v26  ;;  %v4693_v54 = vrot.slane %v4691_v41, 5  ;;  %v4721_v59 = vrot.slane %v4719_v46, 5  ;;  %v8325_v17 = vld [vmem:[#allocation2 + $0xac] ss:$8 sps:$4 sm:$0x11]   ;;  %v4753_v22 = vshll.u32 %v8322_v12, 16 }
 0x190   : > { %v4644_v57 = vsel %vm8672_vm8, %v4639_v45, %v4643_v30  ;;  %v8314_v30 = vld [vmem:[%s9576_s3 + $0x650] sm:$0xff]   ;;  %v4709_v62 = vrot.slane %v4708_v31, 4  ;;  %v4716_v45 = vshrl.u32 %v8311_v42, 16  ;;  %v4699_v56 = vrot.slane %v4697_v44, 5  ;;  %v8329_v25 = vld [vmem:[%s9576_s3 + $0x668] sm:$0xff]   ;;  %v8318_v26 = vld [vmem:[%s9576_s3 + $0x698] sm:$0xff]  }
 0x191   : > { %v6842_v4 = vcombine.low %v4644_v57, %v4672_v61  ;;  %v6843_v5 = vcombine.high %v4644_v57, %v4672_v61  ;;  %v4737_v21 = vrot.slane %v4736_v35, 4  ;;  %v4694_v0 = vor.u32 %v4693_v54, %v4690_v3  ;;  %v8346_v18 = vld [vmem:[%s9576_s3 + $0x670] sm:$0xff]   ;;  %v7158_v41 = vpop.f32.mrb[32].mxu0  ;;  %v8330_v46 = vld [vmem:[%s9576_s3 + $0x6a8] sm:$0xff]   ;;  %v8335_v54 = vld [vmem:[#allocation2 + $0xd8] ss:$8 sps:$4 sm:$0xff]  }
 0x192   : > { %v4714_v51 = vsel %vm8672_vm8, %v4709_v62, %v4713_v32  ;;  %v4718_v58 = vrot.slane %v4716_v45, 4  ;;  %v4772_v23 = vshrl.u32 %v8323_v13, 16  ;;  %v4775_v24 = vshll.u32 %v8323_v13, 16  ;;  %v8348_v40 = vld [vmem:[%s9576_s3 + $0x630] sm:$0xff]   ;;  %v8332_v3 = vld [vmem:[#allocation2 + $0xc0] ss:$8 sps:$4 sm:$0xff]  }
 0x193   : > { %5128 = vmatprep.mubr.bf16.mxu0 %v6843_v5  ;;  %v4742_v57 = vsel %vm8672_vm8, %v4737_v21, %v4741_v36  ;;  %v4695_v2 = vrot.slane %v4694_v0, 4  ;;  %v4755_v36 = vrot.slane %v4753_v22, 5  ;;  %v7159_v21 = vpop.f32.mrb[33].mxu0  ;;  %v4831_v0 = vshll.u32 %v8335_v54, 16 }
 0x194   : > { %5129 = vmatmul.mubr.bf16.vlgmr.msra.gmra.mrb[112].mxu0 %v6842_v4  ;;  %v6847_v61 = vcombine.low %v4714_v51, %v4742_v57  ;;  %v4722_v1 = vor.u32 %v4721_v59, %v4718_v58  ;;  %v8326_v4 = vld [vmem:[%s9576_s3 + $0x660] sm:$0xff]   ;;  %v4774_v31 = vrot.slane %v4772_v23, 4  ;;  %v4777_v32 = vrot.slane %v4775_v24, 5 }
 0x195   : > { %7455 = vmatpush3.bf16.msra.mxu0 %v8304_v60  ;;  %v8319_v60 = vld [vmem:[%s9576_s3 + $0x618] sm:$0xff]   ;;  %v4700_v6 = vsel %vm8672_vm8, %v4695_v2, %v4699_v56  ;;  %v7160_v51 = vadd.f32 %v7159_v21, %v7158_v41  ;;  %v8334_v57 = vld [vmem:[#allocation2 + $0xc4] ss:$8 sps:$4 sm:$0x11]   ;;  %v4833_v13 = vrot.slane %v4831_v0, 5 }
 0x196   : > { %7456 = vmatprep.subr.bf16.mxu0 %v8305_v9  ;;  %7691 = vmatmul.mubr.bf16.vlgmr.msra.gmra.mrb[0].mxu1 %v6847_v61  ;;  %v4723_v5 = vrot.slane %v4722_v1, 4  ;;  %v8320_v9 = vld [vmem:[#allocation2 + $0x90] ss:$8 sps:$4 sm:$0xff]   ;;  %v8337_v58 = vld [vmem:[#allocation2 + $0xdc] ss:$8 sps:$4 sm:$0x11]  }
 0x197   : > { %7699 = vmatpush3.bf16.msra.mxu1 %v9365_v15  ;;  %v4744_v15 = vshrl.u32 %v8320_v9, 16  ;;  %v4747_v19 = vshll.u32 %v8320_v9, 16  ;;  %v9450_v59 = vadd.f32 %v9303_v29, %v7160_v51  ;;  %v4828_v61 = vshrl.u32 %v8335_v54, 16  ;;  %v4517_v1 = vld [vmem:[#allocation2 + $0xa0] sm:$0x1f]  ;;  %v8351_v9 = vld [vmem:[%s9576_s3 + $0x638] sm:$0xff]  }
 0x198   : > { %7700 = vmatprep.subr.bf16.mxu1 %v8306_v52  ;;  %v4728_v11 = vsel %vm8672_vm8, %v4723_v5, %v4727_v10  ;;  %v4800_v10 = vshrl.u32 %v8332_v3, 16  ;;  %v4809_v2 = vshll.u32 %v8334_v57, 16  ;;  %v4520_v5 = vld [vmem:[#allocation2 + $0xb8] sm:$0x1f] }
 0x199   : > { %7457 = vmatpush3.bf16.msra.mxu0 %v8307_v28  ;;  %v6846_v14 = vcombine.high %v4700_v6, %v4728_v11  ;;  %v6845_v55 = vcombine.low %v4700_v6, %v4728_v11  ;;  %v4746_v27 = vrot.slane %v4744_v15, 4  ;;  %v4749_v28 = vrot.slane %v4747_v19, 5 }
 0x19a   : > { %7458 = vmatprep.subr.bf16.mxu0 %v8314_v30  ;;  %v4781_v30 = vshll.u32 %v8325_v17, 16  ;;  %v6781_v6 = vcombine.high %v4517_v1, %v4517_v1  ;;  %v4802_v29 = vrot.slane %v4800_v10, 4  ;;  %v4830_v12 = vrot.slane %v4828_v61, 4  ;;  %v7161_v10 = vpop.f32.mrb[34].mxu0 }
 0x19b   : > { %7701 = vmatpush3.bf16.msra.mxu1 %v8306_v52  ;;  %5136 = vmatprep.mubr.bf16.mxu0 %v6846_v14  ;;  %v4750_v35 = vor.u32 %v4749_v28, %v4746_v27  ;;  %v8347_v14 = vld [vmem:[%s9576_s3 + $0x6b0] sm:$0xff]   ;;  %v6783_v15 = vcombine.low %v4520_v5, %v4520_v5  ;;  %v6785_v19 = vcombine.high %v4520_v5, %v4520_v5 }
 0x19c   : > { %7702 = vmatprep.subr.bf16.mxu1 %v8315_v7  ;;  %5137 = vmatmul.mubr.bf16.gmra.mrb[116].mxu0 %v6845_v55  ;;  %v4783_v42 = vrot.slane %v4781_v30, 5  ;;  %v4811_v55 = vrot.slane %v4809_v2, 5  ;;  %v4834_v23 = vor.u32 %v4833_v13, %v4830_v12  ;;  %v8352_v2 = vld [vmem:[#allocation2 + $0x30] ss:$8 sps:$4 sm:$0xee]  }
 0x19d   : > { %7459 = vmatpush3.bf16.msra.mxu0 %v8316_v39  ;;  %v4778_v39 = vor.u32 %v4777_v32, %v4774_v31  ;;  %v4751_v62 = vrot.slane %v4750_v35, 4  ;;  %v4786_v27 = vshrl.u32 %v6783_v15, 16  ;;  %v4789_v28 = vshll.u32 %v6783_v15, 16  ;;  %v4526_v31 = vld [vmem:[#allocation2 + $0xe8] sm:$0x1f]  ;;  %v8350_v32 = vld [vmem:[%s9576_s3 + $0x6b8] sm:$0xff]  }
 0x19e   : > { %7460 = vmatprep.subr.bf16.mxu0 %v8317_v49  ;;  %v4795_v30 = vshll.u32 %v6785_v19, 16  ;;  %v6793_v54 = vcombine.high %v4526_v31, %v4526_v31  ;;  %v8355_v13 = vld [vmem:[#allocation2 + $0x48] ss:$8 sps:$4 sm:$0xee]  }
 0x19f   : > { %7703 = vmatpush3.bf16.msra.mxu1 %v8315_v7  ;;  %v4779_v44 = vrot.slane %v4778_v39, 4  ;;  %v4756_v45 = vsel %vm8672_vm8, %v4751_v62, %v4755_v36  ;;  %v6779_v7 = vcombine.low %v4517_v1, %v4517_v1  ;;  %v4791_v39 = vrot.slane %v4789_v28, 5  ;;  %v8357_v15 = vld [vmem:[#allocation2 + $0x4c] ss:$8 sps:$4 sm:$0x11]  }
 0x1a0   : > { %7704 = vmatprep.subr.bf16.mxu1 %v8318_v26  ;;  %v4797_v62 = vrot.slane %v4795_v30, 5 }
 0x1a1   : > { %7461 = vmatpush3.bf16.msra.mxu0 %v8319_v60  ;;  %v4784_v52 = vsel %vm8672_vm8, %v4779_v44, %v4783_v42  ;;  %v4803_v60 = vshll.u32 %v8332_v3, 16  ;;  %v4758_v24 = vshrl.u32 %v6779_v7, 16  ;;  %v6791_v3 = vcombine.low %v4526_v31, %v4526_v31 }
 0x1a2   : > { %7462 = vmatprep.subr.bf16.mxu0 %v8326_v4  ;;  %v6849_v56 = vcombine.high %v4756_v45, %v4784_v52  ;;  %v6848_v49 = vcombine.low %v4756_v45, %v4784_v52  ;;  %v4837_v4 = vshll.u32 %v8337_v58, 16  ;;  %v5372_v31 = vrot.slane %v8357_v15, 5 }
 0x1a3   : > { %7705 = vmatpush3.bf16.msra.mxu1 %v8318_v26  ;;  %v4805_v11 = vrot.slane %v4803_v60, 5  ;;  %v4767_v26 = vshll.u32 %v6781_v6, 16  ;;  %v4760_v35 = vrot.slane %v4758_v24, 4  ;;  %v4842_v0 = vshrl.u32 %v6791_v3, 16  ;;  %v5236_v24 = vld [vmem:[#allocation2 + $0x40] sm:$0x1e] }
 0x1a4   : > { %7706 = vmatprep.subr.bf16.mxu1 %v8327_v38  ;;  %5144 = vmatprep.mubr.bf16.mxu0 %v6849_v56  ;;  %v4839_v17 = vrot.slane %v4837_v4, 5  ;;  %v4845_v1 = vshll.u32 %v6791_v3, 16  ;;  %v4851_v6 = vshll.u32 %v6793_v54, 16  ;;  %v5248_v3 = vld [vmem:[#allocation2 + $0xa0] sm:$0x1e] }
 0x1a5   : > { %7463 = vmatpush3.bf16.msra.mxu0 %v8328_v20  ;;  %v4523_v20 = vld [vmem:[#allocation2 + $0xd0] sm:$0x1f]  ;;  %v4806_v22 = vor.u32 %v4805_v11, %v4802_v29  ;;  %v4769_v42 = vrot.slane %v4767_v26, 5  ;;  %v4844_v11 = vrot.slane %v4842_v0, 4 }
 0x1a6   : > { %7464 = vmatprep.subr.bf16.mxu0 %v8329_v25  ;;  %5145 = vmatmul.mubr.bf16.gmra.mrb[120].mxu0 %v6848_v49  ;;  %v4761_v25 = vshll.u32 %v6779_v7, 16  ;;  %v6787_v21 = vcombine.low %v4523_v20, %v4523_v20  ;;  %v6789_v51 = vcombine.high %v4523_v20, %v4523_v20  ;;  %v4847_v12 = vrot.slane %v4845_v1, 5  ;;  %v7162_v20 = vpop.f32.mrb[35].mxu0  ;;  %v8369_v1 = vld [vmem:[#allocation2 + $0x78] ss:$8 sps:$4 sm:$0xee]  }
 0x1a7   : > { %7707 = vmatpush3.bf16.msra.mxu1 %v8327_v38  ;;  %v4788_v38 = vrot.slane %v4786_v27, 4  ;;  %v9469_v26 = vadd.f32 %v7162_v20, %v7161_v10  ;;  %v9471_v27 = vpop.f32.mrb[36].mxu0  ;;  %v6895_v20 = vcombine.low %v5248_v3, %v5248_v3 }
 0x1a8   : > { %7708 = vmatprep.subr.bf16.mxu1 %v8330_v46  ;;  %v4763_v36 = vrot.slane %v4761_v25, 5  ;;  %v4814_v56 = vshrl.u32 %v6787_v21, 16  ;;  %v4817_v57 = vshll.u32 %v6787_v21, 16  ;;  %v4823_v58 = vshll.u32 %v6789_v51, 16  ;;  %v5239_v25 = vld [vmem:[#allocation2 + $0x58] sm:$0x1e] }
 0x1a9   : > { %7465 = vmatpush3.bf16.msra.mxu0 %v8331_v34  ;;  %v4807_v34 = vrot.slane %v4806_v22, 4  ;;  %v4848_v22 = vor.u32 %v4847_v12, %v4844_v11 }
 0x1aa   : > { %7466 = vmatprep.subr.bf16.mxu0 %v8346_v18  ;;  %v4835_v18 = vrot.slane %v4834_v23, 4  ;;  %v4764_v44 = vor.u32 %v4763_v36, %v4760_v35  ;;  %v4816_v61 = vrot.slane %v4814_v56, 4  ;;  %v4819_v5 = vrot.slane %v4817_v57, 5 }
 0x1ab   : > { %7709 = vmatpush3.bf16.msra.mxu1 %v8330_v46  ;;  %v4825_v7 = vrot.slane %v4823_v58, 5  ;;  %v6912_v23 = vrot.slane %v8355_v13, 9  ;;  %v4849_v35 = vrot.slane %v4848_v22, 4  ;;  %v6881_v36 = vcombine.high %v5236_v24, %v5236_v24  ;;  %v8368_v58 = vld [vmem:[#allocation2 + $0x64] ss:$8 sps:$4 sm:$0x11]  }
 0x1ac   : > { %7710 = vmatprep.subr.bf16.mxu1 %v8347_v14  ;;  %v4840_v41 = vsel %vm8672_vm8, %v4835_v18, %v4839_v17  ;;  %v4765_v52 = vrot.slane %v4764_v44, 4  ;;  %v4853_v17 = vrot.slane %v4851_v6, 5  ;;  %v5245_v18 = vld [vmem:[#allocation2 + $0x88] sm:$0x1e]  ;;  %v6916_v13 = vrot.slane %v8369_v1, 9 }
 0x1ad   : > { %7467 = vmatpush3.bf16.msra.mxu0 %v8348_v40  ;;  %v4812_v40 = vsel %vm8672_vm8, %v4807_v34, %v4811_v55  ;;  %v4820_v55 = vor.u32 %v4819_v5, %v4816_v61  ;;  %v5242_v34 = vld [vmem:[#allocation2 + $0x70] sm:$0x1e]  ;;  %v5368_v51 = vrot.slane %v6881_v36, 5  ;;  %v6891_v61 = vcombine.low %v5245_v18, %v5245_v18  ;;  %v5257_v22 = vld [vmem:[#allocation2 + $0xe8] sm:$0x1e] }
 0x1ae   : > { %7468 = vmatprep.subr.bf16.mxu0 %v8349_v47  ;;  %v6852_v45 = vcombine.high %v4812_v40, %v4840_v41  ;;  %v4792_v47 = vor.u32 %v4791_v39, %v4788_v38  ;;  %v6851_v46 = vcombine.low %v4812_v40, %v4840_v41  ;;  %v4770_v60 = vsel %vm8672_vm8, %v4765_v52, %v4769_v42  ;;  %v9475_v39 = vpop.f32.mrb[37].mxu0  ;;  %v8366_v52 = vld [vmem:[#allocation2 + $0x60] ss:$8 sps:$4 sm:$0xee]  }
 0x1af   : > { %7711 = vmatpush3.bf16.msra.mxu1 %v8347_v14  ;;  %v6910_v14 = vrot.slane %v8352_v2, 9  ;;  %v4821_v28 = vrot.slane %v4820_v55, 4  ;;  %v6883_v42 = vcombine.low %v5239_v25, %v5239_v25  ;;  %v6885_v38 = vcombine.high %v5239_v25, %v5239_v25  ;;  %v9481_v21 = vpop.f32.mrb[38].mxu0  ;;  %v5251_v2 = vld [vmem:[#allocation2 + $0xb8] sm:$0x1e] }
 0x1b0   : > { %5152 = vmatprep.mubr.bf16.mxu0 %v6852_v45  ;;  %v4793_v49 = vrot.slane %v4792_v47, 4  ;;  %7712 = vmatprep.subr.bf16.mxu1 %v8350_v32  ;;  %v5373_v40 = vsel %vm8854_vm11, %v6912_v23, %v5372_v31  ;;  %v6887_v44 = vcombine.low %v5242_v34, %v5242_v34  ;;  %v4854_v45 = vsel %vm8672_vm8, %v4849_v35, %v4853_v17  ;;  %v9485_v10 = vpop.f32.mrb[39].mxu0  ;;  %v8380_v35 = vld [vmem:[#allocation2 + $0x90] ss:$8 sps:$4 sm:$0xee]  }
 0x1b1   : > { %7469 = vmatpush3.bf16.msra.mxu0 %v8351_v9  ;;  %v8354_v9 = vld [vmem:[#allocation2 + $0x34] ss:$8 sps:$4 sm:$0x11]   ;;  %v6913_v56 = vrot.slane %v6883_v42, 9  ;;  %v6889_v57 = vcombine.high %v5242_v34, %v5242_v34  ;;  %v6893_v0 = vcombine.high %v5245_v18, %v5245_v18  ;;  %v6914_v6 = vrot.slane %v8366_v52, 9  ;;  %v9491_v55 = vpop.f32.mrb[40].mxu0 }
 0x1b2   : > { %5153 = vmatmul.mubr.bf16.gmra.mrb[124].mxu0 %v6851_v46  ;;  %v4798_v4 = vsel %vm8672_vm8, %v4793_v49, %v4797_v62  ;;  %v5364_v19 = vrot.slane %v8354_v9, 5  ;;  %v4826_v62 = vsel %vm8672_vm8, %v4821_v28, %v4825_v7  ;;  %v5376_v49 = vrot.slane %v6885_v38, 5  ;;  %v8371_v7 = vld [vmem:[#allocation2 + $0x7c] ss:$8 sps:$4 sm:$0x11]   ;;  %v7171_v23 = vpop.f32.mrb[41].mxu0 }
 0x1b3   : > { %v6850_v29 = vcombine.low %v4770_v60, %v4798_v4  ;;  %7713 = vmatpush3.bf16.msra.mxu1 %v8350_v32  ;;  %v6879_v32 = vcombine.low %v5236_v24, %v5236_v24  ;;  %v6853_v54 = vcombine.low %v4826_v62, %v4854_v45  ;;  %v6915_v50 = vrot.slane %v6887_v44, 9 }
 0x1b4   : > { %v5365_v30 = vsel %vm8854_vm11, %v6910_v14, %v5364_v19  ;;  %v5377_v4 = vsel %vm8854_vm11, %v6913_v56, %v5376_v49  ;;  %v5384_v5 = vrot.slane %v6889_v57, 5  ;;  %v5380_v9 = vrot.slane %v8368_v58, 5  ;;  %v5254_v14 = vld [vmem:[#allocation2 + $0xd0] sm:$0x1e] }
 0x1b5   : > { %7694 = vmatprep.mubr.bf16.mxu1 %v6850_v29  ;;  %v6911_v41 = vrot.slane %v6879_v32, 9  ;;  %v6974_v47 = vcombine.low %v5365_v30, %v5373_v40  ;;  %v6975_v46 = vcombine.high %v5365_v30, %v5373_v40  ;;  %v6917_v11 = vrot.slane %v6891_v61, 9  ;;  %v8382_v40 = vld [vmem:[#allocation2 + $0x94] ss:$8 sps:$4 sm:$0x11]   ;;  %v7173_v61 = vpop.f32.mrb[42].mxu0 }
 0x1b6   : > { %7695 = vmatmul.mubr.bf16.gmra.mrb[4].mxu1 %v6853_v54  ;;  %v5392_v12 = vrot.slane %v6893_v0, 5  ;;  %v5385_v17 = vsel %vm8854_vm11, %v6915_v50, %v5384_v5  ;;  %v5381_v15 = vsel %vm8854_vm11, %v6914_v6, %v5380_v9  ;;  %v5388_v19 = vrot.slane %v8371_v7, 5  ;;  %v8388_v6 = vld [vmem:[#allocation2 + $0xc4] ss:$8 sps:$4 sm:$0x11]  }
 0x1b7   : > { %5699 = vmatprep.mubr.bf16.mxu0 %v6975_v46  ;;  %v5369_v60 = vsel %vm8854_vm11, %v6911_v41, %v5368_v51  ;;  %v6897_v25 = vcombine.high %v5248_v3, %v5248_v3  ;;  %v6899_v28 = vcombine.low %v5251_v2, %v5251_v2  ;;  %v6901_v30 = vcombine.high %v5251_v2, %v5251_v2  ;;  %v8383_v46 = vld [vmem:[#allocation2 + $0xa8] ss:$8 sps:$4 sm:$0xee]   ;;  %v8385_v51 = vld [vmem:[#allocation2 + $0xac] ss:$8 sps:$4 sm:$0x11]  }
 0x1b8   : > { %v6976_v29 = vcombine.low %v5369_v60, %v5377_v4  ;;  %v5393_v24 = vsel %vm8854_vm11, %v6917_v11, %v5392_v12  ;;  %v5389_v32 = vsel %vm8854_vm11, %v6916_v13, %v5388_v19  ;;  %v6919_v34 = vrot.slane %v6895_v20, 9  ;;  %v8386_v4 = vld [vmem:[#allocation2 + $0xc0] ss:$8 sps:$4 sm:$0xee]  }
 0x1b9   : > { %v6979_v31 = vcombine.low %v5385_v17, %v5393_v24  ;;  %v6903_v18 = vcombine.low %v5254_v14, %v5254_v14  ;;  %v6978_v36 = vcombine.high %v5381_v15, %v5389_v32  ;;  %v5400_v42 = vrot.slane %v6897_v25, 5  ;;  %v8389_v9 = vld [vmem:[#allocation2 + $0xd8] ss:$8 sps:$4 sm:$0xee]   ;;  %v7174_v17 = vpop.f32.mrb[43].mxu0 }
 0x1ba   : > { %5700 = vmatmul.mubr.bf16.vlgmr.msra.gmra.mrb[128].mxu0 %v6974_v47  ;;  %7714 = vmatprep.mubr.bf16.mxu1 %v6976_v29  ;;  %v6921_v38 = vrot.slane %v6899_v28, 9  ;;  %v5408_v62 = vrot.slane %v6901_v30, 5  ;;  %v6977_v41 = vcombine.low %v5381_v15, %v5389_v32  ;;  %v6905_v44 = vcombine.high %v5254_v14, %v5254_v14  ;;  %v8391_v13 = vld [vmem:[#allocation2 + $0xdc] ss:$8 sps:$4 sm:$0x11]   ;;  %v7176_v24 = vpop.f32.mrb[44].mxu0 }
 0x1bb   : > { %v6907_v45 = vcombine.low %v5257_v22, %v5257_v22  ;;  %v6909_v47 = vcombine.high %v5257_v22, %v5257_v22  ;;  %5707 = vmatprep.mubr.bf16.mxu0 %v6978_v36  ;;  %v5401_v52 = vsel %vm8854_vm11, %v6919_v34, %v5400_v42  ;;  %v6923_v54 = vrot.slane %v6903_v18, 9 }
 0x1bc   : > { %v5409_v3 = vsel %vm8854_vm11, %v6921_v38, %v5408_v62  ;;  %v6918_v56 = vrot.slane %v8380_v35, 9  ;;  %v5416_v57 = vrot.slane %v6905_v44, 5  ;;  %v5396_v0 = vrot.slane %v8382_v40, 5 }
 0x1bd   : > { %v6982_v49 = vcombine.low %v5401_v52, %v5409_v3  ;;  %v6925_v58 = vrot.slane %v6907_v45, 9  ;;  %v5424_v60 = vrot.slane %v6909_v47, 5  ;;  %v6920_v50 = vrot.slane %v8383_v46, 9 }
 0x1be   : > { %7715 = vmatmul.mubr.bf16.vlgmr.msra.gmra.mrb[0].mxu1 %v6979_v31  ;;  %v5404_v1 = vrot.slane %v8385_v51, 5  ;;  %v7750_v2 = vadd.f32 %v9309_v33, %v9469_v26  ;;  %v5417_v5 = vsel %vm8854_vm11, %v6923_v54, %v5416_v57  ;;  %v7166_v29 = vadd.f32 %v9475_v39, %v9471_v27 }
 0x1bf   : > { %7718 = vmatprep.mubr.bf16.mxu1 %v6982_v49  ;;  %v5425_v7 = vsel %vm8854_vm11, %v6925_v58, %v5424_v60  ;;  %v7169_v11 = vadd.f32 %v9485_v10, %v9481_v21  ;;  %v5397_v33 = vsel %vm8854_vm11, %v6918_v56, %v5396_v0  ;;  %v6922_v14 = vrot.slane %v8386_v4, 9  ;;  %v7177_v10 = vpop.f32.mrb[45].mxu0 }
 0x1c0   : > { %v6985_v12 = vcombine.low %v5417_v5, %v5425_v7  ;;  %v5405_v26 = vsel %vm8854_vm11, %v6920_v50, %v5404_v1  ;;  %v5412_v20 = vrot.slane %v8388_v6, 5  ;;  %v6924_v22 = vrot.slane %v8389_v9, 9  ;;  %v7179_v32 = vpop.f32.mrb[46].mxu0 }
 0x1c1   : > { %v6981_v15 = vcombine.high %v5397_v33, %v5405_v26  ;;  %v6980_v19 = vcombine.low %v5397_v33, %v5405_v26  ;;  %v5420_v25 = vrot.slane %v8391_v13, 5  ;;  %v7723_v27 = vadd.f32 %v9324_v43, %v7166_v29  ;;  %v7180_v35 = vpop.f32.mrb[47].mxu0 }
 0x1c2   : > { %5708 = vmatmul.mubr.bf16.gmra.mrb[132].mxu0 %v6977_v41  ;;  %v7741_v39 = vadd.f32 %v9330_v48, %v7169_v11  ;;  %v7172_v21 = vadd.f32 %v7171_v23, %v9491_v55  ;;  %v5413_v28 = vsel %vm8854_vm11, %v6922_v14, %v5412_v20  ;;  %v7175_v30 = vadd.f32 %v7174_v17, %v7173_v61  ;;  %v7210_v55 = vpop.f32.mrb[48].mxu0 }
 0x1c3   : > { %5715 = vmatprep.mubr.bf16.mxu0 %v6981_v15  ;;  %v7178_v31 = vadd.f32 %v7177_v10, %v7176_v24  ;;  %v5421_v34 = vsel %vm8854_vm11, %v6924_v22, %v5420_v25  ;;  %v7181_v36 = vadd.f32 %v7180_v35, %v7179_v32  ;;  %v7211_v42 = vpop.f32.mrb[49].mxu0 }
 0x1c4   : > { %v7768_v18 = vadd.f32 %v9333_v53, %v7172_v21  ;;  %v6984_v43 = vcombine.high %v5413_v28, %v5421_v34  ;;  %v7786_v48 = vadd.f32 %v9348_v63, %v7175_v30  ;;  %v7212_v38 = vadd.f32 %v7211_v42, %v7210_v55  ;;  %v7213_v62 = vpop.f32.mrb[50].mxu0 }
 0x1c5   : > { %v7759_v23 = vadd.f32 %v9357_v8, %v7178_v31  ;;  %v7777_v40 = vadd.f32 %v9368_v16, %v7181_v36  ;;  %v7214_v37 = vpop.f32.mrb[51].mxu0  ;;  %v6983_v41 = vcombine.low %v5413_v28, %v5421_v34 }
 0x1c6   : > { %7719 = vmatmul.mubr.bf16.gmra.mrb[4].mxu1 %v6985_v12  ;;  %v7733_v53 = vadd.f32 %v9450_v59, %v7212_v38  ;;  %v7215_v44 = vadd.f32 %v7214_v37, %v7213_v62  ;;  %v7216_v45 = vpop.f32.mrb[52].mxu0 }
 0x1c7   : > { %v7217_v47 = vpop.f32.mrb[53].mxu0 }
 0x1c8   : > { %v7751_v46 = vadd.f32 %v7750_v2, %v7215_v44  ;;  %v7218_v51 = vadd.f32 %v7217_v47, %v7216_v45  ;;  %v7219_v63 = vpop.f32.mrb[54].mxu0 }
 0x1c9   : > { %v7220_v52 = vpop.f32.mrb[55].mxu0 }
 0x1ca   : > { %5716 = vmatmul.mubr.bf16.gmra.mrb[136].mxu0 %v6980_v19  ;;  %v7724_v8 = vadd.f32 %v7723_v27, %v7218_v51  ;;  %v7221_v3 = vadd.f32 %v7220_v52, %v7219_v63  ;;  %v7222_v54 = vpop.f32.mrb[56].mxu0 }
 0x1cb   : > { %5723 = vmatprep.mubr.bf16.mxu0 %v6984_v43  ;;  %v7223_v56 = vpop.f32.mrb[57].mxu0 }
 0x1cc   : > { %v7742_v49 = vadd.f32 %v7741_v39, %v7221_v3  ;;  %v7224_v57 = vadd.f32 %v7223_v56, %v7222_v54  ;;  %v7225_v58 = vpop.f32.mrb[58].mxu0 }
 0x1cd   : > { %v7226_v16 = vpop.f32.mrb[59].mxu0 }
 0x1ce   : > { %v7769_v60 = vadd.f32 %v7768_v18, %v7224_v57  ;;  %v7227_v61 = vadd.f32 %v7226_v16, %v7225_v58  ;;  %v7228_v0 = vpop.f32.mrb[60].mxu0 }
 0x1cf   : > { %v7229_v59 = vpop.f32.mrb[61].mxu0 }
 0x1d0   : > { %v7787_v50 = vadd.f32 %v7786_v48, %v7227_v61  ;;  %v7230_v1 = vadd.f32 %v7229_v59, %v7228_v0  ;;  %v7231_v4 = vpop.f32.mrb[62].mxu0 }
 0x1d1   : > { %v7232_v2 = vpop.f32.mrb[63].mxu0 }
 0x1d2   : > { %5724 = vmatmul.mubr.bf16.gmra.mrb[140].mxu0 %v6983_v41  ;;  %v7760_v5 = vadd.f32 %v7759_v23, %v7230_v1  ;;  %v7233_v7 = vadd.f32 %v7232_v2, %v7231_v4  ;;  %v7262_v6 = vpop.f32.mrb[64].mxu0 }
 0x1d3   : > { %v7263_v9 = vpop.f32.mrb[65].mxu0 }
 0x1d4   : > { %v7778_v29 = vadd.f32 %v7777_v40, %v7233_v7  ;;  %v7264_v11 = vadd.f32 %v7263_v9, %v7262_v6  ;;  %v7265_v12 = vpop.f32.mrb[66].mxu0 }
 0x1d5   : > { %v7266_v33 = vpop.f32.mrb[67].mxu0 }
 0x1d6   : > { %v7734_v26 = vadd.f32 %v7733_v53, %v7264_v11  ;;  %v7267_v13 = vadd.f32 %v7266_v33, %v7265_v12  ;;  %v7268_v17 = vpop.f32.mrb[68].mxu0 }
 0x1d7   : > { %v7269_v15 = vpop.f32.mrb[69].mxu0 }
 0x1d8   : > { %v7752_v14 = vadd.f32 %v7751_v46, %v7267_v13  ;;  %v7270_v19 = vadd.f32 %v7269_v15, %v7268_v17  ;;  %v7271_v20 = vpop.f32.mrb[70].mxu0 }
 0x1d9   : > { %v7272_v22 = vpop.f32.mrb[71].mxu0 }
 0x1da   : > { %v7725_v24 = vadd.f32 %v7724_v8, %v7270_v19  ;;  %v7273_v25 = vadd.f32 %v7272_v22, %v7271_v20 }
 0x1dc   : > { %v7743_v27 = vadd.f32 %v7742_v49, %v7273_v25 }
 0x1ea   : > { %v7274_v39 = vpop.f32.mrb[72].mxu0 }
 0x1eb   : > { %v7275_v21 = vpop.f32.mrb[73].mxu0 }
 0x1ec   : > { %v7276_v10 = vadd.f32 %v7275_v21, %v7274_v39  ;;  %v7277_v28 = vpop.f32.mrb[74].mxu0 }
 0x1ed   : > { %v7278_v30 = vpop.f32.mrb[75].mxu0 }
 0x1ee   : > { %v7770_v31 = vadd.f32 %v7769_v60, %v7276_v10  ;;  %v7279_v32 = vadd.f32 %v7278_v30, %v7277_v28 }
 0x1f0   : > { %v7788_v34 = vadd.f32 %v7787_v50, %v7279_v32 }
 0x1f2   : > { %v7280_v18 = vpop.f32.mrb[76].mxu0 }
 0x1f3   : > { %v7281_v35 = vpop.f32.mrb[77].mxu0 }
 0x1f4   : > { %v7282_v43 = vadd.f32 %v7281_v35, %v7280_v18  ;;  %v7283_v48 = vpop.f32.mrb[78].mxu0 }
 0x1f5   : > { %v7284_v55 = vpop.f32.mrb[79].mxu0 }
 0x1f6   : > { %v7761_v23 = vadd.f32 %v7760_v5, %v7282_v43  ;;  %v7285_v36 = vadd.f32 %v7284_v55, %v7283_v48 }
 0x1f8   : > { %v7779_v42 = vadd.f32 %v7778_v29, %v7285_v36 }
 0x1fa   : > { %v7314_v38 = vpop.f32.mrb[80].mxu0 }
 0x1fb   : > { %v7315_v62 = vpop.f32.mrb[81].mxu0 }
 0x1fc   : > { %v7316_v40 = vadd.f32 %v7315_v62, %v7314_v38  ;;  %v7317_v37 = vpop.f32.mrb[82].mxu0 }
 0x1fd   : > { %v7318_v41 = vpop.f32.mrb[83].mxu0 }
 0x1fe   : > { %v7735_v53 = vadd.f32 %v7734_v26, %v7316_v40  ;;  %v7319_v44 = vadd.f32 %v7318_v41, %v7317_v37 }
 0x200   : > { %v7753_v45 = vadd.f32 %v7752_v14, %v7319_v44 }
 0x202   : > { %v7320_v47 = vpop.f32.mrb[84].mxu0 }
 0x203   : > { %v7321_v46 = vpop.f32.mrb[85].mxu0 }
 0x204   : > { %v7322_v51 = vadd.f32 %v7321_v46, %v7320_v47  ;;  %v7323_v63 = vpop.f32.mrb[86].mxu0 }
 0x205   : > { %v7324_v52 = vpop.f32.mrb[87].mxu0 }
 0x206   : > { %v7726_v8 = vadd.f32 %v7725_v24, %v7322_v51  ;;  %v7325_v3 = vadd.f32 %v7324_v52, %v7323_v63 }
 0x208   : > { %v7744_v54 = vadd.f32 %v7743_v27, %v7325_v3 }
 0x20a   : > { %v7326_v56 = vpop.f32.mrb[88].mxu0 }
 0x20b   : > { %v7327_v49 = vpop.f32.mrb[89].mxu0 }
 0x20c   : > { %v7328_v57 = vadd.f32 %v7327_v49, %v7326_v56  ;;  %v7329_v58 = vpop.f32.mrb[90].mxu0 }
 0x20d   : > { %v7330_v16 = vpop.f32.mrb[91].mxu0 }
 0x20e   : > { %v7771_v60 = vadd.f32 %v7770_v31, %v7328_v57  ;;  %v7331_v61 = vadd.f32 %v7330_v16, %v7329_v58 }
 0x210   : > { %v7789_v0 = vadd.f32 %v7788_v34, %v7331_v61 }
 0x212   : > { %v7332_v59 = vpop.f32.mrb[92].mxu0 }
 0x213   : > { %v7333_v50 = vpop.f32.mrb[93].mxu0 }
 0x214   : > { %v7334_v1 = vadd.f32 %v7333_v50, %v7332_v59  ;;  %v7335_v4 = vpop.f32.mrb[94].mxu0 }
 0x215   : > { %v7336_v2 = vpop.f32.mrb[95].mxu0 }
 0x216   : > { %v7762_v5 = vadd.f32 %v7761_v23, %v7334_v1  ;;  %v7337_v7 = vadd.f32 %v7336_v2, %v7335_v4 }
 0x218   : > { %v7780_v6 = vadd.f32 %v7779_v42, %v7337_v7 }
 0x21a   : > { %v7366_v9 = vpop.f32.mrb[96].mxu0 }
 0x21b   : > { %v7367_v29 = vpop.f32.mrb[97].mxu0 }
 0x21c   : > { %v7368_v11 = vadd.f32 %v7367_v29, %v7366_v9  ;;  %v7369_v12 = vpop.f32.mrb[98].mxu0 }
 0x21d   : > { %v7370_v33 = vpop.f32.mrb[99].mxu0 }
 0x21e   : > { %v7736_v26 = vadd.f32 %v7735_v53, %v7368_v11  ;;  %v7371_v13 = vadd.f32 %v7370_v33, %v7369_v12 }
 0x220   : > { %v7754_v14 = vadd.f32 %v7753_v45, %v7371_v13 }
 0x222   : > { %v7372_v17 = vpop.f32.mrb[100].mxu0 }
 0x223   : > { %v7373_v15 = vpop.f32.mrb[101].mxu0 }
 0x224   : > { %v7374_v19 = vadd.f32 %v7373_v15, %v7372_v17  ;;  %v7375_v20 = vpop.f32.mrb[102].mxu0 }
 0x225   : > { %v7376_v22 = vpop.f32.mrb[103].mxu0 }
 0x226   : > { %v7727_v24 = vadd.f32 %v7726_v8, %v7374_v19  ;;  %v7377_v25 = vadd.f32 %v7376_v22, %v7375_v20  ;;  %v9538_v20 = vld [vmem:[%s9577_s4] ss:$0 sm:$0xff] }
 0x228   : > { %v7745_v27 = vadd.f32 %v7744_v54, %v7377_v25 }
 0x22a   : > { %v7378_v39 = vpop.f32.mrb[104].mxu0 }
 0x22b   : > { %v7379_v21 = vpop.f32.mrb[105].mxu0 }
 0x22c   : > { %v7380_v10 = vadd.f32 %v7379_v21, %v7378_v39  ;;  %v7381_v28 = vpop.f32.mrb[106].mxu0 }
 0x22d   : > { %v7382_v30 = vpop.f32.mrb[107].mxu0 }
 0x22e   : > { %v7772_v31 = vadd.f32 %v7771_v60, %v7380_v10  ;;  %v7383_v32 = vadd.f32 %v7382_v30, %v7381_v28 }
 0x230   : > { %v7790_v34 = vadd.f32 %v7789_v0, %v7383_v32 }
 0x232   : > { %v7384_v18 = vpop.f32.mrb[108].mxu0 }
 0x233   : > { %v7385_v35 = vpop.f32.mrb[109].mxu0 }
 0x234   : > { %v7386_v43 = vadd.f32 %v7385_v35, %v7384_v18  ;;  %v7387_v48 = vpop.f32.mrb[110].mxu0 }
 0x235   : > { %v7388_v55 = vpop.f32.mrb[111].mxu0 }
 0x236   : > { %v7763_v23 = vadd.f32 %v7762_v5, %v7386_v43  ;;  %v7389_v36 = vadd.f32 %v7388_v55, %v7387_v48 }
 0x238   : > { %v7781_v42 = vadd.f32 %v7780_v6, %v7389_v36 }
 0x267   : > { %v7418_v38 = vpop.f32.mrb[112].mxu0 }
 0x268   : > { %v7419_v62 = vpop.f32.mrb[113].mxu0 }
 0x269   : > { %v7420_v40 = vadd.f32 %v7419_v62, %v7418_v38  ;;  %v7421_v37 = vpop.f32.mrb[114].mxu0 }
 0x26a   : > { %v7422_v41 = vpop.f32.mrb[115].mxu0 }
 0x26b   : > { %v7737_v53 = vadd.f32 %v7736_v26, %v7420_v40  ;;  %v7423_v44 = vadd.f32 %v7422_v41, %v7421_v37 }
 0x26d   : > { %v7755_v45 = vadd.f32 %v7754_v14, %v7423_v44 }
 0x26f   : > { %v7424_v47 = vpop.f32.mrb[116].mxu0 }
 0x270   : > { %v7425_v46 = vpop.f32.mrb[117].mxu0 }
 0x271   : > { %v7426_v51 = vadd.f32 %v7425_v46, %v7424_v47  ;;  %v7427_v63 = vpop.f32.mrb[118].mxu0 }
 0x272   : > { %v7428_v52 = vpop.f32.mrb[119].mxu0 }
 0x273   : > { %v7728_v8 = vadd.f32 %v7727_v24, %v7426_v51  ;;  %v7429_v3 = vadd.f32 %v7428_v52, %v7427_v63 }
 0x275   : > { %v7746_v54 = vadd.f32 %v7745_v27, %v7429_v3 }
 0x279   : > { %v7430_v56 = vpop.f32.mrb[120].mxu0 }
 0x27a   : > { %v7431_v49 = vpop.f32.mrb[121].mxu0 }
 0x27b   : > { %v7432_v57 = vadd.f32 %v7431_v49, %v7430_v56  ;;  %v7433_v58 = vpop.f32.mrb[122].mxu0 }
 0x27c   : > { %v7434_v16 = vpop.f32.mrb[123].mxu0 }
 0x27d   : > { %v7773_v60 = vadd.f32 %v7772_v31, %v7432_v57  ;;  %v7435_v61 = vadd.f32 %v7434_v16, %v7433_v58 }
 0x27f   : > { %v7791_v0 = vadd.f32 %v7790_v34, %v7435_v61 }
 0x285   : > { %v7436_v59 = vpop.f32.mrb[124].mxu0 }
 0x286   : > { %v7437_v50 = vpop.f32.mrb[125].mxu0 }
 0x287   : > { %v7438_v1 = vadd.f32 %v7437_v50, %v7436_v59  ;;  %v7439_v4 = vpop.f32.mrb[126].mxu0 }
 0x288   : > { %v7440_v2 = vpop.f32.mrb[127].mxu0 }
 0x289   : > { %v9531_v5 = vadd.f32 %v7763_v23, %v7438_v1  ;;  %v7441_v7 = vadd.f32 %v7440_v2, %v7439_v4 }
 0x28b   : > { %v9533_v6 = vadd.f32 %v7781_v42, %v7441_v7 }
 0x28d   : > { %v7470_v9 = vpop.f32.mrb[128].mxu0 }
 0x28e   : > { %v7471_v29 = vpop.f32.mrb[129].mxu0 }
 0x28f   : > { %v7472_v11 = vadd.f32 %v7471_v29, %v7470_v9  ;;  %v7473_v12 = vpop.f32.mrb[130].mxu0 }
 0x290   : > { %v7474_v33 = vpop.f32.mrb[131].mxu0 }
 0x291   : > { %v7738_v26 = vadd.f32 %v7737_v53, %v7472_v11  ;;  %v7475_v13 = vadd.f32 %v7474_v33, %v7473_v12  ;;  %v7716_v17 = vpop.f32.mrb[0].mxu1 }
 0x292   : > { %v5766_v19 = vpop.f32.mrb[1].mxu1 }
 0x293   : > { %v7756_v14 = vadd.f32 %v7755_v45, %v7475_v13  ;;  %v7739_v24 = vadd.f32 %v7738_v26, %v5766_v19  ;;  %v7717_v25 = vpop.f32.mrb[2].mxu1 }
 0x294   : > { %v5769_v21 = vpop.f32.mrb[3].mxu1 }
 0x295   : > { %v7476_v15 = vpop.f32.mrb[132].mxu0  ;;  %v5812_v28 = vadd.f32 %v7739_v24, %v9538_v20  ;;  %v7757_v30 = vadd.f32 %v7756_v14, %v5769_v21 }
 0x296   : > { %v7477_v22 = vpop.f32.mrb[133].mxu0 }
 0x297   : > { %v7478_v27 = vadd.f32 %v7477_v22, %v7476_v15  ;;  %v7479_v39 = vpop.f32.mrb[134].mxu0  ;;  %v5813_v34 = vadd.f32 %v7757_v30, %v9538_v20  ;;  %v5850_v43 = vmul.f32 %v5812_v28, %v5812_v28 }
 0x298   : > { %v7480_v10 = vpop.f32.mrb[135].mxu0 }
 0x299   : > { %v7729_v31 = vadd.f32 %v7728_v8, %v7478_v27  ;;  %v7481_v32 = vadd.f32 %v7480_v10, %v7479_v39  ;;  %v7018_v48 = vpack.c.bf16 %v5813_v34, %v5812_v28  ;;  %v5836_v55 = vadd.f32 %v5813_v34, %v5812_v28  ;;  %v7720_v36 = vpop.f32.mrb[4].mxu1 }
 0x29a   : > { %v5851_v23 = vmul.f32 %v5813_v34, %v5813_v34  ;;  %v5782_v62 = vpop.f32.mrb[5].mxu1 }
 0x29b   : > { %v7730_v18 = vadd.f32 %v7729_v31, %v7716_v17  ;;  %v7747_v35 = vadd.f32 %v7746_v54, %v7481_v32  ;;  %7019 = vst [vmem:[%s8527_s14] sm:$0xff] %v7018_v48   ;;  %v7721_v45 = vpop.f32.mrb[6].mxu1 }
 0x29c   : > { %v5858_v41 = vadd.f32 %v5851_v23, %v5850_v43  ;;  %v5785_v63 = vpop.f32.mrb[7].mxu1 }
 0x29d   : > { %v5814_v42 = vadd.f32 %v7730_v18, %v9538_v20  ;;  %v7482_v38 = vpop.f32.mrb[136].mxu0  ;;  %v7748_v40 = vadd.f32 %v7747_v35, %v7717_v25 }
 0x29e   : > { %v7483_v37 = vpop.f32.mrb[137].mxu0 }
 0x29f   : > { %v5837_v53 = vadd.f32 %v5836_v55, %v5814_v42  ;;  %v5852_v44 = vmul.f32 %v5814_v42, %v5814_v42  ;;  %v7484_v47 = vadd.f32 %v7483_v37, %v7482_v38  ;;  %v7485_v46 = vpop.f32.mrb[138].mxu0  ;;  %v5815_v51 = vadd.f32 %v7748_v40, %v9538_v20 }
 0x2a0   : > { %v7486_v52 = vpop.f32.mrb[139].mxu0 }
 0x2a1   : > { %v5859_v8 = vadd.f32 %v5858_v41, %v5852_v44  ;;  %v7774_v3 = vadd.f32 %v7773_v60, %v7484_v47  ;;  %v7487_v54 = vadd.f32 %v7486_v52, %v7485_v46  ;;  %v7023_v56 = vpack.c.bf16 %v5815_v51, %v5814_v42  ;;  %v5875_v42 = vld [vmem:[%s8517_s19] sm:$0x1] }
 0x2a2   : > { %v5838_v49 = vadd.f32 %v5837_v53, %v5815_v51  ;;  %v5853_v57 = vmul.f32 %v5815_v51, %v5815_v51 }
 0x2a3   : > { %v7775_v58 = vadd.f32 %v7774_v3, %v5782_v62  ;;  %v7792_v16 = vadd.f32 %v7791_v0, %v7487_v54  ;;  %7035 = vst [vmem:[%s8527_s14 + $0x8] sm:$0xff] %v7023_v56  }
 0x2a4   : > { %v5860_v61 = vadd.f32 %v5859_v8, %v5853_v57 }
 0x2a5   : > { %v5816_v59 = vadd.f32 %v7775_v58, %v9538_v20  ;;  %v7793_v50 = vadd.f32 %v7792_v16, %v5785_v63  ;;  %v7488_v1 = vpop.f32.mrb[140].mxu0 }
 0x2a6   : > { %v7489_v4 = vpop.f32.mrb[141].mxu0 }
 0x2a7   : > { %v5839_v2 = vadd.f32 %v5838_v49, %v5816_v59  ;;  %v5854_v7 = vmul.f32 %v5816_v59, %v5816_v59  ;;  %v5817_v9 = vadd.f32 %v7793_v50, %v9538_v20  ;;  %v7490_v29 = vadd.f32 %v7489_v4, %v7488_v1  ;;  %v7491_v60 = vpop.f32.mrb[142].mxu0 }
 0x2a8   : > { %v7492_v11 = vpop.f32.mrb[143].mxu0 }
 0x2a9   : > { %v5861_v12 = vadd.f32 %v5860_v61, %v5854_v7  ;;  %v7028_v33 = vpack.c.bf16 %v5817_v9, %v5816_v59  ;;  %v5840_v26 = vadd.f32 %v5839_v2, %v5817_v9  ;;  %v5855_v13 = vmul.f32 %v5817_v9, %v5817_v9 }
 0x2aa   : > { %v7765_v0 = vadd.f32 %v9531_v5, %v7490_v29  ;;  %v7493_v14 = vadd.f32 %v7492_v11, %v7491_v60 }
 0x2ab   : > { %7036 = vst [vmem:[%s8527_s14 + $0x10] sm:$0xff] %v7028_v33   ;;  %v5862_v17 = vadd.f32 %v5861_v12, %v5855_v13 }
 0x2ac   : > { %v7766_v15 = vadd.f32 %v7765_v0, %v7720_v36  ;;  %v7783_v19 = vadd.f32 %v9533_v6, %v7493_v14 }
 0x2ae   : > { %v5818_v22 = vadd.f32 %v7766_v15, %v9538_v20  ;;  %v7784_v24 = vadd.f32 %v7783_v19, %v7721_v45 }
 0x2b0   : > { %v5841_v25 = vadd.f32 %v5840_v26, %v5818_v22  ;;  %v5856_v27 = vmul.f32 %v5818_v22, %v5818_v22  ;;  %v5819_v39 = vadd.f32 %v7784_v24, %v9538_v20  ;;  %v5872_v20 = vld [vmem:[%s8512_s15] sm:$0x1] }
 0x2b2   : > { %v5863_v21 = vadd.f32 %v5862_v17, %v5856_v27  ;;  %v7033_v10 = vpack.c.bf16 %v5819_v39, %v5818_v22  ;;  %v5842_v28 = vadd.f32 %v5841_v25, %v5819_v39  ;;  %v5857_v30 = vmul.f32 %v5819_v39, %v5819_v39 }
 0x2b4   : > { %7037 = vst [vmem:[%s8527_s14 + $0x18] sm:$0xff] %v7033_v10   ;;  %v5843_v5 = vrot.slane %v5842_v28, 4  ;;  %v5864_v31 = vadd.f32 %v5863_v21, %v5857_v30 }
 0x2b6   : > { %v5844_v32 = vadd.f32 %v5843_v5, %v5842_v28  ;;  %v5865_v6 = vrot.slane %v5864_v31, 4 }
 0x2b8   : > { %v5845_v34 = vrot.slane %v5844_v32, 2  ;;  %v5866_v18 = vadd.f32 %v5865_v6, %v5864_v31 }
 0x2ba   : > { %v5846_v35 = vadd.f32 %v5845_v34, %v5844_v32  ;;  %v5867_v43 = vrot.slane %v5866_v18, 2 }
 0x2bc   : > { %v5847_v48 = vrot.slane %v5846_v35, 1  ;;  %v5868_v55 = vadd.f32 %v5867_v43, %v5866_v18 }
 0x2be   : > { %v5848_v23 = vadd.f32 %v5847_v48, %v5846_v35  ;;  %v5869_v36 = vrot.slane %v5868_v55, 1 }
 0x2c0   : > { %v5870_v38 = vadd.f32 %v5869_v36, %v5868_v55  ;;  %v5873_v62 = vadd.f32 %v5872_v20, %v5848_v23 }
 0x2c2   : > { %5874 = vst [vmem:[%s8512_s15] sm:$0x1] %v5873_v62  ;;  %v5876_v40 = vadd.f32 %v5875_v42, %v5870_v38 }
 0x2c4   : > { %5877 = vst [vmem:[%s8517_s19] sm:$0x1] %v5876_v40 }
 0x2c5 PF: > { %s18_s28 = sadd.s32 1, %s8430_s28   ;;  %s9590_s14 = sld [smem:[#allocation3_spill]] }
 0x2c6   : > { %p15_p13 = scmp.ge.s32.totalorder %s18_s28, 20   ;;  %s9591_s24 = smov %s8422_s26 }
 0x2c7   : > { %s9592_s25 = smov %s8426_s27  ;;  %s9593_s26 = smov %s9596_s29 }
 0x2c8   :  { %17 = sbr.rel (!%p15_p13) target bundleno = 3 (0x3), region = 126 }
 0x2cb   : > { %s9594_s27 = smov %s9590_s14 }

// kernel: residual_block_forward.6
= control target key start
LH: loop header
LB: loop body
LE: loop exit
PB: predicated region body
PF: predicated region fallthrough
CT: control target
= control target key end

     0   :  { %s8501_s24 = smov 0   ;;  %s8503_s25 = smov 0   ;;  %s9596_s0 = inlined_call_operand.vmem [shape: bf16[2,8,8,8,128], index: 0, kind: input, shape index: {}]   ;;  %s9597_s1 = inlined_call_operand.vmem [shape: f32[1,128], index: 1, kind: input, shape index: {}]   ;;  %s9598_s2 = inlined_call_operand.vmem [shape: f32[1,128], index: 2, kind: input, shape index: {}]   ;;  %s9599_s3 = inlined_call_operand.vmem [shape: bf16[9,384,128], index: 3, kind: input, shape index: {}]   ;;  %s9600_s4 = inlined_call_operand.vmem [shape: f32[1,128], index: 4, kind: input, shape index: {}]   ;;  %s9601_s5 = inlined_call_operand.vmem [shape: bf16[2,8,8,8,128], index: 5, kind: output, shape index: {0}]   ;;  %s9602_s6 = inlined_call_operand.vmem [shape: f32[2,1,128], index: 6, kind: output, shape index: {1}]   ;;  %s9603_s7 = inlined_call_operand.vmem [shape: f32[2,1,128], index: 7, kind: output, shape index: {2}]  }
   0x1   :  { %s8505_s26 = smov 0   ;;  %s8507_s27 = smov 0  }
   0x2   :  { %s8509_s28 = smov 0  }
   0x3 LB: > { %s27_s29 = sadd.s32 1, %s8449_s26  ;;  %s30_s30 = sadd.s32 1, %s8453_s27  ;;  %s8457_s28 = sphi %s8509_s28, %s18_s28   ;;  %s8453_s27 = sphi %s8507_s27, %s9617_s27   ;;  %s8449_s26 = sphi %s8505_s26, %s9616_s26   ;;  %s8445_s25 = sphi %s8503_s25, %s9615_s25   ;;  %s8441_s24 = sphi %s8501_s24, %s9614_s24  }
   0x4   : > { %p28_p0 = scmp.ge.s32.totalorder %s27_s29, 9  ;;  %p6047_p1 = scmp.ge.s32.totalorder %s8457_s28, 1 }
   0x5   : > { %p276_p2 = scmp.lt.s32.totalorder %s8457_s28, 19 }
   0x6   : > { %s9619_s29 = smov (%p28_p0, %s27_s29), 0  ;;  %s9621_s30 = smov (!%p28_p0, %s30_s30), %s8453_s27 }
   0x7   : > { %p277_p3 = pnand %p6047_p1, %p276_p2  ;;  %p32_p4 = scmp.ge.s32.totalorder %s9621_s30, 2 }
   0x8   : > { %p327_p5 = scmp.lt.s32.totalorder (!%p277_p3), %s8441_s24, 7  ;;  %p329_p6 = scmp.lt.s32.totalorder (!%p277_p3), %s8445_s25, 1 }
   0x9   : > { %s9623_s30 = smov (%p32_p4, %s9621_s30), 0  ;;  %280 = sbr.rel (%p277_p3) target bundleno = 708 (0x2c4), region = 40 }
   0xa   : > { %9604 = sst [smem:[#allocation3_spill]] %s9623_s30  ;;  %s6054_s8 = sadd.s32 (!%p277_p3), 4294967295, %s8441_s24 }
   0xb   : > { %p341_p7 = scmp.gt.s32.totalorder (!%p277_p3), %s6054_s8, 0  ;;  %p6055_p8 = scmp.lt.s32.totalorder (!%p277_p3), %s6054_s8, 7 }
   0xc   : > { %p6063_p9 = scmp.ne.s32.totalorder (!%p277_p3), %s8441_s24, 0 }
  0x10   : > { %s328_s9 = scalar_select %p327_p5, %s8441_s24, 7 }
  0x11   : > { %s9625_s25 = smov (!%p329_p6, %s8445_s25), 1  ;;  %s9629_s8 = smov (!%p341_p7, %s6054_s8), 0 }
  0x12   : > { %s9627_s9 = smov (!%p327_p5, %s328_s9), 7  ;;  %s6052_s10 = sshll.u32 %s9625_s25, 6  ;;  %v8459_v0 = vmov (!%p6063_p9), 0   ;;  %v8460_v1 = vmov (!%p6063_p9), 0.0  }
  0x13   : > { %s6051_s11 = sshll.u32 %s9627_s9, 3  ;;  %s8539_s15 = scalar_lea.vmem %s9602_s6, %s9625_s25  ;;  %366 = vst [vmem:[#allocation2] sm:$0xff] (!%p6063_p9), %v8459_v0  ;;  %367 = vst [vmem:[#allocation2 + $0x8] sm:$0xff] (!%p6063_p9), %v8459_v0 }
  0x14   : > { %s335_s12 = sadd.s32 %s6052_s10, %s6051_s11  ;;  %s8544_s19 = scalar_lea.vmem %s9603_s7, %s9625_s25  ;;  %368 = vst [vmem:[#allocation2 + $0x10] sm:$0xff] (!%p6063_p9), %v8459_v0  ;;  %369 = vst [vmem:[#allocation2 + $0x18] sm:$0xff] (!%p6063_p9), %v8459_v0 }
  0x15   : > { %s6053_s16 = sshll.u32 %s335_s12, 2  ;;  %s9631_s8 = smov (!%p6055_p8, %s9629_s8), 7  ;;  %370 = vst [vmem:[#allocation2 + $0x20] sm:$0xff] (!%p6063_p9), %v8459_v0  ;;  %371 = vst [vmem:[#allocation2 + $0x28] sm:$0xff] (!%p6063_p9), %v8459_v0 }
  0x16   : > { %s8549_s22 = scalar_lea.vmem %s9596_s0, %s6053_s16  ;;  %s6060_s23 = sshll.u32 %s9631_s8, 3  ;;  %372 = vst [vmem:[#allocation2 + $0x30] sm:$0xff] (!%p6063_p9), %v8459_v0  ;;  %373 = vst [vmem:[#allocation2 + $0x38] sm:$0xff] (!%p6063_p9), %v8459_v0 }
  0x17   : > { %s349_s9 = sadd.s32 %s6060_s23, %s6052_s10  ;;  %365 = sbr.rel (%p6063_p9) target bundleno = 35 (0x23), region = 44  ;;  %374 = vst [vmem:[#allocation2 + $0x40] sm:$0xff] (!%p6063_p9), %v8459_v0  ;;  %375 = vst [vmem:[#allocation2 + $0x48] sm:$0xff] (!%p6063_p9), %v8459_v0 }
  0x18   : > { %s6062_s11 = sshll.u32 %s349_s9, 2  ;;  %376 = vst [vmem:[#allocation2 + $0x50] sm:$0xff] (!%p6063_p9), %v8459_v0  ;;  %377 = vst [vmem:[#allocation2 + $0x58] sm:$0xff] (!%p6063_p9), %v8459_v0 }
  0x19   : > { %s8554_s14 = scalar_lea.vmem %s9601_s5, %s6062_s11  ;;  %378 = vst [vmem:[#allocation2 + $0x60] sm:$0xff] (!%p6063_p9), %v8459_v0  ;;  %379 = vst [vmem:[#allocation2 + $0x68] sm:$0xff] (!%p6063_p9), %v8459_v0 }
  0x1a   : > { %380 = vst [vmem:[#allocation2 + $0x70] sm:$0xff] (!%p6063_p9), %v8459_v0  ;;  %381 = vst [vmem:[#allocation2 + $0x78] sm:$0xff] (!%p6063_p9), %v8459_v0 }
  0x1b   : > { %382 = vst [vmem:[#allocation2 + $0x80] sm:$0xff] (!%p6063_p9), %v8459_v0  ;;  %383 = vst [vmem:[#allocation2 + $0x88] sm:$0xff] (!%p6063_p9), %v8459_v0 }
  0x1c   : > { %384 = vst [vmem:[#allocation2 + $0x90] sm:$0xff] (!%p6063_p9), %v8459_v0  ;;  %385 = vst [vmem:[#allocation2 + $0x98] sm:$0xff] (!%p6063_p9), %v8459_v0 }
  0x1d   : > { %386 = vst [vmem:[#allocation2 + $0xa0] sm:$0xff] (!%p6063_p9), %v8459_v0  ;;  %387 = vst [vmem:[#allocation2 + $0xa8] sm:$0xff] (!%p6063_p9), %v8459_v0 }
  0x1e   : > { %388 = vst [vmem:[#allocation2 + $0xb0] sm:$0xff] %v8459_v0  ;;  %389 = vst [vmem:[#allocation2 + $0xb8] sm:$0xff] %v8459_v0 }
  0x1f   : > { %390 = vst [vmem:[#allocation2 + $0xc0] sm:$0xff] %v8459_v0  ;;  %391 = vst [vmem:[#allocation2 + $0xc8] sm:$0xff] %v8459_v0 }
  0x20   : > { %392 = vst [vmem:[#allocation2 + $0xd0] sm:$0xff] %v8459_v0  ;;  %393 = vst [vmem:[#allocation2 + $0xd8] sm:$0xff] %v8459_v0 }
  0x21   : > { %394 = vst [vmem:[#allocation2 + $0xe0] sm:$0xff] %v8459_v0  ;;  %395 = vst [vmem:[#allocation2 + $0xe8] sm:$0xff] %v8459_v0 }
  0x22   : > { %396 = vst [vmem:[%s8539_s15] sm:$0x1] %v8460_v1  ;;  %397 = vst [vmem:[%s8544_s19] sm:$0x1] %v8460_v1 }
  0x23 PF: > { %p6064_p10 = scmp.le.s32.totalorder %s8441_s24, 0 }
  0x24   : > { %v402_v2 = vld [vmem:[#allocation2 + $0x8] sm:$0xff] (!%p6064_p10)  ;;  %v403_v3 = vld [vmem:[#allocation2 + $0x20] sm:$0xff] (!%p6064_p10)  ;;  %v404_v4 = vld [vmem:[#allocation2 + $0x38] sm:$0xff] (!%p6064_p10) }
  0x25   : > { %401 = sbr.rel (%p6064_p10) target bundleno = 47 (0x2f), region = 48  ;;  %412 = vst [vmem:[#allocation2] sm:$0xff] (!%p6064_p10), %v402_v2  ;;  %413 = vst [vmem:[#allocation2 + $0x18] sm:$0xff] (!%p6064_p10), %v403_v3  ;;  %v405_v5 = vld [vmem:[#allocation2 + $0x50] sm:$0xff] (!%p6064_p10)  ;;  %v406_v6 = vld [vmem:[#allocation2 + $0x68] sm:$0xff] (!%p6064_p10) }
  0x26   : > { %414 = vst [vmem:[#allocation2 + $0x30] sm:$0xff] (!%p6064_p10), %v404_v4  ;;  %415 = vst [vmem:[#allocation2 + $0x48] sm:$0xff] (!%p6064_p10), %v405_v5  ;;  %v410_v10 = vld [vmem:[#allocation2 + $0xc8] sm:$0xff] (!%p6064_p10)  ;;  %v422_v12 = vld [vmem:[#allocation2 + $0x10] sm:$0xff] (!%p6064_p10) }
  0x27   : > { %v407_v7 = vld [vmem:[#allocation2 + $0x80] sm:$0xff] (!%p6064_p10)  ;;  %416 = vst [vmem:[#allocation2 + $0x60] sm:$0xff] (!%p6064_p10), %v406_v6  ;;  %420 = vst [vmem:[#allocation2 + $0xc0] sm:$0xff] (!%p6064_p10), %v410_v10  ;;  %v423_v13 = vld [vmem:[#allocation2 + $0x28] sm:$0xff] (!%p6064_p10) }
  0x28   : > { %417 = vst [vmem:[#allocation2 + $0x78] sm:$0xff] (!%p6064_p10), %v407_v7  ;;  %v408_v8 = vld [vmem:[#allocation2 + $0x98] sm:$0xff] (!%p6064_p10)  ;;  %v411_v11 = vld [vmem:[#allocation2 + $0xe0] sm:$0xff] (!%p6064_p10)  ;;  %432 = vst [vmem:[#allocation2 + $0x8] sm:$0xff] (!%p6064_p10), %v422_v12 }
  0x29   : > { %418 = vst [vmem:[#allocation2 + $0x90] sm:$0xff] (!%p6064_p10), %v408_v8  ;;  %421 = vst [vmem:[#allocation2 + $0xd8] sm:$0xff] (!%p6064_p10), %v411_v11  ;;  %v424_v14 = vld [vmem:[#allocation2 + $0x40] sm:$0xff] (!%p6064_p10)  ;;  %v425_v15 = vld [vmem:[#allocation2 + $0x58] sm:$0xff] (!%p6064_p10) }
  0x2a   : > { %v409_v9 = vld [vmem:[#allocation2 + $0xb0] sm:$0xff] (!%p6064_p10)  ;;  %433 = vst [vmem:[#allocation2 + $0x20] sm:$0xff] (!%p6064_p10), %v423_v13  ;;  %434 = vst [vmem:[#allocation2 + $0x38] sm:$0xff] (!%p6064_p10), %v424_v14  ;;  %v427_v17 = vld [vmem:[#allocation2 + $0x88] sm:$0xff] (!%p6064_p10) }
  0x2b   : > { %419 = vst [vmem:[#allocation2 + $0xa8] sm:$0xff] (!%p6064_p10), %v409_v9  ;;  %v426_v16 = vld [vmem:[#allocation2 + $0x70] sm:$0xff] (!%p6064_p10)  ;;  %435 = vst [vmem:[#allocation2 + $0x50] sm:$0xff] (!%p6064_p10), %v425_v15  ;;  %v428_v18 = vld [vmem:[#allocation2 + $0xa0] sm:$0xff] (!%p6064_p10) }
  0x2c   : > { %436 = vst [vmem:[#allocation2 + $0x68] sm:$0xff] %v426_v16  ;;  %v429_v19 = vld [vmem:[#allocation2 + $0xb8] sm:$0xff]  ;;  %437 = vst [vmem:[#allocation2 + $0x80] sm:$0xff] %v427_v17  ;;  %v430_v20 = vld [vmem:[#allocation2 + $0xd0] sm:$0xff] }
  0x2d   : > { %438 = vst [vmem:[#allocation2 + $0x98] sm:$0xff] %v428_v18  ;;  %439 = vst [vmem:[#allocation2 + $0xb0] sm:$0xff] %v429_v19  ;;  %v431_v21 = vld [vmem:[#allocation2 + $0xe8] sm:$0xff] }
  0x2e   : > { %440 = vst [vmem:[#allocation2 + $0xc8] sm:$0xff] %v430_v20  ;;  %441 = vst [vmem:[#allocation2 + $0xe0] sm:$0xff] %v431_v21 }
  0x2f PF: > { %p6065_p11 = scmp.ge.s32.totalorder %s8441_s24, 8 }
  0x30   : > { %v7024_v22 = vld [vmem:[%s8549_s22] sm:$0xff] (!%p6065_p11)   ;;  %v7059_v27 = vld [vmem:[%s8549_s22 + $0x8] sm:$0xff] (!%p6065_p11)   ;;  %v7060_v32 = vld [vmem:[%s8549_s22 + $0x10] sm:$0xff] (!%p6065_p11)   ;;  %vm573_vm0 = vcmask (!%p6065_p11), 1044480   ;;  %vm574_vm1 = vsmask.f32 (!%p6065_p11), 4354 }
  0x31   : > { %445 = sbr.rel (%p6065_p11) target bundleno = 73 (0x49), region = 52  ;;  %v6066_v23 = vld [vmem:[%s9597_s1] ss:$0 sm:$0xff] (!%p6065_p11)  ;;  %v7025_v24 = vunpack.c.l.bf16 (!%p6065_p11), %v7024_v22  ;;  %v7026_v25 = vunpack.c.h.bf16 (!%p6065_p11), %v7024_v22  ;;  %v7029_v30 = vunpack.c.l.bf16 (!%p6065_p11), %v7059_v27  ;;  %v7030_v31 = vunpack.c.h.bf16 (!%p6065_p11), %v7059_v27  ;;  %v7061_v35 = vld [vmem:[%s8549_s22 + $0x18] sm:$0xff] (!%p6065_p11)   ;;  %v576_v5 = vld [vmem:[#allocation2 + $0x28] sm:$0x1f] (!%p6065_p11) }
  0x32   : > { %v6067_v26 = vld [vmem:[%s9598_s2] ss:$0 sm:$0xff] (!%p6065_p11)  ;;  %v7033_v33 = vunpack.c.l.bf16 (!%p6065_p11), %v7060_v32  ;;  %v7034_v34 = vunpack.c.h.bf16 (!%p6065_p11), %v7060_v32  ;;  %v7037_v42 = vunpack.c.l.bf16 (!%p6065_p11), %v7061_v35  ;;  %v7038_v43 = vunpack.c.h.bf16 (!%p6065_p11), %v7061_v35  ;;  %vm8575_vm2 = vmand (!%p6065_p11), %vm573_vm0, %vm574_vm1 }
  0x33   : > { %v469_v28 = vmul.f32 (!%p6065_p11), %v7025_v24, %v6066_v23  ;;  %v470_v29 = vmul.f32 (!%p6065_p11), %v7026_v25, %v6066_v23  ;;  %v471_v38 = vmul.f32 (!%p6065_p11), %v7029_v30, %v6066_v23  ;;  %v472_v39 = vmul.f32 (!%p6065_p11), %v7030_v31, %v6066_v23  ;;  %v579_v10 = vld [vmem:[#allocation2 + $0x40] sm:$0x1f] (!%p6065_p11)  ;;  %v582_v25 = vld [vmem:[#allocation2 + $0x58] sm:$0x1f] (!%p6065_p11)  ;;  %v588_v31 = vld [vmem:[#allocation2 + $0x88] sm:$0x1f] (!%p6065_p11) }
  0x34   : > { %v473_v40 = vmul.f32 (!%p6065_p11), %v7033_v33, %v6066_v23  ;;  %v474_v41 = vmul.f32 (!%p6065_p11), %v7034_v34, %v6066_v23  ;;  %v475_v50 = vmul.f32 (!%p6065_p11), %v7037_v42, %v6066_v23  ;;  %v476_v51 = vmul.f32 (!%p6065_p11), %v7038_v43, %v6066_v23  ;;  %v591_v35 = vld [vmem:[#allocation2 + $0xa0] sm:$0x1f] (!%p6065_p11) }
  0x35   : > { %v484_v36 = vadd.f32 (!%p6065_p11), %v6067_v26, %v469_v28  ;;  %v485_v37 = vadd.f32 (!%p6065_p11), %v6067_v26, %v470_v29  ;;  %v486_v46 = vadd.f32 (!%p6065_p11), %v6067_v26, %v471_v38  ;;  %v487_v47 = vadd.f32 (!%p6065_p11), %v6067_v26, %v472_v39 }
  0x36   : > { %v488_v48 = vadd.f32 (!%p6065_p11), %v6067_v26, %v473_v40  ;;  %v489_v49 = vadd.f32 (!%p6065_p11), %v6067_v26, %v474_v41  ;;  %v490_v58 = vadd.f32 (!%p6065_p11), %v6067_v26, %v475_v50  ;;  %v491_v59 = vadd.f32 (!%p6065_p11), %v6067_v26, %v476_v51  ;;  %v585_v26 = vld [vmem:[#allocation2 + $0x70] sm:$0x1f] (!%p6065_p11) }
  0x37   : > { %v492_v44 = vmax.f32 (!%p6065_p11), %v484_v36, 0.0  ;;  %v493_v45 = vmax.f32 (!%p6065_p11), %v485_v37, 0.0  ;;  %v494_v54 = vmax.f32 (!%p6065_p11), %v486_v46, 0.0  ;;  %v495_v55 = vmax.f32 (!%p6065_p11), %v487_v47, 0.0  ;;  %v594_v46 = vld [vmem:[#allocation2 + $0xb8] sm:$0x1f] (!%p6065_p11) }
  0x38   : > { %v496_v56 = vmax.f32 %v488_v48, 0.0  ;;  %v497_v57 = vmax.f32 %v489_v49, 0.0  ;;  %v498_v7 = vmax.f32 %v490_v58, 0.0  ;;  %v499_v8 = vmax.f32 %v491_v59, 0.0  ;;  %v597_v49 = vld [vmem:[#allocation2 + $0xd0] sm:$0x1f] }
  0x39   : > { %v500_v52 = vpack.c.bf16 %v492_v44, %v492_v44  ;;  %v501_v53 = vpack.c.bf16 %v493_v45, %v493_v45  ;;  %v502_v0 = vpack.c.bf16 %v494_v54, %v494_v54  ;;  %v503_v1 = vpack.c.bf16 %v495_v55, %v495_v55 }
  0x3a   : > { %v504_v2 = vpack.c.bf16 %v496_v56, %v496_v56  ;;  %v505_v3 = vpack.c.bf16 %v497_v57, %v497_v57  ;;  %v506_v28 = vpack.c.bf16 %v498_v7, %v498_v7  ;;  %v507_v33 = vpack.c.bf16 %v499_v8, %v499_v8 }
  0x3b   : > { %v509_v60 = vshrl.u32 %v500_v52, 16  ;;  %v512_v61 = vshll.u32 %v500_v52, 16  ;;  %v516_v62 = vshrl.u32 %v501_v53, 16  ;;  %v519_v63 = vshll.u32 %v501_v53, 16 }
  0x3c   : > { %v523_v11 = vshrl.u32 %v502_v0, 16  ;;  %v526_v12 = vshll.u32 %v502_v0, 16  ;;  %v530_v13 = vshrl.u32 %v503_v1, 16  ;;  %v533_v14 = vshll.u32 %v503_v1, 16 }
  0x3d   : > { %v511_v4 = vrot.slane %v509_v60, 7  ;;  %v518_v6 = vrot.slane %v516_v62, 7  ;;  %v537_v17 = vshrl.u32 %v504_v2, 16  ;;  %v540_v18 = vshll.u32 %v504_v2, 16 }
  0x3e   : > { %v525_v19 = vrot.slane %v523_v11, 7  ;;  %v532_v20 = vrot.slane %v530_v13, 7  ;;  %v544_v21 = vshrl.u32 %v505_v3, 16  ;;  %v547_v22 = vshll.u32 %v505_v3, 16 }
  0x3f   : > { %v514_v15 = vor.u32 %v512_v61, %v511_v4  ;;  %v521_v16 = vor.u32 %v519_v63, %v518_v6  ;;  %v539_v27 = vrot.slane %v537_v17, 7  ;;  %v551_v36 = vshrl.u32 %v506_v28, 16 }
  0x40   : > { %v528_v29 = vor.u32 %v526_v12, %v525_v19  ;;  %v535_v30 = vor.u32 %v533_v14, %v532_v20  ;;  %v546_v32 = vrot.slane %v544_v21, 7  ;;  %v554_v37 = vshll.u32 %v506_v28, 16 }
  0x41   : > { %v577_v23 = vsel %vm8575_vm2, %v514_v15, %v576_v5  ;;  %v580_v24 = vsel %vm8575_vm2, %v521_v16, %v579_v10  ;;  %v542_v34 = vor.u32 %v540_v18, %v539_v27  ;;  %v558_v41 = vshrl.u32 %v507_v33, 16 }
  0x42   : > { %578 = vst [vmem:[#allocation2 + $0x28] sm:$0x1f] %v577_v23  ;;  %581 = vst [vmem:[#allocation2 + $0x40] sm:$0x1f] %v580_v24  ;;  %v583_v38 = vsel %vm8575_vm2, %v528_v29, %v582_v25  ;;  %v586_v39 = vsel %vm8575_vm2, %v535_v30, %v585_v26  ;;  %v549_v40 = vor.u32 %v547_v22, %v546_v32  ;;  %v553_v43 = vrot.slane %v551_v36, 7 }
  0x43   : > { %584 = vst [vmem:[#allocation2 + $0x58] sm:$0x1f] %v583_v38  ;;  %587 = vst [vmem:[#allocation2 + $0x70] sm:$0x1f] %v586_v39  ;;  %v589_v42 = vsel %vm8575_vm2, %v542_v34, %v588_v31  ;;  %v561_v44 = vshll.u32 %v507_v33, 16  ;;  %v560_v47 = vrot.slane %v558_v41, 7 }
  0x44   : > { %590 = vst [vmem:[#allocation2 + $0x88] sm:$0x1f] %v589_v42  ;;  %v592_v45 = vsel %vm8575_vm2, %v549_v40, %v591_v35  ;;  %v556_v48 = vor.u32 %v554_v37, %v553_v43 }
  0x45   : > { %593 = vst [vmem:[#allocation2 + $0xa0] sm:$0x1f] %v592_v45  ;;  %v563_v50 = vor.u32 %v561_v44, %v560_v47 }
  0x46   : > { %v595_v51 = vsel %vm8575_vm2, %v556_v48, %v594_v46 }
  0x47   : > { %596 = vst [vmem:[#allocation2 + $0xb8] sm:$0x1f] %v595_v51  ;;  %v598_v52 = vsel %vm8575_vm2, %v563_v50, %v597_v49 }
  0x48   : > { %599 = vst [vmem:[#allocation2 + $0xd0] sm:$0x1f] %v598_v52 }
  0x49 PF: > { %p6068_p12 = scmp.ne.s32.totalorder %s8441_s24, 8 }
  0x4a   : > { %vm605_vm3 = vcmask (!%p6068_p12), 1044480   ;;  %vm606_vm4 = vsmask.f32 (!%p6068_p12), 4354  ;;  %v608_v53 = vld [vmem:[#allocation2 + $0x28] sm:$0x1f] (!%p6068_p12) }
  0x4b   : > { %603 = sbr.rel (%p6068_p12) target bundleno = 83 (0x53), region = 56  ;;  %vm8596_vm5 = vmand (!%p6068_p12), %vm605_vm3, %vm606_vm4  ;;  %v611_v55 = vld [vmem:[#allocation2 + $0x40] sm:$0x1f] (!%p6068_p12)  ;;  %v614_v56 = vld [vmem:[#allocation2 + $0x58] sm:$0x1f] (!%p6068_p12) }
  0x4c   : > { %v609_v57 = vsel (!%p6068_p12), %vm8596_vm5, 0, %v608_v53  ;;  %v612_v58 = vsel (!%p6068_p12), %vm8596_vm5, 0, %v611_v55  ;;  %v615_v59 = vsel (!%p6068_p12), %vm8596_vm5, 0, %v614_v56  ;;  %v617_v60 = vld [vmem:[#allocation2 + $0x70] sm:$0x1f] (!%p6068_p12) }
  0x4d   : > { %610 = vst [vmem:[#allocation2 + $0x28] sm:$0x1f] (!%p6068_p12), %v609_v57  ;;  %613 = vst [vmem:[#allocation2 + $0x40] sm:$0x1f] (!%p6068_p12), %v612_v58  ;;  %v618_v61 = vsel (!%p6068_p12), %vm8596_vm5, 0, %v617_v60 }
  0x4e   : > { %616 = vst [vmem:[#allocation2 + $0x58] sm:$0x1f] (!%p6068_p12), %v615_v59  ;;  %v620_v62 = vld [vmem:[#allocation2 + $0x88] sm:$0x1f] (!%p6068_p12)  ;;  %v623_v63 = vld [vmem:[#allocation2 + $0xa0] sm:$0x1f] (!%p6068_p12) }
  0x4f   : > { %619 = vst [vmem:[#allocation2 + $0x70] sm:$0x1f] (!%p6068_p12), %v618_v61  ;;  %v621_v0 = vsel (!%p6068_p12), %vm8596_vm5, 0, %v620_v62  ;;  %v624_v1 = vsel (!%p6068_p12), %vm8596_vm5, 0, %v623_v63  ;;  %v626_v2 = vld [vmem:[#allocation2 + $0xb8] sm:$0x1f] (!%p6068_p12) }
  0x50   : > { %v629_v3 = vld [vmem:[#allocation2 + $0xd0] sm:$0x1f] (!%p6068_p12)  ;;  %622 = vst [vmem:[#allocation2 + $0x88] sm:$0x1f] (!%p6068_p12), %v621_v0  ;;  %625 = vst [vmem:[#allocation2 + $0xa0] sm:$0x1f] (!%p6068_p12), %v624_v1 }
  0x51   : > { %v627_v4 = vsel (!%p6068_p12), %vm8596_vm5, 0, %v626_v2  ;;  %v630_v5 = vsel (!%p6068_p12), %vm8596_vm5, 0, %v629_v3 }
  0x52   : > { %628 = vst [vmem:[#allocation2 + $0xb8] sm:$0x1f] %v627_v4  ;;  %631 = vst [vmem:[#allocation2 + $0xd0] sm:$0x1f] %v630_v5 }
  0x53 PF: > { %634 = sbr.rel (%p6064_p10) target bundleno = 708 (0x2c4), region = 60  ;;  %v7927_v6 = vld [vmem:[%s9599_s3 + $0x100] sm:$0xff] (!%p6064_p10)   ;;  %v7930_v9 = vld [vmem:[%s9599_s3 + $0x108] sm:$0xff] (!%p6064_p10)   ;;  %v7933_v12 = vld [vmem:[%s9599_s3 + $0x110] sm:$0xff] (!%p6064_p10)   ;;  %vm883_vm6 = vsmask.f32 (!%p6064_p10), 3328 }
  0x54   : > { %v7928_v7 = vld [vmem:[%s9599_s3 + $0x140] sm:$0xff] (!%p6064_p10)   ;;  %7065 = vmatprep.subr.bf16.mxu0 (!%p6064_p10), %v7927_v6  ;;  %v7931_v10 = vld [vmem:[%s9599_s3 + $0x148] sm:$0xff] (!%p6064_p10)   ;;  %v7934_v13 = vld [vmem:[%s9599_s3 + $0x150] sm:$0xff] (!%p6064_p10)   ;;  %vm884_vm7 = vsmask.f32 (!%p6064_p10), 7440  ;;  %vm1907_vm9 = vcmask (!%p6064_p10), 1042432  }
  0x55   : > { %v7929_v8 = vld [vmem:[%s9599_s3 + $0xc0] sm:$0xff] (!%p6064_p10)   ;;  %7533 = vmatprep.subr.bf16.mxu1 (!%p6064_p10), %v7928_v7  ;;  %v7932_v11 = vld [vmem:[%s9599_s3 + $0xc8] sm:$0xff] (!%p6064_p10)   ;;  %v7935_v14 = vld [vmem:[%s9599_s3 + $0xd0] sm:$0xff] (!%p6064_p10)   ;;  %vm1908_vm10 = vcmask (!%p6064_p10), 1046532  }
  0x56   : > { %7066 = vmatpush3.bf16.msra.mxu0 (!%p6064_p10), %v7929_v8  ;;  %7534 = vmatpush3.bf16.msra.mxu1 (!%p6064_p10), %v7928_v7  ;;  %v7936_v15 = vld [vmem:[%s9599_s3 + $0x118] sm:$0xff] (!%p6064_p10)   ;;  %v7939_v18 = vld [vmem:[%s9599_s3 + $0x120] sm:$0xff] (!%p6064_p10)   ;;  %v7942_v21 = vld [vmem:[%s9599_s3 + $0x128] sm:$0xff] (!%p6064_p10)  }
  0x57   : > { %7067 = vmatprep.subr.bf16.mxu0 (!%p6064_p10), %v7930_v9  ;;  %7535 = vmatprep.subr.bf16.mxu1 (!%p6064_p10), %v7931_v10  ;;  %v7937_v16 = vld [vmem:[%s9599_s3 + $0x158] sm:$0xff] (!%p6064_p10)   ;;  %v7940_v19 = vld [vmem:[%s9599_s3 + $0x160] sm:$0xff] (!%p6064_p10)   ;;  %v7943_v22 = vld [vmem:[%s9599_s3 + $0x168] sm:$0xff] (!%p6064_p10)  }
  0x58   : > { %v7938_v17 = vld [vmem:[%s9599_s3 + $0xd8] sm:$0xff] (!%p6064_p10)   ;;  %v7941_v20 = vld [vmem:[%s9599_s3 + $0xe0] sm:$0xff] (!%p6064_p10)   ;;  %v7944_v23 = vld [vmem:[%s9599_s3 + $0xe8] sm:$0xff] (!%p6064_p10)  }
  0x59   : > { %v7945_v24 = vld [vmem:[%s9599_s3 + $0x130] sm:$0xff] (!%p6064_p10)   ;;  %v7948_v27 = vld [vmem:[%s9599_s3 + $0x138] sm:$0xff] (!%p6064_p10)   ;;  %v7951_v29 = vld [vmem:[#allocation2] ss:$8 sps:$4 sm:$0xff] (!%p6064_p10)  }
  0x5a   : > { %7068 = vmatpush3.bf16.msra.mxu0 %v7932_v11  ;;  %7536 = vmatpush3.bf16.msra.mxu1 %v7931_v10  ;;  %v7946_v25 = vld [vmem:[%s9599_s3 + $0x170] sm:$0xff]   ;;  %v7949_v28 = vld [vmem:[%s9599_s3 + $0x178] sm:$0xff]   ;;  %v7953_v32 = vld [vmem:[#allocation2 + $0x4] ss:$8 sps:$4 sm:$0x11]   ;;  %v887_v34 = vshrl.u32 %v7951_v29, 16 }
  0x5b   : > { %7069 = vmatprep.subr.bf16.mxu0 %v7933_v12  ;;  %7537 = vmatprep.subr.bf16.mxu1 %v7934_v13  ;;  %v7947_v26 = vld [vmem:[%s9599_s3 + $0xf0] sm:$0xff]   ;;  %v7954_v30 = vld [vmem:[#allocation2 + $0x18] ss:$8 sps:$4 sm:$0xff]   ;;  %v7956_v33 = vld [vmem:[#allocation2 + $0x1c] ss:$8 sps:$4 sm:$0x11]  }
  0x5c   : > { %v7950_v31 = vld [vmem:[%s9599_s3 + $0xf8] sm:$0xff]   ;;  %v890_v35 = vshll.u32 %v7951_v29, 16  ;;  %v896_v36 = vshll.u32 %v7953_v32, 16  ;;  %v915_v37 = vshrl.u32 %v7954_v30, 16  ;;  %v918_v38 = vshll.u32 %v7954_v30, 16  ;;  %v7961_v53 = vld [vmem:[%s9599_s3 + $0x40] sm:$0xff]   ;;  %vm8695_vm8 = vmor %vm883_vm6, %vm884_vm7 }
  0x5d   : > { %v924_v39 = vshll.u32 %v7956_v33, 16  ;;  %v757_v40 = vld [vmem:[#allocation2 + $0x10] sm:$0x1f]  ;;  %v889_v41 = vrot.slane %v887_v34, 4  ;;  %v760_v43 = vld [vmem:[#allocation2 + $0x28] sm:$0x1f]  ;;  %vm8877_vm11 = vmor %vm1907_vm9, %vm1908_vm10 }
  0x5e   : > { %7070 = vmatpush3.bf16.msra.mxu0 %v7935_v14  ;;  %7538 = vmatpush3.bf16.msra.mxu1 %v7934_v13  ;;  %v892_v42 = vrot.slane %v890_v35, 5  ;;  %v6071_v44 = vcombine.low %v757_v40, %v757_v40  ;;  %v6073_v45 = vcombine.high %v757_v40, %v757_v40  ;;  %v898_v46 = vrot.slane %v896_v36, 5  ;;  %v8702_v59 = vld [vmem:[%s9599_s3 + $0x80] sm:$0xff]   ;;  %v766_v1 = vld [vmem:[#allocation2 + $0x58] sm:$0x1f]  ;;  %v7970_v35 = vld [vmem:[%s9599_s3 + $0x8] sm:$0xff]  }
  0x5f   : > { %7071 = vmatprep.subr.bf16.mxu0 %v7936_v15  ;;  %7539 = vmatprep.subr.bf16.mxu1 %v7937_v16  ;;  %v917_v47 = vrot.slane %v915_v37, 4  ;;  %v920_v48 = vrot.slane %v918_v38, 5  ;;  %v6075_v50 = vcombine.low %v760_v43, %v760_v43  ;;  %v6077_v51 = vcombine.high %v760_v43, %v760_v43  ;;  %v763_v60 = vld [vmem:[#allocation2 + $0x40] sm:$0x1f]  ;;  %v7977_v36 = vld [vmem:[%s9599_s3 + $0x50] sm:$0xff]  }
  0x60   : > { %v893_v49 = vor.u32 %v892_v42, %v889_v41  ;;  %v901_v52 = vshrl.u32 %v6071_v44, 16  ;;  %v926_v56 = vrot.slane %v924_v39, 5  ;;  %v904_v57 = vshll.u32 %v6071_v44, 16  ;;  %v7971_v41 = vld [vmem:[#allocation2 + $0x30] ss:$8 sps:$4 sm:$0xff]  }
  0x61   : > { %v921_v55 = vor.u32 %v920_v48, %v917_v47  ;;  %v910_v58 = vshll.u32 %v6073_v45, 16  ;;  %v929_v63 = vshrl.u32 %v6075_v50, 16  ;;  %v932_v0 = vshll.u32 %v6075_v50, 16  ;;  %v7973_v43 = vld [vmem:[#allocation2 + $0x34] ss:$8 sps:$4 sm:$0x11]  }
  0x62   : > { %7072 = vmatpush3.bf16.msra.mxu0 %v7938_v17  ;;  %7540 = vmatpush3.bf16.msra.mxu1 %v7937_v16  ;;  %v894_v61 = vrot.slane %v893_v49, 4  ;;  %v903_v62 = vrot.slane %v901_v52, 4  ;;  %v906_v3 = vrot.slane %v904_v57, 5  ;;  %v938_v5 = vshll.u32 %v6077_v51, 16  ;;  %v7974_v44 = vld [vmem:[#allocation2 + $0x48] ss:$8 sps:$4 sm:$0xff]  }
  0x63   : > { %7073 = vmatprep.subr.bf16.mxu0 %v7939_v18  ;;  %7541 = vmatprep.subr.bf16.mxu1 %v7940_v19  ;;  %v922_v2 = vrot.slane %v921_v55, 4  ;;  %v912_v4 = vrot.slane %v910_v58, 5  ;;  %v931_v7 = vrot.slane %v929_v63, 4  ;;  %v934_v8 = vrot.slane %v932_v0, 5  ;;  %v7967_v18 = vld [vmem:[%s9599_s3] sm:$0xff]   ;;  %v7979_v45 = vld [vmem:[%s9599_s3 + $0x10] sm:$0xff]  }
  0x64   : > { %v899_v6 = vsel %vm8695_vm8, %v894_v61, %v898_v46  ;;  %v6079_v9 = vcombine.low %v763_v60, %v763_v60  ;;  %v907_v11 = vor.u32 %v906_v3, %v903_v62  ;;  %v940_v12 = vrot.slane %v938_v5, 5  ;;  %v7976_v47 = vld [vmem:[#allocation2 + $0x4c] ss:$8 sps:$4 sm:$0x11]   ;;  %v7982_v5 = vld [vmem:[%s9599_s3 + $0x18] sm:$0xff]  }
  0x65   : > { %v927_v10 = vsel %vm8695_vm8, %v922_v2, %v926_v56  ;;  %v6081_v13 = vcombine.high %v763_v60, %v763_v60  ;;  %v935_v16 = vor.u32 %v934_v8, %v931_v7  ;;  %v6083_v17 = vcombine.low %v766_v1, %v766_v1  ;;  %v7980_v60 = vld [vmem:[%s9599_s3 + $0x58] sm:$0xff]   ;;  %v7969_v62 = vld [vmem:[%s9599_s3 + $0x88] sm:$0xff]   ;;  %v7989_v8 = vld [vmem:[%s9599_s3 + $0x60] sm:$0xff]  }
  0x66   : > { %7074 = vmatpush3.bf16.msra.mxu0 %v7941_v20  ;;  %7542 = vmatpush3.bf16.msra.mxu1 %v7940_v19  ;;  %v6150_v14 = vcombine.low %v899_v6, %v927_v10  ;;  %v6151_v15 = vcombine.high %v899_v6, %v927_v10  ;;  %v908_v19 = vrot.slane %v907_v11, 4  ;;  %v6085_v20 = vcombine.high %v766_v1, %v766_v1  ;;  %v7978_v10 = vld [vmem:[%s9599_s3 + $0x90] sm:$0xff]  }
  0x67   : > { %7075 = vmatprep.subr.bf16.mxu0 %v7942_v21  ;;  %7543 = vmatprep.subr.bf16.mxu1 %v7943_v22  ;;  %v957_v21 = vshrl.u32 %v6079_v9, 16  ;;  %v943_v48 = vshrl.u32 %v7971_v41, 16  ;;  %v946_v49 = vshll.u32 %v7971_v41, 16  ;;  %v952_v51 = vshll.u32 %v7973_v43, 16 }
  0x68   : > { %1383 = vmatprep.mubr.bf16.mxu0 %v6151_v15  ;;  %v971_v52 = vshrl.u32 %v7974_v44, 16  ;;  %v980_v58 = vshll.u32 %v7976_v47, 16  ;;  %v7986_v15 = vld [vmem:[#allocation2 + $0x78] ss:$8 sps:$4 sm:$0xff]   ;;  %v8005_v47 = vld [vmem:[%s9599_s3 + $0x70] sm:$0xff]  }
  0x69   : > { %v959_v29 = vrot.slane %v957_v21, 4  ;;  %v945_v56 = vrot.slane %v943_v48, 4  ;;  %v948_v57 = vrot.slane %v946_v49, 5  ;;  %v954_v63 = vrot.slane %v952_v51, 5 }
  0x6a   : > { %7076 = vmatpush3.bf16.msra.mxu0 %v7944_v23  ;;  %7544 = vmatpush3.bf16.msra.mxu1 %v7943_v22  ;;  %v960_v22 = vshll.u32 %v6079_v9, 16  ;;  %v7968_v23 = vld [vmem:[%s9599_s3 + $0x48] sm:$0xff]   ;;  %v973_v0 = vrot.slane %v971_v52, 4 }
  0x6b   : > { %7077 = vmatprep.subr.bf16.mxu0 %v7945_v24  ;;  %7545 = vmatprep.subr.bf16.mxu1 %v7946_v25  ;;  %v936_v24 = vrot.slane %v935_v16, 4  ;;  %v949_v3 = vor.u32 %v948_v57, %v945_v56  ;;  %v8000_v48 = vld [vmem:[#allocation2 + $0xac] ss:$8 sps:$4 sm:$0x11]  }
  0x6c   : > { %v962_v30 = vrot.slane %v960_v22, 5  ;;  %v1027_v22 = vshrl.u32 %v7986_v15, 16  ;;  %v8011_v56 = vld [vmem:[%s9599_s3 + $0x30] sm:$0xff]  }
  0x6d   : > { %v941_v32 = vsel %vm8695_vm8, %v936_v24, %v940_v12  ;;  %v950_v7 = vrot.slane %v949_v3, 4  ;;  %v7991_v12 = vld [vmem:[%s9599_s3 + $0x20] sm:$0xff]  }
  0x6e   : > { %7078 = vmatpush3.bf16.msra.mxu0 %v7947_v26  ;;  %7546 = vmatpush3.bf16.msra.mxu1 %v7946_v25  ;;  %v966_v25 = vshll.u32 %v6081_v13, 16  ;;  %v985_v26 = vshrl.u32 %v6083_v17, 16  ;;  %v963_v38 = vor.u32 %v962_v30, %v959_v29 }
  0x6f   : > { %7079 = vmatprep.subr.bf16.mxu0 %v7948_v27  ;;  %7547 = vmatprep.subr.bf16.mxu1 %v7949_v28  ;;  %v988_v27 = vshll.u32 %v6083_v17, 16  ;;  %v955_v11 = vsel %vm8695_vm8, %v950_v7, %v954_v63  ;;  %v7981_v17 = vld [vmem:[%s9599_s3 + $0x98] sm:$0xff]  }
  0x70   : > { %v987_v33 = vrot.slane %v985_v26, 4  ;;  %v968_v39 = vrot.slane %v966_v25, 5  ;;  %v964_v46 = vrot.slane %v963_v38, 4  ;;  %v7993_v38 = vld [vmem:[%s9599_s3 + $0xa8] sm:$0xff]   ;;  %v8012_v63 = vld [vmem:[%s9599_s3 + $0x78] sm:$0xff]  }
  0x71   : > { %v990_v34 = vrot.slane %v988_v27, 5 }
  0x72   : > { %7080 = vmatpush3.bf16.msra.mxu0 %v7950_v31  ;;  %7548 = vmatpush3.bf16.msra.mxu1 %v7949_v28  ;;  %v913_v28 = vsel %vm8695_vm8, %v908_v19, %v912_v4  ;;  %v994_v31 = vshll.u32 %v6085_v20, 16  ;;  %v969_v55 = vsel %vm8695_vm8, %v964_v46, %v968_v39  ;;  %v982_v4 = vrot.slane %v980_v58, 5  ;;  %v7988_v19 = vld [vmem:[#allocation2 + $0x7c] ss:$8 sps:$4 sm:$0x11]   ;;  %v7994_v39 = vld [vmem:[%s9599_s3 + $0x28] sm:$0xff]  }
  0x73   : > { %7117 = vmatprep.subr.bf16.mxu0 %v7961_v53  ;;  %7557 = vmatprep.subr.bf16.mxu1 %v8702_v59  ;;  %v6152_v37 = vcombine.low %v913_v28, %v941_v32  ;;  %v991_v42 = vor.u32 %v990_v34, %v987_v33  ;;  %v974_v53 = vshll.u32 %v7974_v44, 16  ;;  %v1036_v25 = vshll.u32 %v7988_v19, 16  ;;  %v7992_v34 = vld [vmem:[%s9599_s3 + $0x68] sm:$0xff]   ;;  %v775_v19 = vld [vmem:[#allocation2 + $0xa0] sm:$0x1f] }
  0x74   : > { %v996_v40 = vrot.slane %v994_v31, 5  ;;  %v1029_v28 = vrot.slane %v1027_v22, 4  ;;  %v7998_v46 = vld [vmem:[#allocation2 + $0xa8] ss:$8 sps:$4 sm:$0xff]  }
  0x75   : > { %1384 = vmatmul.mubr.bf16.vlgmr.msra.gmra.mrb[0].mxu0 %v6150_v14  ;;  %7549 = vmatprep.mubr.bf16.mxu1 %v6152_v37  ;;  %v992_v50 = vrot.slane %v991_v42, 4  ;;  %v976_v1 = vrot.slane %v974_v53, 5  ;;  %v7983_v14 = vld [vmem:[#allocation2 + $0x60] ss:$8 sps:$4 sm:$0xff]   ;;  %v1038_v33 = vrot.slane %v1036_v25, 5  ;;  %v1083_v52 = vshrl.u32 %v7998_v46, 16 }
  0x76   : > { %7118 = vmatpush3.bf16.msra.mxu0 %v7967_v18  ;;  %v7985_v18 = vld [vmem:[#allocation2 + $0x64] ss:$8 sps:$4 sm:$0x11]   ;;  %v999_v20 = vshrl.u32 %v7983_v14, 16  ;;  %v1002_v21 = vshll.u32 %v7983_v14, 16  ;;  %v1086_v53 = vshll.u32 %v7998_v46, 16 }
  0x77   : > { %7119 = vmatprep.subr.bf16.mxu0 %v7968_v23  ;;  %v997_v61 = vsel %vm8695_vm8, %v992_v50, %v996_v40  ;;  %v977_v6 = vor.u32 %v976_v1, %v973_v0  ;;  %v1030_v23 = vshll.u32 %v7986_v15, 16  ;;  %v1008_v24 = vshll.u32 %v7985_v18, 16  ;;  %v7995_v42 = vld [vmem:[#allocation2 + $0x90] ss:$8 sps:$4 sm:$0xff]   ;;  %v8018_v15 = vld [vmem:[%s9599_s3 + $0x1c0] sm:$0xff]  }
  0x78   : > { %v6155_v2 = vcombine.low %v969_v55, %v997_v61  ;;  %v1001_v26 = vrot.slane %v999_v20, 4  ;;  %v1004_v27 = vrot.slane %v1002_v21, 5  ;;  %v1055_v49 = vshrl.u32 %v7995_v42, 16  ;;  %v769_v55 = vld [vmem:[#allocation2 + $0x70] sm:$0x1f]  ;;  %v8013_v14 = vld [vmem:[%s9599_s3 + $0xb8] sm:$0xff]  }
  0x79   : > { %v978_v9 = vrot.slane %v977_v6, 4  ;;  %v1032_v29 = vrot.slane %v1030_v23, 5  ;;  %v1010_v30 = vrot.slane %v1008_v24, 5  ;;  %v1058_v50 = vshll.u32 %v7995_v42, 16  ;;  %v772_v61 = vld [vmem:[#allocation2 + $0x88] sm:$0x1f] }
  0x7a   : > { %7120 = vmatpush3.bf16.msra.mxu0 %v7970_v35  ;;  %7550 = vmatmul.mubr.bf16.vlgmr.msra.gmra.mrb[0].mxu1 %v6155_v2  ;;  %v1005_v31 = vor.u32 %v1004_v27, %v1001_v26  ;;  %v7990_v35 = vld [vmem:[%s9599_s3 + $0xa0] sm:$0xff]   ;;  %v1057_v57 = vrot.slane %v1055_v49, 4  ;;  %v1085_v1 = vrot.slane %v1083_v52, 4  ;;  %v1088_v2 = vrot.slane %v1086_v53, 5  ;;  %v778_v24 = vld [vmem:[#allocation2 + $0xb8] sm:$0x1f] }
  0x7b   : > { %7121 = vmatprep.subr.bf16.mxu0 %v7977_v36  ;;  %7558 = vmatpush3.bf16.msra.mxu1 %v8702_v59  ;;  %v983_v13 = vsel %vm8695_vm8, %v978_v9, %v982_v4  ;;  %v1033_v32 = vor.u32 %v1032_v29, %v1029_v28  ;;  %v1060_v58 = vrot.slane %v1058_v50, 5  ;;  %v6089_v3 = vcombine.high %v769_v55, %v769_v55  ;;  %v8006_v4 = vld [vmem:[%s9599_s3 + $0xb0] sm:$0xff]   ;;  %v8014_v9 = vld [vmem:[%s9599_s3 + $0x38] sm:$0xff]   ;;  %v8015_v53 = vld [vmem:[#allocation2 + $0x8] ss:$24 sps:$4 sm:$0xff]  }
  0x7c   : > { %7559 = vmatprep.subr.bf16.mxu1 %v7969_v62  ;;  %v6154_v59 = vcombine.high %v955_v11, %v983_v13  ;;  %v6153_v16 = vcombine.low %v955_v11, %v983_v13  ;;  %v1006_v36 = vrot.slane %v1005_v31, 4  ;;  %v6091_v7 = vcombine.low %v772_v61, %v772_v61 }
  0x7d   : > { %v1034_v37 = vrot.slane %v1033_v32, 4  ;;  %v1022_v13 = vshll.u32 %v6089_v3, 16  ;;  %v6095_v31 = vcombine.low %v775_v19, %v775_v19  ;;  %v6097_v32 = vcombine.high %v775_v19, %v775_v19  ;;  %v8038_v19 = vld [vmem:[%s9599_s3 + $0x1e8] sm:$0xff]  }
  0x7e   : > { %7122 = vmatpush3.bf16.msra.mxu0 %v7979_v45  ;;  %1391 = vmatprep.mubr.bf16.mxu0 %v6154_v59  ;;  %v1011_v40 = vsel %vm8695_vm8, %v1006_v36, %v1010_v30  ;;  %v7997_v45 = vld [vmem:[#allocation2 + $0x94] ss:$8 sps:$4 sm:$0x11]   ;;  %v6099_v36 = vcombine.low %v778_v24, %v778_v24 }
  0x7f   : > { %7123 = vmatprep.subr.bf16.mxu0 %v7980_v60  ;;  %7560 = vmatpush3.bf16.msra.mxu1 %v7969_v62  ;;  %v1039_v41 = vsel %vm8695_vm8, %v1034_v37, %v1038_v33  ;;  %v1064_v51 = vshll.u32 %v7997_v45, 16  ;;  %v1092_v60 = vshll.u32 %v8000_v48, 16  ;;  %v6087_v62 = vcombine.low %v769_v55, %v769_v55 }
  0x80   : > { %7561 = vmatprep.subr.bf16.mxu1 %v7978_v10  ;;  %1392 = vmatmul.mubr.bf16.gmra.mrb[4].mxu0 %v6153_v16  ;;  %v6157_v43 = vcombine.high %v1011_v40, %v1039_v41  ;;  %v6156_v44 = vcombine.low %v1011_v40, %v1039_v41  ;;  %v1041_v16 = vshrl.u32 %v6091_v7, 16  ;;  %v1024_v23 = vrot.slane %v1022_v13, 5  ;;  %v8019_v41 = vld [vmem:[%s9599_s3 + $0x200] sm:$0xff]   ;;  %v8023_v13 = vld [vmem:[%s9599_s3 + $0x208] sm:$0xff]  }
  0x81   : > { %v1066_v0 = vrot.slane %v1064_v51, 5  ;;  %v1094_v6 = vrot.slane %v1092_v60, 5  ;;  %v1013_v11 = vshrl.u32 %v6087_v62, 16  ;;  %v1072_v40 = vshll.u32 %v6095_v31, 16 }
  0x82   : > { %7124 = vmatpush3.bf16.msra.mxu0 %v7982_v5  ;;  %1399 = vmatprep.mubr.bf16.mxu0 %v6157_v43  ;;  %v1061_v5 = vor.u32 %v1060_v58, %v1057_v57  ;;  %v1043_v26 = vrot.slane %v1041_v16, 4  ;;  %v1078_v43 = vshll.u32 %v6097_v32, 16  ;;  %v1100_v45 = vshll.u32 %v6099_v36, 16  ;;  %v8034_v16 = vld [vmem:[#allocation2 + $0x60] ss:$24 sps:$4 sm:$0xff]  }
  0x83   : > { %7125 = vmatprep.subr.bf16.mxu0 %v7989_v8  ;;  %7562 = vmatpush3.bf16.msra.mxu1 %v7978_v10  ;;  %v6093_v8 = vcombine.high %v772_v61, %v772_v61  ;;  %v1089_v10 = vor.u32 %v1088_v2, %v1085_v1  ;;  %v1015_v21 = vrot.slane %v1013_v11, 4  ;;  %v1074_v48 = vrot.slane %v1072_v40, 5  ;;  %v8022_v1 = vld [vmem:[%s9599_s3 + $0x1c8] sm:$0xff]   ;;  %v8029_v11 = vld [vmem:[%s9599_s3 + $0x190] sm:$0xff]   ;;  %v8050_v32 = vld [vmem:[%s9599_s3 + $0x1b8] sm:$0xff]  }
  0x84   : > { %7563 = vmatprep.subr.bf16.mxu1 %v7981_v17  ;;  %v1062_v59 = vrot.slane %v1061_v5, 4  ;;  %v1102_v52 = vrot.slane %v1100_v45, 5  ;;  %v1080_v57 = vrot.slane %v1078_v43, 5  ;;  %v8024_v5 = vld [vmem:[%s9599_s3 + $0x188] sm:$0xff]  }
  0x85   : > { %v1050_v18 = vshll.u32 %v6093_v8, 16  ;;  %v1090_v20 = vrot.slane %v1089_v10, 4  ;;  %v8025_v8 = vld [vmem:[#allocation2 + $0x38] ss:$24 sps:$4 sm:$0xff]  }
  0x86   : > { %7126 = vmatpush3.bf16.msra.mxu0 %v7991_v12  ;;  %v1016_v12 = vshll.u32 %v6087_v62, 16  ;;  %v1067_v25 = vsel %vm8695_vm8, %v1062_v59, %v1066_v0  ;;  %v8016_v62 = vld [vmem:[#allocation2] ss:$24 sps:$4 sm:$0xff]   ;;  %v8056_v40 = vld [vmem:[#allocation2 + $0x1c] ss:$8 sps:$4 sm:$0x11]  }
  0x87   : > { %7127 = vmatprep.subr.bf16.mxu0 %v7992_v34  ;;  %7564 = vmatpush3.bf16.msra.mxu1 %v7981_v17  ;;  %v1044_v17 = vshll.u32 %v6091_v7, 16  ;;  %v1052_v28 = vrot.slane %v1050_v18, 5  ;;  %v1095_v29 = vsel %vm8695_vm8, %v1090_v20, %v1094_v6  ;;  %v8027_v7 = vld [vmem:[%s9599_s3 + $0x1d0] sm:$0xff]   ;;  %v8020_v10 = vld [vmem:[#allocation2 + $0x40] ss:$24 sps:$4 sm:$0xff]  }
  0x88   : > { %7565 = vmatprep.subr.bf16.mxu1 %v7990_v35  ;;  %1400 = vmatmul.mubr.bf16.gmra.mrb[8].mxu0 %v6156_v44  ;;  %v1018_v22 = vrot.slane %v1016_v12, 5  ;;  %v6160_v33 = vcombine.high %v1067_v25, %v1095_v29  ;;  %v6159_v34 = vcombine.low %v1067_v25, %v1095_v29  ;;  %v1097_v44 = vshrl.u32 %v6099_v36, 16  ;;  %v8030_v12 = vld [vmem:[%s9599_s3 + $0x1d8] sm:$0xff]   ;;  %v8033_v59 = vld [vmem:[#allocation2 + $0x68] ss:$24 sps:$4 sm:$0xff]   ;;  %v8047_v29 = vld [vmem:[%s9599_s3 + $0x1b0] sm:$0xff]  }
  0x89   : > { %v1046_v27 = vrot.slane %v1044_v17, 5  ;;  %v8035_v17 = vld [vmem:[%s9599_s3 + $0x1e0] sm:$0xff]   ;;  %v8031_v20 = vld [vmem:[%s9599_s3 + $0x218] sm:$0xff]   ;;  %v8043_v25 = vld [vmem:[#allocation2 + $0x70] ss:$24 sps:$4 sm:$0xff]  }
  0x8a   : > { %7128 = vmatpush3.bf16.msra.mxu0 %v7994_v39  ;;  %v1019_v30 = vor.u32 %v1018_v22, %v1015_v21  ;;  %v1069_v39 = vshrl.u32 %v6095_v31, 16  ;;  %1407 = vmatprep.mubr.bf16.mxu0 %v6160_v33  ;;  %v1099_v51 = vrot.slane %v1097_v44, 4  ;;  %v8037_v18 = vld [vmem:[%s9599_s3 + $0x1a0] sm:$0xff]   ;;  %v8040_v21 = vld [vmem:[%s9599_s3 + $0x1a8] sm:$0xff]   ;;  %v8045_v31 = vld [vmem:[%s9599_s3 + $0x230] sm:$0xff]  }
  0x8b   : > { %7129 = vmatprep.subr.bf16.mxu0 %v8005_v47  ;;  %7566 = vmatpush3.bf16.msra.mxu1 %v7990_v35  ;;  %v1047_v35 = vor.u32 %v1046_v27, %v1043_v26  ;;  %v8036_v22 = vld [vmem:[%s9599_s3 + $0x220] sm:$0xff]   ;;  %v8044_v26 = vld [vmem:[%s9599_s3 + $0x1f0] sm:$0xff]   ;;  %v8039_v27 = vld [vmem:[%s9599_s3 + $0x228] sm:$0xff]  }
  0x8c   : > { %7567 = vmatprep.subr.bf16.mxu1 %v7993_v38  ;;  %v1020_v37 = vrot.slane %v1019_v30, 4  ;;  %v1071_v47 = vrot.slane %v1069_v39, 4  ;;  %v1103_v58 = vor.u32 %v1102_v52, %v1099_v51  ;;  %v8048_v30 = vld [vmem:[%s9599_s3 + $0x1f8] sm:$0xff]   ;;  %v1781_v33 = vld [vmem:[#allocation2 + $0x10] sm:$0x1e]  ;;  %v8061_v52 = vld [vmem:[%s9599_s3 + $0x280] sm:$0xff]  }
  0x8d   : > { %v1048_v42 = vrot.slane %v1047_v35, 4  ;;  %v8053_v35 = vld [vmem:[#allocation2 + $0x4] ss:$8 sps:$4 sm:$0x11]   ;;  %v6223_v36 = vcombine.low %v1781_v33, %v1781_v33 }
  0x8e   : > { %7130 = vmatpush3.bf16.msra.mxu0 %v8011_v56  ;;  %v1025_v46 = vsel %vm8695_vm8, %v1020_v37, %v1024_v23  ;;  %v1075_v56 = vor.u32 %v1074_v48, %v1071_v47  ;;  %v1104_v0 = vrot.slane %v1103_v58, 4  ;;  %v8041_v23 = vld [vmem:[#allocation2 + $0x98] ss:$24 sps:$4 sm:$0xff]   ;;  %v6225_v37 = vcombine.high %v1781_v33, %v1781_v33  ;;  %v1784_v44 = vld [vmem:[#allocation2 + $0x28] sm:$0x1e]  ;;  %v8062_v58 = vld [vmem:[%s9599_s3 + $0x2c0] sm:$0xff]  }
  0x8f   : > { %7131 = vmatprep.subr.bf16.mxu0 %v8012_v63  ;;  %7568 = vmatpush3.bf16.msra.mxu1 %v7993_v38  ;;  %v6101_v38 = vcombine.high %v778_v24, %v778_v24  ;;  %v1053_v50 = vsel %vm8695_vm8, %v1048_v42, %v1052_v28  ;;  %v8021_v63 = vld [vmem:[%s9599_s3 + $0x180] sm:$0xff]   ;;  %v8042_v24 = vld [vmem:[#allocation2 + $0x90] ss:$24 sps:$4 sm:$0xff]   ;;  %v1912_v43 = vrot.slane %v8053_v35, 5  ;;  %v6255_v45 = vrot.slane %v6223_v36, 9  ;;  %v8082_v33 = vld [vmem:[%s9599_s3 + $0x258] sm:$0xff]  }
  0x90   : > { %7569 = vmatprep.subr.bf16.mxu1 %v8006_v4  ;;  %1408 = vmatmul.mubr.bf16.gmra.mrb[12].mxu0 %v6159_v34  ;;  %v6158_v55 = vcombine.low %v1025_v46, %v1053_v50  ;;  %v1076_v61 = vrot.slane %v1075_v56, 4  ;;  %v8046_v28 = vld [vmem:[#allocation2 + $0xa0] ss:$24 sps:$4 sm:$0xff]   ;;  %v1916_v46 = vrot.slane %v6225_v37, 5  ;;  %v1920_v48 = vrot.slane %v8056_v40, 5 }
  0x91   : > { %v1106_v49 = vshll.u32 %v6101_v38, 16  ;;  %1681 = vmatprep.mubr.bf16.mxu0 %v8015_v53  ;;  %v8051_v34 = vld [vmem:[#allocation2] ss:$8 sps:$4 sm:$0xee]   ;;  %v8049_v38 = vld [vmem:[%s9599_s3 + $0x238] sm:$0xff]   ;;  %v6229_v50 = vcombine.high %v1784_v44, %v1784_v44 }
  0x92   : > { %7132 = vmatpush3.bf16.msra.mxu0 %v8014_v9  ;;  %7553 = vmatprep.mubr.bf16.mxu1 %v6158_v55  ;;  %v1081_v2 = vsel %vm8695_vm8, %v1076_v61, %v1080_v57  ;;  %v8026_v9 = vld [vmem:[#allocation2 + $0x30] ss:$24 sps:$4 sm:$0xff]   ;;  %v8054_v39 = vld [vmem:[#allocation2 + $0x18] ss:$8 sps:$4 sm:$0xee]   ;;  %v6254_v42 = vrot.slane %v8051_v34, 9  ;;  %v1917_v55 = vsel %vm8877_vm11, %v6255_v45, %v1916_v46 }
  0x93   : > { %7169 = vmatprep.subr.bf16.mxu0 %v8018_v15  ;;  %7570 = vmatpush3.bf16.msra.mxu1 %v8006_v4  ;;  %v1108_v60 = vrot.slane %v1106_v49, 5  ;;  %v8017_v4 = vld [vmem:[#allocation2 + $0x10] ss:$24 sps:$4 sm:$0xff]   ;;  %v6256_v47 = vrot.slane %v8054_v39, 9  ;;  %v6227_v49 = vcombine.low %v1784_v44, %v1784_v44  ;;  %v1924_v57 = vrot.slane %v6229_v50, 5  ;;  %v8089_v35 = vld [vmem:[%s9599_s3 + $0x2a0] sm:$0xff]  }
  0x94   : > { %7571 = vmatprep.subr.bf16.mxu1 %v8013_v14  ;;  %v8028_v15 = vld [vmem:[%s9599_s3 + $0x210] sm:$0xff]   ;;  %v1913_v51 = vsel %vm8877_vm11, %v6254_v42, %v1912_v43  ;;  %v8083_v34 = vld [vmem:[#allocation2 + $0x60] ss:$8 sps:$4 sm:$0xee]  }
  0x95   : > { %v1109_v3 = vsel %vm8695_vm8, %v1104_v0, %v1108_v60  ;;  %v1921_v53 = vsel %vm8877_vm11, %v6256_v47, %v1920_v48  ;;  %v6257_v56 = vrot.slane %v6227_v49, 9  ;;  %v1787_v60 = vld [vmem:[#allocation2 + $0x40] sm:$0x1e]  ;;  %v6262_v39 = vrot.slane %v8083_v34, 9  ;;  %v8092_v48 = vld [vmem:[%s9599_s3 + $0x2a8] sm:$0xff]  }
  0x96   : > { %v6161_v6 = vcombine.low %v1081_v2, %v1109_v3  ;;  %v6318_v61 = vcombine.low %v1913_v51, %v1921_v53  ;;  %v6231_v0 = vcombine.low %v1787_v60, %v1787_v60  ;;  %v6233_v2 = vcombine.high %v1787_v60, %v1787_v60  ;;  %v8085_v36 = vld [vmem:[#allocation2 + $0x64] ss:$8 sps:$4 sm:$0x11]   ;;  %v8086_v37 = vld [vmem:[#allocation2 + $0x78] ss:$8 sps:$4 sm:$0xee]  }
  0x97   : > { %7572 = vmatpush3.bf16.msra.mxu1 %v8013_v14  ;;  %v8032_v14 = vld [vmem:[%s9599_s3 + $0x198] sm:$0xff]   ;;  %v1944_v40 = vrot.slane %v8085_v36, 5  ;;  %v6264_v42 = vrot.slane %v8086_v37, 9  ;;  %v8090_v44 = vld [vmem:[%s9599_s3 + $0x2e0] sm:$0xff]  }
  0x98   : > { %7581 = vmatprep.subr.bf16.mxu1 %v8019_v41  ;;  %1682 = vmatmul.mubr.bf16.vlgmr.msra.gmra.mrb[16].mxu0 %v8016_v62  ;;  %v6319_v62 = vcombine.high %v1913_v51, %v1921_v53  ;;  %v8091_v46 = vld [vmem:[%s9599_s3 + $0x260] sm:$0xff]   ;;  %v8093_v51 = vld [vmem:[%s9599_s3 + $0x2e8] sm:$0xff]   ;;  %v8095_v53 = vld [vmem:[#allocation2 + $0x90] ss:$8 sps:$4 sm:$0xee]  }
  0x99   : > { %7170 = vmatpush3.bf16.msra.mxu0 %v8021_v63  ;;  %7554 = vmatmul.mubr.bf16.gmra.mrb[4].mxu1 %v6161_v6  ;;  %v1790_v63 = vld [vmem:[#allocation2 + $0x58] sm:$0x1e]  ;;  %v1945_v45 = vsel %vm8877_vm11, %v6262_v39, %v1944_v40  ;;  %v8117_v36 = vld [vmem:[#allocation2 + $0x28] ss:$24 sps:$4 sm:$0xff]  }
  0x9a   : > { %7171 = vmatprep.subr.bf16.mxu0 %v8022_v1  ;;  %7573 = vmatprep.mubr.bf16.mxu1 %v8017_v4  ;;  %v1925_v1 = vsel %vm8877_vm11, %v6257_v56, %v1924_v57  ;;  %v6235_v3 = vcombine.low %v1790_v63, %v1790_v63  ;;  %v6237_v4 = vcombine.high %v1790_v63, %v1790_v63  ;;  %v8098_v56 = vld [vmem:[#allocation2 + $0xa8] ss:$8 sps:$4 sm:$0xee]   ;;  %v8100_v57 = vld [vmem:[#allocation2 + $0xac] ss:$8 sps:$4 sm:$0x11]  }
  0x9b   : > { %1689 = vmatprep.mubr.bf16.mxu0 %v8025_v8  ;;  %v6320_v6 = vcombine.low %v1917_v55, %v1925_v1  ;;  %v8068_v8 = vld [vmem:[%s9599_s3 + $0x288] sm:$0xff]   ;;  %v8097_v55 = vld [vmem:[#allocation2 + $0x94] ss:$8 sps:$4 sm:$0x11]   ;;  %v6268_v63 = vrot.slane %v8098_v56, 9  ;;  %v8118_v37 = vld [vmem:[%s9599_s3 + $0x340] sm:$0xff]  }
  0x9c   : > { %v1960_v60 = vrot.slane %v8097_v55, 5  ;;  %v8116_v34 = vld [vmem:[#allocation2 + $0x18] ss:$24 sps:$4 sm:$0xff]   ;;  %v8121_v40 = vld [vmem:[%s9599_s3 + $0x300] sm:$0xff]  }
  0x9d   : > { %7172 = vmatpush3.bf16.msra.mxu0 %v8024_v5  ;;  %v8067_v5 = vld [vmem:[%s9599_s3 + $0x240] sm:$0xff]   ;;  %v8120_v39 = vld [vmem:[#allocation2 + $0x58] ss:$24 sps:$4 sm:$0xff]  }
  0x9e   : > { %7173 = vmatprep.subr.bf16.mxu0 %v8027_v7  ;;  %v6259_v7 = vrot.slane %v6231_v0, 9  ;;  %v1968_v0 = vrot.slane %v8100_v57, 5  ;;  %v8134_v55 = vld [vmem:[#allocation2 + $0x78] ss:$24 sps:$4 sm:$0xff]   ;;  %v8135_v56 = vld [vmem:[%s9599_s3 + $0x360] sm:$0xff]  }
  0x9f   : > { %v8136_v57 = vld [vmem:[%s9599_s3 + $0x3a0] sm:$0xff]  }
  0xa0   : > { %1690 = vmatmul.mubr.bf16.gmra.mrb[20].mxu0 %v8026_v9  ;;  %v1932_v9 = vrot.slane %v6233_v2, 5 }
  0xa1   : > { %7174 = vmatpush3.bf16.msra.mxu0 %v8029_v11  ;;  %7574 = vmatmul.mubr.bf16.vlgmr.msra.gmra.mrb[0].mxu1 %v8020_v10  ;;  %v6261_v10 = vrot.slane %v6235_v3, 9  ;;  %v1940_v11 = vrot.slane %v6237_v4, 5 }
  0xa2   : > { %7175 = vmatprep.subr.bf16.mxu0 %v8030_v12  ;;  %7582 = vmatpush3.bf16.msra.mxu1 %v8019_v41  ;;  %v8070_v12 = vld [vmem:[%s9599_s3 + $0x248] sm:$0xff]  }
  0xa3   : > { %7583 = vmatprep.subr.bf16.mxu1 %v8023_v13  ;;  %1697 = vmatprep.mubr.bf16.mxu0 %v8033_v59 }
  0xa4   : > { %7577 = vmatprep.mubr.bf16.mxu1 %v8043_v25 }
  0xa5   : > { %7176 = vmatpush3.bf16.msra.mxu0 %v8032_v14  ;;  %v1933_v14 = vsel %vm8877_vm11, %v6259_v7, %v1932_v9  ;;  %v1969_v7 = vsel %vm8877_vm11, %v6268_v63, %v1968_v0  ;;  %v8141_v63 = vld [vmem:[#allocation2 + $0xb0] ss:$24 sps:$4 sm:$0xff]  }
  0xa6   : > { %7177 = vmatprep.subr.bf16.mxu0 %v8035_v17  ;;  %7584 = vmatpush3.bf16.msra.mxu1 %v8023_v13  ;;  %v8069_v13 = vld [vmem:[%s9599_s3 + $0x2c8] sm:$0xff]   ;;  %v8073_v17 = vld [vmem:[#allocation2 + $0x34] ss:$8 sps:$4 sm:$0x11]  }
  0xa7   : > { %7585 = vmatprep.subr.bf16.mxu1 %v8028_v15  ;;  %v8142_v0 = vld [vmem:[#allocation2 + $0xa8] ss:$24 sps:$4 sm:$0xff]  }
  0xa8   : > { %1698 = vmatmul.mubr.bf16.gmra.mrb[24].mxu0 %v8034_v16  ;;  %v8071_v16 = vld [vmem:[#allocation2 + $0x30] ss:$8 sps:$4 sm:$0xee]  }
  0xa9   : > { %7178 = vmatpush3.bf16.msra.mxu0 %v8037_v18  ;;  %1705 = vmatprep.mubr.bf16.mxu0 %v8041_v23  ;;  %v8074_v18 = vld [vmem:[#allocation2 + $0x48] ss:$8 sps:$4 sm:$0xee]  }
  0xaa   : > { %7179 = vmatprep.subr.bf16.mxu0 %v8038_v19  ;;  %7586 = vmatpush3.bf16.msra.mxu1 %v8028_v15  ;;  %v1941_v15 = vsel %vm8877_vm11, %v6261_v10, %v1940_v11  ;;  %v8076_v19 = vld [vmem:[#allocation2 + $0x4c] ss:$8 sps:$4 sm:$0x11]   ;;  %v1799_v11 = vld [vmem:[#allocation2 + $0xa0] sm:$0x1e] }
  0xab   : > { %7587 = vmatprep.subr.bf16.mxu1 %v8031_v20  ;;  %7578 = vmatmul.mubr.bf16.gmra.mrb[4].mxu1 %v8046_v28  ;;  %v6323_v59 = vcombine.low %v1933_v14, %v1941_v15  ;;  %v8078_v23 = vld [vmem:[%s9599_s3 + $0x2d0] sm:$0xff]   ;;  %v1936_v25 = vrot.slane %v8076_v19, 5  ;;  %v6249_v19 = vcombine.high %v1799_v11, %v1799_v11 }
  0xac   : > { %7597 = vmatprep.mubr.bf16.mxu1 %v6320_v6  ;;  %v8105_v6 = vld [vmem:[%s9599_s3 + $0x2b0] sm:$0xff]  }
  0xad   : > { %7180 = vmatpush3.bf16.msra.mxu0 %v8040_v21  ;;  %v1928_v21 = vrot.slane %v8073_v17, 5  ;;  %v8106_v10 = vld [vmem:[%s9599_s3 + $0x2f0] sm:$0xff]  }
  0xae   : > { %7588 = vmatpush3.bf16.msra.mxu1 %v8031_v20  ;;  %7181 = vmatprep.subr.bf16.mxu0 %v8044_v26  ;;  %v6258_v20 = vrot.slane %v8071_v16, 9  ;;  %v1802_v16 = vld [vmem:[#allocation2 + $0xb8] sm:$0x1e] }
  0xaf   : > { %7589 = vmatprep.subr.bf16.mxu1 %v8036_v22 }
  0xb0   : > { %1706 = vmatmul.mubr.bf16.gmra.mrb[28].mxu0 %v8042_v24  ;;  %v6260_v24 = vrot.slane %v8074_v18, 9  ;;  %v1929_v26 = vsel %vm8877_vm11, %v6258_v20, %v1928_v21  ;;  %v6247_v18 = vcombine.low %v1799_v11, %v1799_v11  ;;  %v6251_v20 = vcombine.low %v1802_v16, %v1802_v16  ;;  %v8161_v11 = vld [vmem:[%s9599_s3 + $0x400] sm:$0xff]  }
  0xb1   : > { %7182 = vmatpush3.bf16.msra.mxu0 %v8047_v29  ;;  %2247 = vmatprep.mubr.bf16.mxu0 %v6319_v62  ;;  %v8080_v29 = vld [vmem:[%s9599_s3 + $0x298] sm:$0xff]   ;;  %v1796_v62 = vld [vmem:[#allocation2 + $0x88] sm:$0x1e] }
  0xb2   : > { %7590 = vmatpush3.bf16.msra.mxu1 %v8036_v22  ;;  %7183 = vmatprep.subr.bf16.mxu0 %v8048_v30  ;;  %v8077_v22 = vld [vmem:[%s9599_s3 + $0x290] sm:$0xff]   ;;  %v1937_v28 = vsel %vm8877_vm11, %v6260_v24, %v1936_v25  ;;  %v6243_v4 = vcombine.low %v1796_v62, %v1796_v62  ;;  %v6267_v25 = vrot.slane %v6247_v18, 9 }
  0xb3   : > { %7591 = vmatprep.subr.bf16.mxu1 %v8039_v27  ;;  %v6322_v30 = vcombine.high %v1929_v26, %v1937_v28 }
  0xb4   : > { %v6265_v15 = vrot.slane %v6243_v4, 9  ;;  %v8146_v4 = vld [vmem:[#allocation2 + $0xb8] ss:$24 sps:$4 sm:$0xff]  }
  0xb5   : > { %7184 = vmatpush3.bf16.msra.mxu0 %v8050_v32  ;;  %v8081_v32 = vld [vmem:[%s9599_s3 + $0x2d8] sm:$0xff]  }
  0xb6   : > { %7592 = vmatpush3.bf16.msra.mxu1 %v8039_v27  ;;  %7221 = vmatprep.subr.bf16.mxu0 %v8061_v52  ;;  %v8079_v27 = vld [vmem:[%s9599_s3 + $0x250] sm:$0xff]   ;;  %v8094_v52 = vld [vmem:[%s9599_s3 + $0x268] sm:$0xff]  }
  0xb7   : > { %7593 = vmatprep.subr.bf16.mxu1 %v8045_v31 }
  0xb8   : > { %2248 = vmatmul.mubr.bf16.vlgmr.msra.gmra.mrb[32].mxu0 %v6318_v61  ;;  %v1793_v61 = vld [vmem:[#allocation2 + $0x70] sm:$0x1e] }
  0xb9   : > { %7222 = vmatpush3.bf16.msra.mxu0 %v8067_v5  ;;  %2255 = vmatprep.mubr.bf16.mxu0 %v6322_v30  ;;  %v6239_v1 = vcombine.low %v1793_v61, %v1793_v61  ;;  %v6241_v2 = vcombine.high %v1793_v61, %v1793_v61  ;;  %v6245_v5 = vcombine.high %v1796_v62, %v1796_v62  ;;  %v8114_v30 = vld [vmem:[%s9599_s3 + $0x278] sm:$0xff]   ;;  %v8139_v61 = vld [vmem:[%s9599_s3 + $0x3a8] sm:$0xff]  }
  0xba   : > { %7594 = vmatpush3.bf16.msra.mxu1 %v8045_v31  ;;  %7223 = vmatprep.subr.bf16.mxu0 %v8068_v8  ;;  %v6321_v31 = vcombine.low %v1929_v26, %v1937_v28  ;;  %v1964_v26 = vrot.slane %v6249_v19, 5  ;;  %v8113_v28 = vld [vmem:[%s9599_s3 + $0x2f8] sm:$0xff]   ;;  %v8140_v62 = vld [vmem:[%s9599_s3 + $0x328] sm:$0xff]  }
  0xbb   : > { %7595 = vmatprep.subr.bf16.mxu1 %v8049_v38  ;;  %v6263_v8 = vrot.slane %v6239_v1, 9  ;;  %v1948_v9 = vrot.slane %v6241_v2, 5  ;;  %v8143_v1 = vld [vmem:[#allocation2 + $0x88] ss:$24 sps:$4 sm:$0xff]   ;;  %v8144_v2 = vld [vmem:[%s9599_s3 + $0x370] sm:$0xff]  }
  0xbd   : > { %7224 = vmatpush3.bf16.msra.mxu0 %v8070_v12  ;;  %v8111_v12 = vld [vmem:[%s9599_s3 + $0x270] sm:$0xff]   ;;  %v1949_v17 = vsel %vm8877_vm11, %v6263_v8, %v1948_v9  ;;  %v8150_v8 = vld [vmem:[%s9599_s3 + $0x338] sm:$0xff]  }
  0xbe   : > { %7596 = vmatpush3.bf16.msra.mxu1 %v8049_v38  ;;  %7225 = vmatprep.subr.bf16.mxu0 %v8077_v22  ;;  %v8088_v38 = vld [vmem:[#allocation2 + $0x7c] ss:$8 sps:$4 sm:$0x11]   ;;  %v6253_v22 = vcombine.high %v1802_v16, %v1802_v16  ;;  %v8151_v9 = vld [vmem:[#allocation2 + $0x18] ss:$8 sps:$4 sm:$0xff]  }
  0xbf   : > { %7605 = vmatprep.subr.bf16.mxu1 %v8062_v58  ;;  %v1952_v43 = vrot.slane %v8088_v38, 5  ;;  %v8119_v38 = vld [vmem:[%s9599_s3 + $0x380] sm:$0xff]  }
  0xc0   : > { %2256 = vmatmul.mubr.bf16.gmra.mrb[36].mxu0 %v6321_v31  ;;  %v1965_v31 = vsel %vm8877_vm11, %v6267_v25, %v1964_v26 }
  0xc1   : > { %7598 = vmatmul.mubr.bf16.vlgmr.msra.gmra.mrb[0].mxu1 %v6323_v59  ;;  %7226 = vmatpush3.bf16.msra.mxu0 %v8079_v27  ;;  %v1953_v47 = vsel %vm8877_vm11, %v6264_v42, %v1952_v43  ;;  %v1956_v59 = vrot.slane %v6245_v5, 5  ;;  %v6269_v27 = vrot.slane %v6251_v20, 9  ;;  %v8122_v42 = vld [vmem:[%s9599_s3 + $0x348] sm:$0xff]   ;;  %v8147_v5 = vld [vmem:[%s9599_s3 + $0x330] sm:$0xff]  }
  0xc2   : > { %7606 = vmatpush3.bf16.msra.mxu1 %v8062_v58  ;;  %7227 = vmatprep.subr.bf16.mxu0 %v8080_v29  ;;  %v6325_v49 = vcombine.high %v1945_v45, %v1953_v47  ;;  %v6324_v50 = vcombine.low %v1945_v45, %v1953_v47  ;;  %v6266_v58 = vrot.slane %v8095_v53, 9  ;;  %v1972_v29 = vrot.slane %v6253_v22, 5  ;;  %v8123_v43 = vld [vmem:[%s9599_s3 + $0x388] sm:$0xff]   ;;  %v8127_v47 = vld [vmem:[%s9599_s3 + $0x350] sm:$0xff]   ;;  %v8133_v53 = vld [vmem:[#allocation2 + $0x80] ss:$24 sps:$4 sm:$0xff]  }
  0xc3   : > { %7607 = vmatprep.subr.bf16.mxu1 %v8069_v13  ;;  %v1957_v21 = vsel %vm8877_vm11, %v6265_v15, %v1956_v59  ;;  %v8125_v45 = vld [vmem:[#allocation2 + $0x50] ss:$24 sps:$4 sm:$0xff]   ;;  %v2910_v15 = vshrl.u32 %v8151_v9, 16  ;;  %v2913_v59 = vshll.u32 %v8151_v9, 16 }
  0xc4   : > { %2263 = vmatprep.mubr.bf16.mxu0 %v6325_v49  ;;  %v1961_v3 = vsel %vm8877_vm11, %v6266_v58, %v1960_v60  ;;  %v6326_v24 = vcombine.low %v1949_v17, %v1957_v21  ;;  %v8129_v49 = vld [vmem:[%s9599_s3 + $0x310] sm:$0xff]   ;;  %v8137_v58 = vld [vmem:[%s9599_s3 + $0x320] sm:$0xff]   ;;  %v8138_v60 = vld [vmem:[%s9599_s3 + $0x368] sm:$0xff]  }
  0xc5   : > { %7228 = vmatpush3.bf16.msra.mxu0 %v8082_v33  ;;  %v6327_v14 = vcombine.low %v1961_v3, %v1969_v7  ;;  %v1973_v33 = vsel %vm8877_vm11, %v6269_v27, %v1972_v29  ;;  %v2783_v17 = vld [vmem:[#allocation2 + $0x28] sm:$0x1f]  ;;  %v2786_v21 = vld [vmem:[#allocation2 + $0x40] sm:$0x1f] }
  0xc6   : > { %7608 = vmatpush3.bf16.msra.mxu1 %v8069_v13  ;;  %7229 = vmatprep.subr.bf16.mxu0 %v8089_v35  ;;  %v6328_v13 = vcombine.high %v1961_v3, %v1969_v7  ;;  %v6329_v35 = vcombine.low %v1965_v31, %v1973_v33  ;;  %v8145_v3 = vld [vmem:[%s9599_s3 + $0x3b0] sm:$0xff]   ;;  %v8149_v7 = vld [vmem:[%s9599_s3 + $0x3b8] sm:$0xff]   ;;  %v6439_v22 = vcombine.low %v2783_v17, %v2783_v17 }
  0xc7   : > { %7609 = vmatprep.subr.bf16.mxu1 %v8078_v23  ;;  %7601 = vmatprep.mubr.bf16.mxu1 %v6326_v24  ;;  %v2915_v24 = vrot.slane %v2913_v59, 5  ;;  %v6441_v26 = vcombine.high %v2783_v17, %v2783_v17  ;;  %v8177_v17 = vld [vmem:[%s9599_s3 + $0x410] sm:$0xff]  }
  0xc8   : > { %2264 = vmatmul.mubr.bf16.gmra.mrb[40].mxu0 %v6324_v50  ;;  %v8130_v50 = vld [vmem:[%s9599_s3 + $0x358] sm:$0xff]   ;;  %v2924_v33 = vshrl.u32 %v6439_v22, 16 }
  0xc9   : > { %7230 = vmatpush3.bf16.msra.mxu0 %v8091_v46  ;;  %2271 = vmatprep.mubr.bf16.mxu0 %v6328_v13  ;;  %v8126_v46 = vld [vmem:[#allocation2 + $0x48] ss:$24 sps:$4 sm:$0xff]   ;;  %v8156_v13 = vld [vmem:[#allocation2 + $0x34] ss:$8 sps:$4 sm:$0x11]  }
  0xca   : > { %7610 = vmatpush3.bf16.msra.mxu1 %v8078_v23  ;;  %7231 = vmatprep.subr.bf16.mxu0 %v8092_v48  ;;  %v8112_v23 = vld [vmem:[%s9599_s3 + $0x2b8] sm:$0xff]   ;;  %v8128_v48 = vld [vmem:[%s9599_s3 + $0x390] sm:$0xff]   ;;  %v2947_v20 = vshll.u32 %v8156_v13, 16 }
  0xcb   : > { %7611 = vmatprep.subr.bf16.mxu1 %v8081_v32  ;;  %7602 = vmatmul.mubr.bf16.gmra.mrb[4].mxu1 %v6329_v35 }
  0xcc   : > { %7621 = vmatprep.mubr.bf16.mxu1 %v8117_v36  ;;  %v2949_v29 = vrot.slane %v2947_v20, 5  ;;  %v2933_v36 = vshll.u32 %v6441_v26, 16  ;;  %v8171_v20 = vld [vmem:[#allocation2 + $0x48] ss:$8 sps:$4 sm:$0xff]  }
  0xcd   : > { %7232 = vmatpush3.bf16.msra.mxu0 %v8094_v52  ;;  %v8132_v52 = vld [vmem:[%s9599_s3 + $0x318] sm:$0xff]   ;;  %v8179_v26 = vld [vmem:[%s9599_s3 + $0x3d0] sm:$0xff]  }
  0xce   : > { %7612 = vmatpush3.bf16.msra.mxu1 %v8081_v32  ;;  %7233 = vmatprep.subr.bf16.mxu0 %v8105_v6  ;;  %v8115_v32 = vld [vmem:[#allocation2 + $0x20] ss:$24 sps:$4 sm:$0xff]  }
  0xcf   : > { %7613 = vmatprep.subr.bf16.mxu1 %v8090_v44  ;;  %v8148_v6 = vld [vmem:[%s9599_s3 + $0x378] sm:$0xff]  }
  0xd0   : > { %2272 = vmatmul.mubr.bf16.gmra.mrb[44].mxu0 %v6327_v14  ;;  %v9063_v14 = vld [vmem:[%s9599_s3 + $0x440] sm:$0xff]  }
  0xd1   : > { %7234 = vmatpush3.bf16.msra.mxu0 %v8111_v12  ;;  %2675 = vmatprep.mubr.bf16.mxu0 %v8115_v32  ;;  %v8154_v12 = vld [vmem:[#allocation2 + $0x30] ss:$8 sps:$4 sm:$0xff]   ;;  %v6445_v32 = vcombine.high %v2786_v21, %v2786_v21 }
  0xd2   : > { %7614 = vmatpush3.bf16.msra.mxu1 %v8090_v44  ;;  %7235 = vmatprep.subr.bf16.mxu0 %v8112_v23  ;;  %v8124_v44 = vld [vmem:[%s9599_s3 + $0x308] sm:$0xff]   ;;  %v2938_v18 = vshrl.u32 %v8154_v12, 16  ;;  %v2941_v19 = vshll.u32 %v8154_v12, 16  ;;  %v2912_v23 = vrot.slane %v2910_v15, 4 }
  0xd3   : > { %7615 = vmatprep.subr.bf16.mxu1 %v8093_v51 }
  0xd4   : > { %v2940_v27 = vrot.slane %v2938_v18, 4  ;;  %v2916_v31 = vor.u32 %v2915_v24, %v2912_v23  ;;  %v8174_v24 = vld [vmem:[#allocation2 + $0x60] ss:$8 sps:$4 sm:$0xff]  }
  0xd5   : > { %7236 = vmatpush3.bf16.msra.mxu0 %v8114_v30  ;;  %v6443_v30 = vcombine.low %v2786_v21, %v2786_v21  ;;  %v8173_v21 = vld [vmem:[#allocation2 + $0x4c] ss:$8 sps:$4 sm:$0x11]  }
  0xd6   : > { %7616 = vmatpush3.bf16.msra.mxu1 %v8093_v51  ;;  %7273 = vmatprep.subr.bf16.mxu0 %v8118_v37  ;;  %v8131_v51 = vld [vmem:[%s9599_s3 + $0x398] sm:$0xff]  }
  0xd7   : > { %7617 = vmatprep.subr.bf16.mxu1 %v8106_v10  ;;  %v2952_v37 = vshrl.u32 %v6443_v30, 16 }
  0xd8   : > { %2676 = vmatmul.mubr.bf16.vlgmr.msra.gmra.mrb[48].mxu0 %v8116_v34  ;;  %v2927_v34 = vshll.u32 %v6439_v22, 16 }
  0xd9   : > { %7274 = vmatpush3.bf16.msra.mxu0 %v8121_v40  ;;  %2683 = vmatprep.mubr.bf16.mxu0 %v8125_v45  ;;  %v2917_v40 = vrot.slane %v2916_v31, 4  ;;  %v2792_v45 = vld [vmem:[#allocation2 + $0x70] sm:$0x1f] }
  0xda   : > { %7618 = vmatpush3.bf16.msra.mxu1 %v8106_v10  ;;  %7275 = vmatprep.subr.bf16.mxu0 %v8122_v42  ;;  %v8153_v10 = vld [vmem:[#allocation2 + $0x1c] ss:$8 sps:$4 sm:$0x11]   ;;  %v2926_v42 = vrot.slane %v2924_v33, 4  ;;  %v2997_v33 = vshll.u32 %v8174_v24, 16 }
  0xdb   : > { %7619 = vmatprep.subr.bf16.mxu1 %v8113_v28  ;;  %v2919_v16 = vshll.u32 %v8153_v10, 16 }
  0xdd   : > { %7276 = vmatpush3.bf16.msra.mxu0 %v8124_v44  ;;  %v2921_v25 = vrot.slane %v2919_v16, 5  ;;  %v2961_v44 = vshll.u32 %v6445_v32, 16  ;;  %v8170_v16 = vld [vmem:[%s9599_s3 + $0x3c8] sm:$0xff]   ;;  %v2994_v32 = vshrl.u32 %v8174_v24, 16  ;;  %v8212_v24 = vld [vmem:[%s9599_s3 + $0x438] sm:$0xff]  }
  0xde   : > { %7620 = vmatpush3.bf16.msra.mxu1 %v8113_v28  ;;  %7277 = vmatprep.subr.bf16.mxu0 %v8127_v47  ;;  %v2943_v28 = vrot.slane %v2941_v19, 5  ;;  %v2935_v47 = vrot.slane %v2933_v36, 5  ;;  %v8169_v36 = vld [vmem:[%s9599_s3 + $0x448] sm:$0xff]  }
  0xdf   : > { %7629 = vmatprep.subr.bf16.mxu1 %v8119_v38 }
  0xe0   : > { %2684 = vmatmul.mubr.bf16.gmra.mrb[52].mxu0 %v8126_v46  ;;  %v2944_v35 = vor.u32 %v2943_v28, %v2940_v27  ;;  %v2966_v28 = vshrl.u32 %v8171_v20, 16 }
  0xe1   : > { %7622 = vmatmul.mubr.bf16.vlgmr.msra.gmra.mrb[0].mxu1 %v8120_v39  ;;  %7278 = vmatpush3.bf16.msra.mxu0 %v8129_v49  ;;  %v2789_v39 = vld [vmem:[#allocation2 + $0x58] sm:$0x1f] }
  0xe2   : > { %7630 = vmatpush3.bf16.msra.mxu1 %v8119_v38  ;;  %7279 = vmatprep.subr.bf16.mxu0 %v8130_v50  ;;  %v2955_v38 = vshll.u32 %v6443_v30, 16  ;;  %v2945_v46 = vrot.slane %v2944_v35, 4  ;;  %v2922_v50 = vsel %vm8695_vm8, %v2917_v40, %v2921_v25  ;;  %v8176_v25 = vld [vmem:[#allocation2 + $0x64] ss:$8 sps:$4 sm:$0x11]   ;;  %v2975_v30 = vshll.u32 %v8173_v21, 16 }
  0xe3   : > { %7631 = vmatprep.subr.bf16.mxu1 %v8123_v43  ;;  %2691 = vmatprep.mubr.bf16.mxu0 %v8133_v53  ;;  %v6447_v53 = vcombine.low %v2789_v39, %v2789_v39  ;;  %v8180_v40 = vld [vmem:[%s9599_s3 + $0x418] sm:$0xff]   ;;  %v8211_v21 = vld [vmem:[%s9599_s3 + $0x3f0] sm:$0xff]  }
  0xe4   : > { %7625 = vmatprep.mubr.bf16.mxu1 %v8143_v1  ;;  %v2957_v49 = vrot.slane %v2955_v38, 5  ;;  %v8168_v1 = vld [vmem:[%s9599_s3 + $0x408] sm:$0xff]  }
  0xe5   : > { %7280 = vmatpush3.bf16.msra.mxu0 %v8132_v52  ;;  %v2963_v52 = vrot.slane %v2961_v44, 5  ;;  %v2999_v44 = vrot.slane %v2997_v33, 5 }
  0xe6   : > { %7632 = vmatpush3.bf16.msra.mxu1 %v8123_v43  ;;  %7281 = vmatprep.subr.bf16.mxu0 %v8135_v56  ;;  %v2929_v43 = vrot.slane %v2927_v34, 5  ;;  %v2950_v56 = vsel %vm8695_vm8, %v2945_v46, %v2949_v29  ;;  %v2969_v29 = vshll.u32 %v8171_v20, 16  ;;  %v3003_v34 = vshll.u32 %v8176_v25, 16  ;;  %v8182_v46 = vld [vmem:[%s9599_s3 + $0x3d8] sm:$0xff]  }
  0xe7   : > { %7633 = vmatprep.subr.bf16.mxu1 %v8128_v48 }
  0xe8   : > { %2692 = vmatmul.mubr.bf16.gmra.mrb[56].mxu0 %v8134_v55  ;;  %v8167_v55 = vld [vmem:[%s9599_s3 + $0x3c0] sm:$0xff]   ;;  %v2971_v38 = vrot.slane %v2969_v29, 5 }
  0xe9   : > { %7282 = vmatpush3.bf16.msra.mxu0 %v8137_v58  ;;  %2699 = vmatprep.mubr.bf16.mxu0 %v8141_v63  ;;  %v6449_v58 = vcombine.high %v2789_v39, %v2789_v39  ;;  %v2977_v39 = vrot.slane %v2975_v30, 5  ;;  %v8197_v30 = vld [vmem:[#allocation2 + $0xac] ss:$8 sps:$4 sm:$0x11]  }
  0xea   : > { %7634 = vmatpush3.bf16.msra.mxu1 %v8128_v48  ;;  %7283 = vmatprep.subr.bf16.mxu0 %v8138_v60  ;;  %v2954_v48 = vrot.slane %v2952_v37, 4  ;;  %v6451_v60 = vcombine.low %v2792_v45, %v2792_v45  ;;  %v2968_v37 = vrot.slane %v2966_v28, 4 }
  0xeb   : > { %7635 = vmatprep.subr.bf16.mxu1 %v8131_v51  ;;  %7626 = vmatmul.mubr.bf16.gmra.mrb[4].mxu1 %v8146_v4  ;;  %v2983_v4 = vshll.u32 %v6447_v53, 16 }
  0xed   : > { %7284 = vmatpush3.bf16.msra.mxu0 %v8140_v62  ;;  %v6519_v62 = vcombine.high %v2922_v50, %v2950_v56  ;;  %v2985_v12 = vrot.slane %v2983_v4, 5 }
  0xee   : > { %7636 = vmatpush3.bf16.msra.mxu1 %v8131_v51  ;;  %7285 = vmatprep.subr.bf16.mxu0 %v8144_v2  ;;  %v2930_v51 = vor.u32 %v2929_v43, %v2926_v42  ;;  %v2996_v43 = vrot.slane %v2994_v32, 4  ;;  %v8214_v32 = vld [vmem:[%s9599_s3 + $0x3f8] sm:$0xff]  }
  0xef   : > { %7637 = vmatprep.subr.bf16.mxu1 %v8136_v57 }
  0xf0   : > { %2700 = vmatmul.mubr.bf16.gmra.mrb[60].mxu0 %v8142_v0  ;;  %v2931_v63 = vrot.slane %v2930_v51, 4  ;;  %v6453_v0 = vcombine.high %v2792_v45, %v2792_v45  ;;  %v3005_v45 = vrot.slane %v3003_v34, 5  ;;  %v8189_v51 = vld [vmem:[%s9599_s3 + $0x420] sm:$0xff]  }
  0xf1   : > { %7286 = vmatpush3.bf16.msra.mxu0 %v8147_v5  ;;  %v2989_v5 = vshll.u32 %v6449_v58, 16  ;;  %3406 = vmatprep.mubr.bf16.mxu0 %v6519_v62  ;;  %v8185_v58 = vld [vmem:[#allocation2 + $0x7c] ss:$8 sps:$4 sm:$0x11]  }
  0xf2   : > { %7638 = vmatpush3.bf16.msra.mxu1 %v8136_v57  ;;  %7287 = vmatprep.subr.bf16.mxu0 %v8148_v6  ;;  %v2958_v57 = vor.u32 %v2957_v49, %v2954_v48  ;;  %v2936_v6 = vsel %vm8695_vm8, %v2931_v63, %v2935_v47  ;;  %v3017_v9 = vshll.u32 %v6453_v0, 16  ;;  %v2972_v48 = vor.u32 %v2971_v38, %v2968_v37  ;;  %v8188_v63 = vld [vmem:[#allocation2 + $0x94] ss:$8 sps:$4 sm:$0x11]   ;;  %v2795_v37 = vld [vmem:[#allocation2 + $0x88] sm:$0x1f] }
  0xf3   : > { %7639 = vmatprep.subr.bf16.mxu1 %v8139_v61  ;;  %v2991_v19 = vrot.slane %v2989_v5, 5  ;;  %v3000_v49 = vor.u32 %v2999_v44, %v2996_v43  ;;  %v8192_v5 = vld [vmem:[%s9599_s3 + $0x428] sm:$0xff]   ;;  %v8225_v38 = vld [vmem:[%s9599_s3 + $0x4c0] sm:$0xff]   ;;  %v6455_v43 = vcombine.low %v2795_v37, %v2795_v37  ;;  %v6457_v44 = vcombine.high %v2795_v37, %v2795_v37 }
  0xf4   : > { %v2959_v2 = vrot.slane %v2958_v57, 4  ;;  %v3019_v23 = vrot.slane %v3017_v9, 5  ;;  %v3059_v9 = vshll.u32 %v8188_v63, 16 }
  0xf5   : > { %7288 = vmatpush3.bf16.msra.mxu0 %v8150_v8  ;;  %v3011_v8 = vshll.u32 %v6451_v60, 16 }
  0xf6   : > { %7640 = vmatpush3.bf16.msra.mxu1 %v8139_v61  ;;  %7325 = vmatprep.subr.bf16.mxu0 %v8161_v11  ;;  %v6518_v61 = vcombine.low %v2922_v50, %v2950_v56  ;;  %v2964_v10 = vsel %vm8695_vm8, %v2959_v2, %v2963_v52  ;;  %v2973_v50 = vrot.slane %v2972_v48, 4  ;;  %v3001_v52 = vrot.slane %v3000_v49, 4  ;;  %v8183_v56 = vld [vmem:[#allocation2 + $0x78] ss:$8 sps:$4 sm:$0xff]  }
  0xf7   : > { %7641 = vmatprep.subr.bf16.mxu1 %v8145_v3  ;;  %v6520_v13 = vcombine.low %v2936_v6, %v2964_v10  ;;  %v3013_v59 = vrot.slane %v3011_v8, 5  ;;  %v3025_v0 = vshll.u32 %v8183_v56, 16  ;;  %v3031_v2 = vshll.u32 %v8185_v58, 16  ;;  %v8181_v6 = vld [vmem:[%s9599_s3 + $0x458] sm:$0xff]  }
  0xf8   : > { %3407 = vmatmul.mubr.bf16.vlgmr.msra.gmra.mrb[64].mxu0 %v6518_v61  ;;  %v3006_v57 = vsel %vm8695_vm8, %v3001_v52, %v3005_v45  ;;  %v8206_v45 = vld [vmem:[%s9599_s3 + $0x470] sm:$0xff]   ;;  %v3039_v58 = vshll.u32 %v6455_v43, 16 }
  0xf9   : > { %7326 = vmatpush3.bf16.msra.mxu0 %v8167_v55  ;;  %7645 = vmatprep.mubr.bf16.mxu1 %v6520_v13  ;;  %v2978_v55 = vsel %vm8695_vm8, %v2973_v50, %v2977_v39  ;;  %v3027_v8 = vrot.slane %v3025_v0, 5  ;;  %v8205_v13 = vld [vmem:[%s9599_s3 + $0x430] sm:$0xff]   ;;  %v3087_v39 = vshll.u32 %v8197_v30, 16  ;;  %v8215_v30 = vld [vmem:[#allocation2 + $0x18] ss:$8 sps:$4 sm:$0xee]  }
  0xfa   : > { %7642 = vmatpush3.bf16.msra.mxu1 %v8145_v3  ;;  %v2980_v3 = vshrl.u32 %v6447_v53, 16  ;;  %7327 = vmatprep.subr.bf16.mxu0 %v8168_v1  ;;  %v8178_v53 = vld [vmem:[%s9599_s3 + $0x450] sm:$0xff]   ;;  %v6522_v61 = vcombine.high %v2978_v55, %v3006_v57  ;;  %v6521_v62 = vcombine.low %v2978_v55, %v3006_v57  ;;  %v8191_v1 = vld [vmem:[%s9599_s3 + $0x3e0] sm:$0xff]   ;;  %v3036_v57 = vshrl.u32 %v6455_v43, 16 }
  0xfb   : > { %7643 = vmatprep.subr.bf16.mxu1 %v8149_v7  ;;  %v3089_v50 = vrot.slane %v3087_v39, 5  ;;  %v2804_v0 = vld [vmem:[#allocation2 + $0xd0] sm:$0x1f]  ;;  %v6586_v39 = vrot.slane %v8215_v30, 9 }
  0xfc   : > { %v2982_v11 = vrot.slane %v2980_v3, 4  ;;  %3414 = vmatprep.mubr.bf16.mxu0 %v6522_v61  ;;  %v3045_v61 = vshll.u32 %v6457_v44, 16  ;;  %v8220_v43 = vld [vmem:[#allocation2 + $0x34] ss:$8 sps:$4 sm:$0x11]  }
  0xfd   : > { %7328 = vmatpush3.bf16.msra.mxu0 %v8170_v16  ;;  %v3061_v16 = vrot.slane %v3059_v9, 5  ;;  %v8238_v30 = vld [vmem:[#allocation2 + $0x60] ss:$8 sps:$4 sm:$0xee]  }
  0xfe   : > { %7644 = vmatpush3.bf16.msra.mxu1 %v8149_v7  ;;  %v3008_v7 = vshrl.u32 %v6451_v60, 16  ;;  %v2986_v18 = vor.u32 %v2985_v12, %v2982_v11  ;;  %7329 = vmatprep.subr.bf16.mxu0 %v8177_v17  ;;  %v8186_v60 = vld [vmem:[#allocation2 + $0x90] ss:$8 sps:$4 sm:$0xff]   ;;  %v8194_v12 = vld [vmem:[%s9599_s3 + $0x3e8] sm:$0xff]  }
  0xff   : > { %7653 = vmatprep.subr.bf16.mxu1 %v9063_v14  ;;  %v3050_v3 = vshrl.u32 %v8186_v60, 16  ;;  %v3053_v4 = vshll.u32 %v8186_v60, 16  ;;  %v2801_v60 = vld [vmem:[#allocation2 + $0xb8] sm:$0x1f] }
 0x100   : > { %v3010_v15 = vrot.slane %v3008_v7, 4  ;;  %v2987_v27 = vrot.slane %v2986_v18, 4  ;;  %3415 = vmatmul.mubr.bf16.gmra.mrb[68].mxu0 %v6521_v62 }
 0x101   : > { %7330 = vmatpush3.bf16.msra.mxu0 %v8179_v26  ;;  %v3052_v10 = vrot.slane %v3050_v3, 4  ;;  %v3055_v11 = vrot.slane %v3053_v4, 5  ;;  %v8195_v26 = vld [vmem:[#allocation2 + $0xa8] ss:$8 sps:$4 sm:$0xff]   ;;  %v3038_v4 = vrot.slane %v3036_v57, 4 }
 0x102   : > { %v3014_v22 = vor.u32 %v3013_v59, %v3010_v15  ;;  %v2992_v35 = vsel %vm8695_vm8, %v2987_v27, %v2991_v19  ;;  %7331 = vmatprep.subr.bf16.mxu0 %v8180_v40  ;;  %v3033_v59 = vrot.slane %v3031_v2, 5  ;;  %v8190_v19 = vld [vmem:[%s9599_s3 + $0x460] sm:$0xff]   ;;  %v3078_v33 = vshrl.u32 %v8195_v26, 16 }
 0x103   : > { %v3056_v17 = vor.u32 %v3055_v11, %v3052_v10  ;;  %v8198_v27 = vld [vmem:[#allocation2 + $0xc0] ss:$8 sps:$4 sm:$0xff]   ;;  %v3081_v34 = vshll.u32 %v8195_v26, 16 }
 0x104   : > { %v3015_v31 = vrot.slane %v3014_v22, 4 }
 0x105   : > { %7332 = vmatpush3.bf16.msra.mxu0 %v8182_v46  ;;  %v3057_v20 = vrot.slane %v3056_v17, 4  ;;  %v3080_v46 = vrot.slane %v3078_v33, 4  ;;  %v6465_v17 = vcombine.high %v2801_v60, %v2801_v60 }
 0x106   : > { %v3020_v42 = vsel %vm8695_vm8, %v3015_v31, %v3019_v23  ;;  %7333 = vmatprep.subr.bf16.mxu0 %v8189_v51  ;;  %v8193_v23 = vld [vmem:[%s9599_s3 + $0x468] sm:$0xff]  }
 0x107   : > { %v6523_v47 = vcombine.low %v2992_v35, %v3020_v42  ;;  %v3062_v25 = vsel %vm8695_vm8, %v3057_v20, %v3061_v16  ;;  %v8200_v31 = vld [vmem:[#allocation2 + $0xc4] ss:$8 sps:$4 sm:$0x11]   ;;  %v3106_v35 = vshrl.u32 %v8198_v27, 16  ;;  %v6469_v20 = vcombine.high %v2804_v0, %v2804_v0 }
 0x108   : > { %v3115_v40 = vshll.u32 %v8200_v31, 16  ;;  %v2798_v42 = vld [vmem:[#allocation2 + $0xa0] sm:$0x1f] }
 0x109   : > { %7646 = vmatmul.mubr.bf16.vlgmr.msra.gmra.mrb[0].mxu1 %v6523_v47  ;;  %7334 = vmatpush3.bf16.msra.mxu0 %v8191_v1  ;;  %v3083_v47 = vrot.slane %v3081_v34, 5  ;;  %v3108_v48 = vrot.slane %v3106_v35, 4  ;;  %v6459_v52 = vcombine.low %v2798_v42, %v2798_v42  ;;  %v8213_v1 = vld [vmem:[%s9599_s3 + $0x478] sm:$0xff]   ;;  %v3129_v33 = vshll.u32 %v6469_v20, 16 }
 0x10a   : > { %7654 = vmatpush3.bf16.msra.mxu1 %v9063_v14  ;;  %v3022_v14 = vshrl.u32 %v8183_v56, 16  ;;  %7335 = vmatprep.subr.bf16.mxu0 %v8192_v5  ;;  %v3117_v51 = vrot.slane %v3115_v40, 5  ;;  %v3041_v5 = vrot.slane %v3039_v58, 5  ;;  %v8217_v34 = vld [vmem:[#allocation2 + $0x1c] ss:$8 sps:$4 sm:$0x11]  }
 0x10b   : > { %7655 = vmatprep.subr.bf16.mxu1 %v8169_v36  ;;  %v3084_v55 = vor.u32 %v3083_v47, %v3080_v46  ;;  %v3064_v62 = vshrl.u32 %v6459_v52, 16  ;;  %v3067_v63 = vshll.u32 %v6459_v52, 16  ;;  %v3642_v44 = vrot.slane %v8217_v34, 5 }
 0x10c   : > { %v3024_v7 = vrot.slane %v3022_v14, 4  ;;  %v3131_v46 = vrot.slane %v3129_v33, 5  ;;  %v3650_v52 = vrot.slane %v8220_v43, 5 }
 0x10d   : > { %7336 = vmatpush3.bf16.msra.mxu0 %v8194_v12  ;;  %v3085_v2 = vrot.slane %v3084_v55, 4  ;;  %v3042_v12 = vor.u32 %v3041_v5, %v3038_v4  ;;  %v8232_v5 = vld [vmem:[%s9599_s3 + $0x4c8] sm:$0xff]  }
 0x10e   : > { %7656 = vmatpush3.bf16.msra.mxu1 %v8169_v36  ;;  %v3028_v15 = vor.u32 %v3027_v8, %v3024_v7  ;;  %7337 = vmatprep.subr.bf16.mxu0 %v8205_v13  ;;  %v3109_v36 = vshll.u32 %v8198_v27, 16  ;;  %v3066_v7 = vrot.slane %v3064_v62, 4  ;;  %v3069_v8 = vrot.slane %v3067_v63, 5  ;;  %v3520_v63 = vld [vmem:[#allocation2 + $0x58] sm:$0x1e] }
 0x10f   : > { %7657 = vmatprep.subr.bf16.mxu1 %v8178_v53  ;;  %v3090_v10 = vsel %vm8695_vm8, %v3085_v2, %v3089_v50  ;;  %v6463_v13 = vcombine.low %v2801_v60, %v2801_v60 }
 0x110   : > { %v3029_v18 = vrot.slane %v3028_v15, 4  ;;  %v3111_v49 = vrot.slane %v3109_v36, 5  ;;  %v3070_v16 = vor.u32 %v3069_v8, %v3066_v7 }
 0x111   : > { %7338 = vmatpush3.bf16.msra.mxu0 %v8211_v21  ;;  %v3092_v21 = vshrl.u32 %v6463_v13, 16 }
 0x112   : > { %7658 = vmatpush3.bf16.msra.mxu1 %v8178_v53  ;;  %v3034_v22 = vsel %vm8695_vm8, %v3029_v18, %v3033_v59  ;;  %v6461_v53 = vcombine.high %v2798_v42, %v2798_v42  ;;  %7339 = vmatprep.subr.bf16.mxu0 %v8212_v24  ;;  %v3112_v56 = vor.u32 %v3111_v49, %v3108_v48  ;;  %v3043_v18 = vrot.slane %v3042_v12, 4  ;;  %v3514_v48 = vld [vmem:[#allocation2 + $0x28] sm:$0x1e]  ;;  %v3517_v49 = vld [vmem:[#allocation2 + $0x40] sm:$0x1e] }
 0x113   : > { %7659 = vmatprep.subr.bf16.mxu1 %v8181_v6  ;;  %v6525_v28 = vcombine.high %v3034_v22, %v3062_v25  ;;  %v6524_v29 = vcombine.low %v3034_v22, %v3062_v25  ;;  %v3071_v22 = vrot.slane %v3070_v16, 4  ;;  %v3101_v24 = vshll.u32 %v6465_v17, 16  ;;  %v9163_v25 = vld [vmem:[%s9599_s3 + $0x500] sm:$0xff]   ;;  %v8234_v16 = vld [vmem:[%s9599_s3 + $0x488] sm:$0xff]  }
 0x114   : > { %v3073_v14 = vshll.u32 %v6461_v53, 16  ;;  %v3113_v3 = vrot.slane %v3112_v56, 4  ;;  %v3094_v27 = vrot.slane %v3092_v21, 4  ;;  %v6555_v53 = vcombine.low %v3514_v48, %v3514_v48  ;;  %v8241_v21 = vld [vmem:[%s9599_s3 + $0x4d0] sm:$0xff]  }
 0x115   : > { %3422 = vmatprep.mubr.bf16.mxu0 %v6525_v28  ;;  %7340 = vmatpush3.bf16.msra.mxu0 %v8214_v32  ;;  %v3103_v42 = vrot.slane %v3101_v24, 5  ;;  %v6557_v56 = vcombine.high %v3514_v48, %v3514_v48  ;;  %v6559_v57 = vcombine.low %v3517_v49, %v3517_v49  ;;  %v6561_v58 = vcombine.high %v3517_v49, %v3517_v49  ;;  %v8235_v24 = vld [vmem:[#allocation2 + $0x48] ss:$8 sps:$4 sm:$0xee]   ;;  %v8253_v48 = vld [vmem:[%s9599_s3 + $0x4e0] sm:$0xff]  }
 0x116   : > { %7660 = vmatpush3.bf16.msra.mxu1 %v8181_v6  ;;  %3423 = vmatmul.mubr.bf16.gmra.mrb[72].mxu0 %v6524_v29  ;;  %v3047_v6 = vrot.slane %v3045_v61, 5  ;;  %v3075_v9 = vrot.slane %v3073_v14, 5  ;;  %v3118_v11 = vsel %vm8695_vm8, %v3113_v3, %v3117_v51  ;;  %v3643_v51 = vsel %vm8877_vm11, %v6586_v39, %v3642_v44  ;;  %v3523_v14 = vld [vmem:[#allocation2 + $0x70] sm:$0x1e]  ;;  %v8246_v44 = vld [vmem:[%s9599_s3 + $0x498] sm:$0xff]  }
 0x117   : > { %7661 = vmatprep.subr.bf16.mxu1 %v8190_v19  ;;  %7377 = vmatprep.subr.bf16.mxu0 %v8225_v38  ;;  %v6528_v15 = vcombine.high %v3090_v10, %v3118_v11  ;;  %v6527_v59 = vcombine.low %v3090_v10, %v3118_v11  ;;  %v8218_v38 = vld [vmem:[#allocation2 + $0x30] ss:$8 sps:$4 sm:$0xee]   ;;  %v6587_v62 = vrot.slane %v6555_v53, 9  ;;  %v3646_v4 = vrot.slane %v6557_v56, 5 }
 0x118   : > { %v3048_v26 = vsel %vm8695_vm8, %v3043_v18, %v3047_v6  ;;  %v3076_v31 = vsel %vm8695_vm8, %v3071_v22, %v3075_v9  ;;  %v6588_v47 = vrot.slane %v8218_v38, 9  ;;  %v6589_v7 = vrot.slane %v6559_v57, 9  ;;  %v8242_v39 = vld [vmem:[%s9599_s3 + $0x510] sm:$0xff]   ;;  %v8249_v49 = vld [vmem:[#allocation2 + $0x7c] ss:$8 sps:$4 sm:$0x11]  }
 0x119   : > { %3430 = vmatprep.mubr.bf16.mxu0 %v6528_v15  ;;  %v6526_v35 = vcombine.low %v3048_v26, %v3076_v31  ;;  %v3654_v8 = vrot.slane %v6561_v58, 5  ;;  %v6563_v9 = vcombine.low %v3520_v63, %v3520_v63  ;;  %v3647_v10 = vsel %vm8877_vm11, %v6587_v62, %v3646_v4  ;;  %v8237_v26 = vld [vmem:[#allocation2 + $0x4c] ss:$8 sps:$4 sm:$0x11]   ;;  %v8255_v58 = vld [vmem:[%s9599_s3 + $0x4a0] sm:$0xff]  }
 0x11a   : > { %7662 = vmatpush3.bf16.msra.mxu1 %v8190_v19  ;;  %v6467_v19 = vcombine.low %v2804_v0, %v2804_v0  ;;  %v3651_v61 = vsel %vm8877_vm11, %v6588_v47, %v3650_v52  ;;  %v8231_v0 = vld [vmem:[%s9599_s3 + $0x480] sm:$0xff]   ;;  %v6565_v11 = vcombine.high %v3520_v63, %v3520_v63  ;;  %v6567_v12 = vcombine.low %v3523_v14, %v3523_v14  ;;  %v8256_v62 = vld [vmem:[%s9599_s3 + $0x4e8] sm:$0xff]  }
 0x11b   : > { %7663 = vmatprep.subr.bf16.mxu1 %v8193_v23  ;;  %7649 = vmatprep.mubr.bf16.mxu1 %v6526_v35  ;;  %v6650_v2 = vcombine.low %v3643_v51, %v3651_v61  ;;  %v6651_v3 = vcombine.high %v3643_v51, %v3651_v61  ;;  %v3655_v15 = vsel %vm8877_vm11, %v6589_v7, %v3654_v8  ;;  %v8240_v31 = vld [vmem:[#allocation2 + $0x64] ss:$8 sps:$4 sm:$0x11]   ;;  %v6590_v33 = vrot.slane %v8235_v24, 9 }
 0x11c   : > { %v3120_v28 = vshrl.u32 %v6467_v19, 16  ;;  %v3123_v29 = vshll.u32 %v6467_v19, 16  ;;  %v6652_v17 = vcombine.low %v3647_v10, %v3655_v15  ;;  %v3662_v18 = vrot.slane %v6565_v11, 5  ;;  %v8247_v47 = vld [vmem:[#allocation2 + $0x78] ss:$8 sps:$4 sm:$0xee]  }
 0x11d   : > { %v6593_v19 = vrot.slane %v6567_v12, 9  ;;  %v3658_v34 = vrot.slane %v8237_v26, 5  ;;  %v6592_v35 = vrot.slane %v8238_v30, 9  ;;  %v8252_v51 = vld [vmem:[#allocation2 + $0x94] ss:$8 sps:$4 sm:$0x11]  }
 0x11e   : > { %7664 = vmatpush3.bf16.msra.mxu1 %v8193_v23  ;;  %v3095_v23 = vshll.u32 %v6463_v13, 16  ;;  %3431 = vmatmul.mubr.bf16.gmra.mrb[76].mxu0 %v6527_v59  ;;  %v3122_v36 = vrot.slane %v3120_v28, 4  ;;  %v3125_v37 = vrot.slane %v3123_v29, 5  ;;  %v6569_v13 = vcombine.high %v3523_v14, %v3523_v14  ;;  %v8233_v29 = vld [vmem:[%s9599_s3 + $0x508] sm:$0xff]   ;;  %v3532_v30 = vld [vmem:[#allocation2 + $0xb8] sm:$0x1e] }
 0x11f   : > { %7665 = vmatprep.subr.bf16.mxu1 %v8206_v45  ;;  %3977 = vmatprep.mubr.bf16.mxu0 %v6651_v3  ;;  %v6591_v59 = vrot.slane %v6563_v9, 9  ;;  %v6594_v52 = vrot.slane %v8247_v47, 9  ;;  %v3674_v53 = vrot.slane %v8249_v49, 5  ;;  %v3682_v56 = vrot.slane %v8252_v51, 5  ;;  %v8258_v4 = vld [vmem:[%s9599_s3 + $0x4a8] sm:$0xff]  }
 0x120   : > { %v3097_v32 = vrot.slane %v3095_v23, 5  ;;  %v3670_v20 = vrot.slane %v6569_v13, 5  ;;  %v8259_v8 = vld [vmem:[#allocation2 + $0xa8] ss:$8 sps:$4 sm:$0xee]  }
 0x121   : > { %v3663_v22 = vsel %vm8877_vm11, %v6591_v59, %v3662_v18  ;;  %v3675_v57 = vsel %vm8877_vm11, %v6594_v52, %v3674_v53  ;;  %v8261_v9 = vld [vmem:[#allocation2 + $0xac] ss:$8 sps:$4 sm:$0x11]   ;;  %v8262_v10 = vld [vmem:[#allocation2 + $0xc0] ss:$8 sps:$4 sm:$0xee]  }
 0x122   : > { %7666 = vmatpush3.bf16.msra.mxu1 %v8206_v45  ;;  %v3098_v40 = vor.u32 %v3097_v32, %v3094_v27  ;;  %v3126_v45 = vor.u32 %v3125_v37, %v3122_v36  ;;  %v3671_v23 = vsel %vm8877_vm11, %v6593_v19, %v3670_v20  ;;  %v8243_v27 = vld [vmem:[%s9599_s3 + $0x490] sm:$0xff]   ;;  %v8244_v32 = vld [vmem:[%s9599_s3 + $0x4d8] sm:$0xff]   ;;  %v3666_v36 = vrot.slane %v8240_v31, 5  ;;  %v8264_v11 = vld [vmem:[#allocation2 + $0xc4] ss:$8 sps:$4 sm:$0x11]  }
 0x123   : > { %7667 = vmatprep.subr.bf16.mxu1 %v8213_v1  ;;  %v6655_v28 = vcombine.low %v3663_v22, %v3671_v23  ;;  %v3659_v37 = vsel %vm8877_vm11, %v6590_v33, %v3658_v34  ;;  %v6598_v12 = vrot.slane %v8259_v8, 9  ;;  %v3690_v13 = vrot.slane %v8261_v9, 5  ;;  %v3526_v15 = vld [vmem:[#allocation2 + $0x88] sm:$0x1e]  ;;  %v3529_v59 = vld [vmem:[#allocation2 + $0xa0] sm:$0x1e] }
 0x124   : > { %v3099_v50 = vrot.slane %v3098_v40, 4  ;;  %v3127_v55 = vrot.slane %v3126_v45, 4  ;;  %v3667_v38 = vsel %vm8877_vm11, %v6592_v35, %v3666_v36  ;;  %v6571_v18 = vcombine.low %v3526_v15, %v3526_v15  ;;  %v8269_v23 = vld [vmem:[%s9599_s3 + $0x4f0] sm:$0xff]   ;;  %v8278_v52 = vld [vmem:[%s9599_s3 + $0x4b8] sm:$0xff]   ;;  %v8287_v9 = vld [vmem:[%s9599_s3 + $0x5c8] sm:$0xff]  }
 0x125   : > { %v6653_v43 = vcombine.low %v3659_v37, %v3667_v38  ;;  %v6573_v19 = vcombine.high %v3526_v15, %v3526_v15  ;;  %v3691_v20 = vsel %vm8877_vm11, %v6598_v12, %v3690_v13  ;;  %v6577_v22 = vcombine.high %v3529_v59, %v3529_v59  ;;  %v8275_v31 = vld [vmem:[%s9599_s3 + $0x4b0] sm:$0xff]   ;;  %v8288_v12 = vld [vmem:[%s9599_s3 + $0x548] sm:$0xff]  }
 0x126   : > { %7668 = vmatpush3.bf16.msra.mxu1 %v8213_v1  ;;  %v3104_v60 = vsel %vm8695_vm8, %v3099_v50, %v3103_v42  ;;  %v3132_v1 = vsel %vm8695_vm8, %v3127_v55, %v3131_v46  ;;  %3978 = vmatmul.mubr.bf16.vlgmr.msra.gmra.mrb[80].mxu0 %v6650_v2  ;;  %v6654_v42 = vcombine.high %v3659_v37, %v3667_v38  ;;  %v8250_v50 = vld [vmem:[#allocation2 + $0x90] ss:$8 sps:$4 sm:$0xee]   ;;  %v8289_v15 = vld [vmem:[#allocation2 + $0x68] ss:$24 sps:$4 sm:$0xff]  }
 0x127   : > { %7677 = vmatprep.subr.bf16.mxu1 %v9163_v25  ;;  %v6529_v6 = vcombine.low %v3104_v60, %v3132_v1  ;;  %7378 = vmatpush3.bf16.msra.mxu0 %v8231_v0  ;;  %v6596_v55 = vrot.slane %v8250_v50, 9  ;;  %v8254_v1 = vld [vmem:[%s9599_s3 + $0x520] sm:$0xff]   ;;  %v3686_v35 = vrot.slane %v6577_v22, 5  ;;  %v3535_v36 = vld [vmem:[#allocation2 + $0xd0] sm:$0x1e]  ;;  %v6579_v38 = vcombine.low %v3532_v30, %v3532_v30  ;;  %v8277_v50 = vld [vmem:[%s9599_s3 + $0x538] sm:$0xff]  }
 0x128   : > { %7379 = vmatprep.subr.bf16.mxu0 %v8232_v5  ;;  %3985 = vmatprep.mubr.bf16.mxu0 %v6654_v42 }
 0x129   : > { %7650 = vmatmul.mubr.bf16.gmra.mrb[4].mxu1 %v6529_v6  ;;  %v3683_v61 = vsel %vm8877_vm11, %v6596_v55, %v3682_v56  ;;  %v8257_v6 = vld [vmem:[%s9599_s3 + $0x528] sm:$0xff]   ;;  %v8279_v56 = vld [vmem:[#allocation2 + $0x38] ss:$24 sps:$4 sm:$0xff]  }
 0x12a   : > { %7669 = vmatprep.mubr.bf16.mxu1 %v6652_v17  ;;  %v6657_v14 = vcombine.high %v3675_v57, %v3683_v61  ;;  %v6656_v0 = vcombine.low %v3675_v57, %v3683_v61  ;;  %v3698_v17 = vrot.slane %v8264_v11, 5  ;;  %v8281_v61 = vld [vmem:[#allocation2 + $0x40] ss:$24 sps:$4 sm:$0xff]  }
 0x12b   : > { %7380 = vmatpush3.bf16.msra.mxu0 %v8234_v16  ;;  %v6600_v16 = vrot.slane %v8262_v10, 9 }
 0x12c   : > { %7381 = vmatprep.subr.bf16.mxu0 %v8241_v21  ;;  %v6575_v21 = vcombine.low %v3529_v59, %v3529_v59 }
 0x12d   : > { %v3699_v26 = vsel %vm8877_vm11, %v6600_v16, %v3698_v17  ;;  %v8290_v16 = vld [vmem:[#allocation2 + $0x60] ss:$24 sps:$4 sm:$0xff]   ;;  %v8291_v17 = vld [vmem:[%s9599_s3 + $0x590] sm:$0xff]  }
 0x12e   : > { %3986 = vmatmul.mubr.bf16.gmra.mrb[84].mxu0 %v6653_v43  ;;  %v6659_v33 = vcombine.low %v3691_v20, %v3699_v26  ;;  %v6597_v34 = vrot.slane %v6575_v21, 9  ;;  %v6585_v43 = vcombine.high %v3535_v36, %v3535_v36  ;;  %v8293_v21 = vld [vmem:[%s9599_s3 + $0x550] sm:$0xff]  }
 0x12f   : > { %7382 = vmatpush3.bf16.msra.mxu0 %v8243_v27  ;;  %3993 = vmatprep.mubr.bf16.mxu0 %v6657_v14  ;;  %v6595_v27 = vrot.slane %v6571_v18, 9  ;;  %v8283_v14 = vld [vmem:[%s9599_s3 + $0x5c0] sm:$0xff]  }
 0x130   : > { %7383 = vmatprep.subr.bf16.mxu0 %v8244_v32  ;;  %v6660_v32 = vcombine.high %v3691_v20, %v3699_v26  ;;  %v3687_v42 = vsel %vm8877_vm11, %v6597_v34, %v3686_v35  ;;  %v3702_v51 = vrot.slane %v6585_v43, 5  ;;  %v8298_v35 = vld [vmem:[#allocation2 + $0x90] ss:$24 sps:$4 sm:$0xff]  }
 0x131   : > { %7670 = vmatmul.mubr.bf16.vlgmr.msra.gmra.mrb[0].mxu1 %v6655_v28  ;;  %v3678_v28 = vrot.slane %v6573_v19, 5  ;;  %v8292_v19 = vld [vmem:[%s9599_s3 + $0x5d0] sm:$0xff]  }
 0x132   : > { %7678 = vmatpush3.bf16.msra.mxu1 %v9163_v25  ;;  %v8245_v25 = vld [vmem:[%s9599_s3 + $0x518] sm:$0xff]  }
 0x133   : > { %7679 = vmatprep.subr.bf16.mxu1 %v8233_v29  ;;  %7384 = vmatpush3.bf16.msra.mxu0 %v8246_v44  ;;  %v3679_v37 = vsel %vm8877_vm11, %v6595_v27, %v3678_v28  ;;  %v8276_v44 = vld [vmem:[%s9599_s3 + $0x4f8] sm:$0xff]  }
 0x134   : > { %7385 = vmatprep.subr.bf16.mxu0 %v8253_v48  ;;  %v6658_v47 = vcombine.low %v3679_v37, %v3687_v42  ;;  %v6599_v48 = vrot.slane %v6579_v38, 9  ;;  %v8295_v27 = vld [vmem:[%s9599_s3 + $0x5d8] sm:$0xff]  }
 0x136   : > { %7680 = vmatpush3.bf16.msra.mxu1 %v8233_v29  ;;  %3994 = vmatmul.mubr.bf16.gmra.mrb[88].mxu0 %v6656_v0  ;;  %v8270_v29 = vld [vmem:[%s9599_s3 + $0x530] sm:$0xff]  }
 0x137   : > { %7681 = vmatprep.subr.bf16.mxu1 %v8242_v39  ;;  %7386 = vmatpush3.bf16.msra.mxu0 %v8255_v58  ;;  %v8280_v58 = vld [vmem:[#allocation2 + $0x30] ss:$24 sps:$4 sm:$0xff]  }
 0x138   : > { %7387 = vmatprep.subr.bf16.mxu0 %v8256_v62  ;;  %4001 = vmatprep.mubr.bf16.mxu0 %v6660_v32  ;;  %v8282_v62 = vld [vmem:[%s9599_s3 + $0x580] sm:$0xff]   ;;  %v8297_v32 = vld [vmem:[#allocation2 + $0x98] ss:$24 sps:$4 sm:$0xff]  }
 0x139   : > { %7673 = vmatprep.mubr.bf16.mxu1 %v6658_v47 }
 0x13a   : > { %7682 = vmatpush3.bf16.msra.mxu1 %v8242_v39  ;;  %v6581_v39 = vcombine.high %v3532_v30, %v3532_v30  ;;  %v8296_v30 = vld [vmem:[%s9599_s3 + $0x558] sm:$0xff]  }
 0x13b   : > { %7683 = vmatprep.subr.bf16.mxu1 %v8245_v25  ;;  %7388 = vmatpush3.bf16.msra.mxu0 %v8258_v4  ;;  %v8285_v4 = vld [vmem:[%s9599_s3 + $0x540] sm:$0xff]  }
 0x13c   : > { %7389 = vmatprep.subr.bf16.mxu0 %v8269_v23 }
 0x13e   : > { %7684 = vmatpush3.bf16.msra.mxu1 %v8245_v25  ;;  %4002 = vmatmul.mubr.bf16.gmra.mrb[92].mxu0 %v6659_v33  ;;  %v3694_v25 = vrot.slane %v6581_v39, 5  ;;  %v8300_v39 = vld [vmem:[%s9599_s3 + $0x5e0] sm:$0xff]  }
 0x13f   : > { %7685 = vmatprep.subr.bf16.mxu1 %v8254_v1  ;;  %7390 = vmatpush3.bf16.msra.mxu0 %v8275_v31 }
 0x140   : > { %7391 = vmatprep.subr.bf16.mxu0 %v8276_v44  ;;  %v3695_v55 = vsel %vm8877_vm11, %v6599_v48, %v3694_v25  ;;  %4405 = vmatprep.mubr.bf16.mxu0 %v8279_v56  ;;  %v8306_v56 = vld [vmem:[#allocation2 + $0xc0] ss:$24 sps:$4 sm:$0xff]  }
 0x142   : > { %7686 = vmatpush3.bf16.msra.mxu1 %v8254_v1 }
 0x143   : > { %7687 = vmatprep.subr.bf16.mxu1 %v8257_v6  ;;  %7392 = vmatpush3.bf16.msra.mxu0 %v8278_v52 }
 0x144   : > { %7429 = vmatprep.subr.bf16.mxu0 %v8282_v62  ;;  %v8310_v62 = vld [vmem:[#allocation2 + $0xd0] ss:$24 sps:$4 sm:$0xff]  }
 0x146   : > { %7688 = vmatpush3.bf16.msra.mxu1 %v8257_v6  ;;  %4406 = vmatmul.mubr.bf16.vlgmr.msra.gmra.mrb[96].mxu0 %v8280_v58  ;;  %v8286_v6 = vld [vmem:[%s9599_s3 + $0x588] sm:$0xff]   ;;  %v8308_v58 = vld [vmem:[%s9599_s3 + $0x5b0] sm:$0xff]  }
 0x147   : > { %7689 = vmatprep.subr.bf16.mxu1 %v8270_v29  ;;  %7430 = vmatpush3.bf16.msra.mxu0 %v8285_v4 }
 0x148   : > { %v7081_v40 = vpop.f32.mrb[0].mxu0  ;;  %7431 = vmatprep.subr.bf16.mxu0 %v8286_v6  ;;  %4413 = vmatprep.mubr.bf16.mxu0 %v8289_v15  ;;  %v8317_v15 = vld [vmem:[#allocation2 + $0x34] ss:$8 sps:$4 sm:$0x11]  }
 0x149   : > { %v7082_v45 = vpop.f32.mrb[1].mxu0 }
 0x14a   : > { %v9218_v46 = vadd.f32 %v7082_v45, %v7081_v40  ;;  %v7084_v60 = vpop.f32.mrb[2].mxu0  ;;  %v6583_v40 = vcombine.low %v3535_v36, %v3535_v36  ;;  %7690 = vmatpush3.bf16.msra.mxu1 %v8270_v29  ;;  %v8299_v36 = vld [vmem:[%s9599_s3 + $0x5a0] sm:$0xff]  }
 0x14b   : > { %v7085_v63 = vpop.f32.mrb[3].mxu0  ;;  %7691 = vmatprep.subr.bf16.mxu1 %v8277_v50  ;;  %7432 = vmatpush3.bf16.msra.mxu0 %v8288_v12 }
 0x14c   : > { %v9239_v2 = vadd.f32 %v7085_v63, %v7084_v60  ;;  %v6601_v49 = vrot.slane %v6583_v40, 9  ;;  %7433 = vmatprep.subr.bf16.mxu0 %v8291_v17  ;;  %v8318_v17 = vld [vmem:[#allocation2 + $0x48] ss:$8 sps:$4 sm:$0xff]  }
 0x14e   : > { %v3703_v57 = vsel %vm8877_vm11, %v6601_v49, %v3702_v51  ;;  %7692 = vmatpush3.bf16.msra.mxu1 %v8277_v50  ;;  %4414 = vmatmul.mubr.bf16.gmra.mrb[100].mxu0 %v8290_v16  ;;  %v8304_v49 = vld [vmem:[%s9599_s3 + $0x568] sm:$0xff]   ;;  %v8325_v16 = vld [vmem:[%s9599_s3 + $0x640] sm:$0xff]  }
 0x14f   : > { %v6661_v60 = vcombine.low %v3695_v55, %v3703_v57  ;;  %7701 = vmatprep.subr.bf16.mxu1 %v8283_v14  ;;  %7434 = vmatpush3.bf16.msra.mxu0 %v8293_v21  ;;  %v8305_v51 = vld [vmem:[#allocation2 + $0xc8] ss:$24 sps:$4 sm:$0xff]  }
 0x150   : > { %4421 = vmatprep.mubr.bf16.mxu0 %v8297_v32 }
 0x151   : > { %7674 = vmatmul.mubr.bf16.gmra.mrb[4].mxu1 %v6661_v60 }
 0x152   : > { %7693 = vmatprep.mubr.bf16.mxu1 %v8281_v61 }
 0x153   : > { %v7087_v3 = vpop.f32.mrb[4].mxu0 }
 0x154   : > { %v7088_v5 = vpop.f32.mrb[5].mxu0 }
 0x155   : > { %v9247_v7 = vadd.f32 %v7088_v5, %v7087_v3  ;;  %v7090_v24 = vpop.f32.mrb[6].mxu0  ;;  %v8284_v3 = vld [vmem:[#allocation2 + $0x70] ss:$24 sps:$4 sm:$0xff]  }
 0x156   : > { %v7091_v45 = vpop.f32.mrb[7].mxu0  ;;  %4422 = vmatmul.mubr.bf16.gmra.mrb[104].mxu0 %v8298_v35 }
 0x157   : > { %v9275_v53 = vadd.f32 %v7091_v45, %v7090_v24  ;;  %v8294_v24 = vld [vmem:[%s9599_s3 + $0x598] sm:$0xff]   ;;  %v8303_v45 = vld [vmem:[%s9599_s3 + $0x5e8] sm:$0xff]   ;;  %4429 = vmatprep.mubr.bf16.mxu0 %v8305_v51 }
 0x158   : > { %7435 = vmatprep.subr.bf16.mxu0 %v8294_v24  ;;  %v4513_v24 = vld [vmem:[#allocation2 + $0x40] sm:$0x1f] }
 0x159   : > { %7694 = vmatmul.mubr.bf16.vlgmr.msra.gmra.mrb[0].mxu1 %v8284_v3  ;;  %7436 = vmatpush3.bf16.msra.mxu0 %v8296_v30  ;;  %v6771_v30 = vcombine.low %v4513_v24, %v4513_v24  ;;  %v6773_v35 = vcombine.high %v4513_v24, %v4513_v24 }
 0x15a   : > { %7702 = vmatpush3.bf16.msra.mxu1 %v8283_v14  ;;  %7437 = vmatprep.subr.bf16.mxu0 %v8299_v36  ;;  %v8311_v14 = vld [vmem:[%s9599_s3 + $0x570] sm:$0xff]  }
 0x15b   : > { %v7093_v63 = vpop.f32.mrb[8].mxu0  ;;  %7703 = vmatprep.subr.bf16.mxu1 %v8287_v9 }
 0x15c   : > { %v7094_v0 = vpop.f32.mrb[9].mxu0 }
 0x15d   : > { %v9287_v1 = vadd.f32 %v7094_v0, %v7093_v63  ;;  %v7096_v5 = vpop.f32.mrb[10].mxu0 }
 0x15e   : > { %v7097_v8 = vpop.f32.mrb[11].mxu0  ;;  %7704 = vmatpush3.bf16.msra.mxu1 %v8287_v9  ;;  %4430 = vmatmul.mubr.bf16.gmra.mrb[108].mxu0 %v8306_v56  ;;  %v8314_v9 = vld [vmem:[%s9599_s3 + $0x578] sm:$0xff]   ;;  %v4522_v56 = vld [vmem:[#allocation2 + $0x88] sm:$0x1f] }
 0x15f   : > { %v9298_v10 = vadd.f32 %v7097_v8, %v7096_v5  ;;  %7705 = vmatprep.subr.bf16.mxu1 %v8292_v19  ;;  %v8313_v5 = vld [vmem:[%s9599_s3 + $0x5f8] sm:$0xff]  }
 0x162   : > { %7706 = vmatpush3.bf16.msra.mxu1 %v8292_v19  ;;  %v9388_v19 = vld [vmem:[%s9599_s3 + $0x680] sm:$0xff]  }
 0x163   : > { %v7099_v11 = vpop.f32.mrb[12].mxu0  ;;  %7707 = vmatprep.subr.bf16.mxu1 %v8295_v27 }
 0x164   : > { %v7100_v13 = vpop.f32.mrb[13].mxu0 }
 0x165   : > { %v9303_v59 = vadd.f32 %v7100_v13, %v7099_v11  ;;  %v7102_v18 = vpop.f32.mrb[14].mxu0  ;;  %v8315_v13 = vld [vmem:[#allocation2 + $0x30] ss:$8 sps:$4 sm:$0xff]  }
 0x166   : > { %v7103_v20 = vpop.f32.mrb[15].mxu0  ;;  %7708 = vmatpush3.bf16.msra.mxu1 %v8295_v27  ;;  %v4643_v21 = vshll.u32 %v8315_v13, 16  ;;  %v4671_v27 = vshll.u32 %v8318_v17, 16 }
 0x167   : > { %v9314_v22 = vadd.f32 %v7103_v20, %v7102_v18  ;;  %7709 = vmatprep.subr.bf16.mxu1 %v8300_v39  ;;  %v8320_v18 = vld [vmem:[#allocation2 + $0x4c] ss:$8 sps:$4 sm:$0x11]  }
 0x168   : > { %v4645_v32 = vrot.slane %v4643_v21, 5 }
 0x16a   : > { %7710 = vmatpush3.bf16.msra.mxu1 %v8300_v39 }
 0x16b   : > { %v7133_v23 = vpop.f32.mrb[16].mxu0  ;;  %7711 = vmatprep.subr.bf16.mxu1 %v8303_v45 }
 0x16c   : > { %v7134_v26 = vpop.f32.mrb[17].mxu0 }
 0x16d   : > { %v7135_v28 = vadd.f32 %v7134_v26, %v7133_v23  ;;  %v7136_v29 = vpop.f32.mrb[18].mxu0  ;;  %v4649_v23 = vshll.u32 %v8317_v15, 16  ;;  %v4668_v26 = vshrl.u32 %v8318_v17, 16 }
 0x16e   : > { %v7137_v31 = vpop.f32.mrb[19].mxu0  ;;  %7712 = vmatpush3.bf16.msra.mxu1 %v8303_v45 }
 0x16f   : > { %v9326_v33 = vadd.f32 %v7135_v28, %v9218_v46  ;;  %v7138_v34 = vadd.f32 %v7137_v31, %v7136_v29  ;;  %v8301_v46 = vld [vmem:[%s9599_s3 + $0x560] sm:$0xff]   ;;  %v4677_v28 = vshll.u32 %v8320_v18, 16  ;;  %v4516_v29 = vld [vmem:[#allocation2 + $0x58] sm:$0x1f]  ;;  %v4670_v36 = vrot.slane %v4668_v26, 4 }
 0x170   : > { %7438 = vmatpush3.bf16.msra.mxu0 %v8301_v46  ;;  %v6775_v39 = vcombine.low %v4516_v29, %v4516_v29  ;;  %v6777_v46 = vcombine.high %v4516_v29, %v4516_v29 }
 0x171   : > { %v9332_v37 = vadd.f32 %v7138_v34, %v9239_v2  ;;  %v8302_v2 = vld [vmem:[%s9599_s3 + $0x5a8] sm:$0xff]   ;;  %v4651_v34 = vrot.slane %v4649_v23, 5 }
 0x172   : > { %7439 = vmatprep.subr.bf16.mxu0 %v8302_v2  ;;  %v4682_v45 = vshrl.u32 %v6775_v39, 16 }
 0x173   : > { %v7139_v38 = vpop.f32.mrb[20].mxu0 }
 0x174   : > { %v7140_v40 = vpop.f32.mrb[21].mxu0  ;;  %7440 = vmatpush3.bf16.msra.mxu0 %v8304_v49 }
 0x175   : > { %v7141_v42 = vadd.f32 %v7140_v40, %v7139_v38  ;;  %v7142_v43 = vpop.f32.mrb[22].mxu0  ;;  %7441 = vmatprep.subr.bf16.mxu0 %v8308_v58  ;;  %v4673_v38 = vrot.slane %v4671_v27, 5 }
 0x176   : > { %v7143_v44 = vpop.f32.mrb[23].mxu0 }
 0x177   : > { %v9347_v47 = vadd.f32 %v7141_v42, %v9247_v7  ;;  %v7144_v48 = vadd.f32 %v7143_v44, %v7142_v43  ;;  %v8307_v7 = vld [vmem:[#allocation2 + $0xa0] ss:$24 sps:$4 sm:$0xff]   ;;  %v4654_v42 = vshrl.u32 %v6771_v30, 16  ;;  %v4657_v43 = vshll.u32 %v6771_v30, 16 }
 0x178   : > { %7697 = vmatprep.mubr.bf16.mxu1 %v8307_v7  ;;  %7442 = vmatpush3.bf16.msra.mxu0 %v8311_v14  ;;  %v4674_v2 = vor.u32 %v4673_v38, %v4670_v36  ;;  %v4663_v44 = vshll.u32 %v6773_v35, 16  ;;  %v8335_v38 = vld [vmem:[#allocation2 + $0x60] ss:$8 sps:$4 sm:$0xff]  }
 0x179   : > { %v9353_v52 = vadd.f32 %v7144_v48, %v9275_v53  ;;  %v8309_v53 = vld [vmem:[%s9599_s3 + $0x5f0] sm:$0xff]   ;;  %7698 = vmatmul.mubr.bf16.gmra.mrb[4].mxu1 %v8310_v62  ;;  %v4685_v48 = vshll.u32 %v6775_v39, 16  ;;  %v4659_v51 = vrot.slane %v4657_v43, 5 }
 0x17a   : > { %7713 = vmatprep.subr.bf16.mxu1 %v8309_v53  ;;  %v4675_v7 = vrot.slane %v4674_v2, 4  ;;  %v4665_v58 = vrot.slane %v4663_v44, 5  ;;  %v8343_v43 = vld [vmem:[%s9599_s3 + $0x610] sm:$0xff]   ;;  %v4696_v44 = vshrl.u32 %v8335_v38, 16 }
 0x17b   : > { %v7145_v25 = vpop.f32.mrb[24].mxu0  ;;  %7714 = vmatpush3.bf16.msra.mxu1 %v8309_v53  ;;  %v4687_v53 = vrot.slane %v4685_v48, 5 }
 0x17c   : > { %v7146_v50 = vpop.f32.mrb[25].mxu0  ;;  %7715 = vmatprep.subr.bf16.mxu1 %v8313_v5 }
 0x17d   : > { %v7147_v55 = vadd.f32 %v7146_v50, %v7145_v25  ;;  %v7148_v60 = vpop.f32.mrb[26].mxu0  ;;  %v4519_v25 = vld [vmem:[#allocation2 + $0x70] sm:$0x1f]  ;;  %v4656_v50 = vrot.slane %v4654_v42, 4 }
 0x17e   : > { %v7149_v61 = vpop.f32.mrb[27].mxu0  ;;  %v6779_v14 = vcombine.low %v4519_v25, %v4519_v25  ;;  %v8340_v42 = vld [vmem:[#allocation2 + $0x7c] ss:$8 sps:$4 sm:$0x11]  }
 0x17f   : > { %v9356_v57 = vadd.f32 %v7147_v55, %v9287_v1  ;;  %v7150_v63 = vadd.f32 %v7149_v61, %v7148_v60  ;;  %v8312_v1 = vld [vmem:[%s9599_s3 + $0x5b8] sm:$0xff]   ;;  %7716 = vmatpush3.bf16.msra.mxu1 %v8313_v5  ;;  %v4691_v55 = vshll.u32 %v6777_v46, 16  ;;  %v4684_v60 = vrot.slane %v4682_v45, 4 }
 0x180   : > { %7443 = vmatprep.subr.bf16.mxu0 %v8312_v1  ;;  %7725 = vmatprep.subr.bf16.mxu1 %v9388_v19  ;;  %v4660_v62 = vor.u32 %v4659_v51, %v4656_v50  ;;  %v6781_v5 = vcombine.high %v4519_v25, %v4519_v25  ;;  %v4713_v17 = vshll.u32 %v6779_v14, 16  ;;  %v8338_v46 = vld [vmem:[#allocation2 + $0x78] ss:$8 sps:$4 sm:$0xff]   ;;  %v4699_v45 = vshll.u32 %v8335_v38, 16  ;;  %v8358_v38 = vld [vmem:[%s9599_s3 + $0x628] sm:$0xff]  }
 0x181   : > { %v9371_v3 = vadd.f32 %v7150_v63, %v9298_v10  ;;  %7444 = vmatpush3.bf16.msra.mxu0 %v8314_v9  ;;  %v4693_v63 = vrot.slane %v4691_v55, 5  ;;  %v4727_v50 = vshll.u32 %v8338_v46, 16  ;;  %v4733_v51 = vshll.u32 %v8340_v42, 16  ;;  %v8354_v42 = vld [vmem:[%s9599_s3 + $0x6a0] sm:$0xff]  }
 0x182   : > { %7481 = vmatprep.subr.bf16.mxu0 %v8325_v16  ;;  %v4710_v16 = vshrl.u32 %v6779_v14, 16  ;;  %v4719_v18 = vshll.u32 %v6781_v5, 16 }
 0x183   : > { %v7151_v0 = vpop.f32.mrb[28].mxu0  ;;  %v4735_v14 = vrot.slane %v4733_v51, 5  ;;  %v8376_v51 = vld [vmem:[%s9599_s3 + $0x678] sm:$0xff]  }
 0x184   : > { %v7152_v4 = vpop.f32.mrb[29].mxu0  ;;  %v4712_v27 = vrot.slane %v4710_v16, 4  ;;  %v4721_v36 = vrot.slane %v4719_v18, 5  ;;  %v8349_v16 = vld [vmem:[#allocation2 + $0x94] ss:$8 sps:$4 sm:$0x11]  }
 0x185   : > { %v7153_v6 = vadd.f32 %v7152_v4, %v7151_v0  ;;  %v7154_v8 = vpop.f32.mrb[30].mxu0  ;;  %v8331_v0 = vld [vmem:[%s9599_s3 + $0x600] sm:$0xff]   ;;  %v4688_v4 = vor.u32 %v4687_v53, %v4684_v60  ;;  %v8344_v53 = vld [vmem:[%s9599_s3 + $0x658] sm:$0xff]  }
 0x186   : > { %v7155_v11 = vpop.f32.mrb[31].mxu0 }
 0x187   : > { %v9380_v12 = vadd.f32 %v7153_v6, %v9303_v59  ;;  %v7156_v10 = vadd.f32 %v7155_v11, %v7154_v8  ;;  %v4640_v59 = vshrl.u32 %v8315_v13, 16  ;;  %v6783_v6 = vcombine.low %v4522_v56, %v4522_v56  ;;  %v8332_v13 = vld [vmem:[%s9599_s3 + $0x648] sm:$0xff]  }
 0x188   : > { %v4661_v11 = vrot.slane %v4660_v62, 4  ;;  %v4689_v15 = vrot.slane %v4688_v4, 4 }
 0x189   : > { %v9391_v20 = vadd.f32 %v7156_v10, %v9314_v22  ;;  %v4642_v31 = vrot.slane %v4640_v59, 4  ;;  %v4679_v22 = vrot.slane %v4677_v28, 5  ;;  %v6785_v10 = vcombine.high %v4522_v56, %v4522_v56  ;;  %v8333_v56 = vld [vmem:[%s9599_s3 + $0x688] sm:$0xff]  }
 0x18a   : > { %v4666_v59 = vsel %vm8695_vm8, %v4661_v11, %v4665_v58  ;;  %v4738_v21 = vshrl.u32 %v6783_v6, 16  ;;  %v4741_v23 = vshll.u32 %v6783_v6, 16  ;;  %v4694_v26 = vsel %vm8695_vm8, %v4689_v15, %v4693_v63  ;;  %v8342_v11 = vld [vmem:[%s9599_s3 + $0x690] sm:$0xff]  }
 0x18b   : > { %v4646_v40 = vor.u32 %v4645_v32, %v4642_v31  ;;  %v4680_v1 = vsel %vm8695_vm8, %v4675_v7, %v4679_v22  ;;  %v4747_v24 = vshll.u32 %v6785_v10, 16  ;;  %v4715_v28 = vrot.slane %v4713_v17, 5  ;;  %v8334_v32 = vld [vmem:[%s9599_s3 + $0x608] sm:$0xff]  }
 0x18c   : > { %v6852_v29 = vcombine.low %v4666_v59, %v4694_v26  ;;  %v4740_v30 = vrot.slane %v4738_v21, 4  ;;  %v4743_v31 = vrot.slane %v4741_v23, 5  ;;  %v8337_v22 = vld [vmem:[#allocation2 + $0x64] ss:$8 sps:$4 sm:$0x11]   ;;  %v4698_v7 = vrot.slane %v4696_v44, 4 }
 0x18d   : > { %v4647_v49 = vrot.slane %v4646_v40, 4  ;;  %v4716_v35 = vor.u32 %v4715_v28, %v4712_v27  ;;  %v4749_v40 = vrot.slane %v4747_v24, 5  ;;  %v4705_v48 = vshll.u32 %v8337_v22, 16  ;;  %v8350_v17 = vld [vmem:[#allocation2 + $0xa8] ss:$8 sps:$4 sm:$0xff]   ;;  %v8355_v24 = vld [vmem:[%s9599_s3 + $0x620] sm:$0xff]  }
 0x18e   : > { %7717 = vmatprep.mubr.bf16.mxu1 %v6852_v29  ;;  %v4744_v39 = vor.u32 %v4743_v31, %v4740_v30  ;;  %v4701_v58 = vrot.slane %v4699_v45, 5  ;;  %v4729_v63 = vrot.slane %v4727_v50, 5  ;;  %v8352_v21 = vld [vmem:[#allocation2 + $0xac] ss:$8 sps:$4 sm:$0x11]   ;;  %v4761_v26 = vshll.u32 %v8349_v16, 16 }
 0x18f   : > { %v4652_v61 = vsel %vm8695_vm8, %v4647_v49, %v4651_v34  ;;  %v8341_v34 = vld [vmem:[%s9599_s3 + $0x650] sm:$0xff]   ;;  %v4717_v2 = vrot.slane %v4716_v35, 4  ;;  %v4724_v49 = vshrl.u32 %v8338_v46, 16  ;;  %v4707_v60 = vrot.slane %v4705_v48, 5  ;;  %v8356_v29 = vld [vmem:[%s9599_s3 + $0x668] sm:$0xff]   ;;  %v8345_v30 = vld [vmem:[%s9599_s3 + $0x698] sm:$0xff]  }
 0x190   : > { %v6850_v8 = vcombine.low %v4652_v61, %v4680_v1  ;;  %v6851_v9 = vcombine.high %v4652_v61, %v4680_v1  ;;  %v4745_v25 = vrot.slane %v4744_v39, 4  ;;  %v4702_v4 = vor.u32 %v4701_v58, %v4698_v7  ;;  %v8373_v22 = vld [vmem:[%s9599_s3 + $0x670] sm:$0xff]   ;;  %v7185_v45 = vpop.f32.mrb[32].mxu0  ;;  %v8357_v50 = vld [vmem:[%s9599_s3 + $0x6a8] sm:$0xff]   ;;  %v8362_v58 = vld [vmem:[#allocation2 + $0xd8] ss:$8 sps:$4 sm:$0xff]  }
 0x191   : > { %v4722_v55 = vsel %vm8695_vm8, %v4717_v2, %v4721_v36  ;;  %v4726_v62 = vrot.slane %v4724_v49, 4  ;;  %v4780_v27 = vshrl.u32 %v8350_v17, 16  ;;  %v4783_v28 = vshll.u32 %v8350_v17, 16  ;;  %v8375_v44 = vld [vmem:[%s9599_s3 + $0x630] sm:$0xff]   ;;  %v8359_v7 = vld [vmem:[#allocation2 + $0xc0] ss:$8 sps:$4 sm:$0xff]  }
 0x192   : > { %5136 = vmatprep.mubr.bf16.mxu0 %v6851_v9  ;;  %v4750_v61 = vsel %vm8695_vm8, %v4745_v25, %v4749_v40  ;;  %v4703_v6 = vrot.slane %v4702_v4, 4  ;;  %v4763_v40 = vrot.slane %v4761_v26, 5  ;;  %v7186_v25 = vpop.f32.mrb[33].mxu0  ;;  %v4839_v4 = vshll.u32 %v8362_v58, 16 }
 0x193   : > { %5137 = vmatmul.mubr.bf16.vlgmr.msra.gmra.mrb[112].mxu0 %v6850_v8  ;;  %v6855_v1 = vcombine.low %v4722_v55, %v4750_v61  ;;  %v4730_v5 = vor.u32 %v4729_v63, %v4726_v62  ;;  %v8353_v8 = vld [vmem:[%s9599_s3 + $0x660] sm:$0xff]   ;;  %v4782_v35 = vrot.slane %v4780_v27, 4  ;;  %v4785_v36 = vrot.slane %v4783_v28, 5 }
 0x194   : > { %7482 = vmatpush3.bf16.msra.mxu0 %v8331_v0  ;;  %v8346_v0 = vld [vmem:[%s9599_s3 + $0x618] sm:$0xff]   ;;  %v4708_v10 = vsel %vm8695_vm8, %v4703_v6, %v4707_v60  ;;  %v7187_v55 = vadd.f32 %v7186_v25, %v7185_v45  ;;  %v8361_v61 = vld [vmem:[#allocation2 + $0xc4] ss:$8 sps:$4 sm:$0x11]   ;;  %v4841_v17 = vrot.slane %v4839_v4, 5 }
 0x195   : > { %7483 = vmatprep.subr.bf16.mxu0 %v8332_v13  ;;  %7718 = vmatmul.mubr.bf16.vlgmr.msra.gmra.mrb[0].mxu1 %v6855_v1  ;;  %v4731_v9 = vrot.slane %v4730_v5, 4  ;;  %v8347_v13 = vld [vmem:[#allocation2 + $0x90] ss:$8 sps:$4 sm:$0xff]   ;;  %v8364_v62 = vld [vmem:[#allocation2 + $0xdc] ss:$8 sps:$4 sm:$0x11]  }
 0x196   : > { %7726 = vmatpush3.bf16.msra.mxu1 %v9388_v19  ;;  %v4752_v19 = vshrl.u32 %v8347_v13, 16  ;;  %v4755_v23 = vshll.u32 %v8347_v13, 16  ;;  %v9473_v63 = vadd.f32 %v9326_v33, %v7187_v55  ;;  %v4836_v1 = vshrl.u32 %v8362_v58, 16  ;;  %v4525_v5 = vld [vmem:[#allocation2 + $0xa0] sm:$0x1f]  ;;  %v8378_v13 = vld [vmem:[%s9599_s3 + $0x638] sm:$0xff]  }
 0x197   : > { %7727 = vmatprep.subr.bf16.mxu1 %v8333_v56  ;;  %v4736_v15 = vsel %vm8695_vm8, %v4731_v9, %v4735_v14  ;;  %v4808_v14 = vshrl.u32 %v8359_v7, 16  ;;  %v4817_v6 = vshll.u32 %v8361_v61, 16  ;;  %v4528_v9 = vld [vmem:[#allocation2 + $0xb8] sm:$0x1f] }
 0x198   : > { %7484 = vmatpush3.bf16.msra.mxu0 %v8334_v32  ;;  %v6854_v18 = vcombine.high %v4708_v10, %v4736_v15  ;;  %v6853_v59 = vcombine.low %v4708_v10, %v4736_v15  ;;  %v4754_v31 = vrot.slane %v4752_v19, 4  ;;  %v4757_v32 = vrot.slane %v4755_v23, 5 }
 0x199   : > { %7485 = vmatprep.subr.bf16.mxu0 %v8341_v34  ;;  %v4789_v34 = vshll.u32 %v8352_v21, 16  ;;  %v6789_v10 = vcombine.high %v4525_v5, %v4525_v5  ;;  %v4810_v33 = vrot.slane %v4808_v14, 4  ;;  %v4838_v16 = vrot.slane %v4836_v1, 4  ;;  %v7188_v14 = vpop.f32.mrb[34].mxu0 }
 0x19a   : > { %7728 = vmatpush3.bf16.msra.mxu1 %v8333_v56  ;;  %5144 = vmatprep.mubr.bf16.mxu0 %v6854_v18  ;;  %v4758_v39 = vor.u32 %v4757_v32, %v4754_v31  ;;  %v8374_v18 = vld [vmem:[%s9599_s3 + $0x6b0] sm:$0xff]   ;;  %v6791_v19 = vcombine.low %v4528_v9, %v4528_v9  ;;  %v6793_v23 = vcombine.high %v4528_v9, %v4528_v9 }
 0x19b   : > { %7729 = vmatprep.subr.bf16.mxu1 %v8342_v11  ;;  %5145 = vmatmul.mubr.bf16.gmra.mrb[116].mxu0 %v6853_v59  ;;  %v4791_v46 = vrot.slane %v4789_v34, 5  ;;  %v4819_v59 = vrot.slane %v4817_v6, 5  ;;  %v4842_v27 = vor.u32 %v4841_v17, %v4838_v16  ;;  %v8379_v6 = vld [vmem:[#allocation2 + $0x30] ss:$8 sps:$4 sm:$0xee]  }
 0x19c   : > { %7486 = vmatpush3.bf16.msra.mxu0 %v8343_v43  ;;  %v4786_v43 = vor.u32 %v4785_v36, %v4782_v35  ;;  %v4759_v2 = vrot.slane %v4758_v39, 4  ;;  %v4794_v31 = vshrl.u32 %v6791_v19, 16  ;;  %v4797_v32 = vshll.u32 %v6791_v19, 16  ;;  %v4534_v35 = vld [vmem:[#allocation2 + $0xe8] sm:$0x1f]  ;;  %v8377_v36 = vld [vmem:[%s9599_s3 + $0x6b8] sm:$0xff]  }
 0x19d   : > { %7487 = vmatprep.subr.bf16.mxu0 %v8344_v53  ;;  %v4803_v34 = vshll.u32 %v6793_v23, 16  ;;  %v6801_v58 = vcombine.high %v4534_v35, %v4534_v35  ;;  %v8382_v17 = vld [vmem:[#allocation2 + $0x48] ss:$8 sps:$4 sm:$0xee]  }
 0x19e   : > { %7730 = vmatpush3.bf16.msra.mxu1 %v8342_v11  ;;  %v4787_v48 = vrot.slane %v4786_v43, 4  ;;  %v4764_v49 = vsel %vm8695_vm8, %v4759_v2, %v4763_v40  ;;  %v6787_v11 = vcombine.low %v4525_v5, %v4525_v5  ;;  %v4799_v43 = vrot.slane %v4797_v32, 5  ;;  %v8384_v19 = vld [vmem:[#allocation2 + $0x4c] ss:$8 sps:$4 sm:$0x11]  }
 0x19f   : > { %7731 = vmatprep.subr.bf16.mxu1 %v8345_v30  ;;  %v4805_v2 = vrot.slane %v4803_v34, 5 }
 0x1a0   : > { %7488 = vmatpush3.bf16.msra.mxu0 %v8346_v0  ;;  %v4792_v56 = vsel %vm8695_vm8, %v4787_v48, %v4791_v46  ;;  %v4811_v0 = vshll.u32 %v8359_v7, 16  ;;  %v4766_v28 = vshrl.u32 %v6787_v11, 16  ;;  %v6799_v7 = vcombine.low %v4534_v35, %v4534_v35 }
 0x1a1   : > { %7489 = vmatprep.subr.bf16.mxu0 %v8353_v8  ;;  %v6857_v60 = vcombine.high %v4764_v49, %v4792_v56  ;;  %v6856_v53 = vcombine.low %v4764_v49, %v4792_v56  ;;  %v4845_v8 = vshll.u32 %v8364_v62, 16  ;;  %v5380_v35 = vrot.slane %v8384_v19, 5 }
 0x1a2   : > { %7732 = vmatpush3.bf16.msra.mxu1 %v8345_v30  ;;  %v4813_v15 = vrot.slane %v4811_v0, 5  ;;  %v4775_v30 = vshll.u32 %v6789_v10, 16  ;;  %v4768_v39 = vrot.slane %v4766_v28, 4  ;;  %v4850_v4 = vshrl.u32 %v6799_v7, 16  ;;  %v5244_v28 = vld [vmem:[#allocation2 + $0x40] sm:$0x1e] }
 0x1a3   : > { %7733 = vmatprep.subr.bf16.mxu1 %v8354_v42  ;;  %5152 = vmatprep.mubr.bf16.mxu0 %v6857_v60  ;;  %v4847_v21 = vrot.slane %v4845_v8, 5  ;;  %v4853_v5 = vshll.u32 %v6799_v7, 16  ;;  %v4859_v10 = vshll.u32 %v6801_v58, 16  ;;  %v5256_v7 = vld [vmem:[#allocation2 + $0xa0] sm:$0x1e] }
 0x1a4   : > { %7490 = vmatpush3.bf16.msra.mxu0 %v8355_v24  ;;  %v4531_v24 = vld [vmem:[#allocation2 + $0xd0] sm:$0x1f]  ;;  %v4814_v26 = vor.u32 %v4813_v15, %v4810_v33  ;;  %v4777_v46 = vrot.slane %v4775_v30, 5  ;;  %v4852_v15 = vrot.slane %v4850_v4, 4 }
 0x1a5   : > { %7491 = vmatprep.subr.bf16.mxu0 %v8356_v29  ;;  %5153 = vmatmul.mubr.bf16.gmra.mrb[120].mxu0 %v6856_v53  ;;  %v4769_v29 = vshll.u32 %v6787_v11, 16  ;;  %v6795_v25 = vcombine.low %v4531_v24, %v4531_v24  ;;  %v6797_v55 = vcombine.high %v4531_v24, %v4531_v24  ;;  %v4855_v16 = vrot.slane %v4853_v5, 5  ;;  %v7189_v24 = vpop.f32.mrb[35].mxu0  ;;  %v8396_v5 = vld [vmem:[#allocation2 + $0x78] ss:$8 sps:$4 sm:$0xee]  }
 0x1a6   : > { %7734 = vmatpush3.bf16.msra.mxu1 %v8354_v42  ;;  %v4796_v42 = vrot.slane %v4794_v31, 4  ;;  %v9492_v30 = vadd.f32 %v7189_v24, %v7188_v14  ;;  %v9494_v31 = vpop.f32.mrb[36].mxu0  ;;  %v6903_v24 = vcombine.low %v5256_v7, %v5256_v7 }
 0x1a7   : > { %7735 = vmatprep.subr.bf16.mxu1 %v8357_v50  ;;  %v4771_v40 = vrot.slane %v4769_v29, 5  ;;  %v4822_v60 = vshrl.u32 %v6795_v25, 16  ;;  %v4825_v61 = vshll.u32 %v6795_v25, 16  ;;  %v4831_v62 = vshll.u32 %v6797_v55, 16  ;;  %v5247_v29 = vld [vmem:[#allocation2 + $0x58] sm:$0x1e] }
 0x1a8   : > { %7492 = vmatpush3.bf16.msra.mxu0 %v8358_v38  ;;  %v4815_v38 = vrot.slane %v4814_v26, 4  ;;  %v4856_v26 = vor.u32 %v4855_v16, %v4852_v15 }
 0x1a9   : > { %7493 = vmatprep.subr.bf16.mxu0 %v8373_v22  ;;  %v4843_v22 = vrot.slane %v4842_v27, 4  ;;  %v4772_v48 = vor.u32 %v4771_v40, %v4768_v39  ;;  %v4824_v1 = vrot.slane %v4822_v60, 4  ;;  %v4827_v9 = vrot.slane %v4825_v61, 5 }
 0x1aa   : > { %7736 = vmatpush3.bf16.msra.mxu1 %v8357_v50  ;;  %v4833_v11 = vrot.slane %v4831_v62, 5  ;;  %v6920_v27 = vrot.slane %v8382_v17, 9  ;;  %v4857_v39 = vrot.slane %v4856_v26, 4  ;;  %v6889_v40 = vcombine.high %v5244_v28, %v5244_v28  ;;  %v8395_v62 = vld [vmem:[#allocation2 + $0x64] ss:$8 sps:$4 sm:$0x11]  }
 0x1ab   : > { %7737 = vmatprep.subr.bf16.mxu1 %v8374_v18  ;;  %v4848_v45 = vsel %vm8695_vm8, %v4843_v22, %v4847_v21  ;;  %v4773_v56 = vrot.slane %v4772_v48, 4  ;;  %v4861_v21 = vrot.slane %v4859_v10, 5  ;;  %v5253_v22 = vld [vmem:[#allocation2 + $0x88] sm:$0x1e]  ;;  %v6924_v17 = vrot.slane %v8396_v5, 9 }
 0x1ac   : > { %7494 = vmatpush3.bf16.msra.mxu0 %v8375_v44  ;;  %v4820_v44 = vsel %vm8695_vm8, %v4815_v38, %v4819_v59  ;;  %v4828_v59 = vor.u32 %v4827_v9, %v4824_v1  ;;  %v5250_v38 = vld [vmem:[#allocation2 + $0x70] sm:$0x1e]  ;;  %v5376_v55 = vrot.slane %v6889_v40, 5  ;;  %v6899_v1 = vcombine.low %v5253_v22, %v5253_v22  ;;  %v5265_v26 = vld [vmem:[#allocation2 + $0xe8] sm:$0x1e] }
 0x1ad   : > { %7495 = vmatprep.subr.bf16.mxu0 %v8376_v51  ;;  %v6860_v49 = vcombine.high %v4820_v44, %v4848_v45  ;;  %v4800_v51 = vor.u32 %v4799_v43, %v4796_v42  ;;  %v6859_v50 = vcombine.low %v4820_v44, %v4848_v45  ;;  %v4778_v0 = vsel %vm8695_vm8, %v4773_v56, %v4777_v46  ;;  %v9498_v43 = vpop.f32.mrb[37].mxu0  ;;  %v8393_v56 = vld [vmem:[#allocation2 + $0x60] ss:$8 sps:$4 sm:$0xee]  }
 0x1ae   : > { %7738 = vmatpush3.bf16.msra.mxu1 %v8374_v18  ;;  %v6918_v18 = vrot.slane %v8379_v6, 9  ;;  %v4829_v32 = vrot.slane %v4828_v59, 4  ;;  %v6891_v46 = vcombine.low %v5247_v29, %v5247_v29  ;;  %v6893_v42 = vcombine.high %v5247_v29, %v5247_v29  ;;  %v9504_v25 = vpop.f32.mrb[38].mxu0  ;;  %v5259_v6 = vld [vmem:[#allocation2 + $0xb8] sm:$0x1e] }
 0x1af   : > { %5160 = vmatprep.mubr.bf16.mxu0 %v6860_v49  ;;  %v4801_v53 = vrot.slane %v4800_v51, 4  ;;  %7739 = vmatprep.subr.bf16.mxu1 %v8377_v36  ;;  %v5381_v44 = vsel %vm8877_vm11, %v6920_v27, %v5380_v35  ;;  %v6895_v48 = vcombine.low %v5250_v38, %v5250_v38  ;;  %v4862_v49 = vsel %vm8695_vm8, %v4857_v39, %v4861_v21  ;;  %v9508_v14 = vpop.f32.mrb[39].mxu0  ;;  %v8407_v39 = vld [vmem:[#allocation2 + $0x90] ss:$8 sps:$4 sm:$0xee]  }
 0x1b0   : > { %7496 = vmatpush3.bf16.msra.mxu0 %v8378_v13  ;;  %v8381_v13 = vld [vmem:[#allocation2 + $0x34] ss:$8 sps:$4 sm:$0x11]   ;;  %v6921_v60 = vrot.slane %v6891_v46, 9  ;;  %v6897_v61 = vcombine.high %v5250_v38, %v5250_v38  ;;  %v6901_v4 = vcombine.high %v5253_v22, %v5253_v22  ;;  %v6922_v10 = vrot.slane %v8393_v56, 9  ;;  %v9514_v59 = vpop.f32.mrb[40].mxu0 }
 0x1b1   : > { %5161 = vmatmul.mubr.bf16.gmra.mrb[124].mxu0 %v6859_v50  ;;  %v4806_v8 = vsel %vm8695_vm8, %v4801_v53, %v4805_v2  ;;  %v5372_v23 = vrot.slane %v8381_v13, 5  ;;  %v4834_v2 = vsel %vm8695_vm8, %v4829_v32, %v4833_v11  ;;  %v5384_v53 = vrot.slane %v6893_v42, 5  ;;  %v8398_v11 = vld [vmem:[#allocation2 + $0x7c] ss:$8 sps:$4 sm:$0x11]   ;;  %v7198_v27 = vpop.f32.mrb[41].mxu0 }
 0x1b2   : > { %v6858_v33 = vcombine.low %v4778_v0, %v4806_v8  ;;  %7740 = vmatpush3.bf16.msra.mxu1 %v8377_v36  ;;  %v6887_v36 = vcombine.low %v5244_v28, %v5244_v28  ;;  %v6861_v58 = vcombine.low %v4834_v2, %v4862_v49  ;;  %v6923_v54 = vrot.slane %v6895_v48, 9 }
 0x1b3   : > { %v5373_v34 = vsel %vm8877_vm11, %v6918_v18, %v5372_v23  ;;  %v5385_v8 = vsel %vm8877_vm11, %v6921_v60, %v5384_v53  ;;  %v5392_v9 = vrot.slane %v6897_v61, 5  ;;  %v5388_v13 = vrot.slane %v8395_v62, 5  ;;  %v5262_v18 = vld [vmem:[#allocation2 + $0xd0] sm:$0x1e] }
 0x1b4   : > { %7721 = vmatprep.mubr.bf16.mxu1 %v6858_v33  ;;  %v6919_v45 = vrot.slane %v6887_v36, 9  ;;  %v6982_v51 = vcombine.low %v5373_v34, %v5381_v44  ;;  %v6983_v50 = vcombine.high %v5373_v34, %v5381_v44  ;;  %v6925_v15 = vrot.slane %v6899_v1, 9  ;;  %v8409_v44 = vld [vmem:[#allocation2 + $0x94] ss:$8 sps:$4 sm:$0x11]   ;;  %v7200_v1 = vpop.f32.mrb[42].mxu0 }
 0x1b5   : > { %7722 = vmatmul.mubr.bf16.gmra.mrb[4].mxu1 %v6861_v58  ;;  %v5400_v16 = vrot.slane %v6901_v4, 5  ;;  %v5393_v21 = vsel %vm8877_vm11, %v6923_v54, %v5392_v9  ;;  %v5389_v19 = vsel %vm8877_vm11, %v6922_v10, %v5388_v13  ;;  %v5396_v23 = vrot.slane %v8398_v11, 5  ;;  %v8415_v10 = vld [vmem:[#allocation2 + $0xc4] ss:$8 sps:$4 sm:$0x11]  }
 0x1b6   : > { %5707 = vmatprep.mubr.bf16.mxu0 %v6983_v50  ;;  %v5377_v0 = vsel %vm8877_vm11, %v6919_v45, %v5376_v55  ;;  %v6905_v29 = vcombine.high %v5256_v7, %v5256_v7  ;;  %v6907_v32 = vcombine.low %v5259_v6, %v5259_v6  ;;  %v6909_v34 = vcombine.high %v5259_v6, %v5259_v6  ;;  %v8410_v50 = vld [vmem:[#allocation2 + $0xa8] ss:$8 sps:$4 sm:$0xee]   ;;  %v8412_v55 = vld [vmem:[#allocation2 + $0xac] ss:$8 sps:$4 sm:$0x11]  }
 0x1b7   : > { %v6984_v33 = vcombine.low %v5377_v0, %v5385_v8  ;;  %v5401_v28 = vsel %vm8877_vm11, %v6925_v15, %v5400_v16  ;;  %v5397_v36 = vsel %vm8877_vm11, %v6924_v17, %v5396_v23  ;;  %v6927_v38 = vrot.slane %v6903_v24, 9  ;;  %v8413_v8 = vld [vmem:[#allocation2 + $0xc0] ss:$8 sps:$4 sm:$0xee]  }
 0x1b8   : > { %v6987_v35 = vcombine.low %v5393_v21, %v5401_v28  ;;  %v6911_v22 = vcombine.low %v5262_v18, %v5262_v18  ;;  %v6986_v40 = vcombine.high %v5389_v19, %v5397_v36  ;;  %v5408_v46 = vrot.slane %v6905_v29, 5  ;;  %v8416_v13 = vld [vmem:[#allocation2 + $0xd8] ss:$8 sps:$4 sm:$0xee]   ;;  %v7201_v21 = vpop.f32.mrb[43].mxu0 }
 0x1b9   : > { %5708 = vmatmul.mubr.bf16.vlgmr.msra.gmra.mrb[128].mxu0 %v6982_v51  ;;  %7741 = vmatprep.mubr.bf16.mxu1 %v6984_v33  ;;  %v6929_v42 = vrot.slane %v6907_v32, 9  ;;  %v5416_v2 = vrot.slane %v6909_v34, 5  ;;  %v6985_v45 = vcombine.low %v5389_v19, %v5397_v36  ;;  %v6913_v48 = vcombine.high %v5262_v18, %v5262_v18  ;;  %v8418_v17 = vld [vmem:[#allocation2 + $0xdc] ss:$8 sps:$4 sm:$0x11]   ;;  %v7203_v28 = vpop.f32.mrb[44].mxu0 }
 0x1ba   : > { %v6915_v49 = vcombine.low %v5265_v26, %v5265_v26  ;;  %v6917_v51 = vcombine.high %v5265_v26, %v5265_v26  ;;  %5715 = vmatprep.mubr.bf16.mxu0 %v6986_v40  ;;  %v5409_v56 = vsel %vm8877_vm11, %v6927_v38, %v5408_v46  ;;  %v6931_v58 = vrot.slane %v6911_v22, 9 }
 0x1bb   : > { %v5417_v7 = vsel %vm8877_vm11, %v6929_v42, %v5416_v2  ;;  %v6926_v60 = vrot.slane %v8407_v39, 9  ;;  %v5424_v61 = vrot.slane %v6913_v48, 5  ;;  %v5404_v4 = vrot.slane %v8409_v44, 5 }
 0x1bc   : > { %v6990_v53 = vcombine.low %v5409_v56, %v5417_v7  ;;  %v6933_v62 = vrot.slane %v6915_v49, 9  ;;  %v5432_v0 = vrot.slane %v6917_v51, 5  ;;  %v6928_v54 = vrot.slane %v8410_v50, 9 }
 0x1bd   : > { %7742 = vmatmul.mubr.bf16.vlgmr.msra.gmra.mrb[0].mxu1 %v6987_v35  ;;  %v5412_v5 = vrot.slane %v8412_v55, 5  ;;  %v7777_v6 = vadd.f32 %v9332_v37, %v9492_v30  ;;  %v5425_v9 = vsel %vm8877_vm11, %v6931_v58, %v5424_v61  ;;  %v7193_v33 = vadd.f32 %v9498_v43, %v9494_v31 }
 0x1be   : > { %7745 = vmatprep.mubr.bf16.mxu1 %v6990_v53  ;;  %v5433_v11 = vsel %vm8877_vm11, %v6933_v62, %v5432_v0  ;;  %v7196_v15 = vadd.f32 %v9508_v14, %v9504_v25  ;;  %v5405_v37 = vsel %vm8877_vm11, %v6926_v60, %v5404_v4  ;;  %v6930_v18 = vrot.slane %v8413_v8, 9  ;;  %v7204_v14 = vpop.f32.mrb[45].mxu0 }
 0x1bf   : > { %v6993_v16 = vcombine.low %v5425_v9, %v5433_v11  ;;  %v5413_v30 = vsel %vm8877_vm11, %v6928_v54, %v5412_v5  ;;  %v5420_v24 = vrot.slane %v8415_v10, 5  ;;  %v6932_v26 = vrot.slane %v8416_v13, 9  ;;  %v7206_v36 = vpop.f32.mrb[46].mxu0 }
 0x1c0   : > { %v6989_v19 = vcombine.high %v5405_v37, %v5413_v30  ;;  %v6988_v23 = vcombine.low %v5405_v37, %v5413_v30  ;;  %v5428_v29 = vrot.slane %v8418_v17, 5  ;;  %v7750_v31 = vadd.f32 %v9347_v47, %v7193_v33  ;;  %v7207_v39 = vpop.f32.mrb[47].mxu0 }
 0x1c1   : > { %5716 = vmatmul.mubr.bf16.gmra.mrb[132].mxu0 %v6985_v45  ;;  %v7768_v43 = vadd.f32 %v9353_v52, %v7196_v15  ;;  %v7199_v25 = vadd.f32 %v7198_v27, %v9514_v59  ;;  %v5421_v32 = vsel %vm8877_vm11, %v6930_v18, %v5420_v24  ;;  %v7202_v34 = vadd.f32 %v7201_v21, %v7200_v1  ;;  %v7237_v59 = vpop.f32.mrb[48].mxu0 }
 0x1c2   : > { %5723 = vmatprep.mubr.bf16.mxu0 %v6989_v19  ;;  %v7205_v35 = vadd.f32 %v7204_v14, %v7203_v28  ;;  %v5429_v38 = vsel %vm8877_vm11, %v6932_v26, %v5428_v29  ;;  %v7208_v40 = vadd.f32 %v7207_v39, %v7206_v36  ;;  %v7238_v46 = vpop.f32.mrb[49].mxu0 }
 0x1c3   : > { %v7795_v22 = vadd.f32 %v9356_v57, %v7199_v25  ;;  %v6992_v47 = vcombine.high %v5421_v32, %v5429_v38  ;;  %v7813_v52 = vadd.f32 %v9371_v3, %v7202_v34  ;;  %v7239_v42 = vadd.f32 %v7238_v46, %v7237_v59  ;;  %v7240_v2 = vpop.f32.mrb[50].mxu0 }
 0x1c4   : > { %v7786_v27 = vadd.f32 %v9380_v12, %v7205_v35  ;;  %v7804_v44 = vadd.f32 %v9391_v20, %v7208_v40  ;;  %v7241_v41 = vpop.f32.mrb[51].mxu0  ;;  %v6991_v45 = vcombine.low %v5421_v32, %v5429_v38 }
 0x1c5   : > { %7746 = vmatmul.mubr.bf16.gmra.mrb[4].mxu1 %v6993_v16  ;;  %v7760_v57 = vadd.f32 %v9473_v63, %v7239_v42  ;;  %v7242_v48 = vadd.f32 %v7241_v41, %v7240_v2  ;;  %v7243_v49 = vpop.f32.mrb[52].mxu0 }
 0x1c6   : > { %v7244_v51 = vpop.f32.mrb[53].mxu0 }
 0x1c7   : > { %v7778_v50 = vadd.f32 %v7777_v6, %v7242_v48  ;;  %v7245_v55 = vadd.f32 %v7244_v51, %v7243_v49  ;;  %v7246_v3 = vpop.f32.mrb[54].mxu0 }
 0x1c8   : > { %v7247_v56 = vpop.f32.mrb[55].mxu0 }
 0x1c9   : > { %5724 = vmatmul.mubr.bf16.gmra.mrb[136].mxu0 %v6988_v23  ;;  %v7751_v12 = vadd.f32 %v7750_v31, %v7245_v55  ;;  %v7248_v7 = vadd.f32 %v7247_v56, %v7246_v3  ;;  %v7249_v58 = vpop.f32.mrb[56].mxu0 }
 0x1ca   : > { %5731 = vmatprep.mubr.bf16.mxu0 %v6992_v47  ;;  %v7250_v60 = vpop.f32.mrb[57].mxu0 }
 0x1cb   : > { %v7769_v53 = vadd.f32 %v7768_v43, %v7248_v7  ;;  %v7251_v61 = vadd.f32 %v7250_v60, %v7249_v58  ;;  %v7252_v62 = vpop.f32.mrb[58].mxu0 }
 0x1cc   : > { %v7253_v20 = vpop.f32.mrb[59].mxu0 }
 0x1cd   : > { %v7796_v0 = vadd.f32 %v7795_v22, %v7251_v61  ;;  %v7254_v1 = vadd.f32 %v7253_v20, %v7252_v62  ;;  %v7255_v4 = vpop.f32.mrb[60].mxu0 }
 0x1ce   : > { %v7256_v63 = vpop.f32.mrb[61].mxu0 }
 0x1cf   : > { %v7814_v54 = vadd.f32 %v7813_v52, %v7254_v1  ;;  %v7257_v5 = vadd.f32 %v7256_v63, %v7255_v4  ;;  %v7258_v8 = vpop.f32.mrb[62].mxu0 }
 0x1d0   : > { %v7259_v6 = vpop.f32.mrb[63].mxu0 }
 0x1d1   : > { %5732 = vmatmul.mubr.bf16.gmra.mrb[140].mxu0 %v6991_v45  ;;  %v7787_v9 = vadd.f32 %v7786_v27, %v7257_v5  ;;  %v7260_v11 = vadd.f32 %v7259_v6, %v7258_v8  ;;  %v7289_v10 = vpop.f32.mrb[64].mxu0 }
 0x1d2   : > { %v7290_v13 = vpop.f32.mrb[65].mxu0 }
 0x1d3   : > { %v7805_v33 = vadd.f32 %v7804_v44, %v7260_v11  ;;  %v7291_v15 = vadd.f32 %v7290_v13, %v7289_v10  ;;  %v7292_v16 = vpop.f32.mrb[66].mxu0 }
 0x1d4   : > { %v7293_v37 = vpop.f32.mrb[67].mxu0 }
 0x1d5   : > { %v7761_v30 = vadd.f32 %v7760_v57, %v7291_v15  ;;  %v7294_v17 = vadd.f32 %v7293_v37, %v7292_v16  ;;  %v7295_v21 = vpop.f32.mrb[68].mxu0 }
 0x1d6   : > { %v7296_v19 = vpop.f32.mrb[69].mxu0 }
 0x1d7   : > { %v7779_v18 = vadd.f32 %v7778_v50, %v7294_v17  ;;  %v7297_v23 = vadd.f32 %v7296_v19, %v7295_v21  ;;  %v7298_v24 = vpop.f32.mrb[70].mxu0 }
 0x1d8   : > { %v7299_v26 = vpop.f32.mrb[71].mxu0 }
 0x1d9   : > { %v7752_v28 = vadd.f32 %v7751_v12, %v7297_v23  ;;  %v7300_v29 = vadd.f32 %v7299_v26, %v7298_v24 }
 0x1db   : > { %v7770_v31 = vadd.f32 %v7769_v53, %v7300_v29 }
 0x1e9   : > { %v7301_v43 = vpop.f32.mrb[72].mxu0 }
 0x1ea   : > { %v7302_v25 = vpop.f32.mrb[73].mxu0 }
 0x1eb   : > { %v7303_v14 = vadd.f32 %v7302_v25, %v7301_v43  ;;  %v7304_v32 = vpop.f32.mrb[74].mxu0 }
 0x1ec   : > { %v7305_v34 = vpop.f32.mrb[75].mxu0 }
 0x1ed   : > { %v7797_v35 = vadd.f32 %v7796_v0, %v7303_v14  ;;  %v7306_v36 = vadd.f32 %v7305_v34, %v7304_v32 }
 0x1ef   : > { %v7815_v38 = vadd.f32 %v7814_v54, %v7306_v36 }
 0x1f1   : > { %v7307_v22 = vpop.f32.mrb[76].mxu0 }
 0x1f2   : > { %v7308_v39 = vpop.f32.mrb[77].mxu0 }
 0x1f3   : > { %v7309_v47 = vadd.f32 %v7308_v39, %v7307_v22  ;;  %v7310_v52 = vpop.f32.mrb[78].mxu0 }
 0x1f4   : > { %v7311_v59 = vpop.f32.mrb[79].mxu0 }
 0x1f5   : > { %v7788_v27 = vadd.f32 %v7787_v9, %v7309_v47  ;;  %v7312_v40 = vadd.f32 %v7311_v59, %v7310_v52 }
 0x1f7   : > { %v7806_v46 = vadd.f32 %v7805_v33, %v7312_v40 }
 0x1f9   : > { %v7341_v42 = vpop.f32.mrb[80].mxu0 }
 0x1fa   : > { %v7342_v2 = vpop.f32.mrb[81].mxu0 }
 0x1fb   : > { %v7343_v44 = vadd.f32 %v7342_v2, %v7341_v42  ;;  %v7344_v41 = vpop.f32.mrb[82].mxu0 }
 0x1fc   : > { %v7345_v45 = vpop.f32.mrb[83].mxu0 }
 0x1fd   : > { %v7762_v57 = vadd.f32 %v7761_v30, %v7343_v44  ;;  %v7346_v48 = vadd.f32 %v7345_v45, %v7344_v41 }
 0x1ff   : > { %v7780_v49 = vadd.f32 %v7779_v18, %v7346_v48 }
 0x201   : > { %v7347_v51 = vpop.f32.mrb[84].mxu0 }
 0x202   : > { %v7348_v50 = vpop.f32.mrb[85].mxu0 }
 0x203   : > { %v7349_v55 = vadd.f32 %v7348_v50, %v7347_v51  ;;  %v7350_v3 = vpop.f32.mrb[86].mxu0 }
 0x204   : > { %v7351_v56 = vpop.f32.mrb[87].mxu0 }
 0x205   : > { %v7753_v12 = vadd.f32 %v7752_v28, %v7349_v55  ;;  %v7352_v7 = vadd.f32 %v7351_v56, %v7350_v3 }
 0x207   : > { %v7771_v58 = vadd.f32 %v7770_v31, %v7352_v7 }
 0x209   : > { %v7353_v60 = vpop.f32.mrb[88].mxu0 }
 0x20a   : > { %v7354_v53 = vpop.f32.mrb[89].mxu0 }
 0x20b   : > { %v7355_v61 = vadd.f32 %v7354_v53, %v7353_v60  ;;  %v7356_v62 = vpop.f32.mrb[90].mxu0 }
 0x20c   : > { %v7357_v20 = vpop.f32.mrb[91].mxu0 }
 0x20d   : > { %v7798_v0 = vadd.f32 %v7797_v35, %v7355_v61  ;;  %v7358_v1 = vadd.f32 %v7357_v20, %v7356_v62 }
 0x20f   : > { %v7816_v4 = vadd.f32 %v7815_v38, %v7358_v1 }
 0x211   : > { %v7359_v63 = vpop.f32.mrb[92].mxu0 }
 0x212   : > { %v7360_v54 = vpop.f32.mrb[93].mxu0 }
 0x213   : > { %v7361_v5 = vadd.f32 %v7360_v54, %v7359_v63  ;;  %v7362_v8 = vpop.f32.mrb[94].mxu0 }
 0x214   : > { %v7363_v6 = vpop.f32.mrb[95].mxu0 }
 0x215   : > { %v7789_v9 = vadd.f32 %v7788_v27, %v7361_v5  ;;  %v7364_v11 = vadd.f32 %v7363_v6, %v7362_v8 }
 0x217   : > { %v7807_v10 = vadd.f32 %v7806_v46, %v7364_v11 }
 0x219   : > { %v7393_v13 = vpop.f32.mrb[96].mxu0 }
 0x21a   : > { %v7394_v33 = vpop.f32.mrb[97].mxu0 }
 0x21b   : > { %v7395_v15 = vadd.f32 %v7394_v33, %v7393_v13  ;;  %v7396_v16 = vpop.f32.mrb[98].mxu0 }
 0x21c   : > { %v7397_v37 = vpop.f32.mrb[99].mxu0 }
 0x21d   : > { %v7763_v30 = vadd.f32 %v7762_v57, %v7395_v15  ;;  %v7398_v17 = vadd.f32 %v7397_v37, %v7396_v16 }
 0x21f   : > { %v7781_v18 = vadd.f32 %v7780_v49, %v7398_v17 }
 0x221   : > { %v7399_v21 = vpop.f32.mrb[100].mxu0 }
 0x222   : > { %v7400_v19 = vpop.f32.mrb[101].mxu0 }
 0x223   : > { %v7401_v23 = vadd.f32 %v7400_v19, %v7399_v21  ;;  %v7402_v24 = vpop.f32.mrb[102].mxu0 }
 0x224   : > { %v7403_v26 = vpop.f32.mrb[103].mxu0 }
 0x225   : > { %v7754_v28 = vadd.f32 %v7753_v12, %v7401_v23  ;;  %v7404_v29 = vadd.f32 %v7403_v26, %v7402_v24  ;;  %v9561_v24 = vld [vmem:[%s9600_s4] ss:$0 sm:$0xff] }
 0x227   : > { %v7772_v31 = vadd.f32 %v7771_v58, %v7404_v29 }
 0x229   : > { %v7405_v43 = vpop.f32.mrb[104].mxu0 }
 0x22a   : > { %v7406_v25 = vpop.f32.mrb[105].mxu0 }
 0x22b   : > { %v7407_v14 = vadd.f32 %v7406_v25, %v7405_v43  ;;  %v7408_v32 = vpop.f32.mrb[106].mxu0 }
 0x22c   : > { %v7409_v34 = vpop.f32.mrb[107].mxu0 }
 0x22d   : > { %v7799_v35 = vadd.f32 %v7798_v0, %v7407_v14  ;;  %v7410_v36 = vadd.f32 %v7409_v34, %v7408_v32 }
 0x22f   : > { %v7817_v38 = vadd.f32 %v7816_v4, %v7410_v36 }
 0x231   : > { %v7411_v22 = vpop.f32.mrb[108].mxu0 }
 0x232   : > { %v7412_v39 = vpop.f32.mrb[109].mxu0 }
 0x233   : > { %v7413_v47 = vadd.f32 %v7412_v39, %v7411_v22  ;;  %v7414_v52 = vpop.f32.mrb[110].mxu0 }
 0x234   : > { %v7415_v59 = vpop.f32.mrb[111].mxu0 }
 0x235   : > { %v7790_v27 = vadd.f32 %v7789_v9, %v7413_v47  ;;  %v7416_v40 = vadd.f32 %v7415_v59, %v7414_v52 }
 0x237   : > { %v7808_v46 = vadd.f32 %v7807_v10, %v7416_v40 }
 0x266   : > { %v7445_v42 = vpop.f32.mrb[112].mxu0 }
 0x267   : > { %v7446_v2 = vpop.f32.mrb[113].mxu0 }
 0x268   : > { %v7447_v44 = vadd.f32 %v7446_v2, %v7445_v42  ;;  %v7448_v41 = vpop.f32.mrb[114].mxu0 }
 0x269   : > { %v7449_v45 = vpop.f32.mrb[115].mxu0 }
 0x26a   : > { %v7764_v57 = vadd.f32 %v7763_v30, %v7447_v44  ;;  %v7450_v48 = vadd.f32 %v7449_v45, %v7448_v41 }
 0x26c   : > { %v7782_v49 = vadd.f32 %v7781_v18, %v7450_v48 }
 0x26e   : > { %v7451_v51 = vpop.f32.mrb[116].mxu0 }
 0x26f   : > { %v7452_v50 = vpop.f32.mrb[117].mxu0 }
 0x270   : > { %v7453_v55 = vadd.f32 %v7452_v50, %v7451_v51  ;;  %v7454_v3 = vpop.f32.mrb[118].mxu0 }
 0x271   : > { %v7455_v56 = vpop.f32.mrb[119].mxu0 }
 0x272   : > { %v7755_v12 = vadd.f32 %v7754_v28, %v7453_v55  ;;  %v7456_v7 = vadd.f32 %v7455_v56, %v7454_v3 }
 0x274   : > { %v7773_v58 = vadd.f32 %v7772_v31, %v7456_v7 }
 0x278   : > { %v7457_v60 = vpop.f32.mrb[120].mxu0 }
 0x279   : > { %v7458_v53 = vpop.f32.mrb[121].mxu0 }
 0x27a   : > { %v7459_v61 = vadd.f32 %v7458_v53, %v7457_v60  ;;  %v7460_v62 = vpop.f32.mrb[122].mxu0 }
 0x27b   : > { %v7461_v20 = vpop.f32.mrb[123].mxu0 }
 0x27c   : > { %v7800_v0 = vadd.f32 %v7799_v35, %v7459_v61  ;;  %v7462_v1 = vadd.f32 %v7461_v20, %v7460_v62 }
 0x27e   : > { %v7818_v4 = vadd.f32 %v7817_v38, %v7462_v1 }
 0x284   : > { %v7463_v63 = vpop.f32.mrb[124].mxu0 }
 0x285   : > { %v7464_v54 = vpop.f32.mrb[125].mxu0 }
 0x286   : > { %v7465_v5 = vadd.f32 %v7464_v54, %v7463_v63  ;;  %v7466_v8 = vpop.f32.mrb[126].mxu0 }
 0x287   : > { %v7467_v6 = vpop.f32.mrb[127].mxu0 }
 0x288   : > { %v9554_v9 = vadd.f32 %v7790_v27, %v7465_v5  ;;  %v7468_v11 = vadd.f32 %v7467_v6, %v7466_v8 }
 0x28a   : > { %v9556_v10 = vadd.f32 %v7808_v46, %v7468_v11 }
 0x28c   : > { %v7497_v13 = vpop.f32.mrb[128].mxu0 }
 0x28d   : > { %v7498_v33 = vpop.f32.mrb[129].mxu0 }
 0x28e   : > { %v7499_v15 = vadd.f32 %v7498_v33, %v7497_v13  ;;  %v7500_v16 = vpop.f32.mrb[130].mxu0 }
 0x28f   : > { %v7501_v37 = vpop.f32.mrb[131].mxu0 }
 0x290   : > { %v7765_v30 = vadd.f32 %v7764_v57, %v7499_v15  ;;  %v7502_v17 = vadd.f32 %v7501_v37, %v7500_v16  ;;  %v7743_v21 = vpop.f32.mrb[0].mxu1 }
 0x291   : > { %v5774_v23 = vpop.f32.mrb[1].mxu1 }
 0x292   : > { %v7783_v18 = vadd.f32 %v7782_v49, %v7502_v17  ;;  %v7766_v28 = vadd.f32 %v7765_v30, %v5774_v23  ;;  %v7744_v29 = vpop.f32.mrb[2].mxu1 }
 0x293   : > { %v5777_v25 = vpop.f32.mrb[3].mxu1 }
 0x294   : > { %v7503_v19 = vpop.f32.mrb[132].mxu0  ;;  %v5820_v32 = vadd.f32 %v7766_v28, %v9561_v24  ;;  %v7784_v34 = vadd.f32 %v7783_v18, %v5777_v25 }
 0x295   : > { %v7504_v26 = vpop.f32.mrb[133].mxu0 }
 0x296   : > { %v7505_v31 = vadd.f32 %v7504_v26, %v7503_v19  ;;  %v7506_v43 = vpop.f32.mrb[134].mxu0  ;;  %v5821_v38 = vadd.f32 %v7784_v34, %v9561_v24  ;;  %v5858_v47 = vmul.f32 %v5820_v32, %v5820_v32 }
 0x297   : > { %v7507_v14 = vpop.f32.mrb[135].mxu0 }
 0x298   : > { %v7756_v35 = vadd.f32 %v7755_v12, %v7505_v31  ;;  %v7508_v36 = vadd.f32 %v7507_v14, %v7506_v43  ;;  %v7042_v52 = vpack.c.bf16 %v5821_v38, %v5820_v32  ;;  %v5844_v59 = vadd.f32 %v5821_v38, %v5820_v32  ;;  %v7747_v40 = vpop.f32.mrb[4].mxu1 }
 0x299   : > { %v5859_v27 = vmul.f32 %v5821_v38, %v5821_v38  ;;  %v5790_v2 = vpop.f32.mrb[5].mxu1 }
 0x29a   : > { %v7757_v22 = vadd.f32 %v7756_v35, %v7743_v21  ;;  %v7774_v39 = vadd.f32 %v7773_v58, %v7508_v36  ;;  %7043 = vst [vmem:[%s8554_s14] sm:$0xff] %v7042_v52   ;;  %v7748_v49 = vpop.f32.mrb[6].mxu1 }
 0x29b   : > { %v5866_v45 = vadd.f32 %v5859_v27, %v5858_v47  ;;  %v5793_v3 = vpop.f32.mrb[7].mxu1 }
 0x29c   : > { %v5822_v46 = vadd.f32 %v7757_v22, %v9561_v24  ;;  %v7509_v42 = vpop.f32.mrb[136].mxu0  ;;  %v7775_v44 = vadd.f32 %v7774_v39, %v7744_v29 }
 0x29d   : > { %v7510_v41 = vpop.f32.mrb[137].mxu0 }
 0x29e   : > { %v5845_v57 = vadd.f32 %v5844_v59, %v5822_v46  ;;  %v5860_v48 = vmul.f32 %v5822_v46, %v5822_v46  ;;  %v7511_v51 = vadd.f32 %v7510_v41, %v7509_v42  ;;  %v7512_v50 = vpop.f32.mrb[138].mxu0  ;;  %v5823_v55 = vadd.f32 %v7775_v44, %v9561_v24 }
 0x29f   : > { %v7513_v56 = vpop.f32.mrb[139].mxu0 }
 0x2a0   : > { %v5867_v12 = vadd.f32 %v5866_v45, %v5860_v48  ;;  %v7801_v7 = vadd.f32 %v7800_v0, %v7511_v51  ;;  %v7514_v58 = vadd.f32 %v7513_v56, %v7512_v50  ;;  %v7047_v60 = vpack.c.bf16 %v5823_v55, %v5822_v46  ;;  %v5883_v46 = vld [vmem:[%s8544_s19] sm:$0x1] }
 0x2a1   : > { %v5846_v53 = vadd.f32 %v5845_v57, %v5823_v55  ;;  %v5861_v61 = vmul.f32 %v5823_v55, %v5823_v55 }
 0x2a2   : > { %v7802_v62 = vadd.f32 %v7801_v7, %v5790_v2  ;;  %v7819_v20 = vadd.f32 %v7818_v4, %v7514_v58  ;;  %7062 = vst [vmem:[%s8554_s14 + $0x8] sm:$0xff] %v7047_v60  }
 0x2a3   : > { %v5868_v1 = vadd.f32 %v5867_v12, %v5861_v61 }
 0x2a4   : > { %v5824_v63 = vadd.f32 %v7802_v62, %v9561_v24  ;;  %v7820_v54 = vadd.f32 %v7819_v20, %v5793_v3  ;;  %v7515_v5 = vpop.f32.mrb[140].mxu0 }
 0x2a5   : > { %v7516_v8 = vpop.f32.mrb[141].mxu0 }
 0x2a6   : > { %v5847_v6 = vadd.f32 %v5846_v53, %v5824_v63  ;;  %v5862_v11 = vmul.f32 %v5824_v63, %v5824_v63  ;;  %v5825_v13 = vadd.f32 %v7820_v54, %v9561_v24  ;;  %v7517_v33 = vadd.f32 %v7516_v8, %v7515_v5  ;;  %v7518_v0 = vpop.f32.mrb[142].mxu0 }
 0x2a7   : > { %v7519_v15 = vpop.f32.mrb[143].mxu0 }
 0x2a8   : > { %v5869_v16 = vadd.f32 %v5868_v1, %v5862_v11  ;;  %v7052_v37 = vpack.c.bf16 %v5825_v13, %v5824_v63  ;;  %v5848_v30 = vadd.f32 %v5847_v6, %v5825_v13  ;;  %v5863_v17 = vmul.f32 %v5825_v13, %v5825_v13 }
 0x2a9   : > { %v7792_v4 = vadd.f32 %v9554_v9, %v7517_v33  ;;  %v7520_v18 = vadd.f32 %v7519_v15, %v7518_v0 }
 0x2aa   : > { %7063 = vst [vmem:[%s8554_s14 + $0x10] sm:$0xff] %v7052_v37   ;;  %v5870_v21 = vadd.f32 %v5869_v16, %v5863_v17 }
 0x2ab   : > { %v7793_v19 = vadd.f32 %v7792_v4, %v7747_v40  ;;  %v7810_v23 = vadd.f32 %v9556_v10, %v7520_v18 }
 0x2ad   : > { %v5826_v26 = vadd.f32 %v7793_v19, %v9561_v24  ;;  %v7811_v28 = vadd.f32 %v7810_v23, %v7748_v49 }
 0x2af   : > { %v5849_v29 = vadd.f32 %v5848_v30, %v5826_v26  ;;  %v5864_v31 = vmul.f32 %v5826_v26, %v5826_v26  ;;  %v5827_v43 = vadd.f32 %v7811_v28, %v9561_v24  ;;  %v5880_v24 = vld [vmem:[%s8539_s15] sm:$0x1] }
 0x2b1   : > { %v5871_v25 = vadd.f32 %v5870_v21, %v5864_v31  ;;  %v7057_v14 = vpack.c.bf16 %v5827_v43, %v5826_v26  ;;  %v5850_v32 = vadd.f32 %v5849_v29, %v5827_v43  ;;  %v5865_v34 = vmul.f32 %v5827_v43, %v5827_v43 }
 0x2b3   : > { %7064 = vst [vmem:[%s8554_s14 + $0x18] sm:$0xff] %v7057_v14   ;;  %v5851_v9 = vrot.slane %v5850_v32, 4  ;;  %v5872_v35 = vadd.f32 %v5871_v25, %v5865_v34 }
 0x2b5   : > { %v5852_v36 = vadd.f32 %v5851_v9, %v5850_v32  ;;  %v5873_v10 = vrot.slane %v5872_v35, 4 }
 0x2b7   : > { %v5853_v38 = vrot.slane %v5852_v36, 2  ;;  %v5874_v22 = vadd.f32 %v5873_v10, %v5872_v35 }
 0x2b9   : > { %v5854_v39 = vadd.f32 %v5853_v38, %v5852_v36  ;;  %v5875_v47 = vrot.slane %v5874_v22, 2 }
 0x2bb   : > { %v5855_v52 = vrot.slane %v5854_v39, 1  ;;  %v5876_v59 = vadd.f32 %v5875_v47, %v5874_v22 }
 0x2bd   : > { %v5856_v27 = vadd.f32 %v5855_v52, %v5854_v39  ;;  %v5877_v40 = vrot.slane %v5876_v59, 1 }
 0x2bf   : > { %v5878_v42 = vadd.f32 %v5877_v40, %v5876_v59  ;;  %v5881_v2 = vadd.f32 %v5880_v24, %v5856_v27 }
 0x2c1   : > { %5882 = vst [vmem:[%s8539_s15] sm:$0x1] %v5881_v2  ;;  %v5884_v44 = vadd.f32 %v5883_v46, %v5878_v42 }
 0x2c3   : > { %5885 = vst [vmem:[%s8544_s19] sm:$0x1] %v5884_v44 }
 0x2c4 PF: > { %s18_s28 = sadd.s32 1, %s8457_s28   ;;  %s9613_s14 = sld [smem:[#allocation3_spill]] }
 0x2c5   : > { %p15_p13 = scmp.ge.s32.totalorder %s18_s28, 20   ;;  %s9614_s24 = smov %s8449_s26 }
 0x2c6   : > { %s9615_s25 = smov %s8453_s27  ;;  %s9616_s26 = smov %s9619_s29 }
 0x2c7   :  { %17 = sbr.rel (!%p15_p13) target bundleno = 3 (0x3), region = 126 }
 0x2ca   : > { %s9617_s27 = smov %s9613_s14 }

</bundles_post_ra>
